<compile_context>
chip_gen: v7x
topology: tpu7x:2x2x1
jax: 0.10.0
libtpu: 0.0.40
codegen_flags: <defaults>
</compile_context>

<pallas_src>
import numpy as np

import jax
import jax.numpy as jnp
from jax import lax
from jax.experimental import pallas as pl
from jax.experimental.pallas import tpu as pltpu


P = 16      # packed-row stride (multiple of 8 sublanes)
OFF = 8     # interior packed-column offset inside a padded row (multiple of 8)

# parity -> ((window offset d over the zero-padded input, kernel tap k), ...)
# 1-D identity: out[2m+0] = xp[m+0]*K[3] + xp[m+1]*K[1];  out[2m+1] = xp[m+1]*K[2] + xp[m+2]*K[0]
_PARITY_TAPS = {0: ((0, 3), (1, 1)), 1: ((1, 2), (2, 0))}


# --------------------------- host-side weight repacking --------------------------- #

def _build_packed_weights(w_pt, kin):
    """ConvTranspose2d weight [Cin,Cout,4,4] -> 9 tap matrices [kin*Cin, 4*kin*Cout].

    Input lanes are (sub-column s inside the width-pack, cin); output lanes are ordered
    (py, b, px, cout), which is exactly the next layer's width-packed (packing 2*kin)
    channel layout -- so the inter-layer hand-off needs no data shuffling at all.
    """
    w = np.asarray(w_pt, np.float32)
    cin, cout = w.shape[0], w.shape[1]
    wp = np.zeros((3, 3, kin * cin, 4 * kin * cout), np.float32)
    for py in (0, 1):
        for dy, ky in _PARITY_TAPS[py]:
            for px in (0, 1):
                for dx, kx in _PARITY_TAPS[px]:
                    for b in range(kin):
                        t = b + dx - 1                  # full-res column offset
                        dp = t // kin + 1               # packed-column tap in {0,1,2}
                        s = t % kin                     # sub-column inside that pack
                        n0 = ((py * kin + b) * 2 + px) * cout
                        wp[dy, dp, s * cin:(s + 1) * cin, n0:n0 + cout] += w[:, :, ky, kx]
    return jnp.asarray(wp.reshape(9, kin * cin, 4 * kin * cout))


def pack_params(params):
    """params: [(w [Cin,Cout,4,4], b [Cout])] * 3 -> [(tap_weights, bias_row)] * 3."""
    packed = []
    for (w, b), kin in zip(params, (1, 2, 4)):
        wp = _build_packed_weights(w, kin)
        bp = jnp.tile(jnp.asarray(b, jnp.float32), 4 * kin)[None, :]
        packed.append((wp, bp))
    return packed


# --------------------------------- fused kernel ----------------------------------- #

def _make_decoder_kernel(h0, w0, c_out):
    G = 8                                          # packed rows per register-accumulated chunk
    layers = (
        # (Hin_packed_rows, Cout, activation); K = kin*Cin == 64 for every layer.
        (h0,     32,    "relu"),
        (2 * h0, 16,    "relu"),
        (4 * h0, c_out, "sigmoid"),
    )

    def kernel(x_ref, w1_ref, b1_ref, w2_ref, b2_ref, w3_ref, b3_ref, o_ref, s1, s2, s3):
        s_refs = (s1, s2, s3)
        w_refs = (w1_ref, w2_ref, w3_ref)
        b_refs = (b1_ref, b2_ref, b3_ref)

        # ---- zero ONLY the pad regions (interiors are fully overwritten below).
        #      Runs every grid step: scratch is per-core under the parallel batch axis. ----
        zero8 = jnp.zeros((8, 64), jnp.float32)
        for li, (hin, _, _) in enumerate(layers):
            sref = s_refs[li]
            for r in range(hin + 3):
                sref[pl.ds(r * P, 8), :] = zero8                    # left/right pad packs
            sref[pl.ds(OFF, 8), :] = zero8                          # top pad row interior
            sref[pl.ds((hin + 1) * P + OFF, 8), :] = zero8          # bottom pad row interior

        # ---- stage 0: scatter the (1,H,W,64) NHWC input into the padded flat scratch
        #      (8-aligned destination rows -> unmasked sublane stores). ----
        for h in range(h0):
            s1[pl.ds((1 + h) * P + OFF, w0), :] = x_ref[0, h, :, :]

        # ---- three transposed-conv layers, each = 9 register-accumulated MXU matmuls ----
        for li, (hin, cout, act) in enumerate(layers):
            sref = s_refs[li]
            wref = w_refs[li]
            bias = b_refs[li][...]                   # (1, 4*kin*cout), hoisted per layer
            half = bias.shape[-1] // 2               # per-row-parity lane block (= next K)

            for i0 in range(0, hin, G):              # chunk => bounded vreg pressure
                m = G * P
                base = i0 * P + (OFF - 1)
                acc = jnp.dot(sref[pl.ds(base, m), :], wref[0],
                              preferred_element_type=jnp.float32) + bias
                for tap in range(1, 9):
                    dy, dp = divmod(tap, 3)
                    acc = acc + jnp.dot(sref[pl.ds(base + dy * P + dp, m), :], wref[tap],
                                        preferred_element_type=jnp.float32)
                y = jnp.maximum(acc, 0.0) if act == "relu" else jax.nn.sigmoid(acc)

                if li < 2:
                    # in-VMEM sub-pixel interleave: 8-aligned contiguous copies into the next
                    # layer's padded, width-packed scratch (packing factor doubles per layer).
                    nref = s_refs[li + 1]
                    for i in range(G):
                        for py in range(2):
                            nref[pl.ds((1 + 2 * (i0 + i) + py) * P + OFF, w0), :] = \
                                y[i * P:i * P + w0, py * half:(py + 1) * half]
                else:
                    # final layer: one (8, 16*c_out) block per packed row; parity unpack
                    # happens on the host so the store stays as lane-dense as the layout allows.
                    for i in range(G):
                        o_ref[0, i0 + i, :, :] = y[i * P:i * P + w0, :]

    return kernel


def vae_decoder_forward(x_nchw, packed_params):
    """x: (N, 64, H, W) float32 -> (N, c_out, 8H, 8W) float32 (NCHW)."""
    n, cin0, h0, w0 = x_nchw.shape
    assert cin0 == 64, cin0
    assert w0 == 8 and h0 % 8 == 0, (h0, w0)   # layout assumes an 8-wide packed row
    (wp1, bp1), (wp2, bp2), (wp3, bp3) = packed_params
    c_out = bp3.shape[1] // 16

    x_nhwc = jnp.transpose(x_nchw, (0, 2, 3, 1)).astype(jnp.float32)

    kernel = _make_decoder_kernel(h0, w0, c_out)
    grid_spec = pltpu.PrefetchScalarGridSpec(
        num_scalar_prefetch=0,
        grid=(n,),
        in_specs=[
            pl.BlockSpec((1, h0, w0, 64), lambda b: (b, 0, 0, 0)),
            pl.BlockSpec(wp1.shape, lambda b: (0, 0, 0)),
            pl.BlockSpec(bp1.shape, lambda b: (0, 0)),
            pl.BlockSpec(wp2.shape, lambda b: (0, 0, 0)),
            pl.BlockSpec(bp2.shape, lambda b: (0, 0)),
            pl.BlockSpec(wp3.shape, lambda b: (0, 0, 0)),
            pl.BlockSpec(bp3.shape, lambda b: (0, 0)),
        ],
        out_specs=pl.BlockSpec((1, 4 * h0, w0, 16 * c_out), lambda b: (b, 0, 0, 0)),
        scratch_shapes=[
            pltpu.VMEM(((h0 + 3) * P, 64), jnp.float32),       # layer-1 padded input
            pltpu.VMEM(((2 * h0 + 3) * P, 64), jnp.float32),   # layer-2 padded input
            pltpu.VMEM(((4 * h0 + 3) * P, 64), jnp.float32),   # layer-3 padded input
        ],
    )
    y = pl.pallas_call(
        kernel,
        out_shape=jax.ShapeDtypeStruct((n, 4 * h0, w0, 16 * c_out), jnp.float32),
        grid_spec=grid_spec,
        compiler_params=pltpu.CompilerParams(dimension_semantics=("parallel",)),
    )(x_nhwc, wp1, bp1, wp2, bp2, wp3, bp3)

    # slab (N, i, j, lane) with lane = (py*8 + s')*c_out + c -> pixel (2i+py, 8j+s'), channel c.
    y = y.reshape(n, 4 * h0, w0, 2, 8, c_out)
    y = jnp.transpose(y, (0, 5, 1, 3, 2, 4))          # (N, c, i, py, j, s')
    return y.reshape(n, c_out, 8 * h0, 8 * w0)


# ------------------------------------ reference ------------------------------------ #

def _ref_forward(x_nchw, params):
    acts = ("relu", "relu", "sigmoid")
    x = x_nchw
    for (w, b), act in zip(params, acts):
        y = lax.conv_general_dilated(
            x,
            jnp.flip(w, (2, 3)).transpose(1, 0, 2, 3),
            window_strides=(1, 1),
            padding=((2, 2), (2, 2)),
            lhs_dilation=(2, 2),
            dimension_numbers=("NCHW", "OIHW", "NCHW"))
        y = y + b[None, :, None, None]
        x = jnp.maximum(y, 0.0) if act == "relu" else jax.nn.sigmoid(y)
    return x


def _init_params(key, output_channels=1):
    dims = [(64, 32), (32, 16), (16, output_channels)]
    params = []
    for (cin, cout) in dims:
        key, kw, kb = jax.random.split(key, 3)
        bound = 1.0 / np.sqrt(cin * 4 * 4)
        w = jax.random.uniform(kw, (cin, cout, 4, 4), jnp.float32, -bound, bound)
        b = jax.random.uniform(kb, (cout,), jnp.float32, -bound, bound)
        params.append((w, b))
    return params


# --------------------------------------- main --------------------------------------- #

if __name__ == "__main__":
    key = jax.random.PRNGKey(0)
    key, kx = jax.random.split(key)
    # latent: (batch=2, channels=64, 8, 8) -> reconstructed image (2, 1, 64, 64)
    x = jax.random.normal(kx, (2, 64, 8, 8), jnp.float32)
    params = _init_params(key, output_channels=1)
    packed = pack_params(params)

    fwd = jax.jit(vae_decoder_forward)
    out = jax.block_until_ready(fwd(x, packed))
    assert out.shape == (2, 1, 64, 64), out.shape

    ref = jax.block_until_ready(_ref_forward(x, params))
    np.testing.assert_allclose(np.asarray(out), np.asarray(ref), atol=2e-4, rtol=2e-4)

    print("KERNEL_OK")
</pallas_src>

<mosaic_0001>
module attributes {stable_mosaic.version = 11 : i64} {
  func.func @kernel(%arg0: i32, %arg1: memref<1x8x8x64xf32, #tpu.memory_space<vmem>>, %arg2: memref<9x64x128xf32, #tpu.memory_space<vmem>>, %arg3: memref<1x128xf32, #tpu.memory_space<vmem>>, %arg4: memref<9x64x128xf32, #tpu.memory_space<vmem>>, %arg5: memref<1x128xf32, #tpu.memory_space<vmem>>, %arg6: memref<9x64x16xf32, #tpu.memory_space<vmem>>, %arg7: memref<1x16xf32, #tpu.memory_space<vmem>>, %arg8: memref<1x32x8x16xf32, #tpu.memory_space<vmem>>, %arg9: memref<176x64xf32, #tpu.memory_space<vmem>>, %arg10: memref<304x64xf32, #tpu.memory_space<vmem>>, %arg11: memref<560x64xf32, #tpu.memory_space<vmem>>) attributes {dimension_semantics = [#tpu.dimension_semantics<parallel>], iteration_bounds = array<i64: 2>, scalar_prefetch = 0 : i64, scratch_operands = 3 : i64, tpu.core_type = #tpu.core_type<tc>, window_params = [{transform_indices = @transform_0, window_bounds = array<i64: 1, 8, 8, 64>}, {pipeline_mode = #tpu.pipeline_mode<synchronous>, transform_indices = @transform_1, window_bounds = array<i64: 9, 64, 128>}, {pipeline_mode = #tpu.pipeline_mode<synchronous>, transform_indices = @transform_2, window_bounds = array<i64: 1, 128>}, {pipeline_mode = #tpu.pipeline_mode<synchronous>, transform_indices = @transform_3, window_bounds = array<i64: 9, 64, 128>}, {pipeline_mode = #tpu.pipeline_mode<synchronous>, transform_indices = @transform_4, window_bounds = array<i64: 1, 128>}, {pipeline_mode = #tpu.pipeline_mode<synchronous>, transform_indices = @transform_5, window_bounds = array<i64: 9, 64, 16>}, {pipeline_mode = #tpu.pipeline_mode<synchronous>, transform_indices = @transform_6, window_bounds = array<i64: 1, 16>}, {transform_indices = @transform_7, window_bounds = array<i64: 1, 32, 8, 16>}]} {
    %cst = arith.constant 0.000000e+00 : f32
    %0 = vector.broadcast %cst : f32 to vector<8x64xf32>
    %c0 = arith.constant 0 : index
    %c0_0 = arith.constant 0 : index
    %1 = vector.load %arg9[%c0, %c0_0] : memref<176x64xf32, #tpu.memory_space<vmem>>, vector<8x64xf32>
    tpu.vector_store %arg9[%c0, %c0_0], %0 {strides = array<i32>} : memref<176x64xf32, #tpu.memory_space<vmem>>, vector<8x64xf32>,
    %c16 = arith.constant 16 : index
    %c0_1 = arith.constant 0 : index
    %2 = vector.load %arg9[%c16, %c0_1] : memref<176x64xf32, #tpu.memory_space<vmem>>, vector<8x64xf32>
    tpu.vector_store %arg9[%c16, %c0_1], %0 {strides = array<i32>} : memref<176x64xf32, #tpu.memory_space<vmem>>, vector<8x64xf32>,
    %c32 = arith.constant 32 : index
    %c0_2 = arith.constant 0 : index
    %3 = vector.load %arg9[%c32, %c0_2] : memref<176x64xf32, #tpu.memory_space<vmem>>, vector<8x64xf32>
    tpu.vector_store %arg9[%c32, %c0_2], %0 {strides = array<i32>} : memref<176x64xf32, #tpu.memory_space<vmem>>, vector<8x64xf32>,
    %c48 = arith.constant 48 : index
    %c0_3 = arith.constant 0 : index
    %4 = vector.load %arg9[%c48, %c0_3] : memref<176x64xf32, #tpu.memory_space<vmem>>, vector<8x64xf32>
    tpu.vector_store %arg9[%c48, %c0_3], %0 {strides = array<i32>} : memref<176x64xf32, #tpu.memory_space<vmem>>, vector<8x64xf32>,
    %c64 = arith.constant 64 : index
    %c0_4 = arith.constant 0 : index
    %5 = vector.load %arg9[%c64, %c0_4] : memref<176x64xf32, #tpu.memory_space<vmem>>, vector<8x64xf32>
    tpu.vector_store %arg9[%c64, %c0_4], %0 {strides = array<i32>} : memref<176x64xf32, #tpu.memory_space<vmem>>, vector<8x64xf32>,
    %c80 = arith.constant 80 : index
    %c0_5 = arith.constant 0 : index
    %6 = vector.load %arg9[%c80, %c0_5] : memref<176x64xf32, #tpu.memory_space<vmem>>, vector<8x64xf32>
    tpu.vector_store %arg9[%c80, %c0_5], %0 {strides = array<i32>} : memref<176x64xf32, #tpu.memory_space<vmem>>, vector<8x64xf32>,
    %c96 = arith.constant 96 : index
    %c0_6 = arith.constant 0 : index
    %7 = vector.load %arg9[%c96, %c0_6] : memref<176x64xf32, #tpu.memory_space<vmem>>, vector<8x64xf32>
    tpu.vector_store %arg9[%c96, %c0_6], %0 {strides = array<i32>} : memref<176x64xf32, #tpu.memory_space<vmem>>, vector<8x64xf32>,
    %c112 = arith.constant 112 : index
    %c0_7 = arith.constant 0 : index
    %8 = vector.load %arg9[%c112, %c0_7] : memref<176x64xf32, #tpu.memory_space<vmem>>, vector<8x64xf32>
    tpu.vector_store %arg9[%c112, %c0_7], %0 {strides = array<i32>} : memref<176x64xf32, #tpu.memory_space<vmem>>, vector<8x64xf32>,
    %c128 = arith.constant 128 : index
    %c0_8 = arith.constant 0 : index
    %9 = vector.load %arg9[%c128, %c0_8] : memref<176x64xf32, #tpu.memory_space<vmem>>, vector<8x64xf32>
    tpu.vector_store %arg9[%c128, %c0_8], %0 {strides = array<i32>} : memref<176x64xf32, #tpu.memory_space<vmem>>, vector<8x64xf32>,
    %c144 = arith.constant 144 : index
    %c0_9 = arith.constant 0 : index
    %10 = vector.load %arg9[%c144, %c0_9] : memref<176x64xf32, #tpu.memory_space<vmem>>, vector<8x64xf32>
    tpu.vector_store %arg9[%c144, %c0_9], %0 {strides = array<i32>} : memref<176x64xf32, #tpu.memory_space<vmem>>, vector<8x64xf32>,
    %c160 = arith.constant 160 : index
    %c0_10 = arith.constant 0 : index
    %11 = vector.load %arg9[%c160, %c0_10] : memref<176x64xf32, #tpu.memory_space<vmem>>, vector<8x64xf32>
    tpu.vector_store %arg9[%c160, %c0_10], %0 {strides = array<i32>} : memref<176x64xf32, #tpu.memory_space<vmem>>, vector<8x64xf32>,
    %c8 = arith.constant 8 : index
    %c0_11 = arith.constant 0 : index
    %12 = vector.load %arg9[%c8, %c0_11] : memref<176x64xf32, #tpu.memory_space<vmem>>, vector<8x64xf32>
    tpu.vector_store %arg9[%c8, %c0_11], %0 {strides = array<i32>} : memref<176x64xf32, #tpu.memory_space<vmem>>, vector<8x64xf32>,
    %c152 = arith.constant 152 : index
    %c0_12 = arith.constant 0 : index
    %13 = vector.load %arg9[%c152, %c0_12] : memref<176x64xf32, #tpu.memory_space<vmem>>, vector<8x64xf32>
    tpu.vector_store %arg9[%c152, %c0_12], %0 {strides = array<i32>} : memref<176x64xf32, #tpu.memory_space<vmem>>, vector<8x64xf32>,
    %c0_13 = arith.constant 0 : index
    %c0_14 = arith.constant 0 : index
    %14 = vector.load %arg10[%c0_13, %c0_14] : memref<304x64xf32, #tpu.memory_space<vmem>>, vector<8x64xf32>
    tpu.vector_store %arg10[%c0_13, %c0_14], %0 {strides = array<i32>} : memref<304x64xf32, #tpu.memory_space<vmem>>, vector<8x64xf32>,
    %c16_15 = arith.constant 16 : index
    %c0_16 = arith.constant 0 : index
    %15 = vector.load %arg10[%c16_15, %c0_16] : memref<304x64xf32, #tpu.memory_space<vmem>>, vector<8x64xf32>
    tpu.vector_store %arg10[%c16_15, %c0_16], %0 {strides = array<i32>} : memref<304x64xf32, #tpu.memory_space<vmem>>, vector<8x64xf32>,
    %c32_17 = arith.constant 32 : index
    %c0_18 = arith.constant 0 : index
    %16 = vector.load %arg10[%c32_17, %c0_18] : memref<304x64xf32, #tpu.memory_space<vmem>>, vector<8x64xf32>
    tpu.vector_store %arg10[%c32_17, %c0_18], %0 {strides = array<i32>} : memref<304x64xf32, #tpu.memory_space<vmem>>, vector<8x64xf32>,
    %c48_19 = arith.constant 48 : index
    %c0_20 = arith.constant 0 : index
    %17 = vector.load %arg10[%c48_19, %c0_20] : memref<304x64xf32, #tpu.memory_space<vmem>>, vector<8x64xf32>
    tpu.vector_store %arg10[%c48_19, %c0_20], %0 {strides = array<i32>} : memref<304x64xf32, #tpu.memory_space<vmem>>, vector<8x64xf32>,
    %c64_21 = arith.constant 64 : index
    %c0_22 = arith.constant 0 : index
    %18 = vector.load %arg10[%c64_21, %c0_22] : memref<304x64xf32, #tpu.memory_space<vmem>>, vector<8x64xf32>
    tpu.vector_store %arg10[%c64_21, %c0_22], %0 {strides = array<i32>} : memref<304x64xf32, #tpu.memory_space<vmem>>, vector<8x64xf32>,
    %c80_23 = arith.constant 80 : index
    %c0_24 = arith.constant 0 : index
    %19 = vector.load %arg10[%c80_23, %c0_24] : memref<304x64xf32, #tpu.memory_space<vmem>>, vector<8x64xf32>
    tpu.vector_store %arg10[%c80_23, %c0_24], %0 {strides = array<i32>} : memref<304x64xf32, #tpu.memory_space<vmem>>, vector<8x64xf32>,
    %c96_25 = arith.constant 96 : index
    %c0_26 = arith.constant 0 : index
    %20 = vector.load %arg10[%c96_25, %c0_26] : memref<304x64xf32, #tpu.memory_space<vmem>>, vector<8x64xf32>
    tpu.vector_store %arg10[%c96_25, %c0_26], %0 {strides = array<i32>} : memref<304x64xf32, #tpu.memory_space<vmem>>, vector<8x64xf32>,
    %c112_27 = arith.constant 112 : index
    %c0_28 = arith.constant 0 : index
    %21 = vector.load %arg10[%c112_27, %c0_28] : memref<304x64xf32, #tpu.memory_space<vmem>>, vector<8x64xf32>
    tpu.vector_store %arg10[%c112_27, %c0_28], %0 {strides = array<i32>} : memref<304x64xf32, #tpu.memory_space<vmem>>, vector<8x64xf32>,
    %c128_29 = arith.constant 128 : index
    %c0_30 = arith.constant 0 : index
    %22 = vector.load %arg10[%c128_29, %c0_30] : memref<304x64xf32, #tpu.memory_space<vmem>>, vector<8x64xf32>
    tpu.vector_store %arg10[%c128_29, %c0_30], %0 {strides = array<i32>} : memref<304x64xf32, #tpu.memory_space<vmem>>, vector<8x64xf32>,
    %c144_31 = arith.constant 144 : index
    %c0_32 = arith.constant 0 : index
    %23 = vector.load %arg10[%c144_31, %c0_32] : memref<304x64xf32, #tpu.memory_space<vmem>>, vector<8x64xf32>
    tpu.vector_store %arg10[%c144_31, %c0_32], %0 {strides = array<i32>} : memref<304x64xf32, #tpu.memory_space<vmem>>, vector<8x64xf32>,
    %c160_33 = arith.constant 160 : index
    %c0_34 = arith.constant 0 : index
    %24 = vector.load %arg10[%c160_33, %c0_34] : memref<304x64xf32, #tpu.memory_space<vmem>>, vector<8x64xf32>
    tpu.vector_store %arg10[%c160_33, %c0_34], %0 {strides = array<i32>} : memref<304x64xf32, #tpu.memory_space<vmem>>, vector<8x64xf32>,
    %c176 = arith.constant 176 : index
    %c0_35 = arith.constant 0 : index
    %25 = vector.load %arg10[%c176, %c0_35] : memref<304x64xf32, #tpu.memory_space<vmem>>, vector<8x64xf32>
    tpu.vector_store %arg10[%c176, %c0_35], %0 {strides = array<i32>} : memref<304x64xf32, #tpu.memory_space<vmem>>, vector<8x64xf32>,
    %c192 = arith.constant 192 : index
    %c0_36 = arith.constant 0 : index
    %26 = vector.load %arg10[%c192, %c0_36] : memref<304x64xf32, #tpu.memory_space<vmem>>, vector<8x64xf32>
    tpu.vector_store %arg10[%c192, %c0_36], %0 {strides = array<i32>} : memref<304x64xf32, #tpu.memory_space<vmem>>, vector<8x64xf32>,
    %c208 = arith.constant 208 : index
    %c0_37 = arith.constant 0 : index
    %27 = vector.load %arg10[%c208, %c0_37] : memref<304x64xf32, #tpu.memory_space<vmem>>, vector<8x64xf32>
    tpu.vector_store %arg10[%c208, %c0_37], %0 {strides = array<i32>} : memref<304x64xf32, #tpu.memory_space<vmem>>, vector<8x64xf32>,
    %c224 = arith.constant 224 : index
    %c0_38 = arith.constant 0 : index
    %28 = vector.load %arg10[%c224, %c0_38] : memref<304x64xf32, #tpu.memory_space<vmem>>, vector<8x64xf32>
    tpu.vector_store %arg10[%c224, %c0_38], %0 {strides = array<i32>} : memref<304x64xf32, #tpu.memory_space<vmem>>, vector<8x64xf32>,
    %c240 = arith.constant 240 : index
    %c0_39 = arith.constant 0 : index
    %29 = vector.load %arg10[%c240, %c0_39] : memref<304x64xf32, #tpu.memory_space<vmem>>, vector<8x64xf32>
    tpu.vector_store %arg10[%c240, %c0_39], %0 {strides = array<i32>} : memref<304x64xf32, #tpu.memory_space<vmem>>, vector<8x64xf32>,
    %c256 = arith.constant 256 : index
    %c0_40 = arith.constant 0 : index
    %30 = vector.load %arg10[%c256, %c0_40] : memref<304x64xf32, #tpu.memory_space<vmem>>, vector<8x64xf32>
    tpu.vector_store %arg10[%c256, %c0_40], %0 {strides = array<i32>} : memref<304x64xf32, #tpu.memory_space<vmem>>, vector<8x64xf32>,
    %c272 = arith.constant 272 : index
    %c0_41 = arith.constant 0 : index
    %31 = vector.load %arg10[%c272, %c0_41] : memref<304x64xf32, #tpu.memory_space<vmem>>, vector<8x64xf32>
    tpu.vector_store %arg10[%c272, %c0_41], %0 {strides = array<i32>} : memref<304x64xf32, #tpu.memory_space<vmem>>, vector<8x64xf32>,
    %c288 = arith.constant 288 : index
    %c0_42 = arith.constant 0 : index
    %32 = vector.load %arg10[%c288, %c0_42] : memref<304x64xf32, #tpu.memory_space<vmem>>, vector<8x64xf32>
    tpu.vector_store %arg10[%c288, %c0_42], %0 {strides = array<i32>} : memref<304x64xf32, #tpu.memory_space<vmem>>, vector<8x64xf32>,
    %c8_43 = arith.constant 8 : index
    %c0_44 = arith.constant 0 : index
    %33 = vector.load %arg10[%c8_43, %c0_44] : memref<304x64xf32, #tpu.memory_space<vmem>>, vector<8x64xf32>
    tpu.vector_store %arg10[%c8_43, %c0_44], %0 {strides = array<i32>} : memref<304x64xf32, #tpu.memory_space<vmem>>, vector<8x64xf32>,
    %c280 = arith.constant 280 : index
    %c0_45 = arith.constant 0 : index
    %34 = vector.load %arg10[%c280, %c0_45] : memref<304x64xf32, #tpu.memory_space<vmem>>, vector<8x64xf32>
    tpu.vector_store %arg10[%c280, %c0_45], %0 {strides = array<i32>} : memref<304x64xf32, #tpu.memory_space<vmem>>, vector<8x64xf32>,
    %c0_46 = arith.constant 0 : index
    %c0_47 = arith.constant 0 : index
    %35 = vector.load %arg11[%c0_46, %c0_47] : memref<560x64xf32, #tpu.memory_space<vmem>>, vector<8x64xf32>
    tpu.vector_store %arg11[%c0_46, %c0_47], %0 {strides = array<i32>} : memref<560x64xf32, #tpu.memory_space<vmem>>, vector<8x64xf32>,
    %c16_48 = arith.constant 16 : index
    %c0_49 = arith.constant 0 : index
    %36 = vector.load %arg11[%c16_48, %c0_49] : memref<560x64xf32, #tpu.memory_space<vmem>>, vector<8x64xf32>
    tpu.vector_store %arg11[%c16_48, %c0_49], %0 {strides = array<i32>} : memref<560x64xf32, #tpu.memory_space<vmem>>, vector<8x64xf32>,
    %c32_50 = arith.constant 32 : index
    %c0_51 = arith.constant 0 : index
    %37 = vector.load %arg11[%c32_50, %c0_51] : memref<560x64xf32, #tpu.memory_space<vmem>>, vector<8x64xf32>
    tpu.vector_store %arg11[%c32_50, %c0_51], %0 {strides = array<i32>} : memref<560x64xf32, #tpu.memory_space<vmem>>, vector<8x64xf32>,
    %c48_52 = arith.constant 48 : index
    %c0_53 = arith.constant 0 : index
    %38 = vector.load %arg11[%c48_52, %c0_53] : memref<560x64xf32, #tpu.memory_space<vmem>>, vector<8x64xf32>
    tpu.vector_store %arg11[%c48_52, %c0_53], %0 {strides = array<i32>} : memref<560x64xf32, #tpu.memory_space<vmem>>, vector<8x64xf32>,
    %c64_54 = arith.constant 64 : index
    %c0_55 = arith.constant 0 : index
    %39 = vector.load %arg11[%c64_54, %c0_55] : memref<560x64xf32, #tpu.memory_space<vmem>>, vector<8x64xf32>
    tpu.vector_store %arg11[%c64_54, %c0_55], %0 {strides = array<i32>} : memref<560x64xf32, #tpu.memory_space<vmem>>, vector<8x64xf32>,
    %c80_56 = arith.constant 80 : index
    %c0_57 = arith.constant 0 : index
    %40 = vector.load %arg11[%c80_56, %c0_57] : memref<560x64xf32, #tpu.memory_space<vmem>>, vector<8x64xf32>
    tpu.vector_store %arg11[%c80_56, %c0_57], %0 {strides = array<i32>} : memref<560x64xf32, #tpu.memory_space<vmem>>, vector<8x64xf32>,
    %c96_58 = arith.constant 96 : index
    %c0_59 = arith.constant 0 : index
    %41 = vector.load %arg11[%c96_58, %c0_59] : memref<560x64xf32, #tpu.memory_space<vmem>>, vector<8x64xf32>
    tpu.vector_store %arg11[%c96_58, %c0_59], %0 {strides = array<i32>} : memref<560x64xf32, #tpu.memory_space<vmem>>, vector<8x64xf32>,
    %c112_60 = arith.constant 112 : index
    %c0_61 = arith.constant 0 : index
    %42 = vector.load %arg11[%c112_60, %c0_61] : memref<560x64xf32, #tpu.memory_space<vmem>>, vector<8x64xf32>
    tpu.vector_store %arg11[%c112_60, %c0_61], %0 {strides = array<i32>} : memref<560x64xf32, #tpu.memory_space<vmem>>, vector<8x64xf32>,
    %c128_62 = arith.constant 128 : index
    %c0_63 = arith.constant 0 : index
    %43 = vector.load %arg11[%c128_62, %c0_63] : memref<560x64xf32, #tpu.memory_space<vmem>>, vector<8x64xf32>
    tpu.vector_store %arg11[%c128_62, %c0_63], %0 {strides = array<i32>} : memref<560x64xf32, #tpu.memory_space<vmem>>, vector<8x64xf32>,
    %c144_64 = arith.constant 144 : index
    %c0_65 = arith.constant 0 : index
    %44 = vector.load %arg11[%c144_64, %c0_65] : memref<560x64xf32, #tpu.memory_space<vmem>>, vector<8x64xf32>
    tpu.vector_store %arg11[%c144_64, %c0_65], %0 {strides = array<i32>} : memref<560x64xf32, #tpu.memory_space<vmem>>, vector<8x64xf32>,
    %c160_66 = arith.constant 160 : index
    %c0_67 = arith.constant 0 : index
    %45 = vector.load %arg11[%c160_66, %c0_67] : memref<560x64xf32, #tpu.memory_space<vmem>>, vector<8x64xf32>
    tpu.vector_store %arg11[%c160_66, %c0_67], %0 {strides = array<i32>} : memref<560x64xf32, #tpu.memory_space<vmem>>, vector<8x64xf32>,
    %c176_68 = arith.constant 176 : index
    %c0_69 = arith.constant 0 : index
    %46 = vector.load %arg11[%c176_68, %c0_69] : memref<560x64xf32, #tpu.memory_space<vmem>>, vector<8x64xf32>
    tpu.vector_store %arg11[%c176_68, %c0_69], %0 {strides = array<i32>} : memref<560x64xf32, #tpu.memory_space<vmem>>, vector<8x64xf32>,
    %c192_70 = arith.constant 192 : index
    %c0_71 = arith.constant 0 : index
    %47 = vector.load %arg11[%c192_70, %c0_71] : memref<560x64xf32, #tpu.memory_space<vmem>>, vector<8x64xf32>
    tpu.vector_store %arg11[%c192_70, %c0_71], %0 {strides = array<i32>} : memref<560x64xf32, #tpu.memory_space<vmem>>, vector<8x64xf32>,
    %c208_72 = arith.constant 208 : index
    %c0_73 = arith.constant 0 : index
    %48 = vector.load %arg11[%c208_72, %c0_73] : memref<560x64xf32, #tpu.memory_space<vmem>>, vector<8x64xf32>
    tpu.vector_store %arg11[%c208_72, %c0_73], %0 {strides = array<i32>} : memref<560x64xf32, #tpu.memory_space<vmem>>, vector<8x64xf32>,
    %c224_74 = arith.constant 224 : index
    %c0_75 = arith.constant 0 : index
    %49 = vector.load %arg11[%c224_74, %c0_75] : memref<560x64xf32, #tpu.memory_space<vmem>>, vector<8x64xf32>
    tpu.vector_store %arg11[%c224_74, %c0_75], %0 {strides = array<i32>} : memref<560x64xf32, #tpu.memory_space<vmem>>, vector<8x64xf32>,
    %c240_76 = arith.constant 240 : index
    %c0_77 = arith.constant 0 : index
    %50 = vector.load %arg11[%c240_76, %c0_77] : memref<560x64xf32, #tpu.memory_space<vmem>>, vector<8x64xf32>
    tpu.vector_store %arg11[%c240_76, %c0_77], %0 {strides = array<i32>} : memref<560x64xf32, #tpu.memory_space<vmem>>, vector<8x64xf32>,
    %c256_78 = arith.constant 256 : index
    %c0_79 = arith.constant 0 : index
    %51 = vector.load %arg11[%c256_78, %c0_79] : memref<560x64xf32, #tpu.memory_space<vmem>>, vector<8x64xf32>
    tpu.vector_store %arg11[%c256_78, %c0_79], %0 {strides = array<i32>} : memref<560x64xf32, #tpu.memory_space<vmem>>, vector<8x64xf32>,
    %c272_80 = arith.constant 272 : index
    %c0_81 = arith.constant 0 : index
    %52 = vector.load %arg11[%c272_80, %c0_81] : memref<560x64xf32, #tpu.memory_space<vmem>>, vector<8x64xf32>
    tpu.vector_store %arg11[%c272_80, %c0_81], %0 {strides = array<i32>} : memref<560x64xf32, #tpu.memory_space<vmem>>, vector<8x64xf32>,
    %c288_82 = arith.constant 288 : index
    %c0_83 = arith.constant 0 : index
    %53 = vector.load %arg11[%c288_82, %c0_83] : memref<560x64xf32, #tpu.memory_space<vmem>>, vector<8x64xf32>
    tpu.vector_store %arg11[%c288_82, %c0_83], %0 {strides = array<i32>} : memref<560x64xf32, #tpu.memory_space<vmem>>, vector<8x64xf32>,
    %c304 = arith.constant 304 : index
    %c0_84 = arith.constant 0 : index
    %54 = vector.load %arg11[%c304, %c0_84] : memref<560x64xf32, #tpu.memory_space<vmem>>, vector<8x64xf32>
    tpu.vector_store %arg11[%c304, %c0_84], %0 {strides = array<i32>} : memref<560x64xf32, #tpu.memory_space<vmem>>, vector<8x64xf32>,
    %c320 = arith.constant 320 : index
    %c0_85 = arith.constant 0 : index
    %55 = vector.load %arg11[%c320, %c0_85] : memref<560x64xf32, #tpu.memory_space<vmem>>, vector<8x64xf32>
    tpu.vector_store %arg11[%c320, %c0_85], %0 {strides = array<i32>} : memref<560x64xf32, #tpu.memory_space<vmem>>, vector<8x64xf32>,
    %c336 = arith.constant 336 : index
    %c0_86 = arith.constant 0 : index
    %56 = vector.load %arg11[%c336, %c0_86] : memref<560x64xf32, #tpu.memory_space<vmem>>, vector<8x64xf32>
    tpu.vector_store %arg11[%c336, %c0_86], %0 {strides = array<i32>} : memref<560x64xf32, #tpu.memory_space<vmem>>, vector<8x64xf32>,
    %c352 = arith.constant 352 : index
    %c0_87 = arith.constant 0 : index
    %57 = vector.load %arg11[%c352, %c0_87] : memref<560x64xf32, #tpu.memory_space<vmem>>, vector<8x64xf32>
    tpu.vector_store %arg11[%c352, %c0_87], %0 {strides = array<i32>} : memref<560x64xf32, #tpu.memory_space<vmem>>, vector<8x64xf32>,
    %c368 = arith.constant 368 : index
    %c0_88 = arith.constant 0 : index
    %58 = vector.load %arg11[%c368, %c0_88] : memref<560x64xf32, #tpu.memory_space<vmem>>, vector<8x64xf32>
    tpu.vector_store %arg11[%c368, %c0_88], %0 {strides = array<i32>} : memref<560x64xf32, #tpu.memory_space<vmem>>, vector<8x64xf32>,
    %c384 = arith.constant 384 : index
    %c0_89 = arith.constant 0 : index
    %59 = vector.load %arg11[%c384, %c0_89] : memref<560x64xf32, #tpu.memory_space<vmem>>, vector<8x64xf32>
    tpu.vector_store %arg11[%c384, %c0_89], %0 {strides = array<i32>} : memref<560x64xf32, #tpu.memory_space<vmem>>, vector<8x64xf32>,
    %c400 = arith.constant 400 : index
    %c0_90 = arith.constant 0 : index
    %60 = vector.load %arg11[%c400, %c0_90] : memref<560x64xf32, #tpu.memory_space<vmem>>, vector<8x64xf32>
    tpu.vector_store %arg11[%c400, %c0_90], %0 {strides = array<i32>} : memref<560x64xf32, #tpu.memory_space<vmem>>, vector<8x64xf32>,
    %c416 = arith.constant 416 : index
    %c0_91 = arith.constant 0 : index
    %61 = vector.load %arg11[%c416, %c0_91] : memref<560x64xf32, #tpu.memory_space<vmem>>, vector<8x64xf32>
    tpu.vector_store %arg11[%c416, %c0_91], %0 {strides = array<i32>} : memref<560x64xf32, #tpu.memory_space<vmem>>, vector<8x64xf32>,
    %c432 = arith.constant 432 : index
    %c0_92 = arith.constant 0 : index
    %62 = vector.load %arg11[%c432, %c0_92] : memref<560x64xf32, #tpu.memory_space<vmem>>, vector<8x64xf32>
    tpu.vector_store %arg11[%c432, %c0_92], %0 {strides = array<i32>} : memref<560x64xf32, #tpu.memory_space<vmem>>, vector<8x64xf32>,
    %c448 = arith.constant 448 : index
    %c0_93 = arith.constant 0 : index
    %63 = vector.load %arg11[%c448, %c0_93] : memref<560x64xf32, #tpu.memory_space<vmem>>, vector<8x64xf32>
    tpu.vector_store %arg11[%c448, %c0_93], %0 {strides = array<i32>} : memref<560x64xf32, #tpu.memory_space<vmem>>, vector<8x64xf32>,
    %c464 = arith.constant 464 : index
    %c0_94 = arith.constant 0 : index
    %64 = vector.load %arg11[%c464, %c0_94] : memref<560x64xf32, #tpu.memory_space<vmem>>, vector<8x64xf32>
    tpu.vector_store %arg11[%c464, %c0_94], %0 {strides = array<i32>} : memref<560x64xf32, #tpu.memory_space<vmem>>, vector<8x64xf32>,
    %c480 = arith.constant 480 : index
    %c0_95 = arith.constant 0 : index
    %65 = vector.load %arg11[%c480, %c0_95] : memref<560x64xf32, #tpu.memory_space<vmem>>, vector<8x64xf32>
    tpu.vector_store %arg11[%c480, %c0_95], %0 {strides = array<i32>} : memref<560x64xf32, #tpu.memory_space<vmem>>, vector<8x64xf32>,
    %c496 = arith.constant 496 : index
    %c0_96 = arith.constant 0 : index
    %66 = vector.load %arg11[%c496, %c0_96] : memref<560x64xf32, #tpu.memory_space<vmem>>, vector<8x64xf32>
    tpu.vector_store %arg11[%c496, %c0_96], %0 {strides = array<i32>} : memref<560x64xf32, #tpu.memory_space<vmem>>, vector<8x64xf32>,
    %c512 = arith.constant 512 : index
    %c0_97 = arith.constant 0 : index
    %67 = vector.load %arg11[%c512, %c0_97] : memref<560x64xf32, #tpu.memory_space<vmem>>, vector<8x64xf32>
    tpu.vector_store %arg11[%c512, %c0_97], %0 {strides = array<i32>} : memref<560x64xf32, #tpu.memory_space<vmem>>, vector<8x64xf32>,
    %c528 = arith.constant 528 : index
    %c0_98 = arith.constant 0 : index
    %68 = vector.load %arg11[%c528, %c0_98] : memref<560x64xf32, #tpu.memory_space<vmem>>, vector<8x64xf32>
    tpu.vector_store %arg11[%c528, %c0_98], %0 {strides = array<i32>} : memref<560x64xf32, #tpu.memory_space<vmem>>, vector<8x64xf32>,
    %c544 = arith.constant 544 : index
    %c0_99 = arith.constant 0 : index
    %69 = vector.load %arg11[%c544, %c0_99] : memref<560x64xf32, #tpu.memory_space<vmem>>, vector<8x64xf32>
    tpu.vector_store %arg11[%c544, %c0_99], %0 {strides = array<i32>} : memref<560x64xf32, #tpu.memory_space<vmem>>, vector<8x64xf32>,
    %c8_100 = arith.constant 8 : index
    %c0_101 = arith.constant 0 : index
    %70 = vector.load %arg11[%c8_100, %c0_101] : memref<560x64xf32, #tpu.memory_space<vmem>>, vector<8x64xf32>
    tpu.vector_store %arg11[%c8_100, %c0_101], %0 {strides = array<i32>} : memref<560x64xf32, #tpu.memory_space<vmem>>, vector<8x64xf32>,
    %c536 = arith.constant 536 : index
    %c0_102 = arith.constant 0 : index
    %71 = vector.load %arg11[%c536, %c0_102] : memref<560x64xf32, #tpu.memory_space<vmem>>, vector<8x64xf32>
    tpu.vector_store %arg11[%c536, %c0_102], %0 {strides = array<i32>} : memref<560x64xf32, #tpu.memory_space<vmem>>, vector<8x64xf32>,
    %c0_103 = arith.constant 0 : index
    %c0_104 = arith.constant 0 : index
    %c0_105 = arith.constant 0 : index
    %c0_106 = arith.constant 0 : index
    %72 = vector.load %arg1[%c0_103, %c0_104, %c0_105, %c0_106] : memref<1x8x8x64xf32, #tpu.memory_space<vmem>>, vector<1x1x8x64xf32>
    %73 = vector.shape_cast %72 : vector<1x1x8x64xf32> to vector<8x64xf32>
    %c24 = arith.constant 24 : index
    %c0_107 = arith.constant 0 : index
    %74 = vector.load %arg9[%c24, %c0_107] : memref<176x64xf32, #tpu.memory_space<vmem>>, vector<8x64xf32>
    tpu.vector_store %arg9[%c24, %c0_107], %73 {strides = array<i32>} : memref<176x64xf32, #tpu.memory_space<vmem>>, vector<8x64xf32>,
    %c0_108 = arith.constant 0 : index
    %c1 = arith.constant 1 : index
    %c0_109 = arith.constant 0 : index
    %c0_110 = arith.constant 0 : index
    %75 = vector.load %arg1[%c0_108, %c1, %c0_109, %c0_110] : memref<1x8x8x64xf32, #tpu.memory_space<vmem>>, vector<1x1x8x64xf32>
    %76 = vector.shape_cast %75 : vector<1x1x8x64xf32> to vector<8x64xf32>
    %c40 = arith.constant 40 : index
    %c0_111 = arith.constant 0 : index
    %77 = vector.load %arg9[%c40, %c0_111] : memref<176x64xf32, #tpu.memory_space<vmem>>, vector<8x64xf32>
    tpu.vector_store %arg9[%c40, %c0_111], %76 {strides = array<i32>} : memref<176x64xf32, #tpu.memory_space<vmem>>, vector<8x64xf32>,
    %c0_112 = arith.constant 0 : index
    %c2 = arith.constant 2 : index
    %c0_113 = arith.constant 0 : index
    %c0_114 = arith.constant 0 : index
    %78 = vector.load %arg1[%c0_112, %c2, %c0_113, %c0_114] : memref<1x8x8x64xf32, #tpu.memory_space<vmem>>, vector<1x1x8x64xf32>
    %79 = vector.shape_cast %78 : vector<1x1x8x64xf32> to vector<8x64xf32>
    %c56 = arith.constant 56 : index
    %c0_115 = arith.constant 0 : index
    %80 = vector.load %arg9[%c56, %c0_115] : memref<176x64xf32, #tpu.memory_space<vmem>>, vector<8x64xf32>
    tpu.vector_store %arg9[%c56, %c0_115], %79 {strides = array<i32>} : memref<176x64xf32, #tpu.memory_space<vmem>>, vector<8x64xf32>,
    %c0_116 = arith.constant 0 : index
    %c3 = arith.constant 3 : index
    %c0_117 = arith.constant 0 : index
    %c0_118 = arith.constant 0 : index
    %81 = vector.load %arg1[%c0_116, %c3, %c0_117, %c0_118] : memref<1x8x8x64xf32, #tpu.memory_space<vmem>>, vector<1x1x8x64xf32>
    %82 = vector.shape_cast %81 : vector<1x1x8x64xf32> to vector<8x64xf32>
    %c72 = arith.constant 72 : index
    %c0_119 = arith.constant 0 : index
    %83 = vector.load %arg9[%c72, %c0_119] : memref<176x64xf32, #tpu.memory_space<vmem>>, vector<8x64xf32>
    tpu.vector_store %arg9[%c72, %c0_119], %82 {strides = array<i32>} : memref<176x64xf32, #tpu.memory_space<vmem>>, vector<8x64xf32>,
    %c0_120 = arith.constant 0 : index
    %c4 = arith.constant 4 : index
    %c0_121 = arith.constant 0 : index
    %c0_122 = arith.constant 0 : index
    %84 = vector.load %arg1[%c0_120, %c4, %c0_121, %c0_122] : memref<1x8x8x64xf32, #tpu.memory_space<vmem>>, vector<1x1x8x64xf32>
    %85 = vector.shape_cast %84 : vector<1x1x8x64xf32> to vector<8x64xf32>
    %c88 = arith.constant 88 : index
    %c0_123 = arith.constant 0 : index
    %86 = vector.load %arg9[%c88, %c0_123] : memref<176x64xf32, #tpu.memory_space<vmem>>, vector<8x64xf32>
    tpu.vector_store %arg9[%c88, %c0_123], %85 {strides = array<i32>} : memref<176x64xf32, #tpu.memory_space<vmem>>, vector<8x64xf32>,
    %c0_124 = arith.constant 0 : index
    %c5 = arith.constant 5 : index
    %c0_125 = arith.constant 0 : index
    %c0_126 = arith.constant 0 : index
    %87 = vector.load %arg1[%c0_124, %c5, %c0_125, %c0_126] : memref<1x8x8x64xf32, #tpu.memory_space<vmem>>, vector<1x1x8x64xf32>
    %88 = vector.shape_cast %87 : vector<1x1x8x64xf32> to vector<8x64xf32>
    %c104 = arith.constant 104 : index
    %c0_127 = arith.constant 0 : index
    %89 = vector.load %arg9[%c104, %c0_127] : memref<176x64xf32, #tpu.memory_space<vmem>>, vector<8x64xf32>
    tpu.vector_store %arg9[%c104, %c0_127], %88 {strides = array<i32>} : memref<176x64xf32, #tpu.memory_space<vmem>>, vector<8x64xf32>,
    %c0_128 = arith.constant 0 : index
    %c6 = arith.constant 6 : index
    %c0_129 = arith.constant 0 : index
    %c0_130 = arith.constant 0 : index
    %90 = vector.load %arg1[%c0_128, %c6, %c0_129, %c0_130] : memref<1x8x8x64xf32, #tpu.memory_space<vmem>>, vector<1x1x8x64xf32>
    %91 = vector.shape_cast %90 : vector<1x1x8x64xf32> to vector<8x64xf32>
    %c120 = arith.constant 120 : index
    %c0_131 = arith.constant 0 : index
    %92 = vector.load %arg9[%c120, %c0_131] : memref<176x64xf32, #tpu.memory_space<vmem>>, vector<8x64xf32>
    tpu.vector_store %arg9[%c120, %c0_131], %91 {strides = array<i32>} : memref<176x64xf32, #tpu.memory_space<vmem>>, vector<8x64xf32>,
    %c0_132 = arith.constant 0 : index
    %c7 = arith.constant 7 : index
    %c0_133 = arith.constant 0 : index
    %c0_134 = arith.constant 0 : index
    %93 = vector.load %arg1[%c0_132, %c7, %c0_133, %c0_134] : memref<1x8x8x64xf32, #tpu.memory_space<vmem>>, vector<1x1x8x64xf32>
    %94 = vector.shape_cast %93 : vector<1x1x8x64xf32> to vector<8x64xf32>
    %c136 = arith.constant 136 : index
    %c0_135 = arith.constant 0 : index
    %95 = vector.load %arg9[%c136, %c0_135] : memref<176x64xf32, #tpu.memory_space<vmem>>, vector<8x64xf32>
    tpu.vector_store %arg9[%c136, %c0_135], %94 {strides = array<i32>} : memref<176x64xf32, #tpu.memory_space<vmem>>, vector<8x64xf32>,
    %c0_136 = arith.constant 0 : index
    %c0_137 = arith.constant 0 : index
    %96 = vector.load %arg3[%c0_136, %c0_137] : memref<1x128xf32, #tpu.memory_space<vmem>>, vector<1x128xf32>
    %c7_138 = arith.constant 7 : index
    %c0_139 = arith.constant 0 : index
    %97 = vector.load %arg9[%c7_138, %c0_139] : memref<176x64xf32, #tpu.memory_space<vmem>>, vector<128x64xf32>
    %c0_140 = arith.constant 0 : index
    %c0_141 = arith.constant 0 : index
    %c0_142 = arith.constant 0 : index
    %98 = vector.load %arg2[%c0_140, %c0_141, %c0_142] : memref<9x64x128xf32, #tpu.memory_space<vmem>>, vector<1x64x128xf32>
    %99 = vector.shape_cast %98 : vector<1x64x128xf32> to vector<64x128xf32>
    %cst_143 = arith.constant dense<0.000000e+00> : vector<128x128xf32>
    %100 = tpu.matmul %97, %99, %cst_143 {dimension_numbers = #tpu.dot_dimension_numbers<[1], [0], [0], [1], [0, 0, 1, 1], [], []>} : vector<128x64xf32>, vector<64x128xf32>, vector<128x128xf32> -> vector<128x128xf32>
    %101 = vector.broadcast %96 : vector<1x128xf32> to vector<128x128xf32>
    %102 = arith.addf %100, %101 : vector<128x128xf32>
    %c8_144 = arith.constant 8 : index
    %c0_145 = arith.constant 0 : index
    %103 = vector.load %arg9[%c8_144, %c0_145] : memref<176x64xf32, #tpu.memory_space<vmem>>, vector<128x64xf32>
    %c1_146 = arith.constant 1 : index
    %c0_147 = arith.constant 0 : index
    %c0_148 = arith.constant 0 : index
    %104 = vector.load %arg2[%c1_146, %c0_147, %c0_148] : memref<9x64x128xf32, #tpu.memory_space<vmem>>, vector<1x64x128xf32>
    %105 = vector.shape_cast %104 : vector<1x64x128xf32> to vector<64x128xf32>
    %cst_149 = arith.constant dense<0.000000e+00> : vector<128x128xf32>
    %106 = tpu.matmul %103, %105, %cst_149 {dimension_numbers = #tpu.dot_dimension_numbers<[1], [0], [0], [1], [0, 0, 1, 1], [], []>} : vector<128x64xf32>, vector<64x128xf32>, vector<128x128xf32> -> vector<128x128xf32>
    %107 = arith.addf %102, %106 : vector<128x128xf32>
    %c9 = arith.constant 9 : index
    %c0_150 = arith.constant 0 : index
    %108 = vector.load %arg9[%c9, %c0_150] : memref<176x64xf32, #tpu.memory_space<vmem>>, vector<128x64xf32>
    %c2_151 = arith.constant 2 : index
    %c0_152 = arith.constant 0 : index
    %c0_153 = arith.constant 0 : index
    %109 = vector.load %arg2[%c2_151, %c0_152, %c0_153] : memref<9x64x128xf32, #tpu.memory_space<vmem>>, vector<1x64x128xf32>
    %110 = vector.shape_cast %109 : vector<1x64x128xf32> to vector<64x128xf32>
    %cst_154 = arith.constant dense<0.000000e+00> : vector<128x128xf32>
    %111 = tpu.matmul %108, %110, %cst_154 {dimension_numbers = #tpu.dot_dimension_numbers<[1], [0], [0], [1], [0, 0, 1, 1], [], []>} : vector<128x64xf32>, vector<64x128xf32>, vector<128x128xf32> -> vector<128x128xf32>
    %112 = arith.addf %107, %111 : vector<128x128xf32>
    %c23 = arith.constant 23 : index
    %c0_155 = arith.constant 0 : index
    %113 = vector.load %arg9[%c23, %c0_155] : memref<176x64xf32, #tpu.memory_space<vmem>>, vector<128x64xf32>
    %c3_156 = arith.constant 3 : index
    %c0_157 = arith.constant 0 : index
    %c0_158 = arith.constant 0 : index
    %114 = vector.load %arg2[%c3_156, %c0_157, %c0_158] : memref<9x64x128xf32, #tpu.memory_space<vmem>>, vector<1x64x128xf32>
    %115 = vector.shape_cast %114 : vector<1x64x128xf32> to vector<64x128xf32>
    %cst_159 = arith.constant dense<0.000000e+00> : vector<128x128xf32>
    %116 = tpu.matmul %113, %115, %cst_159 {dimension_numbers = #tpu.dot_dimension_numbers<[1], [0], [0], [1], [0, 0, 1, 1], [], []>} : vector<128x64xf32>, vector<64x128xf32>, vector<128x128xf32> -> vector<128x128xf32>
    %117 = arith.addf %112, %116 : vector<128x128xf32>
    %c24_160 = arith.constant 24 : index
    %c0_161 = arith.constant 0 : index
    %118 = vector.load %arg9[%c24_160, %c0_161] : memref<176x64xf32, #tpu.memory_space<vmem>>, vector<128x64xf32>
    %c4_162 = arith.constant 4 : index
    %c0_163 = arith.constant 0 : index
    %c0_164 = arith.constant 0 : index
    %119 = vector.load %arg2[%c4_162, %c0_163, %c0_164] : memref<9x64x128xf32, #tpu.memory_space<vmem>>, vector<1x64x128xf32>
    %120 = vector.shape_cast %119 : vector<1x64x128xf32> to vector<64x128xf32>
    %cst_165 = arith.constant dense<0.000000e+00> : vector<128x128xf32>
    %121 = tpu.matmul %118, %120, %cst_165 {dimension_numbers = #tpu.dot_dimension_numbers<[1], [0], [0], [1], [0, 0, 1, 1], [], []>} : vector<128x64xf32>, vector<64x128xf32>, vector<128x128xf32> -> vector<128x128xf32>
    %122 = arith.addf %117, %121 : vector<128x128xf32>
    %c25 = arith.constant 25 : index
    %c0_166 = arith.constant 0 : index
    %123 = vector.load %arg9[%c25, %c0_166] : memref<176x64xf32, #tpu.memory_space<vmem>>, vector<128x64xf32>
    %c5_167 = arith.constant 5 : index
    %c0_168 = arith.constant 0 : index
    %c0_169 = arith.constant 0 : index
    %124 = vector.load %arg2[%c5_167, %c0_168, %c0_169] : memref<9x64x128xf32, #tpu.memory_space<vmem>>, vector<1x64x128xf32>
    %125 = vector.shape_cast %124 : vector<1x64x128xf32> to vector<64x128xf32>
    %cst_170 = arith.constant dense<0.000000e+00> : vector<128x128xf32>
    %126 = tpu.matmul %123, %125, %cst_170 {dimension_numbers = #tpu.dot_dimension_numbers<[1], [0], [0], [1], [0, 0, 1, 1], [], []>} : vector<128x64xf32>, vector<64x128xf32>, vector<128x128xf32> -> vector<128x128xf32>
    %127 = arith.addf %122, %126 : vector<128x128xf32>
    %c39 = arith.constant 39 : index
    %c0_171 = arith.constant 0 : index
    %128 = vector.load %arg9[%c39, %c0_171] : memref<176x64xf32, #tpu.memory_space<vmem>>, vector<128x64xf32>
    %c6_172 = arith.constant 6 : index
    %c0_173 = arith.constant 0 : index
    %c0_174 = arith.constant 0 : index
    %129 = vector.load %arg2[%c6_172, %c0_173, %c0_174] : memref<9x64x128xf32, #tpu.memory_space<vmem>>, vector<1x64x128xf32>
    %130 = vector.shape_cast %129 : vector<1x64x128xf32> to vector<64x128xf32>
    %cst_175 = arith.constant dense<0.000000e+00> : vector<128x128xf32>
    %131 = tpu.matmul %128, %130, %cst_175 {dimension_numbers = #tpu.dot_dimension_numbers<[1], [0], [0], [1], [0, 0, 1, 1], [], []>} : vector<128x64xf32>, vector<64x128xf32>, vector<128x128xf32> -> vector<128x128xf32>
    %132 = arith.addf %127, %131 : vector<128x128xf32>
    %c40_176 = arith.constant 40 : index
    %c0_177 = arith.constant 0 : index
    %133 = vector.load %arg9[%c40_176, %c0_177] : memref<176x64xf32, #tpu.memory_space<vmem>>, vector<128x64xf32>
    %c7_178 = arith.constant 7 : index
    %c0_179 = arith.constant 0 : index
    %c0_180 = arith.constant 0 : index
    %134 = vector.load %arg2[%c7_178, %c0_179, %c0_180] : memref<9x64x128xf32, #tpu.memory_space<vmem>>, vector<1x64x128xf32>
    %135 = vector.shape_cast %134 : vector<1x64x128xf32> to vector<64x128xf32>
    %cst_181 = arith.constant dense<0.000000e+00> : vector<128x128xf32>
    %136 = tpu.matmul %133, %135, %cst_181 {dimension_numbers = #tpu.dot_dimension_numbers<[1], [0], [0], [1], [0, 0, 1, 1], [], []>} : vector<128x64xf32>, vector<64x128xf32>, vector<128x128xf32> -> vector<128x128xf32>
    %137 = arith.addf %132, %136 : vector<128x128xf32>
    %c41 = arith.constant 41 : index
    %c0_182 = arith.constant 0 : index
    %138 = vector.load %arg9[%c41, %c0_182] : memref<176x64xf32, #tpu.memory_space<vmem>>, vector<128x64xf32>
    %c8_183 = arith.constant 8 : index
    %c0_184 = arith.constant 0 : index
    %c0_185 = arith.constant 0 : index
    %139 = vector.load %arg2[%c8_183, %c0_184, %c0_185] : memref<9x64x128xf32, #tpu.memory_space<vmem>>, vector<1x64x128xf32>
    %140 = vector.shape_cast %139 : vector<1x64x128xf32> to vector<64x128xf32>
    %cst_186 = arith.constant dense<0.000000e+00> : vector<128x128xf32>
    %141 = tpu.matmul %138, %140, %cst_186 {dimension_numbers = #tpu.dot_dimension_numbers<[1], [0], [0], [1], [0, 0, 1, 1], [], []>} : vector<128x64xf32>, vector<64x128xf32>, vector<128x128xf32> -> vector<128x128xf32>
    %142 = arith.addf %137, %141 : vector<128x128xf32>
    %cst_187 = arith.constant 0.000000e+00 : f32
    %143 = vector.broadcast %cst_187 : f32 to vector<128x128xf32>
    %144 = arith.maximumf %142, %143 : vector<128x128xf32>
    %145 = vector.extract_strided_slice %144 {offsets = [0, 0], sizes = [8, 64], strides = [1, 1]} : vector<128x128xf32> to vector<8x64xf32>
    %c24_188 = arith.constant 24 : index
    %c0_189 = arith.constant 0 : index
    %146 = vector.load %arg10[%c24_188, %c0_189] : memref<304x64xf32, #tpu.memory_space<vmem>>, vector<8x64xf32>
    tpu.vector_store %arg10[%c24_188, %c0_189], %145 {strides = array<i32>} : memref<304x64xf32, #tpu.memory_space<vmem>>, vector<8x64xf32>,
    %147 = vector.extract_strided_slice %144 {offsets = [0, 64], sizes = [8, 64], strides = [1, 1]} : vector<128x128xf32> to vector<8x64xf32>
    %c40_190 = arith.constant 40 : index
    %c0_191 = arith.constant 0 : index
    %148 = vector.load %arg10[%c40_190, %c0_191] : memref<304x64xf32, #tpu.memory_space<vmem>>, vector<8x64xf32>
    tpu.vector_store %arg10[%c40_190, %c0_191], %147 {strides = array<i32>} : memref<304x64xf32, #tpu.memory_space<vmem>>, vector<8x64xf32>,
    %149 = vector.extract_strided_slice %144 {offsets = [16, 0], sizes = [8, 64], strides = [1, 1]} : vector<128x128xf32> to vector<8x64xf32>
    %c56_192 = arith.constant 56 : index
    %c0_193 = arith.constant 0 : index
    %150 = vector.load %arg10[%c56_192, %c0_193] : memref<304x64xf32, #tpu.memory_space<vmem>>, vector<8x64xf32>
    tpu.vector_store %arg10[%c56_192, %c0_193], %149 {strides = array<i32>} : memref<304x64xf32, #tpu.memory_space<vmem>>, vector<8x64xf32>,
    %151 = vector.extract_strided_slice %144 {offsets = [16, 64], sizes = [8, 64], strides = [1, 1]} : vector<128x128xf32> to vector<8x64xf32>
    %c72_194 = arith.constant 72 : index
    %c0_195 = arith.constant 0 : index
    %152 = vector.load %arg10[%c72_194, %c0_195] : memref<304x64xf32, #tpu.memory_space<vmem>>, vector<8x64xf32>
    tpu.vector_store %arg10[%c72_194, %c0_195], %151 {strides = array<i32>} : memref<304x64xf32, #tpu.memory_space<vmem>>, vector<8x64xf32>,
    %153 = vector.extract_strided_slice %144 {offsets = [32, 0], sizes = [8, 64], strides = [1, 1]} : vector<128x128xf32> to vector<8x64xf32>
    %c88_196 = arith.constant 88 : index
    %c0_197 = arith.constant 0 : index
    %154 = vector.load %arg10[%c88_196, %c0_197] : memref<304x64xf32, #tpu.memory_space<vmem>>, vector<8x64xf32>
    tpu.vector_store %arg10[%c88_196, %c0_197], %153 {strides = array<i32>} : memref<304x64xf32, #tpu.memory_space<vmem>>, vector<8x64xf32>,
    %155 = vector.extract_strided_slice %144 {offsets = [32, 64], sizes = [8, 64], strides = [1, 1]} : vector<128x128xf32> to vector<8x64xf32>
    %c104_198 = arith.constant 104 : index
    %c0_199 = arith.constant 0 : index
    %156 = vector.load %arg10[%c104_198, %c0_199] : memref<304x64xf32, #tpu.memory_space<vmem>>, vector<8x64xf32>
    tpu.vector_store %arg10[%c104_198, %c0_199], %155 {strides = array<i32>} : memref<304x64xf32, #tpu.memory_space<vmem>>, vector<8x64xf32>,
    %157 = vector.extract_strided_slice %144 {offsets = [48, 0], sizes = [8, 64], strides = [1, 1]} : vector<128x128xf32> to vector<8x64xf32>
    %c120_200 = arith.constant 120 : index
    %c0_201 = arith.constant 0 : index
    %158 = vector.load %arg10[%c120_200, %c0_201] : memref<304x64xf32, #tpu.memory_space<vmem>>, vector<8x64xf32>
    tpu.vector_store %arg10[%c120_200, %c0_201], %157 {strides = array<i32>} : memref<304x64xf32, #tpu.memory_space<vmem>>, vector<8x64xf32>,
    %159 = vector.extract_strided_slice %144 {offsets = [48, 64], sizes = [8, 64], strides = [1, 1]} : vector<128x128xf32> to vector<8x64xf32>
    %c136_202 = arith.constant 136 : index
    %c0_203 = arith.constant 0 : index
    %160 = vector.load %arg10[%c136_202, %c0_203] : memref<304x64xf32, #tpu.memory_space<vmem>>, vector<8x64xf32>
    tpu.vector_store %arg10[%c136_202, %c0_203], %159 {strides = array<i32>} : memref<304x64xf32, #tpu.memory_space<vmem>>, vector<8x64xf32>,
    %161 = vector.extract_strided_slice %144 {offsets = [64, 0], sizes = [8, 64], strides = [1, 1]} : vector<128x128xf32> to vector<8x64xf32>
    %c152_204 = arith.constant 152 : index
    %c0_205 = arith.constant 0 : index
    %162 = vector.load %arg10[%c152_204, %c0_205] : memref<304x64xf32, #tpu.memory_space<vmem>>, vector<8x64xf32>
    tpu.vector_store %arg10[%c152_204, %c0_205], %161 {strides = array<i32>} : memref<304x64xf32, #tpu.memory_space<vmem>>, vector<8x64xf32>,
    %163 = vector.extract_strided_slice %144 {offsets = [64, 64], sizes = [8, 64], strides = [1, 1]} : vector<128x128xf32> to vector<8x64xf32>
    %c168 = arith.constant 168 : index
    %c0_206 = arith.constant 0 : index
    %164 = vector.load %arg10[%c168, %c0_206] : memref<304x64xf32, #tpu.memory_space<vmem>>, vector<8x64xf32>
    tpu.vector_store %arg10[%c168, %c0_206], %163 {strides = array<i32>} : memref<304x64xf32, #tpu.memory_space<vmem>>, vector<8x64xf32>,
    %165 = vector.extract_strided_slice %144 {offsets = [80, 0], sizes = [8, 64], strides = [1, 1]} : vector<128x128xf32> to vector<8x64xf32>
    %c184 = arith.constant 184 : index
    %c0_207 = arith.constant 0 : index
    %166 = vector.load %arg10[%c184, %c0_207] : memref<304x64xf32, #tpu.memory_space<vmem>>, vector<8x64xf32>
    tpu.vector_store %arg10[%c184, %c0_207], %165 {strides = array<i32>} : memref<304x64xf32, #tpu.memory_space<vmem>>, vector<8x64xf32>,
    %167 = vector.extract_strided_slice %144 {offsets = [80, 64], sizes = [8, 64], strides = [1, 1]} : vector<128x128xf32> to vector<8x64xf32>
    %c200 = arith.constant 200 : index
    %c0_208 = arith.constant 0 : index
    %168 = vector.load %arg10[%c200, %c0_208] : memref<304x64xf32, #tpu.memory_space<vmem>>, vector<8x64xf32>
    tpu.vector_store %arg10[%c200, %c0_208], %167 {strides = array<i32>} : memref<304x64xf32, #tpu.memory_space<vmem>>, vector<8x64xf32>,
    %169 = vector.extract_strided_slice %144 {offsets = [96, 0], sizes = [8, 64], strides = [1, 1]} : vector<128x128xf32> to vector<8x64xf32>
    %c216 = arith.constant 216 : index
    %c0_209 = arith.constant 0 : index
    %170 = vector.load %arg10[%c216, %c0_209] : memref<304x64xf32, #tpu.memory_space<vmem>>, vector<8x64xf32>
    tpu.vector_store %arg10[%c216, %c0_209], %169 {strides = array<i32>} : memref<304x64xf32, #tpu.memory_space<vmem>>, vector<8x64xf32>,
    %171 = vector.extract_strided_slice %144 {offsets = [96, 64], sizes = [8, 64], strides = [1, 1]} : vector<128x128xf32> to vector<8x64xf32>
    %c232 = arith.constant 232 : index
    %c0_210 = arith.constant 0 : index
    %172 = vector.load %arg10[%c232, %c0_210] : memref<304x64xf32, #tpu.memory_space<vmem>>, vector<8x64xf32>
    tpu.vector_store %arg10[%c232, %c0_210], %171 {strides = array<i32>} : memref<304x64xf32, #tpu.memory_space<vmem>>, vector<8x64xf32>,
    %173 = vector.extract_strided_slice %144 {offsets = [112, 0], sizes = [8, 64], strides = [1, 1]} : vector<128x128xf32> to vector<8x64xf32>
    %c248 = arith.constant 248 : index
    %c0_211 = arith.constant 0 : index
    %174 = vector.load %arg10[%c248, %c0_211] : memref<304x64xf32, #tpu.memory_space<vmem>>, vector<8x64xf32>
    tpu.vector_store %arg10[%c248, %c0_211], %173 {strides = array<i32>} : memref<304x64xf32, #tpu.memory_space<vmem>>, vector<8x64xf32>,
    %175 = vector.extract_strided_slice %144 {offsets = [112, 64], sizes = [8, 64], strides = [1, 1]} : vector<128x128xf32> to vector<8x64xf32>
    %c264 = arith.constant 264 : index
    %c0_212 = arith.constant 0 : index
    %176 = vector.load %arg10[%c264, %c0_212] : memref<304x64xf32, #tpu.memory_space<vmem>>, vector<8x64xf32>
    tpu.vector_store %arg10[%c264, %c0_212], %175 {strides = array<i32>} : memref<304x64xf32, #tpu.memory_space<vmem>>, vector<8x64xf32>,
    %c0_213 = arith.constant 0 : index
    %c0_214 = arith.constant 0 : index
    %177 = vector.load %arg5[%c0_213, %c0_214] : memref<1x128xf32, #tpu.memory_space<vmem>>, vector<1x128xf32>
    %c7_215 = arith.constant 7 : index
    %c0_216 = arith.constant 0 : index
    %178 = vector.load %arg10[%c7_215, %c0_216] : memref<304x64xf32, #tpu.memory_space<vmem>>, vector<128x64xf32>
    %c0_217 = arith.constant 0 : index
    %c0_218 = arith.constant 0 : index
    %c0_219 = arith.constant 0 : index
    %179 = vector.load %arg4[%c0_217, %c0_218, %c0_219] : memref<9x64x128xf32, #tpu.memory_space<vmem>>, vector<1x64x128xf32>
    %180 = vector.shape_cast %179 : vector<1x64x128xf32> to vector<64x128xf32>
    %cst_220 = arith.constant dense<0.000000e+00> : vector<128x128xf32>
    %181 = tpu.matmul %178, %180, %cst_220 {dimension_numbers = #tpu.dot_dimension_numbers<[1], [0], [0], [1], [0, 0, 1, 1], [], []>} : vector<128x64xf32>, vector<64x128xf32>, vector<128x128xf32> -> vector<128x128xf32>
    %182 = vector.broadcast %177 : vector<1x128xf32> to vector<128x128xf32>
    %183 = arith.addf %181, %182 : vector<128x128xf32>
    %c8_221 = arith.constant 8 : index
    %c0_222 = arith.constant 0 : index
    %184 = vector.load %arg10[%c8_221, %c0_222] : memref<304x64xf32, #tpu.memory_space<vmem>>, vector<128x64xf32>
    %c1_223 = arith.constant 1 : index
    %c0_224 = arith.constant 0 : index
    %c0_225 = arith.constant 0 : index
    %185 = vector.load %arg4[%c1_223, %c0_224, %c0_225] : memref<9x64x128xf32, #tpu.memory_space<vmem>>, vector<1x64x128xf32>
    %186 = vector.shape_cast %185 : vector<1x64x128xf32> to vector<64x128xf32>
    %cst_226 = arith.constant dense<0.000000e+00> : vector<128x128xf32>
    %187 = tpu.matmul %184, %186, %cst_226 {dimension_numbers = #tpu.dot_dimension_numbers<[1], [0], [0], [1], [0, 0, 1, 1], [], []>} : vector<128x64xf32>, vector<64x128xf32>, vector<128x128xf32> -> vector<128x128xf32>
    %188 = arith.addf %183, %187 : vector<128x128xf32>
    %c9_227 = arith.constant 9 : index
    %c0_228 = arith.constant 0 : index
    %189 = vector.load %arg10[%c9_227, %c0_228] : memref<304x64xf32, #tpu.memory_space<vmem>>, vector<128x64xf32>
    %c2_229 = arith.constant 2 : index
    %c0_230 = arith.constant 0 : index
    %c0_231 = arith.constant 0 : index
    %190 = vector.load %arg4[%c2_229, %c0_230, %c0_231] : memref<9x64x128xf32, #tpu.memory_space<vmem>>, vector<1x64x128xf32>
    %191 = vector.shape_cast %190 : vector<1x64x128xf32> to vector<64x128xf32>
    %cst_232 = arith.constant dense<0.000000e+00> : vector<128x128xf32>
    %192 = tpu.matmul %189, %191, %cst_232 {dimension_numbers = #tpu.dot_dimension_numbers<[1], [0], [0], [1], [0, 0, 1, 1], [], []>} : vector<128x64xf32>, vector<64x128xf32>, vector<128x128xf32> -> vector<128x128xf32>
    %193 = arith.addf %188, %192 : vector<128x128xf32>
    %c23_233 = arith.constant 23 : index
    %c0_234 = arith.constant 0 : index
    %194 = vector.load %arg10[%c23_233, %c0_234] : memref<304x64xf32, #tpu.memory_space<vmem>>, vector<128x64xf32>
    %c3_235 = arith.constant 3 : index
    %c0_236 = arith.constant 0 : index
    %c0_237 = arith.constant 0 : index
    %195 = vector.load %arg4[%c3_235, %c0_236, %c0_237] : memref<9x64x128xf32, #tpu.memory_space<vmem>>, vector<1x64x128xf32>
    %196 = vector.shape_cast %195 : vector<1x64x128xf32> to vector<64x128xf32>
    %cst_238 = arith.constant dense<0.000000e+00> : vector<128x128xf32>
    %197 = tpu.matmul %194, %196, %cst_238 {dimension_numbers = #tpu.dot_dimension_numbers<[1], [0], [0], [1], [0, 0, 1, 1], [], []>} : vector<128x64xf32>, vector<64x128xf32>, vector<128x128xf32> -> vector<128x128xf32>
    %198 = arith.addf %193, %197 : vector<128x128xf32>
    %c24_239 = arith.constant 24 : index
    %c0_240 = arith.constant 0 : index
    %199 = vector.load %arg10[%c24_239, %c0_240] : memref<304x64xf32, #tpu.memory_space<vmem>>, vector<128x64xf32>
    %c4_241 = arith.constant 4 : index
    %c0_242 = arith.constant 0 : index
    %c0_243 = arith.constant 0 : index
    %200 = vector.load %arg4[%c4_241, %c0_242, %c0_243] : memref<9x64x128xf32, #tpu.memory_space<vmem>>, vector<1x64x128xf32>
    %201 = vector.shape_cast %200 : vector<1x64x128xf32> to vector<64x128xf32>
    %cst_244 = arith.constant dense<0.000000e+00> : vector<128x128xf32>
    %202 = tpu.matmul %199, %201, %cst_244 {dimension_numbers = #tpu.dot_dimension_numbers<[1], [0], [0], [1], [0, 0, 1, 1], [], []>} : vector<128x64xf32>, vector<64x128xf32>, vector<128x128xf32> -> vector<128x128xf32>
    %203 = arith.addf %198, %202 : vector<128x128xf32>
    %c25_245 = arith.constant 25 : index
    %c0_246 = arith.constant 0 : index
    %204 = vector.load %arg10[%c25_245, %c0_246] : memref<304x64xf32, #tpu.memory_space<vmem>>, vector<128x64xf32>
    %c5_247 = arith.constant 5 : index
    %c0_248 = arith.constant 0 : index
    %c0_249 = arith.constant 0 : index
    %205 = vector.load %arg4[%c5_247, %c0_248, %c0_249] : memref<9x64x128xf32, #tpu.memory_space<vmem>>, vector<1x64x128xf32>
    %206 = vector.shape_cast %205 : vector<1x64x128xf32> to vector<64x128xf32>
    %cst_250 = arith.constant dense<0.000000e+00> : vector<128x128xf32>
    %207 = tpu.matmul %204, %206, %cst_250 {dimension_numbers = #tpu.dot_dimension_numbers<[1], [0], [0], [1], [0, 0, 1, 1], [], []>} : vector<128x64xf32>, vector<64x128xf32>, vector<128x128xf32> -> vector<128x128xf32>
    %208 = arith.addf %203, %207 : vector<128x128xf32>
    %c39_251 = arith.constant 39 : index
    %c0_252 = arith.constant 0 : index
    %209 = vector.load %arg10[%c39_251, %c0_252] : memref<304x64xf32, #tpu.memory_space<vmem>>, vector<128x64xf32>
    %c6_253 = arith.constant 6 : index
    %c0_254 = arith.constant 0 : index
    %c0_255 = arith.constant 0 : index
    %210 = vector.load %arg4[%c6_253, %c0_254, %c0_255] : memref<9x64x128xf32, #tpu.memory_space<vmem>>, vector<1x64x128xf32>
    %211 = vector.shape_cast %210 : vector<1x64x128xf32> to vector<64x128xf32>
    %cst_256 = arith.constant dense<0.000000e+00> : vector<128x128xf32>
    %212 = tpu.matmul %209, %211, %cst_256 {dimension_numbers = #tpu.dot_dimension_numbers<[1], [0], [0], [1], [0, 0, 1, 1], [], []>} : vector<128x64xf32>, vector<64x128xf32>, vector<128x128xf32> -> vector<128x128xf32>
    %213 = arith.addf %208, %212 : vector<128x128xf32>
    %c40_257 = arith.constant 40 : index
    %c0_258 = arith.constant 0 : index
    %214 = vector.load %arg10[%c40_257, %c0_258] : memref<304x64xf32, #tpu.memory_space<vmem>>, vector<128x64xf32>
    %c7_259 = arith.constant 7 : index
    %c0_260 = arith.constant 0 : index
    %c0_261 = arith.constant 0 : index
    %215 = vector.load %arg4[%c7_259, %c0_260, %c0_261] : memref<9x64x128xf32, #tpu.memory_space<vmem>>, vector<1x64x128xf32>
    %216 = vector.shape_cast %215 : vector<1x64x128xf32> to vector<64x128xf32>
    %cst_262 = arith.constant dense<0.000000e+00> : vector<128x128xf32>
    %217 = tpu.matmul %214, %216, %cst_262 {dimension_numbers = #tpu.dot_dimension_numbers<[1], [0], [0], [1], [0, 0, 1, 1], [], []>} : vector<128x64xf32>, vector<64x128xf32>, vector<128x128xf32> -> vector<128x128xf32>
    %218 = arith.addf %213, %217 : vector<128x128xf32>
    %c41_263 = arith.constant 41 : index
    %c0_264 = arith.constant 0 : index
    %219 = vector.load %arg10[%c41_263, %c0_264] : memref<304x64xf32, #tpu.memory_space<vmem>>, vector<128x64xf32>
    %c8_265 = arith.constant 8 : index
    %c0_266 = arith.constant 0 : index
    %c0_267 = arith.constant 0 : index
    %220 = vector.load %arg4[%c8_265, %c0_266, %c0_267] : memref<9x64x128xf32, #tpu.memory_space<vmem>>, vector<1x64x128xf32>
    %221 = vector.shape_cast %220 : vector<1x64x128xf32> to vector<64x128xf32>
    %cst_268 = arith.constant dense<0.000000e+00> : vector<128x128xf32>
    %222 = tpu.matmul %219, %221, %cst_268 {dimension_numbers = #tpu.dot_dimension_numbers<[1], [0], [0], [1], [0, 0, 1, 1], [], []>} : vector<128x64xf32>, vector<64x128xf32>, vector<128x128xf32> -> vector<128x128xf32>
    %223 = arith.addf %218, %222 : vector<128x128xf32>
    %cst_269 = arith.constant 0.000000e+00 : f32
    %224 = vector.broadcast %cst_269 : f32 to vector<128x128xf32>
    %225 = arith.maximumf %223, %224 : vector<128x128xf32>
    %226 = vector.extract_strided_slice %225 {offsets = [0, 0], sizes = [8, 64], strides = [1, 1]} : vector<128x128xf32> to vector<8x64xf32>
    %c24_270 = arith.constant 24 : index
    %c0_271 = arith.constant 0 : index
    %227 = vector.load %arg11[%c24_270, %c0_271] : memref<560x64xf32, #tpu.memory_space<vmem>>, vector<8x64xf32>
    tpu.vector_store %arg11[%c24_270, %c0_271], %226 {strides = array<i32>} : memref<560x64xf32, #tpu.memory_space<vmem>>, vector<8x64xf32>,
    %228 = vector.extract_strided_slice %225 {offsets = [0, 64], sizes = [8, 64], strides = [1, 1]} : vector<128x128xf32> to vector<8x64xf32>
    %c40_272 = arith.constant 40 : index
    %c0_273 = arith.constant 0 : index
    %229 = vector.load %arg11[%c40_272, %c0_273] : memref<560x64xf32, #tpu.memory_space<vmem>>, vector<8x64xf32>
    tpu.vector_store %arg11[%c40_272, %c0_273], %228 {strides = array<i32>} : memref<560x64xf32, #tpu.memory_space<vmem>>, vector<8x64xf32>,
    %230 = vector.extract_strided_slice %225 {offsets = [16, 0], sizes = [8, 64], strides = [1, 1]} : vector<128x128xf32> to vector<8x64xf32>
    %c56_274 = arith.constant 56 : index
    %c0_275 = arith.constant 0 : index
    %231 = vector.load %arg11[%c56_274, %c0_275] : memref<560x64xf32, #tpu.memory_space<vmem>>, vector<8x64xf32>
    tpu.vector_store %arg11[%c56_274, %c0_275], %230 {strides = array<i32>} : memref<560x64xf32, #tpu.memory_space<vmem>>, vector<8x64xf32>,
    %232 = vector.extract_strided_slice %225 {offsets = [16, 64], sizes = [8, 64], strides = [1, 1]} : vector<128x128xf32> to vector<8x64xf32>
    %c72_276 = arith.constant 72 : index
    %c0_277 = arith.constant 0 : index
    %233 = vector.load %arg11[%c72_276, %c0_277] : memref<560x64xf32, #tpu.memory_space<vmem>>, vector<8x64xf32>
    tpu.vector_store %arg11[%c72_276, %c0_277], %232 {strides = array<i32>} : memref<560x64xf32, #tpu.memory_space<vmem>>, vector<8x64xf32>,
    %234 = vector.extract_strided_slice %225 {offsets = [32, 0], sizes = [8, 64], strides = [1, 1]} : vector<128x128xf32> to vector<8x64xf32>
    %c88_278 = arith.constant 88 : index
    %c0_279 = arith.constant 0 : index
    %235 = vector.load %arg11[%c88_278, %c0_279] : memref<560x64xf32, #tpu.memory_space<vmem>>, vector<8x64xf32>
    tpu.vector_store %arg11[%c88_278, %c0_279], %234 {strides = array<i32>} : memref<560x64xf32, #tpu.memory_space<vmem>>, vector<8x64xf32>,
    %236 = vector.extract_strided_slice %225 {offsets = [32, 64], sizes = [8, 64], strides = [1, 1]} : vector<128x128xf32> to vector<8x64xf32>
    %c104_280 = arith.constant 104 : index
    %c0_281 = arith.constant 0 : index
    %237 = vector.load %arg11[%c104_280, %c0_281] : memref<560x64xf32, #tpu.memory_space<vmem>>, vector<8x64xf32>
    tpu.vector_store %arg11[%c104_280, %c0_281], %236 {strides = array<i32>} : memref<560x64xf32, #tpu.memory_space<vmem>>, vector<8x64xf32>,
    %238 = vector.extract_strided_slice %225 {offsets = [48, 0], sizes = [8, 64], strides = [1, 1]} : vector<128x128xf32> to vector<8x64xf32>
    %c120_282 = arith.constant 120 : index
    %c0_283 = arith.constant 0 : index
    %239 = vector.load %arg11[%c120_282, %c0_283] : memref<560x64xf32, #tpu.memory_space<vmem>>, vector<8x64xf32>
    tpu.vector_store %arg11[%c120_282, %c0_283], %238 {strides = array<i32>} : memref<560x64xf32, #tpu.memory_space<vmem>>, vector<8x64xf32>,
    %240 = vector.extract_strided_slice %225 {offsets = [48, 64], sizes = [8, 64], strides = [1, 1]} : vector<128x128xf32> to vector<8x64xf32>
    %c136_284 = arith.constant 136 : index
    %c0_285 = arith.constant 0 : index
    %241 = vector.load %arg11[%c136_284, %c0_285] : memref<560x64xf32, #tpu.memory_space<vmem>>, vector<8x64xf32>
    tpu.vector_store %arg11[%c136_284, %c0_285], %240 {strides = array<i32>} : memref<560x64xf32, #tpu.memory_space<vmem>>, vector<8x64xf32>,
    %242 = vector.extract_strided_slice %225 {offsets = [64, 0], sizes = [8, 64], strides = [1, 1]} : vector<128x128xf32> to vector<8x64xf32>
    %c152_286 = arith.constant 152 : index
    %c0_287 = arith.constant 0 : index
    %243 = vector.load %arg11[%c152_286, %c0_287] : memref<560x64xf32, #tpu.memory_space<vmem>>, vector<8x64xf32>
    tpu.vector_store %arg11[%c152_286, %c0_287], %242 {strides = array<i32>} : memref<560x64xf32, #tpu.memory_space<vmem>>, vector<8x64xf32>,
    %244 = vector.extract_strided_slice %225 {offsets = [64, 64], sizes = [8, 64], strides = [1, 1]} : vector<128x128xf32> to vector<8x64xf32>
    %c168_288 = arith.constant 168 : index
    %c0_289 = arith.constant 0 : index
    %245 = vector.load %arg11[%c168_288, %c0_289] : memref<560x64xf32, #tpu.memory_space<vmem>>, vector<8x64xf32>
    tpu.vector_store %arg11[%c168_288, %c0_289], %244 {strides = array<i32>} : memref<560x64xf32, #tpu.memory_space<vmem>>, vector<8x64xf32>,
    %246 = vector.extract_strided_slice %225 {offsets = [80, 0], sizes = [8, 64], strides = [1, 1]} : vector<128x128xf32> to vector<8x64xf32>
    %c184_290 = arith.constant 184 : index
    %c0_291 = arith.constant 0 : index
    %247 = vector.load %arg11[%c184_290, %c0_291] : memref<560x64xf32, #tpu.memory_space<vmem>>, vector<8x64xf32>
    tpu.vector_store %arg11[%c184_290, %c0_291], %246 {strides = array<i32>} : memref<560x64xf32, #tpu.memory_space<vmem>>, vector<8x64xf32>,
    %248 = vector.extract_strided_slice %225 {offsets = [80, 64], sizes = [8, 64], strides = [1, 1]} : vector<128x128xf32> to vector<8x64xf32>
    %c200_292 = arith.constant 200 : index
    %c0_293 = arith.constant 0 : index
    %249 = vector.load %arg11[%c200_292, %c0_293] : memref<560x64xf32, #tpu.memory_space<vmem>>, vector<8x64xf32>
    tpu.vector_store %arg11[%c200_292, %c0_293], %248 {strides = array<i32>} : memref<560x64xf32, #tpu.memory_space<vmem>>, vector<8x64xf32>,
    %250 = vector.extract_strided_slice %225 {offsets = [96, 0], sizes = [8, 64], strides = [1, 1]} : vector<128x128xf32> to vector<8x64xf32>
    %c216_294 = arith.constant 216 : index
    %c0_295 = arith.constant 0 : index
    %251 = vector.load %arg11[%c216_294, %c0_295] : memref<560x64xf32, #tpu.memory_space<vmem>>, vector<8x64xf32>
    tpu.vector_store %arg11[%c216_294, %c0_295], %250 {strides = array<i32>} : memref<560x64xf32, #tpu.memory_space<vmem>>, vector<8x64xf32>,
    %252 = vector.extract_strided_slice %225 {offsets = [96, 64], sizes = [8, 64], strides = [1, 1]} : vector<128x128xf32> to vector<8x64xf32>
    %c232_296 = arith.constant 232 : index
    %c0_297 = arith.constant 0 : index
    %253 = vector.load %arg11[%c232_296, %c0_297] : memref<560x64xf32, #tpu.memory_space<vmem>>, vector<8x64xf32>
    tpu.vector_store %arg11[%c232_296, %c0_297], %252 {strides = array<i32>} : memref<560x64xf32, #tpu.memory_space<vmem>>, vector<8x64xf32>,
    %254 = vector.extract_strided_slice %225 {offsets = [112, 0], sizes = [8, 64], strides = [1, 1]} : vector<128x128xf32> to vector<8x64xf32>
    %c248_298 = arith.constant 248 : index
    %c0_299 = arith.constant 0 : index
    %255 = vector.load %arg11[%c248_298, %c0_299] : memref<560x64xf32, #tpu.memory_space<vmem>>, vector<8x64xf32>
    tpu.vector_store %arg11[%c248_298, %c0_299], %254 {strides = array<i32>} : memref<560x64xf32, #tpu.memory_space<vmem>>, vector<8x64xf32>,
    %256 = vector.extract_strided_slice %225 {offsets = [112, 64], sizes = [8, 64], strides = [1, 1]} : vector<128x128xf32> to vector<8x64xf32>
    %c264_300 = arith.constant 264 : index
    %c0_301 = arith.constant 0 : index
    %257 = vector.load %arg11[%c264_300, %c0_301] : memref<560x64xf32, #tpu.memory_space<vmem>>, vector<8x64xf32>
    tpu.vector_store %arg11[%c264_300, %c0_301], %256 {strides = array<i32>} : memref<560x64xf32, #tpu.memory_space<vmem>>, vector<8x64xf32>,
    %c135 = arith.constant 135 : index
    %c0_302 = arith.constant 0 : index
    %258 = vector.load %arg10[%c135, %c0_302] : memref<304x64xf32, #tpu.memory_space<vmem>>, vector<128x64xf32>
    %c0_303 = arith.constant 0 : index
    %c0_304 = arith.constant 0 : index
    %c0_305 = arith.constant 0 : index
    %259 = vector.load %arg4[%c0_303, %c0_304, %c0_305] : memref<9x64x128xf32, #tpu.memory_space<vmem>>, vector<1x64x128xf32>
    %260 = vector.shape_cast %259 : vector<1x64x128xf32> to vector<64x128xf32>
    %cst_306 = arith.constant dense<0.000000e+00> : vector<128x128xf32>
    %261 = tpu.matmul %258, %260, %cst_306 {dimension_numbers = #tpu.dot_dimension_numbers<[1], [0], [0], [1], [0, 0, 1, 1], [], []>} : vector<128x64xf32>, vector<64x128xf32>, vector<128x128xf32> -> vector<128x128xf32>
    %262 = vector.broadcast %177 : vector<1x128xf32> to vector<128x128xf32>
    %263 = arith.addf %261, %262 : vector<128x128xf32>
    %c136_307 = arith.constant 136 : index
    %c0_308 = arith.constant 0 : index
    %264 = vector.load %arg10[%c136_307, %c0_308] : memref<304x64xf32, #tpu.memory_space<vmem>>, vector<128x64xf32>
    %c1_309 = arith.constant 1 : index
    %c0_310 = arith.constant 0 : index
    %c0_311 = arith.constant 0 : index
    %265 = vector.load %arg4[%c1_309, %c0_310, %c0_311] : memref<9x64x128xf32, #tpu.memory_space<vmem>>, vector<1x64x128xf32>
    %266 = vector.shape_cast %265 : vector<1x64x128xf32> to vector<64x128xf32>
    %cst_312 = arith.constant dense<0.000000e+00> : vector<128x128xf32>
    %267 = tpu.matmul %264, %266, %cst_312 {dimension_numbers = #tpu.dot_dimension_numbers<[1], [0], [0], [1], [0, 0, 1, 1], [], []>} : vector<128x64xf32>, vector<64x128xf32>, vector<128x128xf32> -> vector<128x128xf32>
    %268 = arith.addf %263, %267 : vector<128x128xf32>
    %c137 = arith.constant 137 : index
    %c0_313 = arith.constant 0 : index
    %269 = vector.load %arg10[%c137, %c0_313] : memref<304x64xf32, #tpu.memory_space<vmem>>, vector<128x64xf32>
    %c2_314 = arith.constant 2 : index
    %c0_315 = arith.constant 0 : index
    %c0_316 = arith.constant 0 : index
    %270 = vector.load %arg4[%c2_314, %c0_315, %c0_316] : memref<9x64x128xf32, #tpu.memory_space<vmem>>, vector<1x64x128xf32>
    %271 = vector.shape_cast %270 : vector<1x64x128xf32> to vector<64x128xf32>
    %cst_317 = arith.constant dense<0.000000e+00> : vector<128x128xf32>
    %272 = tpu.matmul %269, %271, %cst_317 {dimension_numbers = #tpu.dot_dimension_numbers<[1], [0], [0], [1], [0, 0, 1, 1], [], []>} : vector<128x64xf32>, vector<64x128xf32>, vector<128x128xf32> -> vector<128x128xf32>
    %273 = arith.addf %268, %272 : vector<128x128xf32>
    %c151 = arith.constant 151 : index
    %c0_318 = arith.constant 0 : index
    %274 = vector.load %arg10[%c151, %c0_318] : memref<304x64xf32, #tpu.memory_space<vmem>>, vector<128x64xf32>
    %c3_319 = arith.constant 3 : index
    %c0_320 = arith.constant 0 : index
    %c0_321 = arith.constant 0 : index
    %275 = vector.load %arg4[%c3_319, %c0_320, %c0_321] : memref<9x64x128xf32, #tpu.memory_space<vmem>>, vector<1x64x128xf32>
    %276 = vector.shape_cast %275 : vector<1x64x128xf32> to vector<64x128xf32>
    %cst_322 = arith.constant dense<0.000000e+00> : vector<128x128xf32>
    %277 = tpu.matmul %274, %276, %cst_322 {dimension_numbers = #tpu.dot_dimension_numbers<[1], [0], [0], [1], [0, 0, 1, 1], [], []>} : vector<128x64xf32>, vector<64x128xf32>, vector<128x128xf32> -> vector<128x128xf32>
    %278 = arith.addf %273, %277 : vector<128x128xf32>
    %c152_323 = arith.constant 152 : index
    %c0_324 = arith.constant 0 : index
    %279 = vector.load %arg10[%c152_323, %c0_324] : memref<304x64xf32, #tpu.memory_space<vmem>>, vector<128x64xf32>
    %c4_325 = arith.constant 4 : index
    %c0_326 = arith.constant 0 : index
    %c0_327 = arith.constant 0 : index
    %280 = vector.load %arg4[%c4_325, %c0_326, %c0_327] : memref<9x64x128xf32, #tpu.memory_space<vmem>>, vector<1x64x128xf32>
    %281 = vector.shape_cast %280 : vector<1x64x128xf32> to vector<64x128xf32>
    %cst_328 = arith.constant dense<0.000000e+00> : vector<128x128xf32>
    %282 = tpu.matmul %279, %281, %cst_328 {dimension_numbers = #tpu.dot_dimension_numbers<[1], [0], [0], [1], [0, 0, 1, 1], [], []>} : vector<128x64xf32>, vector<64x128xf32>, vector<128x128xf32> -> vector<128x128xf32>
    %283 = arith.addf %278, %282 : vector<128x128xf32>
    %c153 = arith.constant 153 : index
    %c0_329 = arith.constant 0 : index
    %284 = vector.load %arg10[%c153, %c0_329] : memref<304x64xf32, #tpu.memory_space<vmem>>, vector<128x64xf32>
    %c5_330 = arith.constant 5 : index
    %c0_331 = arith.constant 0 : index
    %c0_332 = arith.constant 0 : index
    %285 = vector.load %arg4[%c5_330, %c0_331, %c0_332] : memref<9x64x128xf32, #tpu.memory_space<vmem>>, vector<1x64x128xf32>
    %286 = vector.shape_cast %285 : vector<1x64x128xf32> to vector<64x128xf32>
    %cst_333 = arith.constant dense<0.000000e+00> : vector<128x128xf32>
    %287 = tpu.matmul %284, %286, %cst_333 {dimension_numbers = #tpu.dot_dimension_numbers<[1], [0], [0], [1], [0, 0, 1, 1], [], []>} : vector<128x64xf32>, vector<64x128xf32>, vector<128x128xf32> -> vector<128x128xf32>
    %288 = arith.addf %283, %287 : vector<128x128xf32>
    %c167 = arith.constant 167 : index
    %c0_334 = arith.constant 0 : index
    %289 = vector.load %arg10[%c167, %c0_334] : memref<304x64xf32, #tpu.memory_space<vmem>>, vector<128x64xf32>
    %c6_335 = arith.constant 6 : index
    %c0_336 = arith.constant 0 : index
    %c0_337 = arith.constant 0 : index
    %290 = vector.load %arg4[%c6_335, %c0_336, %c0_337] : memref<9x64x128xf32, #tpu.memory_space<vmem>>, vector<1x64x128xf32>
    %291 = vector.shape_cast %290 : vector<1x64x128xf32> to vector<64x128xf32>
    %cst_338 = arith.constant dense<0.000000e+00> : vector<128x128xf32>
    %292 = tpu.matmul %289, %291, %cst_338 {dimension_numbers = #tpu.dot_dimension_numbers<[1], [0], [0], [1], [0, 0, 1, 1], [], []>} : vector<128x64xf32>, vector<64x128xf32>, vector<128x128xf32> -> vector<128x128xf32>
    %293 = arith.addf %288, %292 : vector<128x128xf32>
    %c168_339 = arith.constant 168 : index
    %c0_340 = arith.constant 0 : index
    %294 = vector.load %arg10[%c168_339, %c0_340] : memref<304x64xf32, #tpu.memory_space<vmem>>, vector<128x64xf32>
    %c7_341 = arith.constant 7 : index
    %c0_342 = arith.constant 0 : index
    %c0_343 = arith.constant 0 : index
    %295 = vector.load %arg4[%c7_341, %c0_342, %c0_343] : memref<9x64x128xf32, #tpu.memory_space<vmem>>, vector<1x64x128xf32>
    %296 = vector.shape_cast %295 : vector<1x64x128xf32> to vector<64x128xf32>
    %cst_344 = arith.constant dense<0.000000e+00> : vector<128x128xf32>
    %297 = tpu.matmul %294, %296, %cst_344 {dimension_numbers = #tpu.dot_dimension_numbers<[1], [0], [0], [1], [0, 0, 1, 1], [], []>} : vector<128x64xf32>, vector<64x128xf32>, vector<128x128xf32> -> vector<128x128xf32>
    %298 = arith.addf %293, %297 : vector<128x128xf32>
    %c169 = arith.constant 169 : index
    %c0_345 = arith.constant 0 : index
    %299 = vector.load %arg10[%c169, %c0_345] : memref<304x64xf32, #tpu.memory_space<vmem>>, vector<128x64xf32>
    %c8_346 = arith.constant 8 : index
    %c0_347 = arith.constant 0 : index
    %c0_348 = arith.constant 0 : index
    %300 = vector.load %arg4[%c8_346, %c0_347, %c0_348] : memref<9x64x128xf32, #tpu.memory_space<vmem>>, vector<1x64x128xf32>
    %301 = vector.shape_cast %300 : vector<1x64x128xf32> to vector<64x128xf32>
    %cst_349 = arith.constant dense<0.000000e+00> : vector<128x128xf32>
    %302 = tpu.matmul %299, %301, %cst_349 {dimension_numbers = #tpu.dot_dimension_numbers<[1], [0], [0], [1], [0, 0, 1, 1], [], []>} : vector<128x64xf32>, vector<64x128xf32>, vector<128x128xf32> -> vector<128x128xf32>
    %303 = arith.addf %298, %302 : vector<128x128xf32>
    %cst_350 = arith.constant 0.000000e+00 : f32
    %304 = vector.broadcast %cst_350 : f32 to vector<128x128xf32>
    %305 = arith.maximumf %303, %304 : vector<128x128xf32>
    %306 = vector.extract_strided_slice %305 {offsets = [0, 0], sizes = [8, 64], strides = [1, 1]} : vector<128x128xf32> to vector<8x64xf32>
    %c280_351 = arith.constant 280 : index
    %c0_352 = arith.constant 0 : index
    %307 = vector.load %arg11[%c280_351, %c0_352] : memref<560x64xf32, #tpu.memory_space<vmem>>, vector<8x64xf32>
    tpu.vector_store %arg11[%c280_351, %c0_352], %306 {strides = array<i32>} : memref<560x64xf32, #tpu.memory_space<vmem>>, vector<8x64xf32>,
    %308 = vector.extract_strided_slice %305 {offsets = [0, 64], sizes = [8, 64], strides = [1, 1]} : vector<128x128xf32> to vector<8x64xf32>
    %c296 = arith.constant 296 : index
    %c0_353 = arith.constant 0 : index
    %309 = vector.load %arg11[%c296, %c0_353] : memref<560x64xf32, #tpu.memory_space<vmem>>, vector<8x64xf32>
    tpu.vector_store %arg11[%c296, %c0_353], %308 {strides = array<i32>} : memref<560x64xf32, #tpu.memory_space<vmem>>, vector<8x64xf32>,
    %310 = vector.extract_strided_slice %305 {offsets = [16, 0], sizes = [8, 64], strides = [1, 1]} : vector<128x128xf32> to vector<8x64xf32>
    %c312 = arith.constant 312 : index
    %c0_354 = arith.constant 0 : index
    %311 = vector.load %arg11[%c312, %c0_354] : memref<560x64xf32, #tpu.memory_space<vmem>>, vector<8x64xf32>
    tpu.vector_store %arg11[%c312, %c0_354], %310 {strides = array<i32>} : memref<560x64xf32, #tpu.memory_space<vmem>>, vector<8x64xf32>,
    %312 = vector.extract_strided_slice %305 {offsets = [16, 64], sizes = [8, 64], strides = [1, 1]} : vector<128x128xf32> to vector<8x64xf32>
    %c328 = arith.constant 328 : index
    %c0_355 = arith.constant 0 : index
    %313 = vector.load %arg11[%c328, %c0_355] : memref<560x64xf32, #tpu.memory_space<vmem>>, vector<8x64xf32>
    tpu.vector_store %arg11[%c328, %c0_355], %312 {strides = array<i32>} : memref<560x64xf32, #tpu.memory_space<vmem>>, vector<8x64xf32>,
    %314 = vector.extract_strided_slice %305 {offsets = [32, 0], sizes = [8, 64], strides = [1, 1]} : vector<128x128xf32> to vector<8x64xf32>
    %c344 = arith.constant 344 : index
    %c0_356 = arith.constant 0 : index
    %315 = vector.load %arg11[%c344, %c0_356] : memref<560x64xf32, #tpu.memory_space<vmem>>, vector<8x64xf32>
    tpu.vector_store %arg11[%c344, %c0_356], %314 {strides = array<i32>} : memref<560x64xf32, #tpu.memory_space<vmem>>, vector<8x64xf32>,
    %316 = vector.extract_strided_slice %305 {offsets = [32, 64], sizes = [8, 64], strides = [1, 1]} : vector<128x128xf32> to vector<8x64xf32>
    %c360 = arith.constant 360 : index
    %c0_357 = arith.constant 0 : index
    %317 = vector.load %arg11[%c360, %c0_357] : memref<560x64xf32, #tpu.memory_space<vmem>>, vector<8x64xf32>
    tpu.vector_store %arg11[%c360, %c0_357], %316 {strides = array<i32>} : memref<560x64xf32, #tpu.memory_space<vmem>>, vector<8x64xf32>,
    %318 = vector.extract_strided_slice %305 {offsets = [48, 0], sizes = [8, 64], strides = [1, 1]} : vector<128x128xf32> to vector<8x64xf32>
    %c376 = arith.constant 376 : index
    %c0_358 = arith.constant 0 : index
    %319 = vector.load %arg11[%c376, %c0_358] : memref<560x64xf32, #tpu.memory_space<vmem>>, vector<8x64xf32>
    tpu.vector_store %arg11[%c376, %c0_358], %318 {strides = array<i32>} : memref<560x64xf32, #tpu.memory_space<vmem>>, vector<8x64xf32>,
    %320 = vector.extract_strided_slice %305 {offsets = [48, 64], sizes = [8, 64], strides = [1, 1]} : vector<128x128xf32> to vector<8x64xf32>
    %c392 = arith.constant 392 : index
    %c0_359 = arith.constant 0 : index
    %321 = vector.load %arg11[%c392, %c0_359] : memref<560x64xf32, #tpu.memory_space<vmem>>, vector<8x64xf32>
    tpu.vector_store %arg11[%c392, %c0_359], %320 {strides = array<i32>} : memref<560x64xf32, #tpu.memory_space<vmem>>, vector<8x64xf32>,
    %322 = vector.extract_strided_slice %305 {offsets = [64, 0], sizes = [8, 64], strides = [1, 1]} : vector<128x128xf32> to vector<8x64xf32>
    %c408 = arith.constant 408 : index
    %c0_360 = arith.constant 0 : index
    %323 = vector.load %arg11[%c408, %c0_360] : memref<560x64xf32, #tpu.memory_space<vmem>>, vector<8x64xf32>
    tpu.vector_store %arg11[%c408, %c0_360], %322 {strides = array<i32>} : memref<560x64xf32, #tpu.memory_space<vmem>>, vector<8x64xf32>,
    %324 = vector.extract_strided_slice %305 {offsets = [64, 64], sizes = [8, 64], strides = [1, 1]} : vector<128x128xf32> to vector<8x64xf32>
    %c424 = arith.constant 424 : index
    %c0_361 = arith.constant 0 : index
    %325 = vector.load %arg11[%c424, %c0_361] : memref<560x64xf32, #tpu.memory_space<vmem>>, vector<8x64xf32>
    tpu.vector_store %arg11[%c424, %c0_361], %324 {strides = array<i32>} : memref<560x64xf32, #tpu.memory_space<vmem>>, vector<8x64xf32>,
    %326 = vector.extract_strided_slice %305 {offsets = [80, 0], sizes = [8, 64], strides = [1, 1]} : vector<128x128xf32> to vector<8x64xf32>
    %c440 = arith.constant 440 : index
    %c0_362 = arith.constant 0 : index
    %327 = vector.load %arg11[%c440, %c0_362] : memref<560x64xf32, #tpu.memory_space<vmem>>, vector<8x64xf32>
    tpu.vector_store %arg11[%c440, %c0_362], %326 {strides = array<i32>} : memref<560x64xf32, #tpu.memory_space<vmem>>, vector<8x64xf32>,
    %328 = vector.extract_strided_slice %305 {offsets = [80, 64], sizes = [8, 64], strides = [1, 1]} : vector<128x128xf32> to vector<8x64xf32>
    %c456 = arith.constant 456 : index
    %c0_363 = arith.constant 0 : index
    %329 = vector.load %arg11[%c456, %c0_363] : memref<560x64xf32, #tpu.memory_space<vmem>>, vector<8x64xf32>
    tpu.vector_store %arg11[%c456, %c0_363], %328 {strides = array<i32>} : memref<560x64xf32, #tpu.memory_space<vmem>>, vector<8x64xf32>,
    %330 = vector.extract_strided_slice %305 {offsets = [96, 0], sizes = [8, 64], strides = [1, 1]} : vector<128x128xf32> to vector<8x64xf32>
    %c472 = arith.constant 472 : index
    %c0_364 = arith.constant 0 : index
    %331 = vector.load %arg11[%c472, %c0_364] : memref<560x64xf32, #tpu.memory_space<vmem>>, vector<8x64xf32>
    tpu.vector_store %arg11[%c472, %c0_364], %330 {strides = array<i32>} : memref<560x64xf32, #tpu.memory_space<vmem>>, vector<8x64xf32>,
    %332 = vector.extract_strided_slice %305 {offsets = [96, 64], sizes = [8, 64], strides = [1, 1]} : vector<128x128xf32> to vector<8x64xf32>
    %c488 = arith.constant 488 : index
    %c0_365 = arith.constant 0 : index
    %333 = vector.load %arg11[%c488, %c0_365] : memref<560x64xf32, #tpu.memory_space<vmem>>, vector<8x64xf32>
    tpu.vector_store %arg11[%c488, %c0_365], %332 {strides = array<i32>} : memref<560x64xf32, #tpu.memory_space<vmem>>, vector<8x64xf32>,
    %334 = vector.extract_strided_slice %305 {offsets = [112, 0], sizes = [8, 64], strides = [1, 1]} : vector<128x128xf32> to vector<8x64xf32>
    %c504 = arith.constant 504 : index
    %c0_366 = arith.constant 0 : index
    %335 = vector.load %arg11[%c504, %c0_366] : memref<560x64xf32, #tpu.memory_space<vmem>>, vector<8x64xf32>
    tpu.vector_store %arg11[%c504, %c0_366], %334 {strides = array<i32>} : memref<560x64xf32, #tpu.memory_space<vmem>>, vector<8x64xf32>,
    %336 = vector.extract_strided_slice %305 {offsets = [112, 64], sizes = [8, 64], strides = [1, 1]} : vector<128x128xf32> to vector<8x64xf32>
    %c520 = arith.constant 520 : index
    %c0_367 = arith.constant 0 : index
    %337 = vector.load %arg11[%c520, %c0_367] : memref<560x64xf32, #tpu.memory_space<vmem>>, vector<8x64xf32>
    tpu.vector_store %arg11[%c520, %c0_367], %336 {strides = array<i32>} : memref<560x64xf32, #tpu.memory_space<vmem>>, vector<8x64xf32>,
    %c0_368 = arith.constant 0 : index
    %c0_369 = arith.constant 0 : index
    %338 = vector.load %arg7[%c0_368, %c0_369] : memref<1x16xf32, #tpu.memory_space<vmem>>, vector<1x16xf32>
    %c7_370 = arith.constant 7 : index
    %c0_371 = arith.constant 0 : index
    %339 = vector.load %arg11[%c7_370, %c0_371] : memref<560x64xf32, #tpu.memory_space<vmem>>, vector<128x64xf32>
    %c0_372 = arith.constant 0 : index
    %c0_373 = arith.constant 0 : index
    %c0_374 = arith.constant 0 : index
    %340 = vector.load %arg6[%c0_372, %c0_373, %c0_374] : memref<9x64x16xf32, #tpu.memory_space<vmem>>, vector<1x64x16xf32>
    %341 = vector.shape_cast %340 : vector<1x64x16xf32> to vector<64x16xf32>
    %cst_375 = arith.constant dense<0.000000e+00> : vector<128x16xf32>
    %342 = tpu.matmul %339, %341, %cst_375 {dimension_numbers = #tpu.dot_dimension_numbers<[1], [0], [0], [1], [0, 0, 1, 1], [], []>} : vector<128x64xf32>, vector<64x16xf32>, vector<128x16xf32> -> vector<128x16xf32>
    %343 = vector.broadcast %338 : vector<1x16xf32> to vector<128x16xf32>
    %344 = arith.addf %342, %343 : vector<128x16xf32>
    %c8_376 = arith.constant 8 : index
    %c0_377 = arith.constant 0 : index
    %345 = vector.load %arg11[%c8_376, %c0_377] : memref<560x64xf32, #tpu.memory_space<vmem>>, vector<128x64xf32>
    %c1_378 = arith.constant 1 : index
    %c0_379 = arith.constant 0 : index
    %c0_380 = arith.constant 0 : index
    %346 = vector.load %arg6[%c1_378, %c0_379, %c0_380] : memref<9x64x16xf32, #tpu.memory_space<vmem>>, vector<1x64x16xf32>
    %347 = vector.shape_cast %346 : vector<1x64x16xf32> to vector<64x16xf32>
    %cst_381 = arith.constant dense<0.000000e+00> : vector<128x16xf32>
    %348 = tpu.matmul %345, %347, %cst_381 {dimension_numbers = #tpu.dot_dimension_numbers<[1], [0], [0], [1], [0, 0, 1, 1], [], []>} : vector<128x64xf32>, vector<64x16xf32>, vector<128x16xf32> -> vector<128x16xf32>
    %349 = arith.addf %344, %348 : vector<128x16xf32>
    %c9_382 = arith.constant 9 : index
    %c0_383 = arith.constant 0 : index
    %350 = vector.load %arg11[%c9_382, %c0_383] : memref<560x64xf32, #tpu.memory_space<vmem>>, vector<128x64xf32>
    %c2_384 = arith.constant 2 : index
    %c0_385 = arith.constant 0 : index
    %c0_386 = arith.constant 0 : index
    %351 = vector.load %arg6[%c2_384, %c0_385, %c0_386] : memref<9x64x16xf32, #tpu.memory_space<vmem>>, vector<1x64x16xf32>
    %352 = vector.shape_cast %351 : vector<1x64x16xf32> to vector<64x16xf32>
    %cst_387 = arith.constant dense<0.000000e+00> : vector<128x16xf32>
    %353 = tpu.matmul %350, %352, %cst_387 {dimension_numbers = #tpu.dot_dimension_numbers<[1], [0], [0], [1], [0, 0, 1, 1], [], []>} : vector<128x64xf32>, vector<64x16xf32>, vector<128x16xf32> -> vector<128x16xf32>
    %354 = arith.addf %349, %353 : vector<128x16xf32>
    %c23_388 = arith.constant 23 : index
    %c0_389 = arith.constant 0 : index
    %355 = vector.load %arg11[%c23_388, %c0_389] : memref<560x64xf32, #tpu.memory_space<vmem>>, vector<128x64xf32>
    %c3_390 = arith.constant 3 : index
    %c0_391 = arith.constant 0 : index
    %c0_392 = arith.constant 0 : index
    %356 = vector.load %arg6[%c3_390, %c0_391, %c0_392] : memref<9x64x16xf32, #tpu.memory_space<vmem>>, vector<1x64x16xf32>
    %357 = vector.shape_cast %356 : vector<1x64x16xf32> to vector<64x16xf32>
    %cst_393 = arith.constant dense<0.000000e+00> : vector<128x16xf32>
    %358 = tpu.matmul %355, %357, %cst_393 {dimension_numbers = #tpu.dot_dimension_numbers<[1], [0], [0], [1], [0, 0, 1, 1], [], []>} : vector<128x64xf32>, vector<64x16xf32>, vector<128x16xf32> -> vector<128x16xf32>
    %359 = arith.addf %354, %358 : vector<128x16xf32>
    %c24_394 = arith.constant 24 : index
    %c0_395 = arith.constant 0 : index
    %360 = vector.load %arg11[%c24_394, %c0_395] : memref<560x64xf32, #tpu.memory_space<vmem>>, vector<128x64xf32>
    %c4_396 = arith.constant 4 : index
    %c0_397 = arith.constant 0 : index
    %c0_398 = arith.constant 0 : index
    %361 = vector.load %arg6[%c4_396, %c0_397, %c0_398] : memref<9x64x16xf32, #tpu.memory_space<vmem>>, vector<1x64x16xf32>
    %362 = vector.shape_cast %361 : vector<1x64x16xf32> to vector<64x16xf32>
    %cst_399 = arith.constant dense<0.000000e+00> : vector<128x16xf32>
    %363 = tpu.matmul %360, %362, %cst_399 {dimension_numbers = #tpu.dot_dimension_numbers<[1], [0], [0], [1], [0, 0, 1, 1], [], []>} : vector<128x64xf32>, vector<64x16xf32>, vector<128x16xf32> -> vector<128x16xf32>
    %364 = arith.addf %359, %363 : vector<128x16xf32>
    %c25_400 = arith.constant 25 : index
    %c0_401 = arith.constant 0 : index
    %365 = vector.load %arg11[%c25_400, %c0_401] : memref<560x64xf32, #tpu.memory_space<vmem>>, vector<128x64xf32>
    %c5_402 = arith.constant 5 : index
    %c0_403 = arith.constant 0 : index
    %c0_404 = arith.constant 0 : index
    %366 = vector.load %arg6[%c5_402, %c0_403, %c0_404] : memref<9x64x16xf32, #tpu.memory_space<vmem>>, vector<1x64x16xf32>
    %367 = vector.shape_cast %366 : vector<1x64x16xf32> to vector<64x16xf32>
    %cst_405 = arith.constant dense<0.000000e+00> : vector<128x16xf32>
    %368 = tpu.matmul %365, %367, %cst_405 {dimension_numbers = #tpu.dot_dimension_numbers<[1], [0], [0], [1], [0, 0, 1, 1], [], []>} : vector<128x64xf32>, vector<64x16xf32>, vector<128x16xf32> -> vector<128x16xf32>
    %369 = arith.addf %364, %368 : vector<128x16xf32>
    %c39_406 = arith.constant 39 : index
    %c0_407 = arith.constant 0 : index
    %370 = vector.load %arg11[%c39_406, %c0_407] : memref<560x64xf32, #tpu.memory_space<vmem>>, vector<128x64xf32>
    %c6_408 = arith.constant 6 : index
    %c0_409 = arith.constant 0 : index
    %c0_410 = arith.constant 0 : index
    %371 = vector.load %arg6[%c6_408, %c0_409, %c0_410] : memref<9x64x16xf32, #tpu.memory_space<vmem>>, vector<1x64x16xf32>
    %372 = vector.shape_cast %371 : vector<1x64x16xf32> to vector<64x16xf32>
    %cst_411 = arith.constant dense<0.000000e+00> : vector<128x16xf32>
    %373 = tpu.matmul %370, %372, %cst_411 {dimension_numbers = #tpu.dot_dimension_numbers<[1], [0], [0], [1], [0, 0, 1, 1], [], []>} : vector<128x64xf32>, vector<64x16xf32>, vector<128x16xf32> -> vector<128x16xf32>
    %374 = arith.addf %369, %373 : vector<128x16xf32>
    %c40_412 = arith.constant 40 : index
    %c0_413 = arith.constant 0 : index
    %375 = vector.load %arg11[%c40_412, %c0_413] : memref<560x64xf32, #tpu.memory_space<vmem>>, vector<128x64xf32>
    %c7_414 = arith.constant 7 : index
    %c0_415 = arith.constant 0 : index
    %c0_416 = arith.constant 0 : index
    %376 = vector.load %arg6[%c7_414, %c0_415, %c0_416] : memref<9x64x16xf32, #tpu.memory_space<vmem>>, vector<1x64x16xf32>
    %377 = vector.shape_cast %376 : vector<1x64x16xf32> to vector<64x16xf32>
    %cst_417 = arith.constant dense<0.000000e+00> : vector<128x16xf32>
    %378 = tpu.matmul %375, %377, %cst_417 {dimension_numbers = #tpu.dot_dimension_numbers<[1], [0], [0], [1], [0, 0, 1, 1], [], []>} : vector<128x64xf32>, vector<64x16xf32>, vector<128x16xf32> -> vector<128x16xf32>
    %379 = arith.addf %374, %378 : vector<128x16xf32>
    %c41_418 = arith.constant 41 : index
    %c0_419 = arith.constant 0 : index
    %380 = vector.load %arg11[%c41_418, %c0_419] : memref<560x64xf32, #tpu.memory_space<vmem>>, vector<128x64xf32>
    %c8_420 = arith.constant 8 : index
    %c0_421 = arith.constant 0 : index
    %c0_422 = arith.constant 0 : index
    %381 = vector.load %arg6[%c8_420, %c0_421, %c0_422] : memref<9x64x16xf32, #tpu.memory_space<vmem>>, vector<1x64x16xf32>
    %382 = vector.shape_cast %381 : vector<1x64x16xf32> to vector<64x16xf32>
    %cst_423 = arith.constant dense<0.000000e+00> : vector<128x16xf32>
    %383 = tpu.matmul %380, %382, %cst_423 {dimension_numbers = #tpu.dot_dimension_numbers<[1], [0], [0], [1], [0, 0, 1, 1], [], []>} : vector<128x64xf32>, vector<64x16xf32>, vector<128x16xf32> -> vector<128x16xf32>
    %384 = arith.addf %379, %383 : vector<128x16xf32>
    %385 = arith.negf %384 : vector<128x16xf32>
    %386 = math.exp %385 : vector<128x16xf32>
    %cst_424 = arith.constant 1.000000e+00 : f32
    %387 = vector.broadcast %cst_424 : f32 to vector<128x16xf32>
    %388 = arith.addf %387, %386 : vector<128x16xf32>
    %389 = arith.divf %387, %388 : vector<128x16xf32>
    %390 = vector.extract_strided_slice %389 {offsets = [0, 0], sizes = [8, 16], strides = [1, 1]} : vector<128x16xf32> to vector<8x16xf32>
    %c0_425 = arith.constant 0 : index
    %c0_426 = arith.constant 0 : index
    %c0_427 = arith.constant 0 : index
    %c0_428 = arith.constant 0 : index
    %391 = vector.load %arg8[%c0_425, %c0_426, %c0_427, %c0_428] : memref<1x32x8x16xf32, #tpu.memory_space<vmem>>, vector<1x1x8x16xf32>
    %392 = vector.shape_cast %391 : vector<1x1x8x16xf32> to vector<8x16xf32>
    %393 = vector.shape_cast %390 : vector<8x16xf32> to vector<1x1x8x16xf32>
    tpu.vector_store %arg8[%c0_425, %c0_426, %c0_427, %c0_428], %393 {strides = array<i32>} : memref<1x32x8x16xf32, #tpu.memory_space<vmem>>, vector<1x1x8x16xf32>,
    %394 = vector.extract_strided_slice %389 {offsets = [16, 0], sizes = [8, 16], strides = [1, 1]} : vector<128x16xf32> to vector<8x16xf32>
    %c0_429 = arith.constant 0 : index
    %c1_430 = arith.constant 1 : index
    %c0_431 = arith.constant 0 : index
    %c0_432 = arith.constant 0 : index
    %395 = vector.load %arg8[%c0_429, %c1_430, %c0_431, %c0_432] : memref<1x32x8x16xf32, #tpu.memory_space<vmem>>, vector<1x1x8x16xf32>
    %396 = vector.shape_cast %395 : vector<1x1x8x16xf32> to vector<8x16xf32>
    %397 = vector.shape_cast %394 : vector<8x16xf32> to vector<1x1x8x16xf32>
    tpu.vector_store %arg8[%c0_429, %c1_430, %c0_431, %c0_432], %397 {strides = array<i32>} : memref<1x32x8x16xf32, #tpu.memory_space<vmem>>, vector<1x1x8x16xf32>,
    %398 = vector.extract_strided_slice %389 {offsets = [32, 0], sizes = [8, 16], strides = [1, 1]} : vector<128x16xf32> to vector<8x16xf32>
    %c0_433 = arith.constant 0 : index
    %c2_434 = arith.constant 2 : index
    %c0_435 = arith.constant 0 : index
    %c0_436 = arith.constant 0 : index
    %399 = vector.load %arg8[%c0_433, %c2_434, %c0_435, %c0_436] : memref<1x32x8x16xf32, #tpu.memory_space<vmem>>, vector<1x1x8x16xf32>
    %400 = vector.shape_cast %399 : vector<1x1x8x16xf32> to vector<8x16xf32>
    %401 = vector.shape_cast %398 : vector<8x16xf32> to vector<1x1x8x16xf32>
    tpu.vector_store %arg8[%c0_433, %c2_434, %c0_435, %c0_436], %401 {strides = array<i32>} : memref<1x32x8x16xf32, #tpu.memory_space<vmem>>, vector<1x1x8x16xf32>,
    %402 = vector.extract_strided_slice %389 {offsets = [48, 0], sizes = [8, 16], strides = [1, 1]} : vector<128x16xf32> to vector<8x16xf32>
    %c0_437 = arith.constant 0 : index
    %c3_438 = arith.constant 3 : index
    %c0_439 = arith.constant 0 : index
    %c0_440 = arith.constant 0 : index
    %403 = vector.load %arg8[%c0_437, %c3_438, %c0_439, %c0_440] : memref<1x32x8x16xf32, #tpu.memory_space<vmem>>, vector<1x1x8x16xf32>
    %404 = vector.shape_cast %403 : vector<1x1x8x16xf32> to vector<8x16xf32>
    %405 = vector.shape_cast %402 : vector<8x16xf32> to vector<1x1x8x16xf32>
    tpu.vector_store %arg8[%c0_437, %c3_438, %c0_439, %c0_440], %405 {strides = array<i32>} : memref<1x32x8x16xf32, #tpu.memory_space<vmem>>, vector<1x1x8x16xf32>,
    %406 = vector.extract_strided_slice %389 {offsets = [64, 0], sizes = [8, 16], strides = [1, 1]} : vector<128x16xf32> to vector<8x16xf32>
    %c0_441 = arith.constant 0 : index
    %c4_442 = arith.constant 4 : index
    %c0_443 = arith.constant 0 : index
    %c0_444 = arith.constant 0 : index
    %407 = vector.load %arg8[%c0_441, %c4_442, %c0_443, %c0_444] : memref<1x32x8x16xf32, #tpu.memory_space<vmem>>, vector<1x1x8x16xf32>
    %408 = vector.shape_cast %407 : vector<1x1x8x16xf32> to vector<8x16xf32>
    %409 = vector.shape_cast %406 : vector<8x16xf32> to vector<1x1x8x16xf32>
    tpu.vector_store %arg8[%c0_441, %c4_442, %c0_443, %c0_444], %409 {strides = array<i32>} : memref<1x32x8x16xf32, #tpu.memory_space<vmem>>, vector<1x1x8x16xf32>,
    %410 = vector.extract_strided_slice %389 {offsets = [80, 0], sizes = [8, 16], strides = [1, 1]} : vector<128x16xf32> to vector<8x16xf32>
    %c0_445 = arith.constant 0 : index
    %c5_446 = arith.constant 5 : index
    %c0_447 = arith.constant 0 : index
    %c0_448 = arith.constant 0 : index
    %411 = vector.load %arg8[%c0_445, %c5_446, %c0_447, %c0_448] : memref<1x32x8x16xf32, #tpu.memory_space<vmem>>, vector<1x1x8x16xf32>
    %412 = vector.shape_cast %411 : vector<1x1x8x16xf32> to vector<8x16xf32>
    %413 = vector.shape_cast %410 : vector<8x16xf32> to vector<1x1x8x16xf32>
    tpu.vector_store %arg8[%c0_445, %c5_446, %c0_447, %c0_448], %413 {strides = array<i32>} : memref<1x32x8x16xf32, #tpu.memory_space<vmem>>, vector<1x1x8x16xf32>,
    %414 = vector.extract_strided_slice %389 {offsets = [96, 0], sizes = [8, 16], strides = [1, 1]} : vector<128x16xf32> to vector<8x16xf32>
    %c0_449 = arith.constant 0 : index
    %c6_450 = arith.constant 6 : index
    %c0_451 = arith.constant 0 : index
    %c0_452 = arith.constant 0 : index
    %415 = vector.load %arg8[%c0_449, %c6_450, %c0_451, %c0_452] : memref<1x32x8x16xf32, #tpu.memory_space<vmem>>, vector<1x1x8x16xf32>
    %416 = vector.shape_cast %415 : vector<1x1x8x16xf32> to vector<8x16xf32>
    %417 = vector.shape_cast %414 : vector<8x16xf32> to vector<1x1x8x16xf32>
    tpu.vector_store %arg8[%c0_449, %c6_450, %c0_451, %c0_452], %417 {strides = array<i32>} : memref<1x32x8x16xf32, #tpu.memory_space<vmem>>, vector<1x1x8x16xf32>,
    %418 = vector.extract_strided_slice %389 {offsets = [112, 0], sizes = [8, 16], strides = [1, 1]} : vector<128x16xf32> to vector<8x16xf32>
    %c0_453 = arith.constant 0 : index
    %c7_454 = arith.constant 7 : index
    %c0_455 = arith.constant 0 : index
    %c0_456 = arith.constant 0 : index
    %419 = vector.load %arg8[%c0_453, %c7_454, %c0_455, %c0_456] : memref<1x32x8x16xf32, #tpu.memory_space<vmem>>, vector<1x1x8x16xf32>
    %420 = vector.shape_cast %419 : vector<1x1x8x16xf32> to vector<8x16xf32>
    %421 = vector.shape_cast %418 : vector<8x16xf32> to vector<1x1x8x16xf32>
    tpu.vector_store %arg8[%c0_453, %c7_454, %c0_455, %c0_456], %421 {strides = array<i32>} : memref<1x32x8x16xf32, #tpu.memory_space<vmem>>, vector<1x1x8x16xf32>,
    %c135_457 = arith.constant 135 : index
    %c0_458 = arith.constant 0 : index
    %422 = vector.load %arg11[%c135_457, %c0_458] : memref<560x64xf32, #tpu.memory_space<vmem>>, vector<128x64xf32>
    %c0_459 = arith.constant 0 : index
    %c0_460 = arith.constant 0 : index
    %c0_461 = arith.constant 0 : index
    %423 = vector.load %arg6[%c0_459, %c0_460, %c0_461] : memref<9x64x16xf32, #tpu.memory_space<vmem>>, vector<1x64x16xf32>
    %424 = vector.shape_cast %423 : vector<1x64x16xf32> to vector<64x16xf32>
    %cst_462 = arith.constant dense<0.000000e+00> : vector<128x16xf32>
    %425 = tpu.matmul %422, %424, %cst_462 {dimension_numbers = #tpu.dot_dimension_numbers<[1], [0], [0], [1], [0, 0, 1, 1], [], []>} : vector<128x64xf32>, vector<64x16xf32>, vector<128x16xf32> -> vector<128x16xf32>
    %426 = vector.broadcast %338 : vector<1x16xf32> to vector<128x16xf32>
    %427 = arith.addf %425, %426 : vector<128x16xf32>
    %c136_463 = arith.constant 136 : index
    %c0_464 = arith.constant 0 : index
    %428 = vector.load %arg11[%c136_463, %c0_464] : memref<560x64xf32, #tpu.memory_space<vmem>>, vector<128x64xf32>
    %c1_465 = arith.constant 1 : index
    %c0_466 = arith.constant 0 : index
    %c0_467 = arith.constant 0 : index
    %429 = vector.load %arg6[%c1_465, %c0_466, %c0_467] : memref<9x64x16xf32, #tpu.memory_space<vmem>>, vector<1x64x16xf32>
    %430 = vector.shape_cast %429 : vector<1x64x16xf32> to vector<64x16xf32>
    %cst_468 = arith.constant dense<0.000000e+00> : vector<128x16xf32>
    %431 = tpu.matmul %428, %430, %cst_468 {dimension_numbers = #tpu.dot_dimension_numbers<[1], [0], [0], [1], [0, 0, 1, 1], [], []>} : vector<128x64xf32>, vector<64x16xf32>, vector<128x16xf32> -> vector<128x16xf32>
    %432 = arith.addf %427, %431 : vector<128x16xf32>
    %c137_469 = arith.constant 137 : index
    %c0_470 = arith.constant 0 : index
    %433 = vector.load %arg11[%c137_469, %c0_470] : memref<560x64xf32, #tpu.memory_space<vmem>>, vector<128x64xf32>
    %c2_471 = arith.constant 2 : index
    %c0_472 = arith.constant 0 : index
    %c0_473 = arith.constant 0 : index
    %434 = vector.load %arg6[%c2_471, %c0_472, %c0_473] : memref<9x64x16xf32, #tpu.memory_space<vmem>>, vector<1x64x16xf32>
    %435 = vector.shape_cast %434 : vector<1x64x16xf32> to vector<64x16xf32>
    %cst_474 = arith.constant dense<0.000000e+00> : vector<128x16xf32>
    %436 = tpu.matmul %433, %435, %cst_474 {dimension_numbers = #tpu.dot_dimension_numbers<[1], [0], [0], [1], [0, 0, 1, 1], [], []>} : vector<128x64xf32>, vector<64x16xf32>, vector<128x16xf32> -> vector<128x16xf32>
    %437 = arith.addf %432, %436 : vector<128x16xf32>
    %c151_475 = arith.constant 151 : index
    %c0_476 = arith.constant 0 : index
    %438 = vector.load %arg11[%c151_475, %c0_476] : memref<560x64xf32, #tpu.memory_space<vmem>>, vector<128x64xf32>
    %c3_477 = arith.constant 3 : index
    %c0_478 = arith.constant 0 : index
    %c0_479 = arith.constant 0 : index
    %439 = vector.load %arg6[%c3_477, %c0_478, %c0_479] : memref<9x64x16xf32, #tpu.memory_space<vmem>>, vector<1x64x16xf32>
    %440 = vector.shape_cast %439 : vector<1x64x16xf32> to vector<64x16xf32>
    %cst_480 = arith.constant dense<0.000000e+00> : vector<128x16xf32>
    %441 = tpu.matmul %438, %440, %cst_480 {dimension_numbers = #tpu.dot_dimension_numbers<[1], [0], [0], [1], [0, 0, 1, 1], [], []>} : vector<128x64xf32>, vector<64x16xf32>, vector<128x16xf32> -> vector<128x16xf32>
    %442 = arith.addf %437, %441 : vector<128x16xf32>
    %c152_481 = arith.constant 152 : index
    %c0_482 = arith.constant 0 : index
    %443 = vector.load %arg11[%c152_481, %c0_482] : memref<560x64xf32, #tpu.memory_space<vmem>>, vector<128x64xf32>
    %c4_483 = arith.constant 4 : index
    %c0_484 = arith.constant 0 : index
    %c0_485 = arith.constant 0 : index
    %444 = vector.load %arg6[%c4_483, %c0_484, %c0_485] : memref<9x64x16xf32, #tpu.memory_space<vmem>>, vector<1x64x16xf32>
    %445 = vector.shape_cast %444 : vector<1x64x16xf32> to vector<64x16xf32>
    %cst_486 = arith.constant dense<0.000000e+00> : vector<128x16xf32>
    %446 = tpu.matmul %443, %445, %cst_486 {dimension_numbers = #tpu.dot_dimension_numbers<[1], [0], [0], [1], [0, 0, 1, 1], [], []>} : vector<128x64xf32>, vector<64x16xf32>, vector<128x16xf32> -> vector<128x16xf32>
    %447 = arith.addf %442, %446 : vector<128x16xf32>
    %c153_487 = arith.constant 153 : index
    %c0_488 = arith.constant 0 : index
    %448 = vector.load %arg11[%c153_487, %c0_488] : memref<560x64xf32, #tpu.memory_space<vmem>>, vector<128x64xf32>
    %c5_489 = arith.constant 5 : index
    %c0_490 = arith.constant 0 : index
    %c0_491 = arith.constant 0 : index
    %449 = vector.load %arg6[%c5_489, %c0_490, %c0_491] : memref<9x64x16xf32, #tpu.memory_space<vmem>>, vector<1x64x16xf32>
    %450 = vector.shape_cast %449 : vector<1x64x16xf32> to vector<64x16xf32>
    %cst_492 = arith.constant dense<0.000000e+00> : vector<128x16xf32>
    %451 = tpu.matmul %448, %450, %cst_492 {dimension_numbers = #tpu.dot_dimension_numbers<[1], [0], [0], [1], [0, 0, 1, 1], [], []>} : vector<128x64xf32>, vector<64x16xf32>, vector<128x16xf32> -> vector<128x16xf32>
    %452 = arith.addf %447, %451 : vector<128x16xf32>
    %c167_493 = arith.constant 167 : index
    %c0_494 = arith.constant 0 : index
    %453 = vector.load %arg11[%c167_493, %c0_494] : memref<560x64xf32, #tpu.memory_space<vmem>>, vector<128x64xf32>
    %c6_495 = arith.constant 6 : index
    %c0_496 = arith.constant 0 : index
    %c0_497 = arith.constant 0 : index
    %454 = vector.load %arg6[%c6_495, %c0_496, %c0_497] : memref<9x64x16xf32, #tpu.memory_space<vmem>>, vector<1x64x16xf32>
    %455 = vector.shape_cast %454 : vector<1x64x16xf32> to vector<64x16xf32>
    %cst_498 = arith.constant dense<0.000000e+00> : vector<128x16xf32>
    %456 = tpu.matmul %453, %455, %cst_498 {dimension_numbers = #tpu.dot_dimension_numbers<[1], [0], [0], [1], [0, 0, 1, 1], [], []>} : vector<128x64xf32>, vector<64x16xf32>, vector<128x16xf32> -> vector<128x16xf32>
    %457 = arith.addf %452, %456 : vector<128x16xf32>
    %c168_499 = arith.constant 168 : index
    %c0_500 = arith.constant 0 : index
    %458 = vector.load %arg11[%c168_499, %c0_500] : memref<560x64xf32, #tpu.memory_space<vmem>>, vector<128x64xf32>
    %c7_501 = arith.constant 7 : index
    %c0_502 = arith.constant 0 : index
    %c0_503 = arith.constant 0 : index
    %459 = vector.load %arg6[%c7_501, %c0_502, %c0_503] : memref<9x64x16xf32, #tpu.memory_space<vmem>>, vector<1x64x16xf32>
    %460 = vector.shape_cast %459 : vector<1x64x16xf32> to vector<64x16xf32>
    %cst_504 = arith.constant dense<0.000000e+00> : vector<128x16xf32>
    %461 = tpu.matmul %458, %460, %cst_504 {dimension_numbers = #tpu.dot_dimension_numbers<[1], [0], [0], [1], [0, 0, 1, 1], [], []>} : vector<128x64xf32>, vector<64x16xf32>, vector<128x16xf32> -> vector<128x16xf32>
    %462 = arith.addf %457, %461 : vector<128x16xf32>
    %c169_505 = arith.constant 169 : index
    %c0_506 = arith.constant 0 : index
    %463 = vector.load %arg11[%c169_505, %c0_506] : memref<560x64xf32, #tpu.memory_space<vmem>>, vector<128x64xf32>
    %c8_507 = arith.constant 8 : index
    %c0_508 = arith.constant 0 : index
    %c0_509 = arith.constant 0 : index
    %464 = vector.load %arg6[%c8_507, %c0_508, %c0_509] : memref<9x64x16xf32, #tpu.memory_space<vmem>>, vector<1x64x16xf32>
    %465 = vector.shape_cast %464 : vector<1x64x16xf32> to vector<64x16xf32>
    %cst_510 = arith.constant dense<0.000000e+00> : vector<128x16xf32>
    %466 = tpu.matmul %463, %465, %cst_510 {dimension_numbers = #tpu.dot_dimension_numbers<[1], [0], [0], [1], [0, 0, 1, 1], [], []>} : vector<128x64xf32>, vector<64x16xf32>, vector<128x16xf32> -> vector<128x16xf32>
    %467 = arith.addf %462, %466 : vector<128x16xf32>
    %468 = arith.negf %467 : vector<128x16xf32>
    %469 = math.exp %468 : vector<128x16xf32>
    %cst_511 = arith.constant 1.000000e+00 : f32
    %470 = vector.broadcast %cst_511 : f32 to vector<128x16xf32>
    %471 = arith.addf %470, %469 : vector<128x16xf32>
    %472 = arith.divf %470, %471 : vector<128x16xf32>
    %473 = vector.extract_strided_slice %472 {offsets = [0, 0], sizes = [8, 16], strides = [1, 1]} : vector<128x16xf32> to vector<8x16xf32>
    %c0_512 = arith.constant 0 : index
    %c8_513 = arith.constant 8 : index
    %c0_514 = arith.constant 0 : index
    %c0_515 = arith.constant 0 : index
    %474 = vector.load %arg8[%c0_512, %c8_513, %c0_514, %c0_515] : memref<1x32x8x16xf32, #tpu.memory_space<vmem>>, vector<1x1x8x16xf32>
    %475 = vector.shape_cast %474 : vector<1x1x8x16xf32> to vector<8x16xf32>
    %476 = vector.shape_cast %473 : vector<8x16xf32> to vector<1x1x8x16xf32>
    tpu.vector_store %arg8[%c0_512, %c8_513, %c0_514, %c0_515], %476 {strides = array<i32>} : memref<1x32x8x16xf32, #tpu.memory_space<vmem>>, vector<1x1x8x16xf32>,
    %477 = vector.extract_strided_slice %472 {offsets = [16, 0], sizes = [8, 16], strides = [1, 1]} : vector<128x16xf32> to vector<8x16xf32>
    %c0_516 = arith.constant 0 : index
    %c9_517 = arith.constant 9 : index
    %c0_518 = arith.constant 0 : index
    %c0_519 = arith.constant 0 : index
    %478 = vector.load %arg8[%c0_516, %c9_517, %c0_518, %c0_519] : memref<1x32x8x16xf32, #tpu.memory_space<vmem>>, vector<1x1x8x16xf32>
    %479 = vector.shape_cast %478 : vector<1x1x8x16xf32> to vector<8x16xf32>
    %480 = vector.shape_cast %477 : vector<8x16xf32> to vector<1x1x8x16xf32>
    tpu.vector_store %arg8[%c0_516, %c9_517, %c0_518, %c0_519], %480 {strides = array<i32>} : memref<1x32x8x16xf32, #tpu.memory_space<vmem>>, vector<1x1x8x16xf32>,
    %481 = vector.extract_strided_slice %472 {offsets = [32, 0], sizes = [8, 16], strides = [1, 1]} : vector<128x16xf32> to vector<8x16xf32>
    %c0_520 = arith.constant 0 : index
    %c10 = arith.constant 10 : index
    %c0_521 = arith.constant 0 : index
    %c0_522 = arith.constant 0 : index
    %482 = vector.load %arg8[%c0_520, %c10, %c0_521, %c0_522] : memref<1x32x8x16xf32, #tpu.memory_space<vmem>>, vector<1x1x8x16xf32>
    %483 = vector.shape_cast %482 : vector<1x1x8x16xf32> to vector<8x16xf32>
    %484 = vector.shape_cast %481 : vector<8x16xf32> to vector<1x1x8x16xf32>
    tpu.vector_store %arg8[%c0_520, %c10, %c0_521, %c0_522], %484 {strides = array<i32>} : memref<1x32x8x16xf32, #tpu.memory_space<vmem>>, vector<1x1x8x16xf32>,
    %485 = vector.extract_strided_slice %472 {offsets = [48, 0], sizes = [8, 16], strides = [1, 1]} : vector<128x16xf32> to vector<8x16xf32>
    %c0_523 = arith.constant 0 : index
    %c11 = arith.constant 11 : index
    %c0_524 = arith.constant 0 : index
    %c0_525 = arith.constant 0 : index
    %486 = vector.load %arg8[%c0_523, %c11, %c0_524, %c0_525] : memref<1x32x8x16xf32, #tpu.memory_space<vmem>>, vector<1x1x8x16xf32>
    %487 = vector.shape_cast %486 : vector<1x1x8x16xf32> to vector<8x16xf32>
    %488 = vector.shape_cast %485 : vector<8x16xf32> to vector<1x1x8x16xf32>
    tpu.vector_store %arg8[%c0_523, %c11, %c0_524, %c0_525], %488 {strides = array<i32>} : memref<1x32x8x16xf32, #tpu.memory_space<vmem>>, vector<1x1x8x16xf32>,
    %489 = vector.extract_strided_slice %472 {offsets = [64, 0], sizes = [8, 16], strides = [1, 1]} : vector<128x16xf32> to vector<8x16xf32>
    %c0_526 = arith.constant 0 : index
    %c12 = arith.constant 12 : index
    %c0_527 = arith.constant 0 : index
    %c0_528 = arith.constant 0 : index
    %490 = vector.load %arg8[%c0_526, %c12, %c0_527, %c0_528] : memref<1x32x8x16xf32, #tpu.memory_space<vmem>>, vector<1x1x8x16xf32>
    %491 = vector.shape_cast %490 : vector<1x1x8x16xf32> to vector<8x16xf32>
    %492 = vector.shape_cast %489 : vector<8x16xf32> to vector<1x1x8x16xf32>
    tpu.vector_store %arg8[%c0_526, %c12, %c0_527, %c0_528], %492 {strides = array<i32>} : memref<1x32x8x16xf32, #tpu.memory_space<vmem>>, vector<1x1x8x16xf32>,
    %493 = vector.extract_strided_slice %472 {offsets = [80, 0], sizes = [8, 16], strides = [1, 1]} : vector<128x16xf32> to vector<8x16xf32>
    %c0_529 = arith.constant 0 : index
    %c13 = arith.constant 13 : index
    %c0_530 = arith.constant 0 : index
    %c0_531 = arith.constant 0 : index
    %494 = vector.load %arg8[%c0_529, %c13, %c0_530, %c0_531] : memref<1x32x8x16xf32, #tpu.memory_space<vmem>>, vector<1x1x8x16xf32>
    %495 = vector.shape_cast %494 : vector<1x1x8x16xf32> to vector<8x16xf32>
    %496 = vector.shape_cast %493 : vector<8x16xf32> to vector<1x1x8x16xf32>
    tpu.vector_store %arg8[%c0_529, %c13, %c0_530, %c0_531], %496 {strides = array<i32>} : memref<1x32x8x16xf32, #tpu.memory_space<vmem>>, vector<1x1x8x16xf32>,
    %497 = vector.extract_strided_slice %472 {offsets = [96, 0], sizes = [8, 16], strides = [1, 1]} : vector<128x16xf32> to vector<8x16xf32>
    %c0_532 = arith.constant 0 : index
    %c14 = arith.constant 14 : index
    %c0_533 = arith.constant 0 : index
    %c0_534 = arith.constant 0 : index
    %498 = vector.load %arg8[%c0_532, %c14, %c0_533, %c0_534] : memref<1x32x8x16xf32, #tpu.memory_space<vmem>>, vector<1x1x8x16xf32>
    %499 = vector.shape_cast %498 : vector<1x1x8x16xf32> to vector<8x16xf32>
    %500 = vector.shape_cast %497 : vector<8x16xf32> to vector<1x1x8x16xf32>
    tpu.vector_store %arg8[%c0_532, %c14, %c0_533, %c0_534], %500 {strides = array<i32>} : memref<1x32x8x16xf32, #tpu.memory_space<vmem>>, vector<1x1x8x16xf32>,
    %501 = vector.extract_strided_slice %472 {offsets = [112, 0], sizes = [8, 16], strides = [1, 1]} : vector<128x16xf32> to vector<8x16xf32>
    %c0_535 = arith.constant 0 : index
    %c15 = arith.constant 15 : index
    %c0_536 = arith.constant 0 : index
    %c0_537 = arith.constant 0 : index
    %502 = vector.load %arg8[%c0_535, %c15, %c0_536, %c0_537] : memref<1x32x8x16xf32, #tpu.memory_space<vmem>>, vector<1x1x8x16xf32>
    %503 = vector.shape_cast %502 : vector<1x1x8x16xf32> to vector<8x16xf32>
    %504 = vector.shape_cast %501 : vector<8x16xf32> to vector<1x1x8x16xf32>
    tpu.vector_store %arg8[%c0_535, %c15, %c0_536, %c0_537], %504 {strides = array<i32>} : memref<1x32x8x16xf32, #tpu.memory_space<vmem>>, vector<1x1x8x16xf32>,
    %c263 = arith.constant 263 : index
    %c0_538 = arith.constant 0 : index
    %505 = vector.load %arg11[%c263, %c0_538] : memref<560x64xf32, #tpu.memory_space<vmem>>, vector<128x64xf32>
    %c0_539 = arith.constant 0 : index
    %c0_540 = arith.constant 0 : index
    %c0_541 = arith.constant 0 : index
    %506 = vector.load %arg6[%c0_539, %c0_540, %c0_541] : memref<9x64x16xf32, #tpu.memory_space<vmem>>, vector<1x64x16xf32>
    %507 = vector.shape_cast %506 : vector<1x64x16xf32> to vector<64x16xf32>
    %cst_542 = arith.constant dense<0.000000e+00> : vector<128x16xf32>
    %508 = tpu.matmul %505, %507, %cst_542 {dimension_numbers = #tpu.dot_dimension_numbers<[1], [0], [0], [1], [0, 0, 1, 1], [], []>} : vector<128x64xf32>, vector<64x16xf32>, vector<128x16xf32> -> vector<128x16xf32>
    %509 = vector.broadcast %338 : vector<1x16xf32> to vector<128x16xf32>
    %510 = arith.addf %508, %509 : vector<128x16xf32>
    %c264_543 = arith.constant 264 : index
    %c0_544 = arith.constant 0 : index
    %511 = vector.load %arg11[%c264_543, %c0_544] : memref<560x64xf32, #tpu.memory_space<vmem>>, vector<128x64xf32>
    %c1_545 = arith.constant 1 : index
    %c0_546 = arith.constant 0 : index
    %c0_547 = arith.constant 0 : index
    %512 = vector.load %arg6[%c1_545, %c0_546, %c0_547] : memref<9x64x16xf32, #tpu.memory_space<vmem>>, vector<1x64x16xf32>
    %513 = vector.shape_cast %512 : vector<1x64x16xf32> to vector<64x16xf32>
    %cst_548 = arith.constant dense<0.000000e+00> : vector<128x16xf32>
    %514 = tpu.matmul %511, %513, %cst_548 {dimension_numbers = #tpu.dot_dimension_numbers<[1], [0], [0], [1], [0, 0, 1, 1], [], []>} : vector<128x64xf32>, vector<64x16xf32>, vector<128x16xf32> -> vector<128x16xf32>
    %515 = arith.addf %510, %514 : vector<128x16xf32>
    %c265 = arith.constant 265 : index
    %c0_549 = arith.constant 0 : index
    %516 = vector.load %arg11[%c265, %c0_549] : memref<560x64xf32, #tpu.memory_space<vmem>>, vector<128x64xf32>
    %c2_550 = arith.constant 2 : index
    %c0_551 = arith.constant 0 : index
    %c0_552 = arith.constant 0 : index
    %517 = vector.load %arg6[%c2_550, %c0_551, %c0_552] : memref<9x64x16xf32, #tpu.memory_space<vmem>>, vector<1x64x16xf32>
    %518 = vector.shape_cast %517 : vector<1x64x16xf32> to vector<64x16xf32>
    %cst_553 = arith.constant dense<0.000000e+00> : vector<128x16xf32>
    %519 = tpu.matmul %516, %518, %cst_553 {dimension_numbers = #tpu.dot_dimension_numbers<[1], [0], [0], [1], [0, 0, 1, 1], [], []>} : vector<128x64xf32>, vector<64x16xf32>, vector<128x16xf32> -> vector<128x16xf32>
    %520 = arith.addf %515, %519 : vector<128x16xf32>
    %c279 = arith.constant 279 : index
    %c0_554 = arith.constant 0 : index
    %521 = vector.load %arg11[%c279, %c0_554] : memref<560x64xf32, #tpu.memory_space<vmem>>, vector<128x64xf32>
    %c3_555 = arith.constant 3 : index
    %c0_556 = arith.constant 0 : index
    %c0_557 = arith.constant 0 : index
    %522 = vector.load %arg6[%c3_555, %c0_556, %c0_557] : memref<9x64x16xf32, #tpu.memory_space<vmem>>, vector<1x64x16xf32>
    %523 = vector.shape_cast %522 : vector<1x64x16xf32> to vector<64x16xf32>
    %cst_558 = arith.constant dense<0.000000e+00> : vector<128x16xf32>
    %524 = tpu.matmul %521, %523, %cst_558 {dimension_numbers = #tpu.dot_dimension_numbers<[1], [0], [0], [1], [0, 0, 1, 1], [], []>} : vector<128x64xf32>, vector<64x16xf32>, vector<128x16xf32> -> vector<128x16xf32>
    %525 = arith.addf %520, %524 : vector<128x16xf32>
    %c280_559 = arith.constant 280 : index
    %c0_560 = arith.constant 0 : index
    %526 = vector.load %arg11[%c280_559, %c0_560] : memref<560x64xf32, #tpu.memory_space<vmem>>, vector<128x64xf32>
    %c4_561 = arith.constant 4 : index
    %c0_562 = arith.constant 0 : index
    %c0_563 = arith.constant 0 : index
    %527 = vector.load %arg6[%c4_561, %c0_562, %c0_563] : memref<9x64x16xf32, #tpu.memory_space<vmem>>, vector<1x64x16xf32>
    %528 = vector.shape_cast %527 : vector<1x64x16xf32> to vector<64x16xf32>
    %cst_564 = arith.constant dense<0.000000e+00> : vector<128x16xf32>
    %529 = tpu.matmul %526, %528, %cst_564 {dimension_numbers = #tpu.dot_dimension_numbers<[1], [0], [0], [1], [0, 0, 1, 1], [], []>} : vector<128x64xf32>, vector<64x16xf32>, vector<128x16xf32> -> vector<128x16xf32>
    %530 = arith.addf %525, %529 : vector<128x16xf32>
    %c281 = arith.constant 281 : index
    %c0_565 = arith.constant 0 : index
    %531 = vector.load %arg11[%c281, %c0_565] : memref<560x64xf32, #tpu.memory_space<vmem>>, vector<128x64xf32>
    %c5_566 = arith.constant 5 : index
    %c0_567 = arith.constant 0 : index
    %c0_568 = arith.constant 0 : index
    %532 = vector.load %arg6[%c5_566, %c0_567, %c0_568] : memref<9x64x16xf32, #tpu.memory_space<vmem>>, vector<1x64x16xf32>
    %533 = vector.shape_cast %532 : vector<1x64x16xf32> to vector<64x16xf32>
    %cst_569 = arith.constant dense<0.000000e+00> : vector<128x16xf32>
    %534 = tpu.matmul %531, %533, %cst_569 {dimension_numbers = #tpu.dot_dimension_numbers<[1], [0], [0], [1], [0, 0, 1, 1], [], []>} : vector<128x64xf32>, vector<64x16xf32>, vector<128x16xf32> -> vector<128x16xf32>
    %535 = arith.addf %530, %534 : vector<128x16xf32>
    %c295 = arith.constant 295 : index
    %c0_570 = arith.constant 0 : index
    %536 = vector.load %arg11[%c295, %c0_570] : memref<560x64xf32, #tpu.memory_space<vmem>>, vector<128x64xf32>
    %c6_571 = arith.constant 6 : index
    %c0_572 = arith.constant 0 : index
    %c0_573 = arith.constant 0 : index
    %537 = vector.load %arg6[%c6_571, %c0_572, %c0_573] : memref<9x64x16xf32, #tpu.memory_space<vmem>>, vector<1x64x16xf32>
    %538 = vector.shape_cast %537 : vector<1x64x16xf32> to vector<64x16xf32>
    %cst_574 = arith.constant dense<0.000000e+00> : vector<128x16xf32>
    %539 = tpu.matmul %536, %538, %cst_574 {dimension_numbers = #tpu.dot_dimension_numbers<[1], [0], [0], [1], [0, 0, 1, 1], [], []>} : vector<128x64xf32>, vector<64x16xf32>, vector<128x16xf32> -> vector<128x16xf32>
    %540 = arith.addf %535, %539 : vector<128x16xf32>
    %c296_575 = arith.constant 296 : index
    %c0_576 = arith.constant 0 : index
    %541 = vector.load %arg11[%c296_575, %c0_576] : memref<560x64xf32, #tpu.memory_space<vmem>>, vector<128x64xf32>
    %c7_577 = arith.constant 7 : index
    %c0_578 = arith.constant 0 : index
    %c0_579 = arith.constant 0 : index
    %542 = vector.load %arg6[%c7_577, %c0_578, %c0_579] : memref<9x64x16xf32, #tpu.memory_space<vmem>>, vector<1x64x16xf32>
    %543 = vector.shape_cast %542 : vector<1x64x16xf32> to vector<64x16xf32>
    %cst_580 = arith.constant dense<0.000000e+00> : vector<128x16xf32>
    %544 = tpu.matmul %541, %543, %cst_580 {dimension_numbers = #tpu.dot_dimension_numbers<[1], [0], [0], [1], [0, 0, 1, 1], [], []>} : vector<128x64xf32>, vector<64x16xf32>, vector<128x16xf32> -> vector<128x16xf32>
    %545 = arith.addf %540, %544 : vector<128x16xf32>
    %c297 = arith.constant 297 : index
    %c0_581 = arith.constant 0 : index
    %546 = vector.load %arg11[%c297, %c0_581] : memref<560x64xf32, #tpu.memory_space<vmem>>, vector<128x64xf32>
    %c8_582 = arith.constant 8 : index
    %c0_583 = arith.constant 0 : index
    %c0_584 = arith.constant 0 : index
    %547 = vector.load %arg6[%c8_582, %c0_583, %c0_584] : memref<9x64x16xf32, #tpu.memory_space<vmem>>, vector<1x64x16xf32>
    %548 = vector.shape_cast %547 : vector<1x64x16xf32> to vector<64x16xf32>
    %cst_585 = arith.constant dense<0.000000e+00> : vector<128x16xf32>
    %549 = tpu.matmul %546, %548, %cst_585 {dimension_numbers = #tpu.dot_dimension_numbers<[1], [0], [0], [1], [0, 0, 1, 1], [], []>} : vector<128x64xf32>, vector<64x16xf32>, vector<128x16xf32> -> vector<128x16xf32>
    %550 = arith.addf %545, %549 : vector<128x16xf32>
    %551 = arith.negf %550 : vector<128x16xf32>
    %552 = math.exp %551 : vector<128x16xf32>
    %cst_586 = arith.constant 1.000000e+00 : f32
    %553 = vector.broadcast %cst_586 : f32 to vector<128x16xf32>
    %554 = arith.addf %553, %552 : vector<128x16xf32>
    %555 = arith.divf %553, %554 : vector<128x16xf32>
    %556 = vector.extract_strided_slice %555 {offsets = [0, 0], sizes = [8, 16], strides = [1, 1]} : vector<128x16xf32> to vector<8x16xf32>
    %c0_587 = arith.constant 0 : index
    %c16_588 = arith.constant 16 : index
    %c0_589 = arith.constant 0 : index
    %c0_590 = arith.constant 0 : index
    %557 = vector.load %arg8[%c0_587, %c16_588, %c0_589, %c0_590] : memref<1x32x8x16xf32, #tpu.memory_space<vmem>>, vector<1x1x8x16xf32>
    %558 = vector.shape_cast %557 : vector<1x1x8x16xf32> to vector<8x16xf32>
    %559 = vector.shape_cast %556 : vector<8x16xf32> to vector<1x1x8x16xf32>
    tpu.vector_store %arg8[%c0_587, %c16_588, %c0_589, %c0_590], %559 {strides = array<i32>} : memref<1x32x8x16xf32, #tpu.memory_space<vmem>>, vector<1x1x8x16xf32>,
    %560 = vector.extract_strided_slice %555 {offsets = [16, 0], sizes = [8, 16], strides = [1, 1]} : vector<128x16xf32> to vector<8x16xf32>
    %c0_591 = arith.constant 0 : index
    %c17 = arith.constant 17 : index
    %c0_592 = arith.constant 0 : index
    %c0_593 = arith.constant 0 : index
    %561 = vector.load %arg8[%c0_591, %c17, %c0_592, %c0_593] : memref<1x32x8x16xf32, #tpu.memory_space<vmem>>, vector<1x1x8x16xf32>
    %562 = vector.shape_cast %561 : vector<1x1x8x16xf32> to vector<8x16xf32>
    %563 = vector.shape_cast %560 : vector<8x16xf32> to vector<1x1x8x16xf32>
    tpu.vector_store %arg8[%c0_591, %c17, %c0_592, %c0_593], %563 {strides = array<i32>} : memref<1x32x8x16xf32, #tpu.memory_space<vmem>>, vector<1x1x8x16xf32>,
    %564 = vector.extract_strided_slice %555 {offsets = [32, 0], sizes = [8, 16], strides = [1, 1]} : vector<128x16xf32> to vector<8x16xf32>
    %c0_594 = arith.constant 0 : index
    %c18 = arith.constant 18 : index
    %c0_595 = arith.constant 0 : index
    %c0_596 = arith.constant 0 : index
    %565 = vector.load %arg8[%c0_594, %c18, %c0_595, %c0_596] : memref<1x32x8x16xf32, #tpu.memory_space<vmem>>, vector<1x1x8x16xf32>
    %566 = vector.shape_cast %565 : vector<1x1x8x16xf32> to vector<8x16xf32>
    %567 = vector.shape_cast %564 : vector<8x16xf32> to vector<1x1x8x16xf32>
    tpu.vector_store %arg8[%c0_594, %c18, %c0_595, %c0_596], %567 {strides = array<i32>} : memref<1x32x8x16xf32, #tpu.memory_space<vmem>>, vector<1x1x8x16xf32>,
    %568 = vector.extract_strided_slice %555 {offsets = [48, 0], sizes = [8, 16], strides = [1, 1]} : vector<128x16xf32> to vector<8x16xf32>
    %c0_597 = arith.constant 0 : index
    %c19 = arith.constant 19 : index
    %c0_598 = arith.constant 0 : index
    %c0_599 = arith.constant 0 : index
    %569 = vector.load %arg8[%c0_597, %c19, %c0_598, %c0_599] : memref<1x32x8x16xf32, #tpu.memory_space<vmem>>, vector<1x1x8x16xf32>
    %570 = vector.shape_cast %569 : vector<1x1x8x16xf32> to vector<8x16xf32>
    %571 = vector.shape_cast %568 : vector<8x16xf32> to vector<1x1x8x16xf32>
    tpu.vector_store %arg8[%c0_597, %c19, %c0_598, %c0_599], %571 {strides = array<i32>} : memref<1x32x8x16xf32, #tpu.memory_space<vmem>>, vector<1x1x8x16xf32>,
    %572 = vector.extract_strided_slice %555 {offsets = [64, 0], sizes = [8, 16], strides = [1, 1]} : vector<128x16xf32> to vector<8x16xf32>
    %c0_600 = arith.constant 0 : index
    %c20 = arith.constant 20 : index
    %c0_601 = arith.constant 0 : index
    %c0_602 = arith.constant 0 : index
    %573 = vector.load %arg8[%c0_600, %c20, %c0_601, %c0_602] : memref<1x32x8x16xf32, #tpu.memory_space<vmem>>, vector<1x1x8x16xf32>
    %574 = vector.shape_cast %573 : vector<1x1x8x16xf32> to vector<8x16xf32>
    %575 = vector.shape_cast %572 : vector<8x16xf32> to vector<1x1x8x16xf32>
    tpu.vector_store %arg8[%c0_600, %c20, %c0_601, %c0_602], %575 {strides = array<i32>} : memref<1x32x8x16xf32, #tpu.memory_space<vmem>>, vector<1x1x8x16xf32>,
    %576 = vector.extract_strided_slice %555 {offsets = [80, 0], sizes = [8, 16], strides = [1, 1]} : vector<128x16xf32> to vector<8x16xf32>
    %c0_603 = arith.constant 0 : index
    %c21 = arith.constant 21 : index
    %c0_604 = arith.constant 0 : index
    %c0_605 = arith.constant 0 : index
    %577 = vector.load %arg8[%c0_603, %c21, %c0_604, %c0_605] : memref<1x32x8x16xf32, #tpu.memory_space<vmem>>, vector<1x1x8x16xf32>
    %578 = vector.shape_cast %577 : vector<1x1x8x16xf32> to vector<8x16xf32>
    %579 = vector.shape_cast %576 : vector<8x16xf32> to vector<1x1x8x16xf32>
    tpu.vector_store %arg8[%c0_603, %c21, %c0_604, %c0_605], %579 {strides = array<i32>} : memref<1x32x8x16xf32, #tpu.memory_space<vmem>>, vector<1x1x8x16xf32>,
    %580 = vector.extract_strided_slice %555 {offsets = [96, 0], sizes = [8, 16], strides = [1, 1]} : vector<128x16xf32> to vector<8x16xf32>
    %c0_606 = arith.constant 0 : index
    %c22 = arith.constant 22 : index
    %c0_607 = arith.constant 0 : index
    %c0_608 = arith.constant 0 : index
    %581 = vector.load %arg8[%c0_606, %c22, %c0_607, %c0_608] : memref<1x32x8x16xf32, #tpu.memory_space<vmem>>, vector<1x1x8x16xf32>
    %582 = vector.shape_cast %581 : vector<1x1x8x16xf32> to vector<8x16xf32>
    %583 = vector.shape_cast %580 : vector<8x16xf32> to vector<1x1x8x16xf32>
    tpu.vector_store %arg8[%c0_606, %c22, %c0_607, %c0_608], %583 {strides = array<i32>} : memref<1x32x8x16xf32, #tpu.memory_space<vmem>>, vector<1x1x8x16xf32>,
    %584 = vector.extract_strided_slice %555 {offsets = [112, 0], sizes = [8, 16], strides = [1, 1]} : vector<128x16xf32> to vector<8x16xf32>
    %c0_609 = arith.constant 0 : index
    %c23_610 = arith.constant 23 : index
    %c0_611 = arith.constant 0 : index
    %c0_612 = arith.constant 0 : index
    %585 = vector.load %arg8[%c0_609, %c23_610, %c0_611, %c0_612] : memref<1x32x8x16xf32, #tpu.memory_space<vmem>>, vector<1x1x8x16xf32>
    %586 = vector.shape_cast %585 : vector<1x1x8x16xf32> to vector<8x16xf32>
    %587 = vector.shape_cast %584 : vector<8x16xf32> to vector<1x1x8x16xf32>
    tpu.vector_store %arg8[%c0_609, %c23_610, %c0_611, %c0_612], %587 {strides = array<i32>} : memref<1x32x8x16xf32, #tpu.memory_space<vmem>>, vector<1x1x8x16xf32>,
    %c391 = arith.constant 391 : index
    %c0_613 = arith.constant 0 : index
    %588 = vector.load %arg11[%c391, %c0_613] : memref<560x64xf32, #tpu.memory_space<vmem>>, vector<128x64xf32>
    %c0_614 = arith.constant 0 : index
    %c0_615 = arith.constant 0 : index
    %c0_616 = arith.constant 0 : index
    %589 = vector.load %arg6[%c0_614, %c0_615, %c0_616] : memref<9x64x16xf32, #tpu.memory_space<vmem>>, vector<1x64x16xf32>
    %590 = vector.shape_cast %589 : vector<1x64x16xf32> to vector<64x16xf32>
    %cst_617 = arith.constant dense<0.000000e+00> : vector<128x16xf32>
    %591 = tpu.matmul %588, %590, %cst_617 {dimension_numbers = #tpu.dot_dimension_numbers<[1], [0], [0], [1], [0, 0, 1, 1], [], []>} : vector<128x64xf32>, vector<64x16xf32>, vector<128x16xf32> -> vector<128x16xf32>
    %592 = vector.broadcast %338 : vector<1x16xf32> to vector<128x16xf32>
    %593 = arith.addf %591, %592 : vector<128x16xf32>
    %c392_618 = arith.constant 392 : index
    %c0_619 = arith.constant 0 : index
    %594 = vector.load %arg11[%c392_618, %c0_619] : memref<560x64xf32, #tpu.memory_space<vmem>>, vector<128x64xf32>
    %c1_620 = arith.constant 1 : index
    %c0_621 = arith.constant 0 : index
    %c0_622 = arith.constant 0 : index
    %595 = vector.load %arg6[%c1_620, %c0_621, %c0_622] : memref<9x64x16xf32, #tpu.memory_space<vmem>>, vector<1x64x16xf32>
    %596 = vector.shape_cast %595 : vector<1x64x16xf32> to vector<64x16xf32>
    %cst_623 = arith.constant dense<0.000000e+00> : vector<128x16xf32>
    %597 = tpu.matmul %594, %596, %cst_623 {dimension_numbers = #tpu.dot_dimension_numbers<[1], [0], [0], [1], [0, 0, 1, 1], [], []>} : vector<128x64xf32>, vector<64x16xf32>, vector<128x16xf32> -> vector<128x16xf32>
    %598 = arith.addf %593, %597 : vector<128x16xf32>
    %c393 = arith.constant 393 : index
    %c0_624 = arith.constant 0 : index
    %599 = vector.load %arg11[%c393, %c0_624] : memref<560x64xf32, #tpu.memory_space<vmem>>, vector<128x64xf32>
    %c2_625 = arith.constant 2 : index
    %c0_626 = arith.constant 0 : index
    %c0_627 = arith.constant 0 : index
    %600 = vector.load %arg6[%c2_625, %c0_626, %c0_627] : memref<9x64x16xf32, #tpu.memory_space<vmem>>, vector<1x64x16xf32>
    %601 = vector.shape_cast %600 : vector<1x64x16xf32> to vector<64x16xf32>
    %cst_628 = arith.constant dense<0.000000e+00> : vector<128x16xf32>
    %602 = tpu.matmul %599, %601, %cst_628 {dimension_numbers = #tpu.dot_dimension_numbers<[1], [0], [0], [1], [0, 0, 1, 1], [], []>} : vector<128x64xf32>, vector<64x16xf32>, vector<128x16xf32> -> vector<128x16xf32>
    %603 = arith.addf %598, %602 : vector<128x16xf32>
    %c407 = arith.constant 407 : index
    %c0_629 = arith.constant 0 : index
    %604 = vector.load %arg11[%c407, %c0_629] : memref<560x64xf32, #tpu.memory_space<vmem>>, vector<128x64xf32>
    %c3_630 = arith.constant 3 : index
    %c0_631 = arith.constant 0 : index
    %c0_632 = arith.constant 0 : index
    %605 = vector.load %arg6[%c3_630, %c0_631, %c0_632] : memref<9x64x16xf32, #tpu.memory_space<vmem>>, vector<1x64x16xf32>
    %606 = vector.shape_cast %605 : vector<1x64x16xf32> to vector<64x16xf32>
    %cst_633 = arith.constant dense<0.000000e+00> : vector<128x16xf32>
    %607 = tpu.matmul %604, %606, %cst_633 {dimension_numbers = #tpu.dot_dimension_numbers<[1], [0], [0], [1], [0, 0, 1, 1], [], []>} : vector<128x64xf32>, vector<64x16xf32>, vector<128x16xf32> -> vector<128x16xf32>
    %608 = arith.addf %603, %607 : vector<128x16xf32>
    %c408_634 = arith.constant 408 : index
    %c0_635 = arith.constant 0 : index
    %609 = vector.load %arg11[%c408_634, %c0_635] : memref<560x64xf32, #tpu.memory_space<vmem>>, vector<128x64xf32>
    %c4_636 = arith.constant 4 : index
    %c0_637 = arith.constant 0 : index
    %c0_638 = arith.constant 0 : index
    %610 = vector.load %arg6[%c4_636, %c0_637, %c0_638] : memref<9x64x16xf32, #tpu.memory_space<vmem>>, vector<1x64x16xf32>
    %611 = vector.shape_cast %610 : vector<1x64x16xf32> to vector<64x16xf32>
    %cst_639 = arith.constant dense<0.000000e+00> : vector<128x16xf32>
    %612 = tpu.matmul %609, %611, %cst_639 {dimension_numbers = #tpu.dot_dimension_numbers<[1], [0], [0], [1], [0, 0, 1, 1], [], []>} : vector<128x64xf32>, vector<64x16xf32>, vector<128x16xf32> -> vector<128x16xf32>
    %613 = arith.addf %608, %612 : vector<128x16xf32>
    %c409 = arith.constant 409 : index
    %c0_640 = arith.constant 0 : index
    %614 = vector.load %arg11[%c409, %c0_640] : memref<560x64xf32, #tpu.memory_space<vmem>>, vector<128x64xf32>
    %c5_641 = arith.constant 5 : index
    %c0_642 = arith.constant 0 : index
    %c0_643 = arith.constant 0 : index
    %615 = vector.load %arg6[%c5_641, %c0_642, %c0_643] : memref<9x64x16xf32, #tpu.memory_space<vmem>>, vector<1x64x16xf32>
    %616 = vector.shape_cast %615 : vector<1x64x16xf32> to vector<64x16xf32>
    %cst_644 = arith.constant dense<0.000000e+00> : vector<128x16xf32>
    %617 = tpu.matmul %614, %616, %cst_644 {dimension_numbers = #tpu.dot_dimension_numbers<[1], [0], [0], [1], [0, 0, 1, 1], [], []>} : vector<128x64xf32>, vector<64x16xf32>, vector<128x16xf32> -> vector<128x16xf32>
    %618 = arith.addf %613, %617 : vector<128x16xf32>
    %c423 = arith.constant 423 : index
    %c0_645 = arith.constant 0 : index
    %619 = vector.load %arg11[%c423, %c0_645] : memref<560x64xf32, #tpu.memory_space<vmem>>, vector<128x64xf32>
    %c6_646 = arith.constant 6 : index
    %c0_647 = arith.constant 0 : index
    %c0_648 = arith.constant 0 : index
    %620 = vector.load %arg6[%c6_646, %c0_647, %c0_648] : memref<9x64x16xf32, #tpu.memory_space<vmem>>, vector<1x64x16xf32>
    %621 = vector.shape_cast %620 : vector<1x64x16xf32> to vector<64x16xf32>
    %cst_649 = arith.constant dense<0.000000e+00> : vector<128x16xf32>
    %622 = tpu.matmul %619, %621, %cst_649 {dimension_numbers = #tpu.dot_dimension_numbers<[1], [0], [0], [1], [0, 0, 1, 1], [], []>} : vector<128x64xf32>, vector<64x16xf32>, vector<128x16xf32> -> vector<128x16xf32>
    %623 = arith.addf %618, %622 : vector<128x16xf32>
    %c424_650 = arith.constant 424 : index
    %c0_651 = arith.constant 0 : index
    %624 = vector.load %arg11[%c424_650, %c0_651] : memref<560x64xf32, #tpu.memory_space<vmem>>, vector<128x64xf32>
    %c7_652 = arith.constant 7 : index
    %c0_653 = arith.constant 0 : index
    %c0_654 = arith.constant 0 : index
    %625 = vector.load %arg6[%c7_652, %c0_653, %c0_654] : memref<9x64x16xf32, #tpu.memory_space<vmem>>, vector<1x64x16xf32>
    %626 = vector.shape_cast %625 : vector<1x64x16xf32> to vector<64x16xf32>
    %cst_655 = arith.constant dense<0.000000e+00> : vector<128x16xf32>
    %627 = tpu.matmul %624, %626, %cst_655 {dimension_numbers = #tpu.dot_dimension_numbers<[1], [0], [0], [1], [0, 0, 1, 1], [], []>} : vector<128x64xf32>, vector<64x16xf32>, vector<128x16xf32> -> vector<128x16xf32>
    %628 = arith.addf %623, %627 : vector<128x16xf32>
    %c425 = arith.constant 425 : index
    %c0_656 = arith.constant 0 : index
    %629 = vector.load %arg11[%c425, %c0_656] : memref<560x64xf32, #tpu.memory_space<vmem>>, vector<128x64xf32>
    %c8_657 = arith.constant 8 : index
    %c0_658 = arith.constant 0 : index
    %c0_659 = arith.constant 0 : index
    %630 = vector.load %arg6[%c8_657, %c0_658, %c0_659] : memref<9x64x16xf32, #tpu.memory_space<vmem>>, vector<1x64x16xf32>
    %631 = vector.shape_cast %630 : vector<1x64x16xf32> to vector<64x16xf32>
    %cst_660 = arith.constant dense<0.000000e+00> : vector<128x16xf32>
    %632 = tpu.matmul %629, %631, %cst_660 {dimension_numbers = #tpu.dot_dimension_numbers<[1], [0], [0], [1], [0, 0, 1, 1], [], []>} : vector<128x64xf32>, vector<64x16xf32>, vector<128x16xf32> -> vector<128x16xf32>
    %633 = arith.addf %628, %632 : vector<128x16xf32>
    %634 = arith.negf %633 : vector<128x16xf32>
    %635 = math.exp %634 : vector<128x16xf32>
    %cst_661 = arith.constant 1.000000e+00 : f32
    %636 = vector.broadcast %cst_661 : f32 to vector<128x16xf32>
    %637 = arith.addf %636, %635 : vector<128x16xf32>
    %638 = arith.divf %636, %637 : vector<128x16xf32>
    %639 = vector.extract_strided_slice %638 {offsets = [0, 0], sizes = [8, 16], strides = [1, 1]} : vector<128x16xf32> to vector<8x16xf32>
    %c0_662 = arith.constant 0 : index
    %c24_663 = arith.constant 24 : index
    %c0_664 = arith.constant 0 : index
    %c0_665 = arith.constant 0 : index
    %640 = vector.load %arg8[%c0_662, %c24_663, %c0_664, %c0_665] : memref<1x32x8x16xf32, #tpu.memory_space<vmem>>, vector<1x1x8x16xf32>
    %641 = vector.shape_cast %640 : vector<1x1x8x16xf32> to vector<8x16xf32>
    %642 = vector.shape_cast %639 : vector<8x16xf32> to vector<1x1x8x16xf32>
    tpu.vector_store %arg8[%c0_662, %c24_663, %c0_664, %c0_665], %642 {strides = array<i32>} : memref<1x32x8x16xf32, #tpu.memory_space<vmem>>, vector<1x1x8x16xf32>,
    %643 = vector.extract_strided_slice %638 {offsets = [16, 0], sizes = [8, 16], strides = [1, 1]} : vector<128x16xf32> to vector<8x16xf32>
    %c0_666 = arith.constant 0 : index
    %c25_667 = arith.constant 25 : index
    %c0_668 = arith.constant 0 : index
    %c0_669 = arith.constant 0 : index
    %644 = vector.load %arg8[%c0_666, %c25_667, %c0_668, %c0_669] : memref<1x32x8x16xf32, #tpu.memory_space<vmem>>, vector<1x1x8x16xf32>
    %645 = vector.shape_cast %644 : vector<1x1x8x16xf32> to vector<8x16xf32>
    %646 = vector.shape_cast %643 : vector<8x16xf32> to vector<1x1x8x16xf32>
    tpu.vector_store %arg8[%c0_666, %c25_667, %c0_668, %c0_669], %646 {strides = array<i32>} : memref<1x32x8x16xf32, #tpu.memory_space<vmem>>, vector<1x1x8x16xf32>,
    %647 = vector.extract_strided_slice %638 {offsets = [32, 0], sizes = [8, 16], strides = [1, 1]} : vector<128x16xf32> to vector<8x16xf32>
    %c0_670 = arith.constant 0 : index
    %c26 = arith.constant 26 : index
    %c0_671 = arith.constant 0 : index
    %c0_672 = arith.constant 0 : index
    %648 = vector.load %arg8[%c0_670, %c26, %c0_671, %c0_672] : memref<1x32x8x16xf32, #tpu.memory_space<vmem>>, vector<1x1x8x16xf32>
    %649 = vector.shape_cast %648 : vector<1x1x8x16xf32> to vector<8x16xf32>
    %650 = vector.shape_cast %647 : vector<8x16xf32> to vector<1x1x8x16xf32>
    tpu.vector_store %arg8[%c0_670, %c26, %c0_671, %c0_672], %650 {strides = array<i32>} : memref<1x32x8x16xf32, #tpu.memory_space<vmem>>, vector<1x1x8x16xf32>,
    %651 = vector.extract_strided_slice %638 {offsets = [48, 0], sizes = [8, 16], strides = [1, 1]} : vector<128x16xf32> to vector<8x16xf32>
    %c0_673 = arith.constant 0 : index
    %c27 = arith.constant 27 : index
    %c0_674 = arith.constant 0 : index
    %c0_675 = arith.constant 0 : index
    %652 = vector.load %arg8[%c0_673, %c27, %c0_674, %c0_675] : memref<1x32x8x16xf32, #tpu.memory_space<vmem>>, vector<1x1x8x16xf32>
    %653 = vector.shape_cast %652 : vector<1x1x8x16xf32> to vector<8x16xf32>
    %654 = vector.shape_cast %651 : vector<8x16xf32> to vector<1x1x8x16xf32>
    tpu.vector_store %arg8[%c0_673, %c27, %c0_674, %c0_675], %654 {strides = array<i32>} : memref<1x32x8x16xf32, #tpu.memory_space<vmem>>, vector<1x1x8x16xf32>,
    %655 = vector.extract_strided_slice %638 {offsets = [64, 0], sizes = [8, 16], strides = [1, 1]} : vector<128x16xf32> to vector<8x16xf32>
    %c0_676 = arith.constant 0 : index
    %c28 = arith.constant 28 : index
    %c0_677 = arith.constant 0 : index
    %c0_678 = arith.constant 0 : index
    %656 = vector.load %arg8[%c0_676, %c28, %c0_677, %c0_678] : memref<1x32x8x16xf32, #tpu.memory_space<vmem>>, vector<1x1x8x16xf32>
    %657 = vector.shape_cast %656 : vector<1x1x8x16xf32> to vector<8x16xf32>
    %658 = vector.shape_cast %655 : vector<8x16xf32> to vector<1x1x8x16xf32>
    tpu.vector_store %arg8[%c0_676, %c28, %c0_677, %c0_678], %658 {strides = array<i32>} : memref<1x32x8x16xf32, #tpu.memory_space<vmem>>, vector<1x1x8x16xf32>,
    %659 = vector.extract_strided_slice %638 {offsets = [80, 0], sizes = [8, 16], strides = [1, 1]} : vector<128x16xf32> to vector<8x16xf32>
    %c0_679 = arith.constant 0 : index
    %c29 = arith.constant 29 : index
    %c0_680 = arith.constant 0 : index
    %c0_681 = arith.constant 0 : index
    %660 = vector.load %arg8[%c0_679, %c29, %c0_680, %c0_681] : memref<1x32x8x16xf32, #tpu.memory_space<vmem>>, vector<1x1x8x16xf32>
    %661 = vector.shape_cast %660 : vector<1x1x8x16xf32> to vector<8x16xf32>
    %662 = vector.shape_cast %659 : vector<8x16xf32> to vector<1x1x8x16xf32>
    tpu.vector_store %arg8[%c0_679, %c29, %c0_680, %c0_681], %662 {strides = array<i32>} : memref<1x32x8x16xf32, #tpu.memory_space<vmem>>, vector<1x1x8x16xf32>,
    %663 = vector.extract_strided_slice %638 {offsets = [96, 0], sizes = [8, 16], strides = [1, 1]} : vector<128x16xf32> to vector<8x16xf32>
    %c0_682 = arith.constant 0 : index
    %c30 = arith.constant 30 : index
    %c0_683 = arith.constant 0 : index
    %c0_684 = arith.constant 0 : index
    %664 = vector.load %arg8[%c0_682, %c30, %c0_683, %c0_684] : memref<1x32x8x16xf32, #tpu.memory_space<vmem>>, vector<1x1x8x16xf32>
    %665 = vector.shape_cast %664 : vector<1x1x8x16xf32> to vector<8x16xf32>
    %666 = vector.shape_cast %663 : vector<8x16xf32> to vector<1x1x8x16xf32>
    tpu.vector_store %arg8[%c0_682, %c30, %c0_683, %c0_684], %666 {strides = array<i32>} : memref<1x32x8x16xf32, #tpu.memory_space<vmem>>, vector<1x1x8x16xf32>,
    %667 = vector.extract_strided_slice %638 {offsets = [112, 0], sizes = [8, 16], strides = [1, 1]} : vector<128x16xf32> to vector<8x16xf32>
    %c0_685 = arith.constant 0 : index
    %c31 = arith.constant 31 : index
    %c0_686 = arith.constant 0 : index
    %c0_687 = arith.constant 0 : index
    %668 = vector.load %arg8[%c0_685, %c31, %c0_686, %c0_687] : memref<1x32x8x16xf32, #tpu.memory_space<vmem>>, vector<1x1x8x16xf32>
    %669 = vector.shape_cast %668 : vector<1x1x8x16xf32> to vector<8x16xf32>
    %670 = vector.shape_cast %667 : vector<8x16xf32> to vector<1x1x8x16xf32>
    tpu.vector_store %arg8[%c0_685, %c31, %c0_686, %c0_687], %670 {strides = array<i32>} : memref<1x32x8x16xf32, #tpu.memory_space<vmem>>, vector<1x1x8x16xf32>,
    return
  }
  func.func @transform_0(%arg0: i32) -> (i32, i32, i32, i32) {
    %c0_i32 = arith.constant 0 : i32
    %c0_i32_0 = arith.constant 0 : i32
    %c0_i32_1 = arith.constant 0 : i32
    %c0_i32_2 = arith.constant 0 : i32
    return %arg0, %c0_i32, %c0_i32_0, %c0_i32_1 : i32, i32, i32, i32
  }
  func.func @transform_1(%arg0: i32) -> (i32, i32, i32) {
    %c0_i32 = arith.constant 0 : i32
    %c0_i32_0 = arith.constant 0 : i32
    %c0_i32_1 = arith.constant 0 : i32
    %c0_i32_2 = arith.constant 0 : i32
    return %c0_i32, %c0_i32_0, %c0_i32_1 : i32, i32, i32
  }
  func.func @transform_2(%arg0: i32) -> (i32, i32) {
    %c0_i32 = arith.constant 0 : i32
    %c0_i32_0 = arith.constant 0 : i32
    %c0_i32_1 = arith.constant 0 : i32
    return %c0_i32, %c0_i32_0 : i32, i32
  }
  func.func @transform_3(%arg0: i32) -> (i32, i32, i32) {
    %c0_i32 = arith.constant 0 : i32
    %c0_i32_0 = arith.constant 0 : i32
    %c0_i32_1 = arith.constant 0 : i32
    %c0_i32_2 = arith.constant 0 : i32
    return %c0_i32, %c0_i32_0, %c0_i32_1 : i32, i32, i32
  }
  func.func @transform_4(%arg0: i32) -> (i32, i32) {
    %c0_i32 = arith.constant 0 : i32
    %c0_i32_0 = arith.constant 0 : i32
    %c0_i32_1 = arith.constant 0 : i32
    return %c0_i32, %c0_i32_0 : i32, i32
  }
  func.func @transform_5(%arg0: i32) -> (i32, i32, i32) {
    %c0_i32 = arith.constant 0 : i32
    %c0_i32_0 = arith.constant 0 : i32
    %c0_i32_1 = arith.constant 0 : i32
    %c0_i32_2 = arith.constant 0 : i32
    return %c0_i32, %c0_i32_0, %c0_i32_1 : i32, i32, i32
  }
  func.func @transform_6(%arg0: i32) -> (i32, i32) {
    %c0_i32 = arith.constant 0 : i32
    %c0_i32_0 = arith.constant 0 : i32
    %c0_i32_1 = arith.constant 0 : i32
    return %c0_i32, %c0_i32_0 : i32, i32
  }
  func.func @transform_7(%arg0: i32) -> (i32, i32, i32, i32) {
    %c0_i32 = arith.constant 0 : i32
    %c0_i32_0 = arith.constant 0 : i32
    %c0_i32_1 = arith.constant 0 : i32
    %c0_i32_2 = arith.constant 0 : i32
    return %arg0, %c0_i32, %c0_i32_0, %c0_i32_1 : i32, i32, i32, i32
  }
}

</mosaic_0001>

<bundles_post_ra>
// kernel: vae_decoder_forward.1
= control target key start
LH: loop header
LB: loop body
LE: loop exit
PB: predicated region body
PF: predicated region fallthrough
CT: control target
= control target key end

     0   :  { %12 = vsyncpa [#allocation6], 0  ;;  %s22185_s24 = smov 0   ;;  %s26139_s0 = inlined_call_operand.vmem [shape: f32[2,8,8,64], index: 0, kind: input, shape index: {}]   ;;  %s26140_s1 = inlined_call_operand.vmem [shape: f32[9,64,128], index: 1, kind: input, shape index: {}]   ;;  %s26141_s2 = inlined_call_operand.vmem [shape: f32[1,128], index: 2, kind: input, shape index: {}]   ;;  %s26142_s3 = inlined_call_operand.hbm [shape: f32[9,64,128], index: 3, kind: input, shape index: {}]   ;;  %s26143_s4 = inlined_call_operand.vmem [shape: f32[1,128], index: 4, kind: input, shape index: {}]   ;;  %s26144_s5 = inlined_call_operand.vmem [shape: f32[9,64,16], index: 5, kind: input, shape index: {}]   ;;  %s26145_s6 = inlined_call_operand.vmem [shape: f32[1,16], index: 6, kind: input, shape index: {}]   ;;  %s26146_s7 = inlined_call_operand.vmem [shape: f32[2,32,8,16], index: 7, kind: output, shape index: {}]  }
   0x1 LB: > { %s22191_s25 = sadd.s32 4294967295, %s22138_s24   ;;  %p14542_p0 = scmp.ge.s32.totalorder %s22138_s24, 1  ;;  %s22138_s24 = sphi %s22185_s24, %s18_s24  }
   0x2   : > { %p201_p1 = scmp.lt.s32.totalorder %s22138_s24, 3  ;;  %s22140_s26 = smov [#allocation5]  }
   0x3   : > { %s219_s27 = sshll.u32 %s22140_s26, 4  ;;  %p26147_p3 = scmp.eq.s32.totalorder %s22191_s25, 0  ;;  %s220_s27 = int_to_ptr.vmem [resolvable:$true] %s219_s27 }
   0x4   : > { %p22195_p2 = pnand %p14542_p0, %p201_p1  ;;  %s22100_s9 = scalar_lea.hbm %s26142_s3, 9216 }
   0x5   : > { %p22101_p6 = scmp.ne.s32.totalorder %s26142_s3, %s22100_s9  ;;  %p22107_p10 = scmp.lt.u32.totalorder %s22100_s9, %s26142_s3 }
   0x6   : > { %s26228_s28 = scalar_select %p22195_p2, 1, 0 }
   0x7   : > { %p21952_p4 = pneg %p22195_p2 }
   0x9   : > { %p22204_p5 = pnand %p26147_p3, %p21952_p4 }
   0xb   : > { %p22102_p7 = pneg %p22204_p5 }
   0xd   : > { %p22103_p8 = pnand %p22102_p7, %p22101_p6 }
   0xf   : > { %p22104_p9 = pneg %p22103_p8 }
  0x11   : > { %p22109_p11 = pnand %p22107_p10, %p22104_p9 }
  0x13   : > { %22112 = shalt.err (!%p22109_p11)
}
  0x14   : > { %s22113_s14 = scalar_lea.vmem %s220_s27, 9216  ;;  %p22121_p1 = scmp.lt.s32.totalorder %s220_s27, %s220_s27 }
  0x15   : > { %p22114_p12 = scmp.ne.s32.totalorder %s220_s27, %s22113_s14  ;;  %p22122_p4 = scmp.lt.s32.totalorder %s22113_s14, %s22113_s14 }
  0x17   : > { %p22116_p13 = pnand %p22114_p12, %p22102_p7  ;;  %p22123_p3 = por %p22122_p4, %p22121_p1 }
  0x19   : > { %p22117_p0 = pneg %p22116_p13 }
  0x1b   : > { %p22124_p2 = pnand %p22123_p3, %p22117_p0 }
  0x1d   : > { %22127 = shalt.err (!%p22124_p2)
}
  0x1e   : > { %s22141_s15 = smov 128   ;;  %s22142_s16 = smov 8  }
  0x1f   : > { %21955 = dma.hbm_to_vmem [thread:$0]  (!%p22204_p5), %s26142_s3, 9216, %s220_s27, [#allocation6], %s22141_s15, %s22141_s15, %s22142_s16  }
  0x20   : > { %p26230_p6 = scmp.ne.s32.totalorder %s26228_s28, 0 }
  0x22   : > { %252 = sbr.rel (%p26230_p6) target bundleno = 1958 (0x7a6), region = 48 }
  0x29   : > { %p26231_p8 = scmp.eq.s32.totalorder %s22191_s25, 0 }
  0x2b   : > { %22133 = dma.done.wait (%p26231_p8), [#allocation6], 9216   ;;  %p26232_p7 = pmov %p26231_p8 }
  0x2c   : > { %vm294_vm0 = vcmask 523264   ;;  %p284_p2 = scmp.lt.s32.totalorder %s22191_s25, 1  ;;  %v22143_v0 = vmov 0.0   ;;  %v406_v1 = vld [vmem:[%s26140_s1] sm:$0xff]  ;;  %v407_v2 = vld [vmem:[%s26140_s1 + $0x8] sm:$0xff]  ;;  %v408_v6 = vld [vmem:[%s26140_s1 + $0x10] sm:$0xff] }
  0x2d   : > { %22135 = vsyncadd (%p26232_p7), [#allocation6], 4294958080  ;;  %295 = vst.msk [vmem:[#allocation2] sm:$0xff] %vm294_vm0, %v22143_v0  ;;  %v14647_v3 = vld [vmem:[%s26140_s1 + $0x100] sm:$0xff]  ;;  %v19988_v4 = vpack.c.bf16 %v407_v2, %v406_v1  ;;  %v14648_v5 = vld [vmem:[%s26140_s1 + $0x108] sm:$0xff]  ;;  %s22144_s27 = smov 64  }
  0x2e   : > { %306 = vst.msk [vmem:[#allocation2 + $0x8] sm:$0xff] %vm294_vm0, %v22143_v0  ;;  %296 = vst.msk [vmem:[#allocation2 + $0x10] sm:$0xff] %vm294_vm0, %v22143_v0  ;;  %s26392_s25 = smov (!%p284_p2, %s22191_s25), 1  ;;  %v409_v7 = vld [vmem:[%s26140_s1 + $0x18] sm:$0xff]  ;;  %v22397_v8 = vpack.c.bf16 %v14648_v5, %v14647_v3  ;;  %v14649_v10 = vld [vmem:[%s26140_s1 + $0x110] sm:$0xff]  ;;  %vm8430_vm1 = vcmask 130048  }
  0x2f   : > { %297 = vst.msk [vmem:[#allocation2 + $0x20] sm:$0xff] %vm294_vm0, %v22143_v0  ;;  %298 = vst.msk [vmem:[#allocation2 + $0x30] sm:$0xff] %vm294_vm0, %v22143_v0  ;;  %s15954_s19 = sshll.u32 %s26392_s25, 6  ;;  %v19992_v9 = vpack.c.bf16 %v409_v7, %v408_v6  ;;  %v14650_v11 = vld [vmem:[%s26140_s1 + $0x118] sm:$0xff]  ;;  %v410_v12 = vld [vmem:[%s26140_s1 + $0x20] sm:$0xff]  ;;  %19989 = vmatprep.subr.bf16.mxu1 %v19988_v4  ;;  %s15955_s11 = sshll.u32 %s26392_s25, 8 }
  0x30   : > { %299 = vst.msk [vmem:[#allocation2 + $0x40] sm:$0xff] %vm294_vm0, %v22143_v0  ;;  %300 = vst.msk [vmem:[#allocation2 + $0x50] sm:$0xff] %vm294_vm0, %v22143_v0  ;;  %s22411_s20 = scalar_lea.vmem %s26139_s0, %s15954_s19  ;;  %v22413_v13 = vpack.c.bf16 %v14650_v11, %v14649_v10  ;;  %v411_v14 = vld [vmem:[%s26140_s1 + $0x28] sm:$0xff]  ;;  %v14651_v15 = vld [vmem:[%s26140_s1 + $0x120] sm:$0xff]  ;;  %20053 = vmatprep.subr.bf16.mxu0 %v22397_v8  ;;  %19991 = vmatpush3.bf16.msra.mxu1 %v19988_v4  ;;  %s25905_s13 = scalar_lea.vmem %s26146_s7, %s15955_s11 }
  0x31   : > { %301 = vst.msk [vmem:[#allocation2 + $0x60] sm:$0xff] %vm294_vm0, %v22143_v0  ;;  %302 = vst.msk [vmem:[#allocation2 + $0x70] sm:$0xff] %vm294_vm0, %v22143_v0  ;;  %v14652_v16 = vld [vmem:[%s26140_s1 + $0x128] sm:$0xff]  ;;  %20055 = vmatpush3.bf16.msra.mxu0 %v22397_v8  ;;  %19993 = vmatprep.subr.bf16.mxu1 %v19992_v9  ;;  %v19996_v17 = vpack.c.bf16 %v411_v14, %v410_v12  ;;  %v366_v19 = vld [vmem:[%s22411_s20] sm:$0xff] }
  0x32   : > { %303 = vst.msk [vmem:[#allocation2 + $0x80] sm:$0xff] %vm294_vm0, %v22143_v0  ;;  %304 = vst.msk [vmem:[#allocation2 + $0x90] sm:$0xff] %vm294_vm0, %v22143_v0  ;;  %20057 = vmatprep.subr.bf16.mxu0 %v22413_v13  ;;  %v22428_v20 = vpack.c.bf16 %v14652_v16, %v14651_v15  ;;  %v412_v21 = vld [vmem:[%s26140_s1 + $0x30] sm:$0xff]  ;;  %v413_v22 = vld [vmem:[%s26140_s1 + $0x38] sm:$0xff] }
  0x33   : > { %305 = vst.msk [vmem:[#allocation2 + $0xa0] sm:$0xff] %vm294_vm0, %v22143_v0  ;;  %307 = vst.msk [vmem:[#allocation2 + $0x98] sm:$0xff] %vm294_vm0, %v22143_v0  ;;  %v14653_v23 = vld [vmem:[%s26140_s1 + $0x130] sm:$0xff]  ;;  %v14654_v24 = vld [vmem:[%s26140_s1 + $0x138] sm:$0xff]  ;;  %v20000_v27 = vpack.c.bf16 %v413_v22, %v412_v21 }
  0x34   : > { %308 = vst.msk [vmem:[#allocation3] sm:$0xff] %vm294_vm0, %v22143_v0  ;;  %309 = vst.msk [vmem:[#allocation3 + $0x10] sm:$0xff] %vm294_vm0, %v22143_v0  ;;  %v14551_v25 = vld [vmem:[%s22411_s20 + $0x8] sm:$0xff]  ;;  %19995 = vmatpush3.bf16.msra.mxu1 %v19992_v9  ;;  %v14552_v26 = vld [vmem:[%s22411_s20 + $0x10] sm:$0xff]  ;;  %v22450_v28 = vpack.c.bf16 %v14654_v24, %v14653_v23 }
  0x35   : > { %310 = vst.msk [vmem:[#allocation3 + $0x20] sm:$0xff] %vm294_vm0, %v22143_v0  ;;  %311 = vst.msk [vmem:[#allocation3 + $0x30] sm:$0xff] %vm294_vm0, %v22143_v0  ;;  %v390_v18 = vld [vmem:[#allocation2 + $0x7] sm:$0xff]  ;;  %20059 = vmatpush3.bf16.msra.mxu0 %v22413_v13  ;;  %19997 = vmatprep.subr.bf16.mxu1 %v19996_v17  ;;  %v14553_v30 = vld [vmem:[%s22411_s20 + $0x18] sm:$0xff] }
  0x36   : > { %312 = vst.msk [vmem:[#allocation3 + $0x40] sm:$0xff] %vm294_vm0, %v22143_v0  ;;  %313 = vst.msk [vmem:[#allocation3 + $0x50] sm:$0xff] %vm294_vm0, %v22143_v0  ;;  %17484 = vmatprep.mubr.msk.f32.mxu1 %vm294_vm0, %v390_v18  ;;  %20061 = vmatprep.subr.bf16.mxu0 %v22428_v20  ;;  %v14671_v29 = vld [vmem:[%s26140_s1 + $0x140] sm:$0xff]  ;;  %v14672_v31 = vld [vmem:[%s26140_s1 + $0x148] sm:$0xff] }
  0x37   : > { %314 = vst.msk [vmem:[#allocation3 + $0x60] sm:$0xff] %vm294_vm0, %v22143_v0  ;;  %315 = vst.msk [vmem:[#allocation3 + $0x70] sm:$0xff] %vm294_vm0, %v22143_v0  ;;  %v14575_v32 = vld [vmem:[%s26140_s1 + $0x40] sm:$0xff]  ;;  %v14576_v33 = vld [vmem:[%s26140_s1 + $0x48] sm:$0xff]  ;;  %v20068_v37 = vpack.c.bf16 %v14672_v31, %v14671_v29 }
  0x38   : > { %316 = vst.msk [vmem:[#allocation3 + $0x80] sm:$0xff] %vm294_vm0, %v22143_v0  ;;  %317 = vst.msk [vmem:[#allocation3 + $0x90] sm:$0xff] %vm294_vm0, %v22143_v0  ;;  %19999 = vmatpush3.bf16.msra.mxu1 %v19996_v17  ;;  %v14554_v34 = vld [vmem:[%s22411_s20 + $0x20] sm:$0xff]  ;;  %v20004_v36 = vpack.c.bf16 %v14576_v33, %v14575_v32  ;;  %v14673_v38 = vld [vmem:[%s26140_s1 + $0x150] sm:$0xff] }
  0x39   : > { %318 = vst.msk [vmem:[#allocation3 + $0xa0] sm:$0xff] %vm294_vm0, %v22143_v0  ;;  %319 = vst.msk [vmem:[#allocation3 + $0xb0] sm:$0xff] %vm294_vm0, %v22143_v0  ;;  %20063 = vmatpush3.bf16.msra.mxu0 %v22428_v20  ;;  %20001 = vmatprep.subr.bf16.mxu1 %v20000_v27  ;;  %v14674_v39 = vld [vmem:[%s26140_s1 + $0x158] sm:$0xff]  ;;  %v391_v40 = vld [vmem:[#allocation2 + $0xf] sm:$0xff] }
  0x3a   : > { %320 = vst.msk [vmem:[#allocation3 + $0xc0] sm:$0xff] %vm294_vm0, %v22143_v0  ;;  %321 = vst.msk [vmem:[#allocation3 + $0xd0] sm:$0xff] %vm294_vm0, %v22143_v0  ;;  %20065 = vmatprep.subr.bf16.mxu0 %v22450_v28  ;;  %v14577_v41 = vld [vmem:[%s26140_s1 + $0x50] sm:$0xff]  ;;  %v14578_v42 = vld [vmem:[%s26140_s1 + $0x58] sm:$0xff]  ;;  %v20072_v46 = vpack.c.bf16 %v14674_v39, %v14673_v38 }
  0x3b   : > { %322 = vst.msk [vmem:[#allocation3 + $0xe0] sm:$0xff] %vm294_vm0, %v22143_v0  ;;  %323 = vst.msk [vmem:[#allocation3 + $0xf0] sm:$0xff] %vm294_vm0, %v22143_v0  ;;  %v22487_v43 = vld [vmem:[#allocation2 + $0x20] sm:$0xff]  ;;  %v14676_v48 = vld [vmem:[%s26140_s1 + $0x168] sm:$0xff]  ;;  %v20008_v49 = vpack.c.bf16 %v14578_v42, %v14577_v41 }
  0x3c   : > { %324 = vst.msk [vmem:[#allocation3 + $0x100] sm:$0xff] %vm294_vm0, %v22143_v0  ;;  %325 = vst.msk [vmem:[#allocation3 + $0x110] sm:$0xff] %vm294_vm0, %v22143_v0  ;;  %20003 = vmatpush3.bf16.msra.mxu1 %v20000_v27  ;;  %v14675_v47 = vld [vmem:[%s26140_s1 + $0x160] sm:$0xff]  ;;  %v14555_v50 = vld [vmem:[%s22411_s20 + $0x28] sm:$0xff] }
  0x3d   : > { %326 = vst.msk [vmem:[#allocation3 + $0x120] sm:$0xff] %vm294_vm0, %v22143_v0  ;;  %327 = vst.msk [vmem:[#allocation3 + $0x8] sm:$0xff] %vm294_vm0, %v22143_v0  ;;  %20067 = vmatpush3.bf16.msra.mxu0 %v22450_v28  ;;  %20005 = vmatprep.subr.bf16.mxu1 %v20004_v36  ;;  %v14579_v52 = vld [vmem:[%s26140_s1 + $0x60] sm:$0xff]  ;;  %v14580_v53 = vld [vmem:[%s26140_s1 + $0x68] sm:$0xff]  ;;  %v20076_v57 = vpack.c.bf16 %v14676_v48, %v14675_v47 }
  0x3e   : > { %328 = vst.msk [vmem:[#allocation3 + $0x118] sm:$0xff] %vm294_vm0, %v22143_v0  ;;  %329 = vst.msk [vmem:[#allocation4] sm:$0xff] %vm294_vm0, %v22143_v0  ;;  %20069 = vmatprep.subr.bf16.mxu0 %v20068_v37  ;;  %v22516_v54 = vld [vmem:[#allocation2 + $0x30] sm:$0xff]  ;;  %v14678_v60 = vld [vmem:[%s26140_s1 + $0x178] sm:$0xff]  ;;  %v20012_v61 = vpack.c.bf16 %v14580_v53, %v14579_v52 }
  0x3f   : > { %330 = vst.msk [vmem:[#allocation4 + $0x10] sm:$0xff] %vm294_vm0, %v22143_v0  ;;  %331 = vst.msk [vmem:[#allocation4 + $0x20] sm:$0xff] %vm294_vm0, %v22143_v0  ;;  %17485 = vmatmul.mubr.msk.f32.vlgmr.msra.gmra.mrb[0].mxu1 %vm294_vm0, %v391_v40  ;;  %v14556_v58 = vld [vmem:[%s22411_s20 + $0x30] sm:$0xff]  ;;  %v22546_v1 = vld [vmem:[#allocation2 + $0x40] sm:$0xff] }
  0x40   : > { %332 = vst.msk [vmem:[#allocation4 + $0x30] sm:$0xff] %vm294_vm0, %v22143_v0  ;;  %333 = vst.msk [vmem:[#allocation4 + $0x40] sm:$0xff] %vm294_vm0, %v22143_v0  ;;  %20007 = vmatpush3.bf16.msra.mxu1 %v20004_v36  ;;  %v14677_v59 = vld [vmem:[%s26140_s1 + $0x170] sm:$0xff]  ;;  %v14557_v3 = vld [vmem:[%s22411_s20 + $0x38] sm:$0xff] }
  0x41   : > { %334 = vst.msk [vmem:[#allocation4 + $0x50] sm:$0xff] %vm294_vm0, %v22143_v0  ;;  %335 = vst.msk [vmem:[#allocation4 + $0x60] sm:$0xff] %vm294_vm0, %v22143_v0  ;;  %20009 = vmatprep.subr.bf16.mxu1 %v20008_v49  ;;  %v14581_v63 = vld [vmem:[%s26140_s1 + $0x70] sm:$0xff]  ;;  %v20080_v5 = vpack.c.bf16 %v14678_v60, %v14677_v59  ;;  %v14695_v6 = vld [vmem:[%s26140_s1 + $0x180] sm:$0xff] }
  0x42   : > { %336 = vst.msk [vmem:[#allocation4 + $0x70] sm:$0xff] %vm294_vm0, %v22143_v0  ;;  %337 = vst.msk [vmem:[#allocation4 + $0x80] sm:$0xff] %vm294_vm0, %v22143_v0  ;;  %v14696_v7 = vld [vmem:[%s26140_s1 + $0x188] sm:$0xff]  ;;  %v14599_v11 = vld [vmem:[%s26140_s1 + $0x80] sm:$0xff] }
  0x43   : > { %338 = vst.msk [vmem:[#allocation4 + $0x90] sm:$0xff] %vm294_vm0, %v22143_v0  ;;  %339 = vst.msk [vmem:[#allocation4 + $0xa0] sm:$0xff] %vm294_vm0, %v22143_v0  ;;  %v14600_v12 = vld [vmem:[%s26140_s1 + $0x88] sm:$0xff]  ;;  %v22576_v14 = vld [vmem:[#allocation2 + $0x50] sm:$0xff]  ;;  %v20084_v17 = vpack.c.bf16 %v14696_v7, %v14695_v6 }
  0x44   : > { %340 = vst.msk [vmem:[#allocation4 + $0xb0] sm:$0xff] %vm294_vm0, %v22143_v0  ;;  %341 = vst.msk [vmem:[#allocation4 + $0xc0] sm:$0xff] %vm294_vm0, %v22143_v0  ;;  %20011 = vmatpush3.bf16.msra.mxu1 %v20008_v49  ;;  %v14697_v18 = vld [vmem:[%s26140_s1 + $0x190] sm:$0xff]  ;;  %v22590_v21 = vpack.c.bf16 %v14600_v12, %v14599_v11  ;;  %v14699_v27 = vld [vmem:[%s26140_s1 + $0x1a0] sm:$0xff] }
  0x45   : > { %342 = vst.msk [vmem:[#allocation4 + $0xd0] sm:$0xff] %vm294_vm0, %v22143_v0  ;;  %343 = vst.msk [vmem:[#allocation4 + $0xe0] sm:$0xff] %vm294_vm0, %v22143_v0  ;;  %20013 = vmatprep.subr.bf16.mxu1 %v20012_v61  ;;  %v14700_v29 = vld [vmem:[%s26140_s1 + $0x1a8] sm:$0xff]  ;;  %v14701_v36 = vld [vmem:[%s26140_s1 + $0x1b0] sm:$0xff] }
  0x46   : > { %344 = vst.msk [vmem:[#allocation4 + $0xf0] sm:$0xff] %vm294_vm0, %v22143_v0  ;;  %345 = vst.msk [vmem:[#allocation4 + $0x100] sm:$0xff] %vm294_vm0, %v22143_v0  ;;  %v14720_v47 = vld [vmem:[%s26140_s1 + $0x1c8] sm:$0xff]  ;;  %v606_v59 = vld [vmem:[#allocation2 + $0x10] sm:$0xff] }
  0x47   : > { %346 = vst.msk [vmem:[#allocation4 + $0x110] sm:$0xff] %vm294_vm0, %v22143_v0  ;;  %347 = vst.msk [vmem:[#allocation4 + $0x120] sm:$0xff] %vm294_vm0, %v22143_v0 }
  0x48   : > { %348 = vst.msk [vmem:[#allocation4 + $0x130] sm:$0xff] %vm294_vm0, %v22143_v0  ;;  %349 = vst.msk [vmem:[#allocation4 + $0x140] sm:$0xff] %vm294_vm0, %v22143_v0  ;;  %20015 = vmatpush3.bf16.msra.mxu1 %v20012_v61 }
  0x49   : > { %350 = vst.msk [vmem:[#allocation4 + $0x150] sm:$0xff] %vm294_vm0, %v22143_v0  ;;  %351 = vst.msk [vmem:[#allocation4 + $0x160] sm:$0xff] %vm294_vm0, %v22143_v0 }
  0x4a   : > { %352 = vst.msk [vmem:[#allocation4 + $0x170] sm:$0xff] %vm294_vm0, %v22143_v0  ;;  %353 = vst.msk [vmem:[#allocation4 + $0x180] sm:$0xff] %vm294_vm0, %v22143_v0 }
  0x4b   : > { %354 = vst.msk [vmem:[#allocation4 + $0x190] sm:$0xff] %vm294_vm0, %v22143_v0  ;;  %355 = vst.msk [vmem:[#allocation4 + $0x1a0] sm:$0xff] %vm294_vm0, %v22143_v0 }
  0x4c   : > { %356 = vst.msk [vmem:[#allocation4 + $0x1b0] sm:$0xff] %vm294_vm0, %v22143_v0  ;;  %357 = vst.msk [vmem:[#allocation4 + $0x1c0] sm:$0xff] %vm294_vm0, %v22143_v0 }
  0x4d   : > { %358 = vst.msk [vmem:[#allocation4 + $0x1d0] sm:$0xff] %vm294_vm0, %v22143_v0  ;;  %359 = vst.msk [vmem:[#allocation4 + $0x1e0] sm:$0xff] %vm294_vm0, %v22143_v0 }
  0x4e   : > { %360 = vst.msk [vmem:[#allocation4 + $0x1f0] sm:$0xff] %vm294_vm0, %v22143_v0  ;;  %361 = vst.msk [vmem:[#allocation4 + $0x200] sm:$0xff] %vm294_vm0, %v22143_v0 }
  0x4f   : > { %362 = vst.msk [vmem:[#allocation4 + $0x210] sm:$0xff] %vm294_vm0, %v22143_v0  ;;  %363 = vst.msk [vmem:[#allocation4 + $0x220] sm:$0xff] %vm294_vm0, %v22143_v0 }
  0x50   : > { %364 = vst.msk [vmem:[#allocation4 + $0x8] sm:$0xff] %vm294_vm0, %v22143_v0  ;;  %365 = vst.msk [vmem:[#allocation4 + $0x218] sm:$0xff] %vm294_vm0, %v22143_v0  ;;  %v14582_v0 = vld [vmem:[%s26140_s1 + $0x78] sm:$0xff] }
  0x51   : > { %367 = vst.msk [vmem:[#allocation2 + $0x18] sm:$0xff] %vm294_vm0, %v366_v19  ;;  %370 = vst.msk [vmem:[#allocation2 + $0x28] sm:$0xff] %vm294_vm0, %v14551_v25  ;;  %v20016_v9 = vpack.c.bf16 %v14582_v0, %v14581_v63  ;;  %v14698_v19 = vld [vmem:[%s26140_s1 + $0x198] sm:$0xff]  ;;  %v14603_v0 = vld [vmem:[%s26140_s1 + $0xa0] sm:$0xff] }
  0x52   : > { %373 = vst.msk [vmem:[#allocation2 + $0x38] sm:$0xff] %vm294_vm0, %v14552_v26  ;;  %376 = vst.msk [vmem:[#allocation2 + $0x48] sm:$0xff] %vm294_vm0, %v14553_v30  ;;  %v20088_v26 = vpack.c.bf16 %v14698_v19, %v14697_v18  ;;  %v14624_v18 = vld [vmem:[%s26140_s1 + $0xc8] sm:$0xff]  ;;  %v22738_v19 = vld [vmem:[#allocation2 + $0x91] sm:$0xff] }
  0x53   : > { %379 = vst.msk [vmem:[#allocation2 + $0x58] sm:$0xff] %vm294_vm0, %v14554_v34  ;;  %382 = vst.msk [vmem:[#allocation2 + $0x68] sm:$0xff] %vm294_vm0, %v14555_v50  ;;  %20017 = vmatprep.subr.bf16.mxu1 %v20016_v9  ;;  %v20092_v34 = vpack.c.bf16 %v14700_v29, %v14699_v27  ;;  %v605_v50 = vld [vmem:[#allocation2 + $0x8] sm:$0xff]  ;;  %v14722_v27 = vld [vmem:[%s26140_s1 + $0x1d8] sm:$0xff] }
  0x54   : > { %385 = vst.msk [vmem:[#allocation2 + $0x78] sm:$0xff] %vm294_vm0, %v14556_v58  ;;  %388 = vst.msk [vmem:[#allocation2 + $0x88] sm:$0xff] %vm294_vm0, %v14557_v3  ;;  %20019 = vmatpush3.bf16.msra.mxu1 %v20016_v9  ;;  %v14602_v58 = vld [vmem:[%s26140_s1 + $0x98] sm:$0xff]  ;;  %v14604_v3 = vld [vmem:[%s26140_s1 + $0xa8] sm:$0xff] }
  0x55   : > { %20021 = vmatprep.subr.bf16.mxu1 %v22590_v21  ;;  %v20028_v7 = vpack.c.bf16 %v14604_v3, %v14603_v0  ;;  %v14605_v9 = vld [vmem:[%s26140_s1 + $0xb0] sm:$0xff]  ;;  %v14744_v0 = vld [vmem:[%s26140_s1 + $0x208] sm:$0xff]  ;;  %v22804_v3 = vld [vmem:[#allocation2 + $0x80] sm:$0xff] }
  0x58   : > { %v22468_v35 = vld [vmem:[#allocation2 + $0x18] sm:$0xff]  ;;  %v22491_v45 = vld [vmem:[#allocation2 + $0x28] sm:$0xff] }
  0x59   : > { %17644 = vmatprep.mubr.msk.f32.mxu0 %vm294_vm0, %v22468_v35  ;;  %v22489_v44 = vld [vmem:[#allocation2 + $0x17] sm:$0xff]  ;;  %v22505_v51 = vld [vmem:[#allocation2 + $0x1f] sm:$0xff]  ;;  %v22518_v55 = vld [vmem:[#allocation2 + $0x27] sm:$0xff] }
  0x5a   : > { %17645 = vmatmul.mubr.msk.f32.vlgmr.msra.gmra.mrb[0].mxu0 %vm294_vm0, %v22487_v43  ;;  %17487 = vmatprep.mubr.msk.f32.mxu1 %vm294_vm0, %v22489_v44  ;;  %v22520_v56 = vld [vmem:[#allocation2 + $0x38] sm:$0xff]  ;;  %v22536_v62 = vld [vmem:[#allocation2 + $0x2f] sm:$0xff]  ;;  %v22578_v15 = vld [vmem:[#allocation2 + $0x47] sm:$0xff] }
  0x5b   : > { %20071 = vmatpush3.bf16.msra.mxu0 %v20068_v37  ;;  %17647 = vmatprep.mubr.msk.f32.mxu0 %vm294_vm0, %v22491_v45  ;;  %v22548_v2 = vld [vmem:[#allocation2 + $0x37] sm:$0xff]  ;;  %v22551_v4 = vld [vmem:[#allocation2 + $0x48] sm:$0xff]  ;;  %v22566_v10 = vld [vmem:[#allocation2 + $0x3f] sm:$0xff] }
  0x5c   : > { %20073 = vmatprep.subr.bf16.mxu0 %v20072_v46  ;;  %17488 = vmatmul.mubr.msk.f32.gmra.mrb[2].mxu1 %vm294_vm0, %v22505_v51  ;;  %v22580_v16 = vld [vmem:[#allocation2 + $0x19] sm:$0xff]  ;;  %v22596_v22 = vld [vmem:[#allocation2 + $0x4f] sm:$0xff]  ;;  %v22600_v23 = vld [vmem:[#allocation2 + $0x21] sm:$0xff] }
  0x5d   : > { %17490 = vmatprep.mubr.msk.f32.mxu1 %vm294_vm0, %v22518_v55  ;;  %v22602_v24 = vld [vmem:[#allocation2 + $0x57] sm:$0xff]  ;;  %v22604_v25 = vld [vmem:[#allocation2 + $0x29] sm:$0xff]  ;;  %v22619_v30 = vld [vmem:[#allocation2 + $0x5f] sm:$0xff] }
  0x5e   : > { %17648 = vmatmul.mubr.msk.f32.gmra.mrb[2].mxu0 %vm294_vm0, %v22516_v54  ;;  %v22623_v31 = vld [vmem:[#allocation2 + $0x31] sm:$0xff]  ;;  %v22625_v32 = vld [vmem:[#allocation2 + $0x67] sm:$0xff]  ;;  %v22627_v33 = vld [vmem:[#allocation2 + $0x39] sm:$0xff] }
  0x5f   : > { %20075 = vmatpush3.bf16.msra.mxu0 %v20072_v46  ;;  %17650 = vmatprep.mubr.msk.f32.mxu0 %vm294_vm0, %v22520_v56  ;;  %v14702_v37 = vld [vmem:[%s26140_s1 + $0x1b8] sm:$0xff]  ;;  %v22641_v38 = vld [vmem:[#allocation2 + $0x6f] sm:$0xff]  ;;  %v22645_v39 = vld [vmem:[#allocation2 + $0x41] sm:$0xff] }
  0x60   : > { %20077 = vmatprep.subr.bf16.mxu0 %v20076_v57  ;;  %17491 = vmatmul.mubr.msk.f32.gmra.mrb[4].mxu1 %vm294_vm0, %v22536_v62  ;;  %v22647_v40 = vld [vmem:[#allocation2 + $0x77] sm:$0xff]  ;;  %v22649_v41 = vld [vmem:[#allocation2 + $0x49] sm:$0xff]  ;;  %v20096_v42 = vpack.c.bf16 %v14702_v37, %v14701_v36  ;;  %v14719_v46 = vld [vmem:[%s26140_s1 + $0x1c0] sm:$0xff] }
  0x61   : > { %17493 = vmatprep.mubr.msk.f32.mxu1 %vm294_vm0, %v22548_v2  ;;  %v22663_v48 = vld [vmem:[#allocation2 + $0x7f] sm:$0xff]  ;;  %v22667_v49 = vld [vmem:[#allocation2 + $0x51] sm:$0xff]  ;;  %v20100_v53 = vpack.c.bf16 %v14720_v47, %v14719_v46  ;;  %v22686_v61 = vld [vmem:[#allocation2 + $0x69] sm:$0xff] }
  0x62   : > { %17651 = vmatmul.mubr.msk.f32.gmra.mrb[4].mxu0 %vm294_vm0, %v22546_v1  ;;  %v22669_v52 = vld [vmem:[#allocation2 + $0x59] sm:$0xff]  ;;  %v22684_v60 = vld [vmem:[#allocation2 + $0x61] sm:$0xff] }
  0x63   : > { %20079 = vmatpush3.bf16.msra.mxu0 %v20076_v57  ;;  %17653 = vmatprep.mubr.msk.f32.mxu0 %vm294_vm0, %v22551_v4  ;;  %v14601_v57 = vld [vmem:[%s26140_s1 + $0x90] sm:$0xff]  ;;  %v22704_v6 = vld [vmem:[#allocation2 + $0x79] sm:$0xff]  ;;  %v22720_v11 = vld [vmem:[#allocation2 + $0x81] sm:$0xff] }
  0x64   : > { %20081 = vmatprep.subr.bf16.mxu0 %v20080_v5  ;;  %17494 = vmatmul.mubr.msk.f32.gmra.mrb[6].mxu1 %vm294_vm0, %v22566_v10  ;;  %v20024_v63 = vpack.c.bf16 %v14602_v58, %v14601_v57  ;;  %v22754_v29 = vld [vmem:[#allocation2 + $0x58] sm:$0xff]  ;;  %v14723_v36 = vld [vmem:[%s26140_s1 + $0x1e0] sm:$0xff]  ;;  %v14724_v37 = vld [vmem:[%s26140_s1 + $0x1e8] sm:$0xff] }
  0x65   : > { %17496 = vmatprep.mubr.msk.f32.mxu1 %vm294_vm0, %v22578_v15  ;;  %v22772_v46 = vld [vmem:[#allocation2 + $0x68] sm:$0xff]  ;;  %v20108_v47 = vpack.c.bf16 %v14724_v37, %v14723_v36  ;;  %v14726_v57 = vld [vmem:[%s26140_s1 + $0x1f8] sm:$0xff]  ;;  %v14629_v37 = vld [vmem:[%s26140_s1 + $0xf0] sm:$0xff] }
  0x66   : > { %17654 = vmatmul.mubr.msk.f32.gmra.mrb[6].mxu0 %vm294_vm0, %v22576_v14  ;;  %v22790_v58 = vld [vmem:[#allocation2 + $0x78] sm:$0xff] }
  0x67   : > { %20083 = vmatpush3.bf16.msra.mxu0 %v20080_v5  ;;  %17684 = vmatprep.mubr.msk.f32.mxu0 %vm294_vm0, %v22580_v16  ;;  %v22701_v5 = vld [vmem:[#allocation2 + $0x71] sm:$0xff] }
  0x68   : > { %20085 = vmatprep.subr.bf16.mxu0 %v20084_v17  ;;  %17497 = vmatmul.mubr.msk.f32.gmra.mrb[8].mxu1 %vm294_vm0, %v22596_v22 }
  0x69   : > { %17499 = vmatprep.mubr.msk.f32.mxu1 %vm294_vm0, %v22602_v24 }
  0x6a   : > { %17685 = vmatmul.mubr.msk.f32.vlgmr.msra.gmra.mrb[0].mxu0 %vm294_vm0, %v22600_v23 }
  0x6b   : > { %20087 = vmatpush3.bf16.msra.mxu0 %v20084_v17  ;;  %17687 = vmatprep.mubr.msk.f32.mxu0 %vm294_vm0, %v22604_v25  ;;  %v14623_v17 = vld [vmem:[%s26140_s1 + $0xc0] sm:$0xff] }
  0x6c   : > { %20089 = vmatprep.subr.bf16.mxu0 %v20088_v26  ;;  %17500 = vmatmul.mubr.msk.f32.gmra.mrb[10].mxu1 %vm294_vm0, %v22619_v30 }
  0x6d   : > { %17502 = vmatprep.mubr.msk.f32.mxu1 %vm294_vm0, %v22625_v32 }
  0x6e   : > { %17688 = vmatmul.mubr.msk.f32.gmra.mrb[2].mxu0 %vm294_vm0, %v22623_v31 }
  0x6f   : > { %17690 = vmatprep.mubr.msk.f32.mxu0 %vm294_vm0, %v22627_v33  ;;  %20091 = vmatpush3.bf16.msra.mxu0 %v20088_v26  ;;  %v14721_v26 = vld [vmem:[%s26140_s1 + $0x1d0] sm:$0xff] }
  0x70   : > { %20093 = vmatprep.subr.bf16.mxu0 %v20092_v34  ;;  %17503 = vmatmul.mubr.msk.f32.gmra.mrb[12].mxu1 %vm294_vm0, %v22641_v38 }
  0x71   : > { %17505 = vmatprep.mubr.msk.f32.mxu1 %vm294_vm0, %v22647_v40 }
  0x72   : > { %17691 = vmatmul.mubr.msk.f32.gmra.mrb[4].mxu0 %vm294_vm0, %v22645_v39 }
  0x73   : > { %17693 = vmatprep.mubr.msk.f32.mxu0 %vm294_vm0, %v22649_v41  ;;  %20095 = vmatpush3.bf16.msra.mxu0 %v20092_v34  ;;  %v20104_v34 = vpack.c.bf16 %v14722_v27, %v14721_v26  ;;  %v14627_v26 = vld [vmem:[%s26140_s1 + $0xe0] sm:$0xff]  ;;  %v14628_v27 = vld [vmem:[%s26140_s1 + $0xe8] sm:$0xff] }
  0x74   : > { %20097 = vmatprep.subr.bf16.mxu0 %v20096_v42  ;;  %17506 = vmatmul.mubr.msk.f32.gmra.mrb[14].mxu1 %vm294_vm0, %v22663_v48  ;;  %v20044_v36 = vpack.c.bf16 %v14628_v27, %v14627_v26 }
  0x75   : > { %17524 = vmatprep.mubr.msk.f32.mxu1 %vm294_vm0, %v605_v50  ;;  %v14725_v50 = vld [vmem:[%s26140_s1 + $0x1f0] sm:$0xff] }
  0x76   : > { %17694 = vmatmul.mubr.msk.f32.gmra.mrb[6].mxu0 %vm294_vm0, %v22667_v49 }
  0x77   : > { %17696 = vmatprep.mubr.msk.f32.mxu0 %vm294_vm0, %v22669_v52  ;;  %20099 = vmatpush3.bf16.msra.mxu0 %v20096_v42  ;;  %v22768_v42 = vld [vmem:[#allocation2 + $0x60] sm:$0xff] }
  0x78   : > { %20101 = vmatprep.subr.bf16.mxu0 %v20100_v53  ;;  %17525 = vmatmul.mubr.msk.f32.vlgmr.msra.gmra.mrb[0].mxu1 %vm294_vm0, %v606_v59  ;;  %v20112_v59 = vpack.c.bf16 %v14726_v57, %v14725_v50  ;;  %v1710_v50 = vld [vmem:[#allocation2 + $0x9f] sm:$0xff]  ;;  %v14745_v57 = vld [vmem:[%s26140_s1 + $0x210] sm:$0xff] }
  0x79   : > { %17527 = vmatprep.mubr.msk.f32.mxu1 %vm294_vm0, %v22468_v35  ;;  %20023 = vmatpush3.bf16.msra.mxu1 %v22590_v21  ;;  %v14606_v35 = vld [vmem:[%s26140_s1 + $0xb8] sm:$0xff]  ;;  %v20036_v21 = vpack.c.bf16 %v14624_v18, %v14623_v17 }
  0x7a   : > { %17697 = vmatmul.mubr.msk.f32.gmra.mrb[8].mxu0 %vm294_vm0, %v22684_v60  ;;  %20025 = vmatprep.subr.bf16.mxu1 %v20024_v63  ;;  %v20032_v12 = vpack.c.bf16 %v14606_v35, %v14605_v9  ;;  %v14625_v35 = vld [vmem:[%s26140_s1 + $0xd0] sm:$0xff] }
  0x7b   : > { %17699 = vmatprep.mubr.msk.f32.mxu0 %vm294_vm0, %v22686_v61  ;;  %v824_v17 = vld [vmem:[#allocation2 + $0x11] sm:$0xff] }
  0x7c   : > { %17528 = vmatmul.mubr.msk.f32.gmra.mrb[2].mxu1 %vm294_vm0, %v22487_v43  ;;  %v22722_v43 = vld [vmem:[#allocation2 + $0x89] sm:$0xff] }
  0x7d   : > { %17530 = vmatprep.mubr.msk.f32.mxu1 %vm294_vm0, %v22491_v45  ;;  %20027 = vmatpush3.bf16.msra.mxu1 %v20024_v63  ;;  %v14743_v63 = vld [vmem:[%s26140_s1 + $0x200] sm:$0xff] }
  0x7e   : > { %17700 = vmatmul.mubr.msk.f32.gmra.mrb[10].mxu0 %vm294_vm0, %v22701_v5  ;;  %20029 = vmatprep.subr.bf16.mxu1 %v20028_v7  ;;  %v20116_v9 = vpack.c.bf16 %v14744_v0, %v14743_v63  ;;  %v14747_v0 = vld [vmem:[%s26140_s1 + $0x220] sm:$0xff] }
  0x7f   : > { %17702 = vmatprep.mubr.msk.f32.mxu0 %vm294_vm0, %v22704_v6 }
  0x80   : > { %17531 = vmatmul.mubr.msk.f32.gmra.mrb[4].mxu1 %vm294_vm0, %v22516_v54 }
  0x81   : > { %17533 = vmatprep.mubr.msk.f32.mxu1 %vm294_vm0, %v22520_v56  ;;  %20031 = vmatpush3.bf16.msra.mxu1 %v20028_v7  ;;  %v823_v7 = vld [vmem:[#allocation2 + $0x9] sm:$0xff] }
  0x82   : > { %17703 = vmatmul.mubr.msk.f32.gmra.mrb[12].mxu0 %vm294_vm0, %v22720_v11  ;;  %20033 = vmatprep.subr.bf16.mxu1 %v20032_v12 }
  0x83   : > { %17705 = vmatprep.mubr.msk.f32.mxu0 %vm294_vm0, %v22722_v43 }
  0x84   : > { %17534 = vmatmul.mubr.msk.f32.gmra.mrb[6].mxu1 %vm294_vm0, %v22546_v1 }
  0x85   : > { %17536 = vmatprep.mubr.msk.f32.mxu1 %vm294_vm0, %v22551_v4  ;;  %20035 = vmatpush3.bf16.msra.mxu1 %v20032_v12  ;;  %v14626_v12 = vld [vmem:[%s26140_s1 + $0xd8] sm:$0xff] }
  0x86   : > { %17706 = vmatmul.mubr.msk.f32.gmra.mrb[14].mxu0 %vm294_vm0, %v22738_v19  ;;  %20037 = vmatprep.subr.bf16.mxu1 %v20036_v21  ;;  %v20040_v18 = vpack.c.bf16 %v14626_v12, %v14625_v35  ;;  %v14749_v35 = vld [vmem:[%s26140_s1 + $0x230] sm:$0xff] }
  0x87   : > { %17724 = vmatprep.mubr.msk.f32.mxu0 %vm294_vm0, %v22518_v55 }
  0x88   : > { %17537 = vmatmul.mubr.msk.f32.gmra.mrb[8].mxu1 %vm294_vm0, %v22576_v14 }
  0x89   : > { %17539 = vmatprep.mubr.msk.f32.mxu1 %vm294_vm0, %v22754_v29 }
  0x8a   : > { %17725 = vmatmul.mubr.msk.f32.vlgmr.msra.gmra.mrb[0].mxu0 %vm294_vm0, %v22536_v62 }
  0x8b   : > { %20103 = vmatpush3.bf16.msra.mxu0 %v20100_v53  ;;  %17727 = vmatprep.mubr.msk.f32.mxu0 %vm294_vm0, %v22548_v2  ;;  %v22786_v53 = vld [vmem:[#allocation2 + $0x70] sm:$0xff] }
  0x8c   : > { %20105 = vmatprep.subr.bf16.mxu0 %v20104_v34  ;;  %17540 = vmatmul.mubr.msk.f32.gmra.mrb[10].mxu1 %vm294_vm0, %v22768_v42 }
  0x8d   : > { %17542 = vmatprep.mubr.msk.f32.mxu1 %vm294_vm0, %v22772_v46 }
  0x8e   : > { %17728 = vmatmul.mubr.msk.f32.gmra.mrb[2].mxu0 %vm294_vm0, %v22566_v10 }
  0x8f   : > { %17730 = vmatprep.mubr.msk.f32.mxu0 %vm294_vm0, %v22578_v15  ;;  %20107 = vmatpush3.bf16.msra.mxu0 %v20104_v34  ;;  %v22834_v34 = vld [vmem:[#allocation2 + $0x87] sm:$0xff] }
  0x90   : > { %20109 = vmatprep.subr.bf16.mxu0 %v20108_v47  ;;  %17543 = vmatmul.mubr.msk.f32.gmra.mrb[12].mxu1 %vm294_vm0, %v22786_v53 }
  0x91   : > { %17545 = vmatprep.mubr.msk.f32.mxu1 %vm294_vm0, %v22790_v58 }
  0x92   : > { %17731 = vmatmul.mubr.msk.f32.gmra.mrb[4].mxu0 %vm294_vm0, %v22596_v22 }
  0x93   : > { %17733 = vmatprep.mubr.msk.f32.mxu0 %vm294_vm0, %v22602_v24  ;;  %20111 = vmatpush3.bf16.msra.mxu0 %v20108_v47  ;;  %v14630_v47 = vld [vmem:[%s26140_s1 + $0xf8] sm:$0xff] }
  0x94   : > { %20113 = vmatprep.subr.bf16.mxu0 %v20112_v59  ;;  %17546 = vmatmul.mubr.msk.f32.gmra.mrb[14].mxu1 %vm294_vm0, %v22804_v3 }
  0x95   : > { %17564 = vmatprep.mubr.msk.f32.mxu1 %vm294_vm0, %v823_v7  ;;  %v14748_v7 = vld [vmem:[%s26140_s1 + $0x228] sm:$0xff] }
  0x96   : > { %17734 = vmatmul.mubr.msk.f32.gmra.mrb[6].mxu0 %vm294_vm0, %v22619_v30 }
  0x97   : > { %17736 = vmatprep.mubr.msk.f32.mxu0 %vm294_vm0, %v22625_v32  ;;  %20115 = vmatpush3.bf16.msra.mxu0 %v20112_v59  ;;  %v14746_v59 = vld [vmem:[%s26140_s1 + $0x218] sm:$0xff] }
  0x98   : > { %20117 = vmatprep.subr.bf16.mxu0 %v20116_v9  ;;  %17565 = vmatmul.mubr.msk.f32.vlgmr.msra.gmra.mrb[0].mxu1 %vm294_vm0, %v824_v17  ;;  %v20120_v63 = vpack.c.bf16 %v14746_v59, %v14745_v57 }
  0x99   : > { %17567 = vmatprep.mubr.msk.f32.mxu1 %vm294_vm0, %v22580_v16  ;;  %20039 = vmatpush3.bf16.msra.mxu1 %v20036_v21  ;;  %v22850_v16 = vld [vmem:[#allocation2 + $0x8f] sm:$0xff]  ;;  %v20048_v21 = vpack.c.bf16 %v14630_v47, %v14629_v37  ;;  %v2643_v47 = vld [vmem:[#allocation5 + $0x68] sm:$0xff] }
  0x9a   : > { %17737 = vmatmul.mubr.msk.f32.gmra.mrb[8].mxu0 %vm294_vm0, %v22641_v38  ;;  %20041 = vmatprep.subr.bf16.mxu1 %v20040_v18  ;;  %v2642_v37 = vld [vmem:[#allocation5 + $0x60] sm:$0xff] }
  0x9b   : > { %17739 = vmatprep.mubr.msk.f32.mxu0 %vm294_vm0, %v22647_v40 }
  0x9c   : > { %17568 = vmatmul.mubr.msk.f32.gmra.mrb[2].mxu1 %vm294_vm0, %v22600_v23  ;;  %v1709_v23 = vld [vmem:[#allocation2 + $0x97] sm:$0xff] }
  0x9d   : > { %17570 = vmatprep.mubr.msk.f32.mxu1 %vm294_vm0, %v22604_v25  ;;  %20043 = vmatpush3.bf16.msra.mxu1 %v20040_v18 }
  0x9e   : > { %17740 = vmatmul.mubr.msk.f32.gmra.mrb[10].mxu0 %vm294_vm0, %v22663_v48  ;;  %20045 = vmatprep.subr.bf16.mxu1 %v20044_v36 }
  0x9f   : > { %17742 = vmatprep.mubr.msk.f32.mxu0 %vm294_vm0, %v22834_v34 }
  0xa0   : > { %17571 = vmatmul.mubr.msk.f32.gmra.mrb[4].mxu1 %vm294_vm0, %v22623_v31 }
  0xa1   : > { %17573 = vmatprep.mubr.msk.f32.mxu1 %vm294_vm0, %v22627_v33  ;;  %20047 = vmatpush3.bf16.msra.mxu1 %v20044_v36 }
  0xa2   : > { %17743 = vmatmul.mubr.msk.f32.gmra.mrb[12].mxu0 %vm294_vm0, %v22850_v16  ;;  %20049 = vmatprep.subr.bf16.mxu1 %v20048_v21 }
  0xa3   : > { %17745 = vmatprep.mubr.msk.f32.mxu0 %vm294_vm0, %v1709_v23 }
  0xa4   : > { %17574 = vmatmul.mubr.msk.f32.gmra.mrb[6].mxu1 %vm294_vm0, %v22645_v39 }
  0xa5   : > { %17576 = vmatprep.mubr.msk.f32.mxu1 %vm294_vm0, %v22649_v41  ;;  %20051 = vmatpush3.bf16.msra.mxu1 %v20048_v21 }
  0xa6   : > { %17746 = vmatmul.mubr.msk.f32.gmra.mrb[14].mxu0 %vm294_vm0, %v1710_v50  ;;  %20996 = vmatprep.subr.bf16.mxu1 %v22397_v8 }
  0xa7   : > { %17764 = vmatprep.mubr.msk.f32.mxu0 %vm294_vm0, %v22491_v45  ;;  %v20124_v45 = vpack.c.bf16 %v14748_v7, %v14747_v0 }
  0xa8   : > { %17577 = vmatmul.mubr.msk.f32.gmra.mrb[8].mxu1 %vm294_vm0, %v22667_v49 }
  0xa9   : > { %17579 = vmatprep.mubr.msk.f32.mxu1 %vm294_vm0, %v22669_v52 }
  0xaa   : > { %17765 = vmatmul.mubr.msk.f32.vlgmr.msra.gmra.mrb[0].mxu0 %vm294_vm0, %v22516_v54  ;;  %v14750_v54 = vld [vmem:[%s26140_s1 + $0x238] sm:$0xff] }
  0xab   : > { %20119 = vmatpush3.bf16.msra.mxu0 %v20116_v9  ;;  %17767 = vmatprep.mubr.msk.f32.mxu0 %vm294_vm0, %v22520_v56  ;;  %v20128_v56 = vpack.c.bf16 %v14750_v54, %v14749_v35 }
  0xac   : > { %20121 = vmatprep.subr.bf16.mxu0 %v20120_v63  ;;  %17580 = vmatmul.mubr.msk.f32.gmra.mrb[10].mxu1 %vm294_vm0, %v22684_v60 }
  0xad   : > { %17582 = vmatprep.mubr.msk.f32.mxu1 %vm294_vm0, %v22686_v61 }
  0xae   : > { %17768 = vmatmul.mubr.msk.f32.gmra.mrb[2].mxu0 %vm294_vm0, %v22546_v1  ;;  %v1925_v1 = vld [vmem:[#allocation2 + $0x88] sm:$0xff] }
  0xaf   : > { %17770 = vmatprep.mubr.msk.f32.mxu0 %vm294_vm0, %v22551_v4  ;;  %20123 = vmatpush3.bf16.msra.mxu0 %v20120_v63  ;;  %v2425_v4 = vld [vmem:[#allocation5 + $0x18] sm:$0xff] }
  0xb0   : > { %20125 = vmatprep.subr.bf16.mxu0 %v20124_v45  ;;  %17583 = vmatmul.mubr.msk.f32.gmra.mrb[12].mxu1 %vm294_vm0, %v22701_v5 }
  0xb1   : > { %17585 = vmatprep.mubr.msk.f32.mxu1 %vm294_vm0, %v22704_v6 }
  0xb2   : > { %17771 = vmatmul.mubr.msk.f32.gmra.mrb[4].mxu0 %vm294_vm0, %v22576_v14  ;;  %v2426_v14 = vld [vmem:[#allocation5 + $0x20] sm:$0xff] }
  0xb3   : > { %17773 = vmatprep.mubr.msk.f32.mxu0 %vm294_vm0, %v22754_v29  ;;  %20127 = vmatpush3.bf16.msra.mxu0 %v20124_v45 }
  0xb4   : > { %20129 = vmatprep.subr.bf16.mxu0 %v20128_v56  ;;  %17586 = vmatmul.mubr.msk.f32.gmra.mrb[14].mxu1 %vm294_vm0, %v22720_v11 }
  0xb5   : > { %17604 = vmatprep.mubr.msk.f32.mxu1 %vm294_vm0, %v22489_v44  ;;  %v1926_v44 = vld [vmem:[#allocation2 + $0x90] sm:$0xff] }
  0xb6   : > { %17774 = vmatmul.mubr.msk.f32.gmra.mrb[6].mxu0 %vm294_vm0, %v22768_v42 }
  0xb7   : > { %17776 = vmatprep.mubr.msk.f32.mxu0 %vm294_vm0, %v22772_v46  ;;  %20131 = vmatpush3.bf16.msra.mxu0 %v20128_v56 }
  0xb8   : > { %17605 = vmatmul.mubr.msk.f32.vlgmr.msra.gmra.mrb[0].mxu1 %vm294_vm0, %v22505_v51  ;;  %v1927_v51 = vld [vmem:[#allocation2 + $0x98] sm:$0xff] }
  0xb9   : > { %17607 = vmatprep.mubr.msk.f32.mxu1 %vm294_vm0, %v22518_v55  ;;  %21000 = vmatpush3.bf16.msra.mxu1 %v22397_v8  ;;  %v1928_v8 = vld [vmem:[#allocation2 + $0xa0] sm:$0xff]  ;;  %v2423_v55 = vld [vmem:[#allocation5 + $0x8] sm:$0xff] }
  0xba   : > { %17777 = vmatmul.mubr.msk.f32.gmra.mrb[8].mxu0 %vm294_vm0, %v22786_v53  ;;  %20997 = vmatprep.subr.bf16.mxu1 %v22413_v13 }
  0xbb   : > { %17779 = vmatprep.mubr.msk.f32.mxu0 %vm294_vm0, %v22790_v58 }
  0xbc   : > { %17608 = vmatmul.mubr.msk.f32.gmra.mrb[2].mxu1 %vm294_vm0, %v22536_v62 }
  0xbd   : > { %17610 = vmatprep.mubr.msk.f32.mxu1 %vm294_vm0, %v22548_v2  ;;  %21001 = vmatpush3.bf16.msra.mxu1 %v22413_v13  ;;  %v2145_v13 = vld [vmem:[#allocation2 + $0x99] sm:$0xff] }
  0xbe   : > { %17780 = vmatmul.mubr.msk.f32.gmra.mrb[10].mxu0 %vm294_vm0, %v22804_v3  ;;  %20998 = vmatprep.subr.bf16.mxu1 %v22428_v20  ;;  %v2424_v2 = vld [vmem:[#allocation5 + $0x10] sm:$0xff] }
  0xbf   : > { %17782 = vmatprep.mubr.msk.f32.mxu0 %vm294_vm0, %v1925_v1 }
  0xc0   : > { %17611 = vmatmul.mubr.msk.f32.gmra.mrb[4].mxu1 %vm294_vm0, %v22566_v10  ;;  %v20136_v10 = vpack.c.bf16 %v2425_v4, %v2424_v2 }
  0xc1   : > { %17613 = vmatprep.mubr.msk.f32.mxu1 %vm294_vm0, %v22578_v15  ;;  %21002 = vmatpush3.bf16.msra.mxu1 %v22428_v20  ;;  %v2146_v20 = vld [vmem:[#allocation2 + $0xa1] sm:$0xff]  ;;  %v2427_v15 = vld [vmem:[#allocation5 + $0x28] sm:$0xff] }
  0xc2   : > { %17783 = vmatmul.mubr.msk.f32.gmra.mrb[12].mxu0 %vm294_vm0, %v1926_v44  ;;  %20999 = vmatprep.subr.bf16.mxu1 %v22450_v28 }
  0xc3   : > { %17785 = vmatprep.mubr.msk.f32.mxu0 %vm294_vm0, %v1927_v51  ;;  %v2645_v51 = vld [vmem:[#allocation5 + $0x78] sm:$0xff] }
  0xc4   : > { %17614 = vmatmul.mubr.msk.f32.gmra.mrb[6].mxu1 %vm294_vm0, %v22596_v22  ;;  %v20140_v22 = vpack.c.bf16 %v2427_v15, %v2426_v14 }
  0xc5   : > { %17616 = vmatprep.mubr.msk.f32.mxu1 %vm294_vm0, %v22602_v24  ;;  %21003 = vmatpush3.bf16.msra.mxu1 %v22450_v28  ;;  %v2422_v28 = vld [vmem:[#allocation5] sm:$0xff]  ;;  %v2428_v24 = vld [vmem:[#allocation5 + $0x30] sm:$0xff] }
  0xc6   : > { %17786 = vmatmul.mubr.msk.f32.gmra.mrb[14].mxu0 %vm294_vm0, %v1928_v8  ;;  %v20132_v62 = vpack.c.bf16 %v2423_v55, %v2422_v28 }
  0xc7   : > { %17804 = vmatprep.mubr.msk.f32.mxu0 %vm294_vm0, %v22604_v25  ;;  %v2429_v25 = vld [vmem:[#allocation5 + $0x38] sm:$0xff] }
  0xc8   : > { %17617 = vmatmul.mubr.msk.f32.gmra.mrb[8].mxu1 %vm294_vm0, %v22619_v30  ;;  %20133 = vmatprep.subr.bf16.mxu1 %v20132_v62  ;;  %v20144_v30 = vpack.c.bf16 %v2429_v25, %v2428_v24 }
  0xc9   : > { %17619 = vmatprep.mubr.msk.f32.mxu1 %vm294_vm0, %v22625_v32  ;;  %20277 = vmatprep.subr.bf16.mxu0 %v20132_v62  ;;  %v2407_v32 = vld [vmem:[#allocation3 + $0xf] sm:$0xff] }
  0xca   : > { %17805 = vmatmul.mubr.msk.f32.vlgmr.msra.gmra.mrb[0].mxu0 %vm294_vm0, %v22623_v31  ;;  %v2406_v31 = vld [vmem:[#allocation3 + $0x7] sm:$0xff] }
  0xcb   : > { %17807 = vmatprep.mubr.msk.f32.mxu0 %vm294_vm0, %v22627_v33  ;;  %20279 = vmatpush3.bf16.msra.mxu0 %v20132_v62 }
  0xcc   : > { %17620 = vmatmul.mubr.msk.f32.gmra.mrb[10].mxu1 %vm294_vm0, %v22641_v38  ;;  %20281 = vmatprep.subr.bf16.mxu0 %v20136_v10 }
  0xcd   : > { %17622 = vmatprep.mubr.msk.f32.mxu1 %vm294_vm0, %v22647_v40 }
  0xce   : > { %17808 = vmatmul.mubr.msk.f32.gmra.mrb[2].mxu0 %vm294_vm0, %v22645_v39 }
  0xcf   : > { %17810 = vmatprep.mubr.msk.f32.mxu0 %vm294_vm0, %v22649_v41  ;;  %20283 = vmatpush3.bf16.msra.mxu0 %v20136_v10 }
  0xd0   : > { %17623 = vmatmul.mubr.msk.f32.gmra.mrb[12].mxu1 %vm294_vm0, %v22663_v48  ;;  %20285 = vmatprep.subr.bf16.mxu0 %v20140_v22 }
  0xd1   : > { %17625 = vmatprep.mubr.msk.f32.mxu1 %vm294_vm0, %v22834_v34 }
  0xd2   : > { %17811 = vmatmul.mubr.msk.f32.gmra.mrb[4].mxu0 %vm294_vm0, %v22667_v49  ;;  %v2638_v49 = vld [vmem:[#allocation5 + $0x40] sm:$0xff] }
  0xd3   : > { %17813 = vmatprep.mubr.msk.f32.mxu0 %vm294_vm0, %v22669_v52  ;;  %20287 = vmatpush3.bf16.msra.mxu0 %v20140_v22  ;;  %v2639_v52 = vld [vmem:[#allocation5 + $0x48] sm:$0xff] }
  0xd4   : > { %17626 = vmatmul.mubr.msk.f32.gmra.mrb[14].mxu1 %vm294_vm0, %v22850_v16  ;;  %20289 = vmatprep.subr.bf16.mxu0 %v20144_v30  ;;  %v23031_v16 = vpack.c.bf16 %v2643_v47, %v2642_v37 }
  0xd5   : > { %17656 = vmatprep.mubr.msk.f32.mxu1 %vm294_vm0, %v22754_v29 }
  0xd6   : > { %17814 = vmatmul.mubr.msk.f32.gmra.mrb[6].mxu0 %vm294_vm0, %v22684_v60  ;;  %v23010_v60 = vpack.c.bf16 %v2639_v52, %v2638_v49 }
  0xd7   : > { %17816 = vmatprep.mubr.msk.f32.mxu0 %vm294_vm0, %v22686_v61  ;;  %20291 = vmatpush3.bf16.msra.mxu0 %v20144_v30 }
  0xd8   : > { %17657 = vmatmul.mubr.msk.f32.vlgmr.msra.gmra.mrb[8].mxu1 %vm294_vm0, %v22768_v42  ;;  %20293 = vmatprep.subr.bf16.mxu0 %v23010_v60  ;;  %v2640_v42 = vld [vmem:[#allocation5 + $0x50] sm:$0xff] }
  0xd9   : > { %17659 = vmatprep.mubr.msk.f32.mxu1 %vm294_vm0, %v22772_v46  ;;  %20135 = vmatpush3.bf16.msra.mxu1 %v20132_v62  ;;  %v2641_v46 = vld [vmem:[#allocation5 + $0x58] sm:$0xff] }
  0xda   : > { %17817 = vmatmul.mubr.msk.f32.gmra.mrb[8].mxu0 %vm294_vm0, %v22701_v5  ;;  %20137 = vmatprep.subr.bf16.mxu1 %v20136_v10 }
  0xdb   : > { %17819 = vmatprep.mubr.msk.f32.mxu0 %vm294_vm0, %v22704_v6  ;;  %v23017_v6 = vld [vmem:[%s26141_s2] ss:$0 sm:$0xff] }
  0xdc   : > { %17660 = vmatmul.mubr.msk.f32.gmra.mrb[10].mxu1 %vm294_vm0, %v22786_v53  ;;  %v23021_v53 = vpack.c.bf16 %v2641_v46, %v2640_v42 }
  0xdd   : > { %17662 = vmatprep.mubr.msk.f32.mxu1 %vm294_vm0, %v22790_v58  ;;  %20139 = vmatpush3.bf16.msra.mxu1 %v20136_v10 }
  0xde   : > { %17820 = vmatmul.mubr.msk.f32.gmra.mrb[10].mxu0 %vm294_vm0, %v22720_v11  ;;  %20141 = vmatprep.subr.bf16.mxu1 %v20140_v22 }
  0xdf   : > { %17822 = vmatprep.mubr.msk.f32.mxu0 %vm294_vm0, %v22722_v43 }
  0xe0   : > { %17663 = vmatmul.mubr.msk.f32.gmra.mrb[12].mxu1 %vm294_vm0, %v22804_v3 }
  0xe1   : > { %17665 = vmatprep.mubr.msk.f32.mxu1 %vm294_vm0, %v1925_v1  ;;  %20143 = vmatpush3.bf16.msra.mxu1 %v20140_v22 }
  0xe2   : > { %17823 = vmatmul.mubr.msk.f32.gmra.mrb[12].mxu0 %vm294_vm0, %v22738_v19  ;;  %20145 = vmatprep.subr.bf16.mxu1 %v20144_v30 }
  0xe3   : > { %17825 = vmatprep.mubr.msk.f32.mxu0 %vm294_vm0, %v2145_v13 }
  0xe4   : > { %17666 = vmatmul.mubr.msk.f32.gmra.mrb[14].mxu1 %vm294_vm0, %v1926_v44  ;;  %v2644_v44 = vld [vmem:[#allocation5 + $0x70] sm:$0xff] }
  0xe5   : > { %20147 = vmatpush3.bf16.msra.mxu1 %v20144_v30  ;;  %17844 = vmatprep.mubr.msk.f32.mxu1 %vm294_vm0, %v2406_v31  ;;  %v2856_v31 = vld [vmem:[#allocation5 + $0x80] sm:$0xff] }
  0xe6   : > { %17826 = vmatmul.mubr.msk.f32.gmra.mrb[14].mxu0 %vm294_vm0, %v2146_v20  ;;  %20149 = vmatprep.subr.bf16.mxu1 %v23010_v60  ;;  %v23049_v20 = vpack.c.bf16 %v2645_v51, %v2644_v44 }
  0xe8   : > { %17845 = vmatmul.mubr.msk.f32.vlgmr.msra.gmra.mrb[16].mxu1 %vm294_vm0, %v2407_v32  ;;  %v2857_v32 = vld [vmem:[#allocation5 + $0x88] sm:$0xff] }
  0xe9   : > { %20151 = vmatpush3.bf16.msra.mxu1 %v23010_v60 }
  0xea   : > { %20153 = vmatprep.subr.bf16.mxu1 %v23021_v53 }
  0xed   : > { %20155 = vmatpush3.bf16.msra.mxu1 %v23021_v53 }
  0xee   : > { %20157 = vmatprep.subr.bf16.mxu1 %v23031_v16 }
  0xf1   : > { %20159 = vmatpush3.bf16.msra.mxu1 %v23031_v16 }
  0xf2   : > { %20161 = vmatprep.subr.bf16.mxu1 %v23049_v20 }
  0xf5   : > { %20163 = vmatpush3.bf16.msra.mxu1 %v23049_v20 }
 0x18b   : > { %v17606_v33 = vpop.f32.mrb[0].mxu1 }
 0x18c   : > { %v1180_v38 = vpop.f32.mrb[1].mxu1 }
 0x18d   : > { %v21004_v11 = vadd.f32 %v23017_v6, %v1180_v38 }
 0x18f   : > { %v17609_v39 = vpop.f32.mrb[2].mxu1 }
 0x190   : > { %v1189_v40 = vpop.f32.mrb[3].mxu1  ;;  %v23059_v39 = vpack.c.bf16 %v2857_v32, %v2856_v31  ;;  %v3075_v31 = vld [vmem:[#allocation5 + $0xc8] sm:$0xff]  ;;  %v23215_v32 = vld [vmem:[#allocation3 + $0x40] sm:$0xff] }
 0x191   : > { %v21006_v58 = vadd.f32 %v23017_v6, %v1189_v40 }
 0x192   : > { %20165 = vmatprep.subr.bf16.mxu1 %v23059_v39 }
 0x193   : > { %v17612_v41 = vpop.f32.mrb[4].mxu1 }
 0x194   : > { %v1198_v48 = vpop.f32.mrb[5].mxu1 }
 0x195   : > { %v21008_v18 = vadd.f32 %v23017_v6, %v1198_v48 }
 0x197   : > { %v17615_v61 = vpop.f32.mrb[6].mxu1 }
 0x198   : > { %v1207_v5 = vpop.f32.mrb[7].mxu1 }
 0x199   : > { %v21010_v23 = vadd.f32 %v23017_v6, %v1207_v5 }
 0x19d   : > { %v17806_v43 = vpop.f32.mrb[0].mxu0 }
 0x19e   : > { %v2270_v19 = vpop.f32.mrb[1].mxu0 }
 0x19f   : > { %v21005_v29 = vadd.f32 %v21004_v11, %v2270_v19 }
 0x1a1   : > { %v2349_v3 = vmax.f32 %v21005_v29, 0.0  ;;  %v17809_v9 = vpop.f32.mrb[2].mxu0 }
 0x1a2   : > { %v2279_v12 = vpop.f32.mrb[3].mxu0 }
 0x1a3   : > { %2357 = vst.msk [vmem:[#allocation3 + $0x18] sm:$0xff] %vm294_vm0, %v2349_v3  ;;  %v21007_v17 = vadd.f32 %v21006_v58, %v2279_v12  ;;  %2359 = vrot.lane.b32.xlu0 %v2349_v3, %s22144_s27 }
 0x1a5   : > { %v2350_v26 = vmax.f32 %v21007_v17, 0.0  ;;  %v17812_v27 = vpop.f32.mrb[4].mxu0 }
 0x1a6   : > { %v2288_v34 = vpop.f32.mrb[5].mxu0 }
 0x1a7   : > { %2363 = vst.msk [vmem:[#allocation3 + $0x38] sm:$0xff] %vm294_vm0, %v2350_v26  ;;  %v21009_v36 = vadd.f32 %v21008_v18, %v2288_v34  ;;  %2365 = vrot.lane.b32.xlu0 %v2350_v26, %s22144_s27 }
 0x1a9   : > { %v2351_v21 = vmax.f32 %v21009_v36, 0.0  ;;  %v17815_v50 = vpop.f32.mrb[6].mxu0 }
 0x1aa   : > { %v2297_v57 = vpop.f32.mrb[7].mxu0  ;;  %v23034_v59 = vld [vmem:[#allocation3 + $0x17] sm:$0xff]  ;;  %v23036_v63 = vld [vmem:[#allocation3 + $0x1f] sm:$0xff] }
 0x1ab   : > { %2369 = vst.msk [vmem:[#allocation3 + $0x58] sm:$0xff] %vm294_vm0, %v2351_v21  ;;  %v21011_v0 = vadd.f32 %v21010_v23, %v2297_v57  ;;  %17847 = vmatprep.mubr.msk.f32.mxu1 %vm294_vm0, %v23034_v59  ;;  %2371 = vrot.lane.b32.xlu1 %v2351_v21, %s22144_s27  ;;  %v17658_v7 = vpop.f32.mrb[8].mxu1  ;;  %v23165_v51 = vld [vmem:[#allocation3 + $0x18] sm:$0xff] }
 0x1ac   : > { %17848 = vmatmul.mubr.msk.f32.gmra.mrb[18].mxu1 %vm294_vm0, %v23036_v63  ;;  %v1434_v54 = vpop.f32.mrb[9].mxu1 }
 0x1ad   : > { %v2352_v45 = vmax.f32 %v21011_v0, 0.0  ;;  %v17818_v35 = vpop.f32.mrb[8].mxu0  ;;  %v21012_v56 = vadd.f32 %v23017_v6, %v1434_v54  ;;  %v2621_v0 = vld [vmem:[#allocation3 + $0x8] sm:$0xff]  ;;  %v2859_v54 = vld [vmem:[#allocation5 + $0x98] sm:$0xff] }
 0x1ae   : > { %v2306_v1 = vpop.f32.mrb[9].mxu0  ;;  %v23078_v42 = vld [vmem:[#allocation3 + $0x37] sm:$0xff]  ;;  %v23083_v58 = vld [vmem:[#allocation3 + $0x3f] sm:$0xff] }
 0x1af   : > { %2375 = vst.msk [vmem:[#allocation3 + $0x78] sm:$0xff] %vm294_vm0, %v2352_v45  ;;  %2377 = vrot.lane.b32.xlu1 %v2352_v45, %s22144_s27  ;;  %v21013_v8 = vadd.f32 %v21012_v56, %v2306_v1  ;;  %v17661_v13 = vpop.f32.mrb[10].mxu1  ;;  %v2858_v35 = vld [vmem:[#allocation5 + $0x90] sm:$0xff] }
 0x1b0   : > { %v1443_v55 = vpop.f32.mrb[11].mxu1  ;;  %v23156_v1 = vpack.c.bf16 %v2859_v54, %v2858_v35  ;;  %v2861_v13 = vld [vmem:[#allocation5 + $0xa8] sm:$0xff]  ;;  %v3076_v35 = vld [vmem:[#allocation5 + $0xd0] sm:$0xff]  ;;  %v3077_v54 = vld [vmem:[#allocation5 + $0xd8] sm:$0xff] }
 0x1b1   : > { %v17821_v28 = vpop.f32.mrb[10].mxu0  ;;  %v2353_v62 = vmax.f32 %v21013_v8, 0.0  ;;  %v21014_v2 = vadd.f32 %v23017_v6, %v1443_v55  ;;  %v2860_v8 = vld [vmem:[#allocation5 + $0xa0] sm:$0xff] }
 0x1b2   : > { %v2315_v4 = vpop.f32.mrb[11].mxu0  ;;  %v23096_v17 = vld [vmem:[#allocation3 + $0x57] sm:$0xff]  ;;  %v23106_v27 = vld [vmem:[#allocation3 + $0x5f] sm:$0xff] }
 0x1b3   : > { %2381 = vst.msk [vmem:[#allocation3 + $0x98] sm:$0xff] %vm294_vm0, %v2353_v62  ;;  %v21015_v10 = vadd.f32 %v21014_v2, %v2315_v4  ;;  %2383 = vrot.lane.b32.xlu0 %v2353_v62, %s22144_s27  ;;  %v17664_v14 = vpop.f32.mrb[12].mxu1  ;;  %v23181_v2 = vpack.c.bf16 %v2861_v13, %v2860_v8  ;;  %v23302_v8 = vld [vmem:[#allocation3 + $0xc0] sm:$0xff]  ;;  %v2840_v13 = vld [vmem:[#allocation3 + $0x11] sm:$0xff] }
 0x1b4   : > { %v1452_v22 = vpop.f32.mrb[13].mxu1  ;;  %v2863_v14 = vld [vmem:[#allocation5 + $0xb8] sm:$0xff]  ;;  %26233 = vst [vmem:[#allocation8_spill] sm:$0xff] %v23302_v8 }
 0x1b5   : > { %v17824_v15 = vpop.f32.mrb[12].mxu0  ;;  %v2354_v24 = vmax.f32 %v21015_v10, 0.0  ;;  %v21016_v25 = vadd.f32 %v23017_v6, %v1452_v22  ;;  %v2862_v10 = vld [vmem:[#allocation5 + $0xb0] sm:$0xff]  ;;  %v23200_v22 = vld [vmem:[#allocation3 + $0x38] sm:$0xff] }
 0x1b6   : > { %v2324_v30 = vpop.f32.mrb[13].mxu0  ;;  %v23134_v57 = vld [vmem:[#allocation3 + $0x77] sm:$0xff] }
 0x1b7   : > { %2387 = vst.msk [vmem:[#allocation3 + $0xb8] sm:$0xff] %vm294_vm0, %v2354_v24  ;;  %v21017_v33 = vadd.f32 %v21016_v25, %v2324_v30  ;;  %2389 = vrot.lane.b32.xlu1 %v2354_v24, %s22144_s27  ;;  %v17667_v38 = vpop.f32.mrb[14].mxu1  ;;  %v23194_v15 = vld [vmem:[#allocation3 + $0x30] sm:$0xff]  ;;  %v23203_v24 = vpack.c.bf16 %v2863_v14, %v2862_v10  ;;  %v3074_v30 = vld [vmem:[#allocation5 + $0xc0] sm:$0xff] }
 0x1b8   : > { %v1461_v41 = vpop.f32.mrb[15].mxu1  ;;  %v23221_v38 = vpack.c.bf16 %v3075_v31, %v3074_v30  ;;  %v23311_v10 = vld [vmem:[#allocation3 + $0x19] sm:$0xff]  ;;  %v3079_v30 = vld [vmem:[#allocation5 + $0xe8] sm:$0xff] }
 0x1b9   : > { %v17827_v40 = vpop.f32.mrb[14].mxu0  ;;  %v2355_v48 = vmax.f32 %v21017_v33, 0.0  ;;  %v21018_v49 = vadd.f32 %v23017_v6, %v1461_v41  ;;  %26234 = vst [vmem:[#allocation9_spill] sm:$0xff] %v23311_v10  ;;  %v3078_v14 = vld [vmem:[#allocation5 + $0xe0] sm:$0xff] }
 0x1ba   : > { %v2333_v52 = vpop.f32.mrb[15].mxu0  ;;  %v23115_v37 = vld [vmem:[#allocation3 + $0x97] sm:$0xff]  ;;  %v23124_v23 = vld [vmem:[#allocation3 + $0x9f] sm:$0xff] }
 0x1bb   : > { %2393 = vst.msk [vmem:[#allocation3 + $0xd8] sm:$0xff] %vm294_vm0, %v2355_v48  ;;  %v21019_v61 = vadd.f32 %v21018_v49, %v2333_v52  ;;  %2395 = vrot.lane.b32.xlu0 %v2355_v48, %s22144_s27  ;;  %v23235_v48 = vld [vmem:[#allocation3 + $0x50] sm:$0xff]  ;;  %v23245_v52 = vld [vmem:[#allocation3 + $0x58] sm:$0xff] }
 0x1bd   : > { %v2356_v5 = vmax.f32 %v21019_v61, 0.0 }
 0x1be   : > { %v23151_v56 = vld [vmem:[#allocation3 + $0xb7] sm:$0xff]  ;;  %v23159_v44 = vld [vmem:[#allocation3 + $0xbf] sm:$0xff] }
 0x1bf   : > { %2399 = vst.msk [vmem:[#allocation3 + $0xf8] sm:$0xff] %vm294_vm0, %v2356_v5  ;;  %2401 = vrot.lane.b32.xlu1 %v2356_v5, %s22144_s27  ;;  %v23253_v5 = vld [vmem:[#allocation3 + $0x60] sm:$0xff] }
 0x1c2   : > { %v23179_v62 = vld [vmem:[#allocation3 + $0xd7] sm:$0xff] }
 0x1c6   : > { %v23229_v41 = vld [vmem:[#allocation3 + $0xf7] sm:$0xff]  ;;  %v23238_v49 = vld [vmem:[#allocation3 + $0xff] sm:$0xff] }
 0x215   : > { %v2360_v11 = vpop.permute.xlu0 %2359 }
 0x216   : > { %2362 = vst.msk [vmem:[#allocation3 + $0x28] sm:$0xff] %vm294_vm0, %v2360_v11  ;;  %v23255_v11 = vld [vmem:[#allocation3 + $0x90] sm:$0xff] }
 0x219   : > { %v2366_v43 = vpop.permute.xlu0 %2365 }
 0x21a   : > { %2368 = vst.msk [vmem:[#allocation3 + $0x48] sm:$0xff] %vm294_vm0, %v2366_v43 }
 0x21d   : > { %v2372_v6 = vpop.permute.xlu1 %2371  ;;  %v23069_v19 = vld [vmem:[#allocation3 + $0x27] sm:$0xff]  ;;  %v23071_v29 = vld [vmem:[#allocation3 + $0x2f] sm:$0xff] }
 0x21e   : > { %2374 = vst.msk [vmem:[#allocation3 + $0x68] sm:$0xff] %vm294_vm0, %v2372_v6  ;;  %17850 = vmatprep.mubr.msk.f32.mxu1 %vm294_vm0, %v23069_v19  ;;  %v23188_v4 = vld [vmem:[#allocation3 + $0x28] sm:$0xff]  ;;  %v23263_v6 = vld [vmem:[#allocation3 + $0x98] sm:$0xff] }
 0x21f   : > { %17851 = vmatmul.mubr.msk.f32.gmra.mrb[20].mxu1 %vm294_vm0, %v23071_v29 }
 0x220   : > { %17853 = vmatprep.mubr.msk.f32.mxu1 %vm294_vm0, %v23078_v42 }
 0x221   : > { %v2378_v46 = vpop.permute.xlu1 %2377  ;;  %v23087_v3 = vld [vmem:[#allocation3 + $0x47] sm:$0xff]  ;;  %v23091_v9 = vld [vmem:[#allocation3 + $0x4f] sm:$0xff] }
 0x222   : > { %2380 = vst.msk [vmem:[#allocation3 + $0x88] sm:$0xff] %vm294_vm0, %v2378_v46  ;;  %v23227_v40 = vld [vmem:[#allocation3 + $0x48] sm:$0xff]  ;;  %v23269_v46 = vld [vmem:[#allocation3 + $0x70] sm:$0xff] }
 0x223   : > { %17854 = vmatmul.mubr.msk.f32.gmra.mrb[22].mxu1 %vm294_vm0, %v23083_v58 }
 0x224   : > { %17856 = vmatprep.mubr.msk.f32.mxu1 %vm294_vm0, %v23087_v3 }
 0x225   : > { %v2384_v12 = vpop.permute.xlu0 %2383  ;;  %v23113_v36 = vld [vmem:[#allocation3 + $0x67] sm:$0xff]  ;;  %v23122_v47 = vld [vmem:[#allocation3 + $0x6f] sm:$0xff] }
 0x226   : > { %2386 = vst.msk [vmem:[#allocation3 + $0xa8] sm:$0xff] %vm294_vm0, %v2384_v12  ;;  %v23261_v43 = vld [vmem:[#allocation3 + $0x68] sm:$0xff]  ;;  %v23271_v12 = vld [vmem:[#allocation3 + $0xa0] sm:$0xff] }
 0x227   : > { %17857 = vmatmul.mubr.msk.f32.gmra.mrb[24].mxu1 %vm294_vm0, %v23091_v9 }
 0x228   : > { %17859 = vmatprep.mubr.msk.f32.mxu1 %vm294_vm0, %v23096_v17 }
 0x229   : > { %v23100_v18 = vld [vmem:[#allocation3 + $0x87] sm:$0xff]  ;;  %v23102_v26 = vld [vmem:[#allocation3 + $0x8f] sm:$0xff]  ;;  %v2390_v34 = vpop.permute.xlu1 %2389 }
 0x22a   : > { %18204 = vmatprep.mubr.msk.f32.mxu0 %vm294_vm0, %v23100_v18  ;;  %2392 = vst.msk [vmem:[#allocation3 + $0xc8] sm:$0xff] %vm294_vm0, %v2390_v34  ;;  %v23247_v61 = vld [vmem:[#allocation3 + $0x88] sm:$0xff]  ;;  %v23279_v34 = vld [vmem:[#allocation3 + $0x78] sm:$0xff] }
 0x22b   : > { %17860 = vmatmul.mubr.msk.f32.gmra.mrb[26].mxu1 %vm294_vm0, %v23106_v27  ;;  %18205 = vmatmul.mubr.msk.f32.vlgmr.msra.gmra.mrb[16].mxu0 %vm294_vm0, %v23102_v26 }
 0x22c   : > { %17862 = vmatprep.mubr.msk.f32.mxu1 %vm294_vm0, %v23113_v36  ;;  %18207 = vmatprep.mubr.msk.f32.mxu0 %vm294_vm0, %v23115_v37 }
 0x22d   : > { %20295 = vmatpush3.bf16.msra.mxu0 %v23010_v60  ;;  %v2396_v21 = vpop.permute.xlu0 %2395  ;;  %v23126_v50 = vld [vmem:[#allocation3 + $0xa7] sm:$0xff]  ;;  %v23140_v60 = vld [vmem:[#allocation3 + $0x7f] sm:$0xff]  ;;  %v23143_v7 = vld [vmem:[#allocation3 + $0xaf] sm:$0xff] }
 0x22e   : > { %20297 = vmatprep.subr.bf16.mxu0 %v23021_v53  ;;  %2398 = vst.msk [vmem:[#allocation3 + $0xe8] sm:$0xff] %vm294_vm0, %v2396_v21  ;;  %v23281_v21 = vld [vmem:[#allocation3 + $0xa8] sm:$0xff] }
 0x22f   : > { %17863 = vmatmul.mubr.msk.f32.gmra.mrb[28].mxu1 %vm294_vm0, %v23122_v47  ;;  %18208 = vmatmul.mubr.msk.f32.gmra.mrb[18].mxu0 %vm294_vm0, %v23124_v23 }
 0x230   : > { %17865 = vmatprep.mubr.msk.f32.mxu1 %vm294_vm0, %v23134_v57  ;;  %18210 = vmatprep.mubr.msk.f32.mxu0 %vm294_vm0, %v23126_v50 }
 0x231   : > { %20299 = vmatpush3.bf16.msra.mxu0 %v23021_v53  ;;  %v2402_v45 = vpop.permute.xlu1 %2401  ;;  %v2622_v53 = vld [vmem:[#allocation3 + $0x10] sm:$0xff]  ;;  %v23170_v28 = vld [vmem:[#allocation3 + $0xc7] sm:$0xff] }
 0x232   : > { %20301 = vmatprep.subr.bf16.mxu0 %v23031_v16  ;;  %2404 = vst.msk [vmem:[#allocation3 + $0x108] sm:$0xff] %vm294_vm0, %v2402_v45  ;;  %v23177_v55 = vld [vmem:[#allocation3 + $0xcf] sm:$0xff] }
 0x233   : > { %17866 = vmatmul.mubr.msk.f32.gmra.mrb[30].mxu1 %vm294_vm0, %v23140_v60  ;;  %18211 = vmatmul.mubr.msk.f32.gmra.mrb[20].mxu0 %vm294_vm0, %v23143_v7  ;;  %v2839_v45 = vld [vmem:[#allocation3 + $0x9] sm:$0xff] }
 0x234   : > { %18213 = vmatprep.mubr.msk.f32.mxu0 %vm294_vm0, %v23151_v56  ;;  %17884 = vmatprep.mubr.msk.f32.mxu1 %vm294_vm0, %v2621_v0  ;;  %v23287_v0 = vld [vmem:[#allocation3 + $0x80] sm:$0xff]  ;;  %v23316_v31 = vld [vmem:[#allocation3 + $0xc8] sm:$0xff] }
 0x235   : > { %20303 = vmatpush3.bf16.msra.mxu0 %v23031_v16  ;;  %v23172_v16 = vld [vmem:[#allocation3 + $0x20] sm:$0xff]  ;;  %v23218_v33 = vld [vmem:[#allocation3 + $0xef] sm:$0xff]  ;;  %26235 = vst [vmem:[#allocation10_spill] sm:$0xff] %v23316_v31 }
 0x236   : > { %20305 = vmatprep.subr.bf16.mxu0 %v23049_v20  ;;  %v23209_v25 = vld [vmem:[#allocation3 + $0xe7] sm:$0xff] }
 0x237   : > { %17885 = vmatmul.mubr.msk.f32.vlgmr.msra.gmra.mrb[16].mxu1 %vm294_vm0, %v2622_v53  ;;  %18214 = vmatmul.mubr.msk.f32.gmra.mrb[22].mxu0 %vm294_vm0, %v23159_v44  ;;  %v23297_v53 = vld [vmem:[#allocation3 + $0xb8] sm:$0xff] }
 0x238   : > { %17887 = vmatprep.mubr.msk.f32.mxu1 %vm294_vm0, %v23165_v51  ;;  %20167 = vmatpush3.bf16.msra.mxu1 %v23059_v39 }
 0x239   : > { %18216 = vmatprep.mubr.msk.f32.mxu0 %vm294_vm0, %v23170_v28  ;;  %20169 = vmatprep.subr.bf16.mxu1 %v23156_v1 }
 0x23a   : > { %20307 = vmatpush3.bf16.msra.mxu0 %v23049_v20  ;;  %v23198_v20 = vld [vmem:[#allocation3 + $0xdf] sm:$0xff] }
 0x23b   : > { %17888 = vmatmul.mubr.msk.f32.gmra.mrb[18].mxu1 %vm294_vm0, %v23172_v16  ;;  %18217 = vmatmul.mubr.msk.f32.gmra.mrb[24].mxu0 %vm294_vm0, %v23177_v55 }
 0x23c   : > { %17890 = vmatprep.mubr.msk.f32.mxu1 %vm294_vm0, %v23188_v4  ;;  %18219 = vmatprep.mubr.msk.f32.mxu0 %vm294_vm0, %v23179_v62 }
 0x23d   : > { %20171 = vmatpush3.bf16.msra.mxu1 %v23156_v1  ;;  %20309 = vmatprep.subr.bf16.mxu0 %v23059_v39 }
 0x23e   : > { %20173 = vmatprep.subr.bf16.mxu1 %v23181_v2 }
 0x23f   : > { %17891 = vmatmul.mubr.msk.f32.gmra.mrb[20].mxu1 %vm294_vm0, %v23194_v15  ;;  %18220 = vmatmul.mubr.msk.f32.gmra.mrb[26].mxu0 %vm294_vm0, %v23198_v20 }
 0x240   : > { %17893 = vmatprep.mubr.msk.f32.mxu1 %vm294_vm0, %v23200_v22  ;;  %18222 = vmatprep.mubr.msk.f32.mxu0 %vm294_vm0, %v23209_v25 }
 0x241   : > { %20175 = vmatpush3.bf16.msra.mxu1 %v23181_v2 }
 0x242   : > { %20177 = vmatprep.subr.bf16.mxu1 %v23203_v24 }
 0x243   : > { %17894 = vmatmul.mubr.msk.f32.gmra.mrb[22].mxu1 %vm294_vm0, %v23215_v32  ;;  %18223 = vmatmul.mubr.msk.f32.gmra.mrb[28].mxu0 %vm294_vm0, %v23218_v33 }
 0x244   : > { %17896 = vmatprep.mubr.msk.f32.mxu1 %vm294_vm0, %v23227_v40  ;;  %18225 = vmatprep.mubr.msk.f32.mxu0 %vm294_vm0, %v23229_v41 }
 0x245   : > { %20179 = vmatpush3.bf16.msra.mxu1 %v23203_v24 }
 0x246   : > { %20181 = vmatprep.subr.bf16.mxu1 %v23221_v38 }
 0x247   : > { %17897 = vmatmul.mubr.msk.f32.gmra.mrb[24].mxu1 %vm294_vm0, %v23235_v48  ;;  %18226 = vmatmul.mubr.msk.f32.gmra.mrb[30].mxu0 %vm294_vm0, %v23238_v49 }
 0x248   : > { %17899 = vmatprep.mubr.msk.f32.mxu1 %vm294_vm0, %v23245_v52  ;;  %18244 = vmatprep.mubr.msk.f32.mxu0 %vm294_vm0, %v23247_v61 }
 0x24b   : > { %17900 = vmatmul.mubr.msk.f32.gmra.mrb[26].mxu1 %vm294_vm0, %v23253_v5  ;;  %18245 = vmatmul.mubr.msk.f32.vlgmr.msra.gmra.mrb[16].mxu0 %vm294_vm0, %v23255_v11 }
 0x24c   : > { %17902 = vmatprep.mubr.msk.f32.mxu1 %vm294_vm0, %v23261_v43  ;;  %18247 = vmatprep.mubr.msk.f32.mxu0 %vm294_vm0, %v23263_v6 }
 0x24d   : > { %20311 = vmatpush3.bf16.msra.mxu0 %v23059_v39  ;;  %v23289_v39 = vld [vmem:[#allocation3 + $0xb0] sm:$0xff] }
 0x24e   : > { %20313 = vmatprep.subr.bf16.mxu0 %v23156_v1 }
 0x24f   : > { %17903 = vmatmul.mubr.msk.f32.gmra.mrb[28].mxu1 %vm294_vm0, %v23269_v46  ;;  %18248 = vmatmul.mubr.msk.f32.gmra.mrb[18].mxu0 %vm294_vm0, %v23271_v12 }
 0x250   : > { %17905 = vmatprep.mubr.msk.f32.mxu1 %vm294_vm0, %v23279_v34  ;;  %18250 = vmatprep.mubr.msk.f32.mxu0 %vm294_vm0, %v23281_v21 }
 0x251   : > { %20315 = vmatpush3.bf16.msra.mxu0 %v23156_v1  ;;  %v23304_v1 = vpack.c.bf16 %v3077_v54, %v3076_v35  ;;  %v23325_v35 = vld [vmem:[#allocation3 + $0xd8] sm:$0xff]  ;;  %v23327_v54 = vpack.c.bf16 %v3079_v30, %v3078_v14  ;;  %v23340_v14 = vld [vmem:[#allocation3 + $0xe0] sm:$0xff] }
 0x252   : > { %20317 = vmatprep.subr.bf16.mxu0 %v23181_v2  ;;  %26238 = vst [vmem:[#allocation13_spill] sm:$0xff] %v23325_v35  ;;  %26240 = vst [vmem:[#allocation15_spill] sm:$0xff] %v23340_v14  ;;  %v23346_v30 = vld [vmem:[#allocation3 + $0x39] sm:$0xff] }
 0x253   : > { %17906 = vmatmul.mubr.msk.f32.gmra.mrb[30].mxu1 %vm294_vm0, %v23287_v0  ;;  %18251 = vmatmul.mubr.msk.f32.gmra.mrb[20].mxu0 %vm294_vm0, %v23289_v39  ;;  %26241 = vst [vmem:[#allocation16_spill] sm:$0xff] %v23346_v30 }
 0x254   : > { %18253 = vmatprep.mubr.msk.f32.mxu0 %vm294_vm0, %v23297_v53  ;;  %17924 = vmatprep.mubr.msk.f32.mxu1 %vm294_vm0, %v2839_v45  ;;  %v23323_v45 = vld [vmem:[#allocation3 + $0x21] sm:$0xff] }
 0x255   : > { %20319 = vmatpush3.bf16.msra.mxu0 %v23181_v2  ;;  %v23318_v2 = vld [vmem:[#allocation3 + $0xd0] sm:$0xff]  ;;  %26237 = vst [vmem:[#allocation12_spill] sm:$0xff] %v23323_v45 }
 0x256   : > { %20321 = vmatprep.subr.bf16.mxu0 %v23203_v24  ;;  %26236 = vst [vmem:[#allocation11_spill] sm:$0xff] %v23318_v2 }
 0x257   : > { %17925 = vmatmul.mubr.msk.f32.vlgmr.msra.gmra.mrb[16].mxu1 %vm294_vm0, %v2840_v13  ;;  %18254 = vmatmul.mubr.msk.f32.gmra.mrb[22].mxu0 %vm294_vm0, %v23302_v8  ;;  %v23334_v13 = vld [vmem:[#allocation3 + $0x29] sm:$0xff] }
 0x258   : > { %17927 = vmatprep.mubr.msk.f32.mxu1 %vm294_vm0, %v23311_v10  ;;  %20183 = vmatpush3.bf16.msra.mxu1 %v23221_v38  ;;  %26239 = vst [vmem:[#allocation14_spill] sm:$0xff] %v23334_v13  ;;  %v3080_v10 = vld [vmem:[#allocation5 + $0xf0] sm:$0xff] }
 0x259   : > { %18256 = vmatprep.mubr.msk.f32.mxu0 %vm294_vm0, %v23316_v31  ;;  %20185 = vmatprep.subr.bf16.mxu1 %v23304_v1  ;;  %v3081_v31 = vld [vmem:[#allocation5 + $0xf8] sm:$0xff]  ;;  %v23361_v8 = vld [vmem:[#allocation3 + $0xf0] sm:$0xff] }
 0x25a   : > { %20323 = vmatpush3.bf16.msra.mxu0 %v23203_v24  ;;  %v23344_v24 = vld [vmem:[#allocation3 + $0x31] sm:$0xff]  ;;  %26243 = vst [vmem:[#allocation18_spill] sm:$0xff] %v23361_v8 }
 0x25b   : > { %17928 = vmatmul.mubr.msk.f32.gmra.mrb[18].mxu1 %vm294_vm0, %v23323_v45  ;;  %18257 = vmatmul.mubr.msk.f32.gmra.mrb[24].mxu0 %vm294_vm0, %v23318_v2  ;;  %v23349_v2 = vpack.c.bf16 %v3081_v31, %v3080_v10  ;;  %v3293_v45 = vld [vmem:[#allocation5 + $0x108] sm:$0xff] }
 0x25c   : > { %17930 = vmatprep.mubr.msk.f32.mxu1 %vm294_vm0, %v23334_v13  ;;  %18259 = vmatprep.mubr.msk.f32.mxu0 %vm294_vm0, %v23325_v35  ;;  %v23355_v35 = vld [vmem:[#allocation3 + $0xe8] sm:$0xff]  ;;  %v3292_v13 = vld [vmem:[#allocation5 + $0x100] sm:$0xff] }
 0x25d   : > { %20187 = vmatpush3.bf16.msra.mxu1 %v23304_v1  ;;  %20325 = vmatprep.subr.bf16.mxu0 %v23221_v38  ;;  %26242 = vst [vmem:[#allocation17_spill] sm:$0xff] %v23355_v35  ;;  %v23364_v10 = vld [vmem:[#allocation3 + $0x41] sm:$0xff]  ;;  %v23367_v31 = vpack.c.bf16 %v3293_v45, %v3292_v13  ;;  %v23384_v45 = vld [vmem:[#allocation3 + $0x51] sm:$0xff]  ;;  %v23391_v13 = vld [vmem:[#allocation3 + $0x59] sm:$0xff] }
 0x25e   : > { %20189 = vmatprep.subr.bf16.mxu1 %v23327_v54  ;;  %26247 = vst [vmem:[#allocation22_spill] sm:$0xff] %v23384_v45  ;;  %26248 = vst [vmem:[#allocation23_spill] sm:$0xff] %v23391_v13 }
 0x25f   : > { %17931 = vmatmul.mubr.msk.f32.gmra.mrb[20].mxu1 %vm294_vm0, %v23344_v24  ;;  %18260 = vmatmul.mubr.msk.f32.gmra.mrb[26].mxu0 %vm294_vm0, %v23340_v14  ;;  %v23375_v14 = vld [vmem:[#allocation3 + $0xf8] sm:$0xff] }
 0x260   : > { %17933 = vmatprep.mubr.msk.f32.mxu1 %vm294_vm0, %v23346_v30  ;;  %18262 = vmatprep.mubr.msk.f32.mxu0 %vm294_vm0, %v23355_v35  ;;  %v23373_v30 = vld [vmem:[#allocation3 + $0x49] sm:$0xff]  ;;  %26245 = vst [vmem:[#allocation20_spill] sm:$0xff] %v23375_v14  ;;  %v23381_v35 = vld [vmem:[#allocation3 + $0x100] sm:$0xff] }
 0x261   : > { %20191 = vmatpush3.bf16.msra.mxu1 %v23327_v54  ;;  %26244 = vst [vmem:[#allocation19_spill] sm:$0xff] %v23373_v30  ;;  %26246 = vst [vmem:[#allocation21_spill] sm:$0xff] %v23381_v35 }
 0x262   : > { %20193 = vmatprep.subr.bf16.mxu1 %v23349_v2 }
 0x263   : > { %17934 = vmatmul.mubr.msk.f32.gmra.mrb[22].mxu1 %vm294_vm0, %v23364_v10  ;;  %18263 = vmatmul.mubr.msk.f32.gmra.mrb[28].mxu0 %vm294_vm0, %v23361_v8  ;;  %v23401_v8 = vld [vmem:[#allocation3 + $0x91] sm:$0xff] }
 0x264   : > { %17936 = vmatprep.mubr.msk.f32.mxu1 %vm294_vm0, %v23373_v30  ;;  %18265 = vmatprep.mubr.msk.f32.mxu0 %vm294_vm0, %v23375_v14  ;;  %v23393_v30 = vld [vmem:[#allocation3 + $0x89] sm:$0xff]  ;;  %v23399_v14 = vld [vmem:[#allocation3 + $0x61] sm:$0xff]  ;;  %26251 = vst [vmem:[#allocation26_spill] sm:$0xff] %v23401_v8 }
 0x265   : > { %20195 = vmatpush3.bf16.msra.mxu1 %v23349_v2  ;;  %26249 = vst [vmem:[#allocation24_spill] sm:$0xff] %v23393_v30  ;;  %26250 = vst [vmem:[#allocation25_spill] sm:$0xff] %v23399_v14 }
 0x266   : > { %20197 = vmatprep.subr.bf16.mxu1 %v23367_v31 }
 0x267   : > { %17937 = vmatmul.mubr.msk.f32.gmra.mrb[24].mxu1 %vm294_vm0, %v23384_v45  ;;  %18266 = vmatmul.mubr.msk.f32.gmra.mrb[30].mxu0 %vm294_vm0, %v23381_v35  ;;  %v23407_v35 = vld [vmem:[#allocation3 + $0x69] sm:$0xff]  ;;  %v23409_v45 = vld [vmem:[#allocation3 + $0x99] sm:$0xff] }
 0x268   : > { %17939 = vmatprep.mubr.msk.f32.mxu1 %vm294_vm0, %v23391_v13  ;;  %18284 = vmatprep.mubr.msk.f32.mxu0 %vm294_vm0, %v23393_v30  ;;  %26252 = vst [vmem:[#allocation27_spill] sm:$0xff] %v23407_v35  ;;  %26253 = vst [vmem:[#allocation28_spill] sm:$0xff] %v23409_v45  ;;  %v23416_v30 = vld [vmem:[#allocation3 + $0x71] sm:$0xff]  ;;  %v23418_v13 = vld [vmem:[#allocation3 + $0xa1] sm:$0xff] }
 0x269   : > { %26254 = vst [vmem:[#allocation29_spill] sm:$0xff] %v23416_v30 }
 0x26b   : > { %17940 = vmatmul.mubr.msk.f32.gmra.mrb[26].mxu1 %vm294_vm0, %v23399_v14  ;;  %18285 = vmatmul.mubr.msk.f32.vlgmr.msra.gmra.mrb[16].mxu0 %vm294_vm0, %v23401_v8  ;;  %v23425_v8 = vld [vmem:[#allocation3 + $0x79] sm:$0xff] }
 0x26c   : > { %17942 = vmatprep.mubr.msk.f32.mxu1 %vm294_vm0, %v23407_v35  ;;  %18287 = vmatprep.mubr.msk.f32.mxu0 %vm294_vm0, %v23409_v45  ;;  %26255 = vst [vmem:[#allocation30_spill] sm:$0xff] %v23425_v8  ;;  %v23427_v35 = vld [vmem:[#allocation3 + $0xa9] sm:$0xff]  ;;  %v23436_v45 = vld [vmem:[#allocation3 + $0x81] sm:$0xff]  ;;  %v3295_v14 = vld [vmem:[#allocation5 + $0x118] sm:$0xff] }
 0x26d   : > { %20327 = vmatpush3.bf16.msra.mxu0 %v23221_v38  ;;  %26256 = vst [vmem:[#allocation31_spill] sm:$0xff] %v23427_v35  ;;  %v23433_v38 = vld [vmem:[#allocation3 + $0xb1] sm:$0xff]  ;;  %26258 = vst [vmem:[#allocation33_spill] sm:$0xff] %v23436_v45 }
 0x26e   : > { %20329 = vmatprep.subr.bf16.mxu0 %v23304_v1  ;;  %26257 = vst [vmem:[#allocation32_spill] sm:$0xff] %v23433_v38 }
 0x26f   : > { %17943 = vmatmul.mubr.msk.f32.gmra.mrb[28].mxu1 %vm294_vm0, %v23416_v30  ;;  %18288 = vmatmul.mubr.msk.f32.gmra.mrb[18].mxu0 %vm294_vm0, %v23418_v13  ;;  %v3294_v30 = vld [vmem:[#allocation5 + $0x110] sm:$0xff] }
 0x270   : > { %17945 = vmatprep.mubr.msk.f32.mxu1 %vm294_vm0, %v23425_v8  ;;  %18290 = vmatprep.mubr.msk.f32.mxu0 %vm294_vm0, %v23427_v35  ;;  %v23443_v8 = vld [vmem:[#allocation3 + $0xb9] sm:$0xff]  ;;  %v23450_v35 = vld [vmem:[#allocation3 + $0xc1] sm:$0xff] }
 0x271   : > { %20331 = vmatpush3.bf16.msra.mxu0 %v23304_v1  ;;  %v20200_v1 = vpack.c.bf16 %v3295_v14, %v3294_v30  ;;  %v3299_v30 = vld [vmem:[#allocation5 + $0x138] sm:$0xff] }
 0x272   : > { %20333 = vmatprep.subr.bf16.mxu0 %v23327_v54 }
 0x273   : > { %17946 = vmatmul.mubr.msk.f32.gmra.mrb[30].mxu1 %vm294_vm0, %v23436_v45  ;;  %18291 = vmatmul.mubr.msk.f32.gmra.mrb[20].mxu0 %vm294_vm0, %v23433_v38  ;;  %v3296_v38 = vld [vmem:[#allocation5 + $0x120] sm:$0xff]  ;;  %v3297_v45 = vld [vmem:[#allocation5 + $0x128] sm:$0xff] }
 0x274   : > { %17964 = vmatprep.mubr.msk.f32.mxu1 %vm294_vm0, %v23034_v59  ;;  %18293 = vmatprep.mubr.msk.f32.mxu0 %vm294_vm0, %v23443_v8  ;;  %v23460_v59 = vld [vmem:[#allocation3 + $0xc9] sm:$0xff]  ;;  %v20204_v14 = vpack.c.bf16 %v3297_v45, %v3296_v38  ;;  %v3510_v38 = vld [vmem:[#allocation5 + $0x140] sm:$0xff] }
 0x275   : > { %20335 = vmatpush3.bf16.msra.mxu0 %v23327_v54  ;;  %v23464_v54 = vld [vmem:[#allocation3 + $0xd1] sm:$0xff]  ;;  %v23484_v45 = vld [vmem:[#allocation3 + $0xe9] sm:$0xff] }
 0x276   : > { %20337 = vmatprep.subr.bf16.mxu0 %v23349_v2 }
 0x277   : > { %17965 = vmatmul.mubr.msk.f32.vlgmr.msra.gmra.mrb[16].mxu1 %vm294_vm0, %v23036_v63  ;;  %18294 = vmatmul.mubr.msk.f32.gmra.mrb[22].mxu0 %vm294_vm0, %v23450_v35  ;;  %v23471_v63 = vld [vmem:[#allocation3 + $0xd9] sm:$0xff] }
 0x278   : > { %17967 = vmatprep.mubr.msk.f32.mxu1 %vm294_vm0, %v23069_v19  ;;  %20199 = vmatpush3.bf16.msra.mxu1 %v23367_v31  ;;  %26259 = vst [vmem:[#allocation34_spill] sm:$0xff] %v23471_v63  ;;  %v3298_v19 = vld [vmem:[#allocation5 + $0x130] sm:$0xff] }
 0x279   : > { %18296 = vmatprep.mubr.msk.f32.mxu0 %vm294_vm0, %v23460_v59  ;;  %20201 = vmatprep.subr.bf16.mxu1 %v20200_v1 }
 0x27a   : > { %20339 = vmatpush3.bf16.msra.mxu0 %v23349_v2  ;;  %v23478_v2 = vld [vmem:[#allocation3 + $0xe1] sm:$0xff] }
 0x27b   : > { %17968 = vmatmul.mubr.msk.f32.gmra.mrb[18].mxu1 %vm294_vm0, %v23071_v29  ;;  %18297 = vmatmul.mubr.msk.f32.gmra.mrb[24].mxu0 %vm294_vm0, %v23464_v54  ;;  %v20208_v29 = vpack.c.bf16 %v3299_v30, %v3298_v19  ;;  %v26281_v30 = vld [vmem:[#allocation31_spill] sm:$0xff] }
 0x27c   : > { %17970 = vmatprep.mubr.msk.f32.mxu1 %vm294_vm0, %v23078_v42  ;;  %18299 = vmatprep.mubr.msk.f32.mxu0 %vm294_vm0, %v23471_v63  ;;  %v3511_v42 = vld [vmem:[#allocation5 + $0x148] sm:$0xff]  ;;  %v23490_v63 = vld [vmem:[#allocation3 + $0xf1] sm:$0xff] }
 0x27d   : > { %20203 = vmatpush3.bf16.msra.mxu1 %v20200_v1  ;;  %20341 = vmatprep.subr.bf16.mxu0 %v23367_v31  ;;  %v23492_v19 = vpack.c.bf16 %v3511_v42, %v3510_v38  ;;  %v26283_v38 = vld [vmem:[#allocation32_spill] sm:$0xff] }
 0x27e   : > { %20205 = vmatprep.subr.bf16.mxu1 %v20204_v14  ;;  %v26284_v42 = vld [vmem:[#allocation24_spill] sm:$0xff] }
 0x27f   : > { %17971 = vmatmul.mubr.msk.f32.gmra.mrb[20].mxu1 %vm294_vm0, %v23083_v58  ;;  %18300 = vmatmul.mubr.msk.f32.gmra.mrb[26].mxu0 %vm294_vm0, %v23478_v2  ;;  %v23498_v58 = vld [vmem:[#allocation3 + $0xf9] sm:$0xff] }
 0x280   : > { %17973 = vmatprep.mubr.msk.f32.mxu1 %vm294_vm0, %v23087_v3  ;;  %18302 = vmatprep.mubr.msk.f32.mxu0 %vm294_vm0, %v23484_v45  ;;  %v23504_v3 = vld [vmem:[#allocation3 + $0x101] sm:$0xff] }
 0x281   : > { %20207 = vmatpush3.bf16.msra.mxu1 %v20204_v14 }
 0x282   : > { %20209 = vmatprep.subr.bf16.mxu1 %v20208_v29 }
 0x283   : > { %17974 = vmatmul.mubr.msk.f32.gmra.mrb[22].mxu1 %vm294_vm0, %v23091_v9  ;;  %18303 = vmatmul.mubr.msk.f32.gmra.mrb[28].mxu0 %vm294_vm0, %v23490_v63  ;;  %v3512_v9 = vld [vmem:[#allocation5 + $0x150] sm:$0xff] }
 0x284   : > { %17976 = vmatprep.mubr.msk.f32.mxu1 %vm294_vm0, %v23096_v17  ;;  %18305 = vmatprep.mubr.msk.f32.mxu0 %vm294_vm0, %v23498_v58  ;;  %v3513_v17 = vld [vmem:[#allocation5 + $0x158] sm:$0xff] }
 0x285   : > { %20211 = vmatpush3.bf16.msra.mxu1 %v20208_v29 }
 0x286   : > { %20213 = vmatprep.subr.bf16.mxu1 %v23492_v19 }
 0x287   : > { %17977 = vmatmul.mubr.msk.f32.gmra.mrb[24].mxu1 %vm294_vm0, %v23106_v27  ;;  %18306 = vmatmul.mubr.msk.f32.gmra.mrb[30].mxu0 %vm294_vm0, %v23504_v3  ;;  %v3514_v27 = vld [vmem:[#allocation5 + $0x160] sm:$0xff] }
 0x288   : > { %17979 = vmatprep.mubr.msk.f32.mxu1 %vm294_vm0, %v23113_v36  ;;  %18324 = vmatprep.mubr.msk.f32.mxu0 %vm294_vm0, %v23115_v37  ;;  %v3516_v37 = vld [vmem:[#allocation5 + $0x170] sm:$0xff] }
 0x28b   : > { %17980 = vmatmul.mubr.msk.f32.gmra.mrb[26].mxu1 %vm294_vm0, %v23122_v47  ;;  %18325 = vmatmul.mubr.msk.f32.vlgmr.msra.gmra.mrb[16].mxu0 %vm294_vm0, %v23124_v23  ;;  %v3517_v47 = vld [vmem:[#allocation5 + $0x178] sm:$0xff] }
 0x28c   : > { %17982 = vmatprep.mubr.msk.f32.mxu1 %vm294_vm0, %v23134_v57  ;;  %18327 = vmatprep.mubr.msk.f32.mxu0 %vm294_vm0, %v23126_v50  ;;  %v20224_v23 = vpack.c.bf16 %v3517_v47, %v3516_v37  ;;  %v3728_v50 = vld [vmem:[#allocation5 + $0x180] sm:$0xff]  ;;  %v3729_v57 = vld [vmem:[#allocation5 + $0x188] sm:$0xff]  ;;  %v3952_v47 = vld [vmem:[#allocation5 + $0x1f0] sm:$0xff] }
 0x28d   : > { %20343 = vmatpush3.bf16.msra.mxu0 %v23367_v31  ;;  %v26278_v31 = vld [vmem:[#allocation28_spill] sm:$0xff] }
 0x28e   : > { %20345 = vmatprep.subr.bf16.mxu0 %v20200_v1 }
 0x28f   : > { %17983 = vmatmul.mubr.msk.f32.gmra.mrb[28].mxu1 %vm294_vm0, %v23140_v60  ;;  %18328 = vmatmul.mubr.msk.f32.gmra.mrb[18].mxu0 %vm294_vm0, %v23143_v7  ;;  %v23566_v60 = vpack.c.bf16 %v3729_v57, %v3728_v50  ;;  %v23572_v7 = vld [vmem:[#allocation3 + $0x107] sm:$0xff]  ;;  %v3716_v50 = vld [vmem:[#allocation3 + $0x4f] sm:$0xff] }
 0x290   : > { %17985 = vmatprep.mubr.msk.f32.mxu1 %vm294_vm0, %v23100_v18  ;;  %18330 = vmatprep.mubr.msk.f32.mxu0 %vm294_vm0, %v23151_v56  ;;  %v20216_v18 = vpack.c.bf16 %v3513_v17, %v3512_v9  ;;  %v23578_v56 = vld [vmem:[#allocation3 + $0x10f] sm:$0xff]  ;;  %v3711_v17 = vld [vmem:[#allocation3 + $0x27] sm:$0xff] }
 0x291   : > { %20347 = vmatpush3.bf16.msra.mxu0 %v20200_v1  ;;  %v26279_v1 = vld [vmem:[#allocation29_spill] sm:$0xff]  ;;  %v26285_v9 = vld [vmem:[#allocation26_spill] sm:$0xff] }
 0x292   : > { %20349 = vmatprep.subr.bf16.mxu0 %v20204_v14 }
 0x293   : > { %17986 = vmatmul.mubr.msk.f32.gmra.mrb[30].mxu1 %vm294_vm0, %v23102_v26  ;;  %18331 = vmatmul.mubr.msk.f32.gmra.mrb[20].mxu0 %vm294_vm0, %v23159_v44  ;;  %v3515_v26 = vld [vmem:[#allocation5 + $0x168] sm:$0xff]  ;;  %v3730_v44 = vld [vmem:[#allocation5 + $0x190] sm:$0xff] }
 0x294   : > { %18004 = vmatprep.mubr.msk.f32.mxu1 %vm294_vm0, %v23165_v51  ;;  %18333 = vmatprep.mubr.msk.f32.mxu0 %vm294_vm0, %v23170_v28  ;;  %v20220_v36 = vpack.c.bf16 %v3515_v26, %v3514_v27  ;;  %v3731_v51 = vld [vmem:[#allocation5 + $0x198] sm:$0xff]  ;;  %v26260_v28 = vld [vmem:[#allocation8_spill] sm:$0xff] }
 0x295   : > { %20351 = vmatpush3.bf16.msra.mxu0 %v20204_v14  ;;  %v26280_v14 = vld [vmem:[#allocation30_spill] sm:$0xff]  ;;  %v3950_v26 = vld [vmem:[#allocation5 + $0x1e0] sm:$0xff] }
 0x296   : > { %20353 = vmatprep.subr.bf16.mxu0 %v20208_v29  ;;  %v3713_v27 = vld [vmem:[#allocation3 + $0x37] sm:$0xff] }
 0x297   : > { %18005 = vmatmul.mubr.msk.f32.vlgmr.msra.gmra.mrb[16].mxu1 %vm294_vm0, %v23172_v16  ;;  %18334 = vmatmul.mubr.msk.f32.gmra.mrb[22].mxu0 %vm294_vm0, %v23177_v55  ;;  %v26261_v16 = vld [vmem:[#allocation9_spill] sm:$0xff]  ;;  %v26262_v55 = vld [vmem:[#allocation10_spill] sm:$0xff] }
 0x298   : > { %18007 = vmatprep.mubr.msk.f32.mxu1 %vm294_vm0, %v23188_v4  ;;  %20215 = vmatpush3.bf16.msra.mxu1 %v23492_v19  ;;  %v26263_v4 = vld [vmem:[#allocation12_spill] sm:$0xff] }
 0x299   : > { %18336 = vmatprep.mubr.msk.f32.mxu0 %vm294_vm0, %v23179_v62  ;;  %20217 = vmatprep.subr.bf16.mxu1 %v20216_v18  ;;  %v20232_v62 = vpack.c.bf16 %v3731_v51, %v3730_v44  ;;  %v4165_v44 = vld [vmem:[#allocation5 + $0x208] sm:$0xff] }
 0x29a   : > { %20355 = vmatpush3.bf16.msra.mxu0 %v20208_v29  ;;  %v26282_v29 = vld [vmem:[#allocation33_spill] sm:$0xff] }
 0x29b   : > { %18008 = vmatmul.mubr.msk.f32.gmra.mrb[18].mxu1 %vm294_vm0, %v23194_v15  ;;  %18337 = vmatmul.mubr.msk.f32.gmra.mrb[24].mxu0 %vm294_vm0, %v23198_v20  ;;  %v26264_v15 = vld [vmem:[#allocation11_spill] sm:$0xff]  ;;  %v3732_v20 = vld [vmem:[#allocation5 + $0x1a0] sm:$0xff] }
 0x29c   : > { %18010 = vmatprep.mubr.msk.f32.mxu1 %vm294_vm0, %v23200_v22  ;;  %18339 = vmatprep.mubr.msk.f32.mxu0 %vm294_vm0, %v23209_v25  ;;  %v3733_v22 = vld [vmem:[#allocation5 + $0x1a8] sm:$0xff]  ;;  %v26265_v25 = vld [vmem:[#allocation14_spill] sm:$0xff] }
 0x29d   : > { %20219 = vmatpush3.bf16.msra.mxu1 %v20216_v18  ;;  %20357 = vmatprep.subr.bf16.mxu0 %v23492_v19 }
 0x29e   : > { %20221 = vmatprep.subr.bf16.mxu1 %v20220_v36 }
 0x29f   : > { %18011 = vmatmul.mubr.msk.f32.gmra.mrb[20].mxu1 %vm294_vm0, %v23215_v32  ;;  %18340 = vmatmul.mubr.msk.f32.gmra.mrb[26].mxu0 %vm294_vm0, %v23218_v33  ;;  %v26266_v32 = vld [vmem:[#allocation13_spill] sm:$0xff]  ;;  %v20236_v33 = vpack.c.bf16 %v3733_v22, %v3732_v20  ;;  %v5717_v20 = vld [vmem:[#allocation3 + $0xb7] sm:$0xff] }
 0x2a0   : > { %18013 = vmatprep.mubr.msk.f32.mxu1 %vm294_vm0, %v23227_v40  ;;  %18342 = vmatprep.mubr.msk.f32.mxu0 %vm294_vm0, %v23229_v41  ;;  %v26267_v40 = vld [vmem:[#allocation15_spill] sm:$0xff]  ;;  %v3734_v41 = vld [vmem:[#allocation5 + $0x1b0] sm:$0xff] }
 0x2a1   : > { %20223 = vmatpush3.bf16.msra.mxu1 %v20220_v36  ;;  %v3724_v22 = vld [vmem:[#allocation3 + $0x8f] sm:$0xff] }
 0x2a2   : > { %20225 = vmatprep.subr.bf16.mxu1 %v20224_v23 }
 0x2a3   : > { %18014 = vmatmul.mubr.msk.f32.gmra.mrb[22].mxu1 %vm294_vm0, %v23235_v48  ;;  %18343 = vmatmul.mubr.msk.f32.gmra.mrb[28].mxu0 %vm294_vm0, %v23238_v49  ;;  %v3735_v48 = vld [vmem:[#allocation5 + $0x1b8] sm:$0xff]  ;;  %v26268_v49 = vld [vmem:[#allocation16_spill] sm:$0xff] }
 0x2a4   : > { %18016 = vmatprep.mubr.msk.f32.mxu1 %vm294_vm0, %v23245_v52  ;;  %18345 = vmatprep.mubr.msk.f32.mxu0 %vm294_vm0, %v23572_v7  ;;  %v26269_v52 = vld [vmem:[#allocation17_spill] sm:$0xff] }
 0x2a5   : > { %20227 = vmatpush3.bf16.msra.mxu1 %v20224_v23 }
 0x2a6   : > { %20229 = vmatprep.subr.bf16.mxu1 %v23566_v60 }
 0x2a7   : > { %18017 = vmatmul.mubr.msk.f32.gmra.mrb[24].mxu1 %vm294_vm0, %v23253_v5  ;;  %18346 = vmatmul.mubr.msk.f32.gmra.mrb[30].mxu0 %vm294_vm0, %v23578_v56  ;;  %v26270_v5 = vld [vmem:[#allocation18_spill] sm:$0xff] }
 0x2a8   : > { %18019 = vmatprep.mubr.msk.f32.mxu1 %vm294_vm0, %v23261_v43  ;;  %18364 = vmatprep.mubr.msk.f32.mxu0 %vm294_vm0, %v23263_v6  ;;  %v3947_v43 = vld [vmem:[#allocation5 + $0x1c8] sm:$0xff]  ;;  %v26271_v6 = vld [vmem:[#allocation19_spill] sm:$0xff] }
 0x2ab   : > { %18020 = vmatmul.mubr.msk.f32.gmra.mrb[26].mxu1 %vm294_vm0, %v23269_v46  ;;  %18365 = vmatmul.mubr.msk.f32.vlgmr.msra.gmra.mrb[16].mxu0 %vm294_vm0, %v23271_v12  ;;  %v26272_v46 = vld [vmem:[#allocation20_spill] sm:$0xff] }
 0x2ac   : > { %18022 = vmatprep.mubr.msk.f32.mxu1 %vm294_vm0, %v23279_v34  ;;  %18367 = vmatprep.mubr.msk.f32.mxu0 %vm294_vm0, %v23281_v21  ;;  %v26273_v34 = vld [vmem:[#allocation22_spill] sm:$0xff]  ;;  %v26274_v21 = vld [vmem:[#allocation21_spill] sm:$0xff] }
 0x2ad   : > { %20359 = vmatpush3.bf16.msra.mxu0 %v23492_v19  ;;  %v3949_v19 = vld [vmem:[#allocation5 + $0x1d8] sm:$0xff] }
 0x2ae   : > { %20361 = vmatprep.subr.bf16.mxu0 %v20216_v18 }
 0x2af   : > { %18023 = vmatmul.mubr.msk.f32.gmra.mrb[28].mxu1 %vm294_vm0, %v23287_v0  ;;  %18368 = vmatmul.mubr.msk.f32.gmra.mrb[18].mxu0 %vm294_vm0, %v23289_v39  ;;  %v23646_v0 = vld [vmem:[#allocation3 + $0x108] sm:$0xff]  ;;  %v26275_v39 = vld [vmem:[#allocation23_spill] sm:$0xff] }
 0x2b0   : > { %18025 = vmatprep.mubr.msk.f32.mxu1 %vm294_vm0, %v23247_v61  ;;  %18370 = vmatprep.mubr.msk.f32.mxu0 %vm294_vm0, %v23297_v53  ;;  %v20240_v61 = vpack.c.bf16 %v3735_v48, %v3734_v41  ;;  %v23652_v53 = vld [vmem:[#allocation3 + $0x110] sm:$0xff] }
 0x2b1   : > { %20363 = vmatpush3.bf16.msra.mxu0 %v20216_v18  ;;  %v5720_v41 = vld [vmem:[#allocation3 + $0xcf] sm:$0xff] }
 0x2b2   : > { %20365 = vmatprep.subr.bf16.mxu0 %v20220_v36  ;;  %v4166_v48 = vld [vmem:[#allocation5 + $0x210] sm:$0xff] }
 0x2b3   : > { %18026 = vmatmul.mubr.msk.f32.gmra.mrb[30].mxu1 %vm294_vm0, %v23255_v11  ;;  %18371 = vmatmul.mubr.msk.f32.gmra.mrb[20].mxu0 %vm294_vm0, %v26260_v28  ;;  %v3946_v11 = vld [vmem:[#allocation5 + $0x1c0] sm:$0xff]  ;;  %v23723_v28 = vld [vmem:[#allocation3 + $0x109] sm:$0xff] }
 0x2b4   : > { %18044 = vmatprep.mubr.msk.f32.mxu1 %vm294_vm0, %v26261_v16  ;;  %18373 = vmatprep.mubr.msk.f32.mxu0 %vm294_vm0, %v26262_v55  ;;  %v23640_v12 = vpack.c.bf16 %v3947_v43, %v3946_v11  ;;  %v3720_v16 = vld [vmem:[#allocation3 + $0x6f] sm:$0xff]  ;;  %v5715_v55 = vld [vmem:[#allocation3 + $0xa7] sm:$0xff]  ;;  %v5722_v43 = vld [vmem:[#allocation3 + $0xdf] sm:$0xff] }
 0x2b5   : > { %20367 = vmatpush3.bf16.msra.mxu0 %v20220_v36  ;;  %v3951_v36 = vld [vmem:[#allocation5 + $0x1e8] sm:$0xff] }
 0x2b6   : > { %20369 = vmatprep.subr.bf16.mxu0 %v20224_v23  ;;  %v23697_v37 = vpack.c.bf16 %v3951_v36, %v3950_v26  ;;  %v3939_v26 = vld [vmem:[#allocation3 + $0x78] sm:$0xff]  ;;  %v5932_v36 = vld [vmem:[#allocation3 + $0xa8] sm:$0xff] }
 0x2b7   : > { %18045 = vmatmul.mubr.msk.f32.vlgmr.msra.gmra.mrb[16].mxu1 %vm294_vm0, %v26263_v4  ;;  %18374 = vmatmul.mubr.msk.f32.gmra.mrb[22].mxu0 %vm294_vm0, %v26264_v15  ;;  %v5716_v4 = vld [vmem:[#allocation3 + $0xaf] sm:$0xff]  ;;  %v3723_v15 = vld [vmem:[#allocation3 + $0x87] sm:$0xff] }
 0x2b8   : > { %18047 = vmatprep.mubr.msk.f32.mxu1 %vm294_vm0, %v26265_v25  ;;  %20231 = vmatpush3.bf16.msra.mxu1 %v23566_v60  ;;  %v5718_v25 = vld [vmem:[#allocation3 + $0xbf] sm:$0xff] }
 0x2b9   : > { %18376 = vmatprep.mubr.msk.f32.mxu0 %vm294_vm0, %v26266_v32  ;;  %20233 = vmatprep.subr.bf16.mxu1 %v20232_v62  ;;  %v3725_v32 = vld [vmem:[#allocation3 + $0x97] sm:$0xff] }
 0x2ba   : > { %20371 = vmatpush3.bf16.msra.mxu0 %v20224_v23  ;;  %v3953_v23 = vld [vmem:[#allocation5 + $0x1f8] sm:$0xff] }
 0x2bb   : > { %18048 = vmatmul.mubr.msk.f32.gmra.mrb[18].mxu1 %vm294_vm0, %v23344_v24  ;;  %18377 = vmatmul.mubr.msk.f32.gmra.mrb[24].mxu0 %vm294_vm0, %v26267_v40  ;;  %v26276_v24 = vld [vmem:[#allocation25_spill] sm:$0xff]  ;;  %v23708_v57 = vpack.c.bf16 %v3953_v23, %v3952_v47  ;;  %v3726_v40 = vld [vmem:[#allocation3 + $0x9f] sm:$0xff] }
 0x2bc   : > { %18050 = vmatprep.mubr.msk.f32.mxu1 %vm294_vm0, %v26268_v49  ;;  %18379 = vmatprep.mubr.msk.f32.mxu0 %vm294_vm0, %v26269_v52  ;;  %v4167_v49 = vld [vmem:[#allocation5 + $0x218] sm:$0xff]  ;;  %v3929_v52 = vld [vmem:[#allocation3 + $0x28] sm:$0xff]  ;;  %v5935_v47 = vld [vmem:[#allocation3 + $0xc0] sm:$0xff] }
 0x2bd   : > { %20235 = vmatpush3.bf16.msra.mxu1 %v20232_v62  ;;  %20373 = vmatprep.subr.bf16.mxu0 %v23566_v60  ;;  %v23753_v11 = vpack.c.bf16 %v4167_v49, %v4166_v48  ;;  %v3943_v23 = vld [vmem:[#allocation3 + $0x98] sm:$0xff]  ;;  %v4155_v48 = vld [vmem:[#allocation3 + $0x69] sm:$0xff]  ;;  %v5947_v49 = vld [vmem:[#allocation3 + $0x120] sm:$0xff] }
 0x2be   : > { %20237 = vmatprep.subr.bf16.mxu1 %v20236_v33 }
 0x2bf   : > { %18051 = vmatmul.mubr.msk.f32.gmra.mrb[20].mxu1 %vm294_vm0, %v23364_v10  ;;  %18380 = vmatmul.mubr.msk.f32.gmra.mrb[26].mxu0 %vm294_vm0, %v26270_v5  ;;  %v26277_v10 = vld [vmem:[#allocation27_spill] sm:$0xff]  ;;  %v3930_v5 = vld [vmem:[#allocation3 + $0x30] sm:$0xff] }
 0x2c0   : > { %18053 = vmatprep.mubr.msk.f32.mxu1 %vm294_vm0, %v26271_v6  ;;  %18382 = vmatprep.mubr.msk.f32.mxu0 %vm294_vm0, %v26272_v46  ;;  %v3931_v6 = vld [vmem:[#allocation3 + $0x38] sm:$0xff]  ;;  %v4168_v46 = vld [vmem:[#allocation5 + $0x220] sm:$0xff] }
 0x2c1   : > { %20239 = vmatpush3.bf16.msra.mxu1 %v20236_v33 }
 0x2c2   : > { %20241 = vmatprep.subr.bf16.mxu1 %v20240_v61 }
 0x2c3   : > { %18054 = vmatmul.mubr.msk.f32.gmra.mrb[22].mxu1 %vm294_vm0, %v26273_v34  ;;  %18383 = vmatmul.mubr.msk.f32.gmra.mrb[28].mxu0 %vm294_vm0, %v26274_v21  ;;  %v5723_v34 = vld [vmem:[#allocation3 + $0xe7] sm:$0xff] }
 0x2c4   : > { %18056 = vmatprep.mubr.msk.f32.mxu1 %vm294_vm0, %v26275_v39  ;;  %18385 = vmatprep.mubr.msk.f32.mxu0 %vm294_vm0, %v23646_v0  ;;  %v3932_v21 = vld [vmem:[#allocation3 + $0x40] sm:$0xff]  ;;  %v5724_v39 = vld [vmem:[#allocation3 + $0xef] sm:$0xff] }
 0x2c5   : > { %20243 = vmatpush3.bf16.msra.mxu1 %v20240_v61 }
 0x2c6   : > { %20245 = vmatprep.subr.bf16.mxu1 %v23640_v12 }
 0x2c7   : > { %18057 = vmatmul.mubr.msk.f32.gmra.mrb[24].mxu1 %vm294_vm0, %v26276_v24  ;;  %18386 = vmatmul.mubr.msk.f32.gmra.mrb[30].mxu0 %vm294_vm0, %v23652_v53  ;;  %v5725_v24 = vld [vmem:[#allocation3 + $0xf7] sm:$0xff] }
 0x2c8   : > { %18059 = vmatprep.mubr.msk.f32.mxu1 %vm294_vm0, %v26277_v10  ;;  %18404 = vmatprep.mubr.msk.f32.mxu0 %vm294_vm0, %v26278_v31  ;;  %v3933_v31 = vld [vmem:[#allocation3 + $0x48] sm:$0xff] }
 0x2cb   : > { %18060 = vmatmul.mubr.msk.f32.gmra.mrb[26].mxu1 %vm294_vm0, %v26279_v1  ;;  %18405 = vmatmul.mubr.msk.f32.vlgmr.msra.gmra.mrb[16].mxu0 %vm294_vm0, %v23418_v13  ;;  %v3948_v13 = vld [vmem:[#allocation5 + $0x1d0] sm:$0xff] }
 0x2cc   : > { %18062 = vmatprep.mubr.msk.f32.mxu1 %vm294_vm0, %v26280_v14  ;;  %18407 = vmatprep.mubr.msk.f32.mxu0 %vm294_vm0, %v26281_v30  ;;  %v23687_v18 = vpack.c.bf16 %v3949_v19, %v3948_v13  ;;  %v4170_v1 = vld [vmem:[#allocation5 + $0x230] sm:$0xff]  ;;  %v4171_v14 = vld [vmem:[#allocation5 + $0x238] sm:$0xff] }
 0x2cd   : > { %20375 = vmatpush3.bf16.msra.mxu0 %v23566_v60  ;;  %v4164_v60 = vld [vmem:[#allocation5 + $0x200] sm:$0xff]  ;;  %v3934_v30 = vld [vmem:[#allocation3 + $0x50] sm:$0xff]  ;;  %v6440_v19 = vld [vmem:[%s26144_s5 + $0x8] sm:$0xff] }
 0x2ce   : > { %20377 = vmatprep.subr.bf16.mxu0 %v20232_v62  ;;  %v23718_v51 = vpack.c.bf16 %v4165_v44, %v4164_v60  ;;  %v6439_v13 = vld [vmem:[%s26144_s5] sm:$0xff]  ;;  %v5938_v60 = vld [vmem:[#allocation3 + $0xd8] sm:$0xff] }
 0x2cf   : > { %18063 = vmatmul.mubr.msk.f32.gmra.mrb[28].mxu1 %vm294_vm0, %v26282_v29  ;;  %18408 = vmatmul.mubr.msk.f32.gmra.mrb[18].mxu0 %vm294_vm0, %v26283_v38  ;;  %v5726_v29 = vld [vmem:[#allocation3 + $0xff] sm:$0xff]  ;;  %v23773_v38 = vpack.c.bf16 %v4171_v14, %v4170_v1  ;;  %v4147_v44 = vld [vmem:[#allocation3 + $0x29] sm:$0xff]  ;;  %v6158_v1 = vld [vmem:[#allocation3 + $0xf1] sm:$0xff] }
 0x2d0   : > { %18065 = vmatprep.mubr.msk.f32.mxu1 %vm294_vm0, %v26284_v42  ;;  %18410 = vmatprep.mubr.msk.f32.mxu0 %vm294_vm0, %v23443_v8  ;;  %v3712_v8 = vld [vmem:[#allocation3 + $0x2f] sm:$0xff]  ;;  %v3935_v42 = vld [vmem:[#allocation3 + $0x58] sm:$0xff] }
 0x2d1   : > { %20379 = vmatpush3.bf16.msra.mxu0 %v20232_v62  ;;  %v3722_v62 = vld [vmem:[#allocation3 + $0x7f] sm:$0xff] }
 0x2d2   : > { %20381 = vmatprep.subr.bf16.mxu0 %v20236_v33  ;;  %v6159_v14 = vld [vmem:[#allocation3 + $0xf9] sm:$0xff] }
 0x2d3   : > { %18066 = vmatmul.mubr.msk.f32.gmra.mrb[30].mxu1 %vm294_vm0, %v26285_v9  ;;  %18411 = vmatmul.mubr.msk.f32.gmra.mrb[20].mxu0 %vm294_vm0, %v23450_v35  ;;  %v26286_v35 = vld [vmem:[#allocation34_spill] sm:$0xff]  ;;  %v3936_v9 = vld [vmem:[#allocation3 + $0x60] sm:$0xff] }
 0x2d4   : > { %18084 = vmatprep.mubr.msk.f32.mxu1 %vm294_vm0, %v3711_v17  ;;  %18413 = vmatprep.mubr.msk.f32.mxu0 %vm294_vm0, %v23460_v59  ;;  %v3714_v59 = vld [vmem:[#allocation3 + $0x3f] sm:$0xff]  ;;  %v5729_v17 = vld [vmem:[#allocation3 + $0x117] sm:$0xff] }
 0x2d5   : > { %20383 = vmatpush3.bf16.msra.mxu0 %v20236_v33  ;;  %v5719_v33 = vld [vmem:[#allocation3 + $0xc7] sm:$0xff] }
 0x2d6   : > { %20385 = vmatprep.subr.bf16.mxu0 %v20240_v61 }
 0x2d7   : > { %18085 = vmatmul.mubr.msk.f32.vlgmr.msra.gmra.mrb[16].mxu1 %vm294_vm0, %v3712_v8  ;;  %18414 = vmatmul.mubr.msk.f32.gmra.mrb[22].mxu0 %vm294_vm0, %v23464_v54  ;;  %v3715_v54 = vld [vmem:[#allocation3 + $0x47] sm:$0xff] }
 0x2d8   : > { %18087 = vmatprep.mubr.msk.f32.mxu1 %vm294_vm0, %v3713_v27  ;;  %20247 = vmatpush3.bf16.msra.mxu1 %v23640_v12  ;;  %v3937_v8 = vld [vmem:[#allocation3 + $0x68] sm:$0xff]  ;;  %v3938_v27 = vld [vmem:[#allocation3 + $0x70] sm:$0xff] }
 0x2d9   : > { %18416 = vmatprep.mubr.msk.f32.mxu0 %vm294_vm0, %v26286_v35  ;;  %20249 = vmatprep.subr.bf16.mxu1 %v23687_v18  ;;  %v5933_v35 = vld [vmem:[#allocation3 + $0xb0] sm:$0xff] }
 0x2da   : > { %20387 = vmatpush3.bf16.msra.mxu0 %v20240_v61  ;;  %v5721_v61 = vld [vmem:[#allocation3 + $0xd7] sm:$0xff] }
 0x2db   : > { %18088 = vmatmul.mubr.msk.f32.gmra.mrb[18].mxu1 %vm294_vm0, %v3714_v59  ;;  %18417 = vmatmul.mubr.msk.f32.gmra.mrb[24].mxu0 %vm294_vm0, %v23478_v2  ;;  %v3717_v2 = vld [vmem:[#allocation3 + $0x57] sm:$0xff]  ;;  %v3941_v59 = vld [vmem:[#allocation3 + $0x88] sm:$0xff] }
 0x2dc   : > { %18090 = vmatprep.mubr.msk.f32.mxu1 %vm294_vm0, %v3715_v54  ;;  %18419 = vmatprep.mubr.msk.f32.mxu0 %vm294_vm0, %v23484_v45  ;;  %v3718_v45 = vld [vmem:[#allocation3 + $0x5f] sm:$0xff]  ;;  %v3942_v54 = vld [vmem:[#allocation3 + $0x90] sm:$0xff] }
 0x2dd   : > { %20251 = vmatpush3.bf16.msra.mxu1 %v23687_v18  ;;  %20389 = vmatprep.subr.bf16.mxu0 %v23640_v12 }
 0x2de   : > { %20253 = vmatprep.subr.bf16.mxu1 %v23697_v37 }
 0x2df   : > { %18091 = vmatmul.mubr.msk.f32.gmra.mrb[20].mxu1 %vm294_vm0, %v3716_v50  ;;  %18420 = vmatmul.mubr.msk.f32.gmra.mrb[26].mxu0 %vm294_vm0, %v23490_v63  ;;  %v3719_v63 = vld [vmem:[#allocation3 + $0x67] sm:$0xff] }
 0x2e0   : > { %18093 = vmatprep.mubr.msk.f32.mxu1 %vm294_vm0, %v3717_v2  ;;  %18422 = vmatprep.mubr.msk.f32.mxu0 %vm294_vm0, %v23498_v58  ;;  %v23728_v58 = vld [vmem:[#allocation3 + $0x111] sm:$0xff]  ;;  %v5936_v50 = vld [vmem:[#allocation3 + $0xc8] sm:$0xff] }
 0x2e1   : > { %20255 = vmatpush3.bf16.msra.mxu1 %v23697_v37  ;;  %v5937_v2 = vld [vmem:[#allocation3 + $0xd0] sm:$0xff] }
 0x2e2   : > { %20257 = vmatprep.subr.bf16.mxu1 %v23708_v57 }
 0x2e3   : > { %18094 = vmatmul.mubr.msk.f32.gmra.mrb[22].mxu1 %vm294_vm0, %v3718_v45  ;;  %18423 = vmatmul.mubr.msk.f32.gmra.mrb[28].mxu0 %vm294_vm0, %v23504_v3  ;;  %v3721_v3 = vld [vmem:[#allocation3 + $0x77] sm:$0xff]  ;;  %v6441_v45 = vld [vmem:[%s26144_s5 + $0x10] sm:$0xff] }
 0x2e4   : > { %18096 = vmatprep.mubr.msk.f32.mxu1 %vm294_vm0, %v3719_v63  ;;  %18425 = vmatprep.mubr.msk.f32.mxu0 %vm294_vm0, %v23723_v28  ;;  %v5939_v63 = vld [vmem:[#allocation3 + $0xe0] sm:$0xff] }
 0x2e5   : > { %20259 = vmatpush3.bf16.msra.mxu1 %v23708_v57 }
 0x2e6   : > { %20261 = vmatprep.subr.bf16.mxu1 %v23718_v51 }
 0x2e7   : > { %18097 = vmatmul.mubr.msk.f32.gmra.mrb[24].mxu1 %vm294_vm0, %v3720_v16  ;;  %18426 = vmatmul.mubr.msk.f32.gmra.mrb[30].mxu0 %vm294_vm0, %v23728_v58  ;;  %v4148_v16 = vld [vmem:[#allocation3 + $0x31] sm:$0xff] }
 0x2e8   : > { %18099 = vmatprep.mubr.msk.f32.mxu1 %vm294_vm0, %v3721_v3  ;;  %18444 = vmatprep.mubr.msk.f32.mxu0 %vm294_vm0, %v5715_v55  ;;  %v4149_v55 = vld [vmem:[#allocation3 + $0x39] sm:$0xff] }
 0x2eb   : > { %18100 = vmatmul.mubr.msk.f32.gmra.mrb[26].mxu1 %vm294_vm0, %v3722_v62  ;;  %18445 = vmatmul.mubr.msk.f32.vlgmr.msra.gmra.mrb[16].mxu0 %vm294_vm0, %v5716_v4  ;;  %v5940_v62 = vld [vmem:[#allocation3 + $0xe8] sm:$0xff]  ;;  %v5941_v4 = vld [vmem:[#allocation3 + $0xf0] sm:$0xff] }
 0x2ec   : > { %18102 = vmatprep.mubr.msk.f32.mxu1 %vm294_vm0, %v3723_v15  ;;  %18447 = vmatprep.mubr.msk.f32.mxu0 %vm294_vm0, %v5717_v20  ;;  %v4150_v15 = vld [vmem:[#allocation3 + $0x41] sm:$0xff]  ;;  %v4151_v20 = vld [vmem:[#allocation3 + $0x49] sm:$0xff] }
 0x2ed   : > { %20391 = vmatpush3.bf16.msra.mxu0 %v23640_v12  ;;  %v4169_v12 = vld [vmem:[#allocation5 + $0x228] sm:$0xff] }
 0x2ee   : > { %20393 = vmatprep.subr.bf16.mxu0 %v23687_v18  ;;  %v23763_v10 = vpack.c.bf16 %v4169_v12, %v4168_v46  ;;  %v6152_v46 = vld [vmem:[#allocation3 + $0xc1] sm:$0xff]  ;;  %v4161_v12 = vld [vmem:[#allocation3 + $0x99] sm:$0xff] }
 0x2ef   : > { %18103 = vmatmul.mubr.msk.f32.gmra.mrb[28].mxu1 %vm294_vm0, %v3724_v22  ;;  %18448 = vmatmul.mubr.msk.f32.gmra.mrb[18].mxu0 %vm294_vm0, %v5718_v25  ;;  %v5942_v22 = vld [vmem:[#allocation3 + $0xf8] sm:$0xff]  ;;  %v5943_v25 = vld [vmem:[#allocation3 + $0x100] sm:$0xff] }
 0x2f0   : > { %18105 = vmatprep.mubr.msk.f32.mxu1 %vm294_vm0, %v3725_v32  ;;  %18450 = vmatprep.mubr.msk.f32.mxu0 %vm294_vm0, %v5719_v33  ;;  %v4152_v32 = vld [vmem:[#allocation3 + $0x51] sm:$0xff]  ;;  %v4153_v33 = vld [vmem:[#allocation3 + $0x59] sm:$0xff] }
 0x2f1   : > { %20395 = vmatpush3.bf16.msra.mxu0 %v23687_v18  ;;  %v23788_v18 = vpack.c.bf16 %v6440_v19, %v6439_v13  ;;  %v6444_v13 = vld [vmem:[%s26144_s5 + $0x28] sm:$0xff] }
 0x2f2   : > { %20397 = vmatprep.subr.bf16.mxu0 %v23697_v37 }
 0x2f3   : > { %18106 = vmatmul.mubr.msk.f32.gmra.mrb[30].mxu1 %vm294_vm0, %v3726_v40  ;;  %18451 = vmatmul.mubr.msk.f32.gmra.mrb[20].mxu0 %vm294_vm0, %v5720_v41  ;;  %v5946_v40 = vld [vmem:[#allocation3 + $0x118] sm:$0xff]  ;;  %v4154_v41 = vld [vmem:[#allocation3 + $0x61] sm:$0xff] }
 0x2f4   : > { %18124 = vmatprep.mubr.msk.f32.mxu1 %vm294_vm0, %v3929_v52  ;;  %18453 = vmatprep.mubr.msk.f32.mxu0 %vm294_vm0, %v5721_v61  ;;  %v4156_v52 = vld [vmem:[#allocation3 + $0x71] sm:$0xff]  ;;  %v4157_v61 = vld [vmem:[#allocation3 + $0x79] sm:$0xff] }
 0x2f5   : > { %20399 = vmatpush3.bf16.msra.mxu0 %v23697_v37  ;;  %v5934_v37 = vld [vmem:[#allocation3 + $0xb8] sm:$0xff] }
 0x2f6   : > { %20401 = vmatprep.subr.bf16.mxu0 %v23708_v57 }
 0x2f7   : > { %18125 = vmatmul.mubr.msk.f32.vlgmr.msra.gmra.mrb[16].mxu1 %vm294_vm0, %v3930_v5  ;;  %18454 = vmatmul.mubr.msk.f32.gmra.mrb[22].mxu0 %vm294_vm0, %v5722_v43  ;;  %v4158_v5 = vld [vmem:[#allocation3 + $0x81] sm:$0xff]  ;;  %v6151_v43 = vld [vmem:[#allocation3 + $0xb9] sm:$0xff] }
 0x2f8   : > { %18127 = vmatprep.mubr.msk.f32.mxu1 %vm294_vm0, %v3931_v6  ;;  %20263 = vmatpush3.bf16.msra.mxu1 %v23718_v51  ;;  %v4160_v6 = vld [vmem:[#allocation3 + $0x91] sm:$0xff] }
 0x2f9   : > { %18456 = vmatprep.mubr.msk.f32.mxu0 %vm294_vm0, %v5723_v34  ;;  %20265 = vmatprep.subr.bf16.mxu1 %v23753_v11  ;;  %v6153_v34 = vld [vmem:[#allocation3 + $0xc9] sm:$0xff] }
 0x2fa   : > { %20403 = vmatpush3.bf16.msra.mxu0 %v23708_v57  ;;  %v3944_v57 = vld [vmem:[#allocation3 + $0xa0] sm:$0xff] }
 0x2fb   : > { %18128 = vmatmul.mubr.msk.f32.gmra.mrb[18].mxu1 %vm294_vm0, %v3932_v21  ;;  %18457 = vmatmul.mubr.msk.f32.gmra.mrb[24].mxu0 %vm294_vm0, %v5724_v39  ;;  %v4162_v21 = vld [vmem:[#allocation3 + $0xa1] sm:$0xff]  ;;  %v6154_v39 = vld [vmem:[#allocation3 + $0xd1] sm:$0xff] }
 0x2fc   : > { %18130 = vmatprep.mubr.msk.f32.mxu1 %vm294_vm0, %v3933_v31  ;;  %18459 = vmatprep.mubr.msk.f32.mxu0 %vm294_vm0, %v5725_v24  ;;  %v6155_v24 = vld [vmem:[#allocation3 + $0xd9] sm:$0xff]  ;;  %v6157_v31 = vld [vmem:[#allocation3 + $0xe9] sm:$0xff] }
 0x2fd   : > { %20267 = vmatpush3.bf16.msra.mxu1 %v23753_v11  ;;  %20405 = vmatprep.subr.bf16.mxu0 %v23718_v51 }
 0x2fe   : > { %20269 = vmatprep.subr.bf16.mxu1 %v23763_v10 }
 0x2ff   : > { %18131 = vmatmul.mubr.msk.f32.gmra.mrb[20].mxu1 %vm294_vm0, %v3934_v30  ;;  %18460 = vmatmul.mubr.msk.f32.gmra.mrb[26].mxu0 %vm294_vm0, %v5726_v29  ;;  %v6160_v30 = vld [vmem:[#allocation3 + $0x101] sm:$0xff]  ;;  %v6163_v29 = vld [vmem:[#allocation3 + $0x119] sm:$0xff] }
 0x300   : > { %18133 = vmatprep.mubr.msk.f32.mxu1 %vm294_vm0, %v3935_v42  ;;  %18462 = vmatprep.mubr.msk.f32.mxu0 %vm294_vm0, %v23572_v7  ;;  %v5730_v7 = vld [vmem:[#allocation3 + $0x11f] sm:$0xff]  ;;  %v6443_v42 = vld [vmem:[%s26144_s5 + $0x20] sm:$0xff] }
 0x301   : > { %20271 = vmatpush3.bf16.msra.mxu1 %v23763_v10  ;;  %v20428_v19 = vpack.c.bf16 %v6444_v13, %v6443_v42 }
 0x302   : > { %20273 = vmatprep.subr.bf16.mxu1 %v23773_v38 }
 0x303   : > { %18134 = vmatmul.mubr.msk.f32.gmra.mrb[22].mxu1 %vm294_vm0, %v3936_v9  ;;  %18463 = vmatmul.mubr.msk.f32.gmra.mrb[28].mxu0 %vm294_vm0, %v23578_v56  ;;  %v3940_v56 = vld [vmem:[#allocation3 + $0x80] sm:$0xff] }
 0x304   : > { %18136 = vmatprep.mubr.msk.f32.mxu1 %vm294_vm0, %v3937_v8  ;;  %18465 = vmatprep.mubr.msk.f32.mxu0 %vm294_vm0, %v5729_v17  ;;  %v6423_v17 = vld [vmem:[#allocation4 + $0x7] sm:$0xff]  ;;  %v23890_v8 = vld [vmem:[%s26143_s4] ss:$0 sm:$0xff] }
 0x305   : > { %20275 = vmatpush3.bf16.msra.mxu1 %v23773_v38 }
 0x306   : > { %20421 = vmatprep.subr.bf16.mxu1 %v23788_v18 }
 0x307   : > { %18137 = vmatmul.mubr.msk.f32.gmra.mrb[24].mxu1 %vm294_vm0, %v3938_v27  ;;  %18466 = vmatmul.mubr.msk.f32.gmra.mrb[30].mxu0 %vm294_vm0, %v5730_v7 }
 0x308   : > { %18139 = vmatprep.mubr.msk.f32.mxu1 %vm294_vm0, %v3939_v26  ;;  %18484 = vmatprep.mubr.msk.f32.mxu0 %vm294_vm0, %v5932_v36 }
 0x30b   : > { %18140 = vmatmul.mubr.msk.f32.gmra.mrb[26].mxu1 %vm294_vm0, %v3940_v56  ;;  %18485 = vmatmul.mubr.msk.f32.vlgmr.msra.gmra.mrb[16].mxu0 %vm294_vm0, %v5933_v35 }
 0x30c   : > { %18142 = vmatprep.mubr.msk.f32.mxu1 %vm294_vm0, %v3941_v59  ;;  %18487 = vmatprep.mubr.msk.f32.mxu0 %vm294_vm0, %v5934_v37 }
 0x30d   : > { %20407 = vmatpush3.bf16.msra.mxu0 %v23718_v51  ;;  %v6442_v51 = vld [vmem:[%s26144_s5 + $0x18] sm:$0xff] }
 0x30e   : > { %20409 = vmatprep.subr.bf16.mxu0 %v23753_v11  ;;  %v20424_v3 = vpack.c.bf16 %v6442_v51, %v6441_v45 }
 0x30f   : > { %18143 = vmatmul.mubr.msk.f32.gmra.mrb[28].mxu1 %vm294_vm0, %v3942_v54  ;;  %18488 = vmatmul.mubr.msk.f32.gmra.mrb[18].mxu0 %vm294_vm0, %v5935_v47 }
 0x310   : > { %18145 = vmatprep.mubr.msk.f32.mxu1 %vm294_vm0, %v3943_v23  ;;  %18490 = vmatprep.mubr.msk.f32.mxu0 %vm294_vm0, %v5936_v50  ;;  %v15073_v50 = vld [vmem:[%s26144_s5 + $0x40] sm:$0xff] }
 0x311   : > { %20411 = vmatpush3.bf16.msra.mxu0 %v23753_v11  ;;  %v6150_v11 = vld [vmem:[#allocation3 + $0xb1] sm:$0xff] }
 0x312   : > { %20413 = vmatprep.subr.bf16.mxu0 %v23763_v10 }
 0x313   : > { %18146 = vmatmul.mubr.msk.f32.gmra.mrb[30].mxu1 %vm294_vm0, %v3944_v57  ;;  %18491 = vmatmul.mubr.msk.f32.gmra.mrb[20].mxu0 %vm294_vm0, %v5937_v2  ;;  %v15074_v57 = vld [vmem:[%s26144_s5 + $0x48] sm:$0xff] }
 0x314   : > { %18164 = vmatprep.mubr.msk.f32.mxu1 %vm294_vm0, %v4147_v44  ;;  %18493 = vmatprep.mubr.msk.f32.mxu0 %vm294_vm0, %v5938_v60  ;;  %v23905_v2 = vpack.c.bf16 %v15074_v57, %v15073_v50 }
 0x315   : > { %20415 = vmatpush3.bf16.msra.mxu0 %v23763_v10  ;;  %v6156_v10 = vld [vmem:[#allocation3 + $0xe1] sm:$0xff] }
 0x316   : > { %20417 = vmatprep.subr.bf16.mxu0 %v23773_v38 }
 0x317   : > { %18165 = vmatmul.mubr.msk.f32.vlgmr.msra.gmra.mrb[16].mxu1 %vm294_vm0, %v4148_v16  ;;  %18494 = vmatmul.mubr.msk.f32.gmra.mrb[22].mxu0 %vm294_vm0, %v5939_v63 }
 0x318   : > { %18167 = vmatprep.mubr.msk.f32.mxu1 %vm294_vm0, %v4149_v55  ;;  %18496 = vmatprep.mubr.msk.f32.mxu0 %vm294_vm0, %v5940_v62  ;;  %v15076_v55 = vld [vmem:[%s26144_s5 + $0x58] sm:$0xff] }
 0x319   : > { %20419 = vmatpush3.bf16.msra.mxu0 %v23773_v38  ;;  %20423 = vmatpush3.bf16.msra.mxu1 %v23788_v18  ;;  %v6164_v38 = vld [vmem:[#allocation3 + $0x121] sm:$0xff] }
 0x31a   : > { %20425 = vmatprep.subr.bf16.mxu1 %v20424_v3  ;;  %20565 = vmatprep.subr.bf16.mxu0 %v23788_v18 }
 0x31b   : > { %18168 = vmatmul.mubr.msk.f32.gmra.mrb[18].mxu1 %vm294_vm0, %v4150_v15  ;;  %18497 = vmatmul.mubr.msk.f32.gmra.mrb[24].mxu0 %vm294_vm0, %v5941_v4 }
 0x31c   : > { %18170 = vmatprep.mubr.msk.f32.mxu1 %vm294_vm0, %v4151_v20  ;;  %18499 = vmatprep.mubr.msk.f32.mxu0 %vm294_vm0, %v5942_v22 }
 0x31d   : > { %20427 = vmatpush3.bf16.msra.mxu1 %v20424_v3 }
 0x31e   : > { %20429 = vmatprep.subr.bf16.mxu1 %v20428_v19 }
 0x31f   : > { %18171 = vmatmul.mubr.msk.f32.gmra.mrb[20].mxu1 %vm294_vm0, %v4152_v32  ;;  %18500 = vmatmul.mubr.msk.f32.gmra.mrb[26].mxu0 %vm294_vm0, %v5943_v25  ;;  %v15077_v25 = vld [vmem:[%s26144_s5 + $0x60] sm:$0xff]  ;;  %v15078_v32 = vld [vmem:[%s26144_s5 + $0x68] sm:$0xff] }
 0x320   : > { %18173 = vmatprep.mubr.msk.f32.mxu1 %vm294_vm0, %v4153_v33  ;;  %18502 = vmatprep.mubr.msk.f32.mxu0 %vm294_vm0, %v23646_v0  ;;  %v6149_v0 = vld [vmem:[#allocation3 + $0xa9] sm:$0xff]  ;;  %v23939_v33 = vpack.c.bf16 %v15078_v32, %v15077_v25 }
 0x321   : > { %20431 = vmatpush3.bf16.msra.mxu1 %v20428_v19 }
 0x323   : > { %18174 = vmatmul.mubr.msk.f32.gmra.mrb[22].mxu1 %vm294_vm0, %v4154_v41  ;;  %18503 = vmatmul.mubr.msk.f32.gmra.mrb[28].mxu0 %vm294_vm0, %v23652_v53  ;;  %v4159_v53 = vld [vmem:[#allocation3 + $0x89] sm:$0xff] }
 0x324   : > { %18176 = vmatprep.mubr.msk.f32.mxu1 %vm294_vm0, %v4155_v48  ;;  %18505 = vmatprep.mubr.msk.f32.mxu0 %vm294_vm0, %v5946_v40 }
 0x327   : > { %18177 = vmatmul.mubr.msk.f32.gmra.mrb[24].mxu1 %vm294_vm0, %v4156_v52  ;;  %18506 = vmatmul.mubr.msk.f32.gmra.mrb[30].mxu0 %vm294_vm0, %v5947_v49 }
 0x328   : > { %18179 = vmatprep.mubr.msk.f32.mxu1 %vm294_vm0, %v4157_v61  ;;  %18524 = vmatprep.mubr.msk.f32.mxu0 %vm294_vm0, %v6149_v0 }
 0x32b   : > { %18180 = vmatmul.mubr.msk.f32.gmra.mrb[26].mxu1 %vm294_vm0, %v4158_v5  ;;  %18525 = vmatmul.mubr.msk.f32.vlgmr.msra.gmra.mrb[16].mxu0 %vm294_vm0, %v6150_v11  ;;  %v15079_v5 = vld [vmem:[%s26144_s5 + $0x70] sm:$0xff]  ;;  %v15080_v11 = vld [vmem:[%s26144_s5 + $0x78] sm:$0xff] }
 0x32c   : > { %18182 = vmatprep.mubr.msk.f32.mxu1 %vm294_vm0, %v4159_v53  ;;  %18527 = vmatprep.mubr.msk.f32.mxu0 %vm294_vm0, %v6151_v43  ;;  %v23953_v53 = vpack.c.bf16 %v15080_v11, %v15079_v5 }
 0x32d   : > { %20567 = vmatpush3.bf16.msra.mxu0 %v23788_v18  ;;  %v6424_v18 = vld [vmem:[#allocation4 + $0xf] sm:$0xff] }
 0x32e   : > { %20569 = vmatprep.subr.bf16.mxu0 %v20424_v3 }
 0x32f   : > { %18183 = vmatmul.mubr.msk.f32.gmra.mrb[28].mxu1 %vm294_vm0, %v4160_v6  ;;  %18528 = vmatmul.mubr.msk.f32.gmra.mrb[18].mxu0 %vm294_vm0, %v6152_v46 }
 0x330   : > { %18185 = vmatprep.mubr.msk.f32.mxu1 %vm294_vm0, %v4161_v12  ;;  %18530 = vmatprep.mubr.msk.f32.mxu0 %vm294_vm0, %v6153_v34 }
 0x331   : > { %20571 = vmatpush3.bf16.msra.mxu0 %v20424_v3  ;;  %v15075_v3 = vld [vmem:[%s26144_s5 + $0x50] sm:$0xff] }
 0x332   : > { %20573 = vmatprep.subr.bf16.mxu0 %v20428_v19  ;;  %v23926_v62 = vpack.c.bf16 %v15076_v55, %v15075_v3 }
 0x333   : > { %18186 = vmatmul.mubr.msk.f32.gmra.mrb[30].mxu1 %vm294_vm0, %v4162_v21  ;;  %18531 = vmatmul.mubr.msk.f32.gmra.mrb[20].mxu0 %vm294_vm0, %v6154_v39 }
 0x334   : > { %18533 = vmatprep.mubr.msk.f32.mxu0 %vm294_vm0, %v6155_v24  ;;  %18564 = vmatprep.mubr.msk.f32.mxu1 %vm294_vm0, %v6423_v17 }
 0x335   : > { %20575 = vmatpush3.bf16.msra.mxu0 %v20428_v19 }
 0x337   : > { %18534 = vmatmul.mubr.msk.f32.gmra.mrb[22].mxu0 %vm294_vm0, %v6156_v10 }
 0x338   : > { %18536 = vmatprep.mubr.msk.f32.mxu0 %vm294_vm0, %v6157_v31 }
 0x33b   : > { %18537 = vmatmul.mubr.msk.f32.gmra.mrb[24].mxu0 %vm294_vm0, %v6158_v1 }
 0x33c   : > { %18539 = vmatprep.mubr.msk.f32.mxu0 %vm294_vm0, %v6159_v14 }
 0x33f   : > { %18540 = vmatmul.mubr.msk.f32.gmra.mrb[26].mxu0 %vm294_vm0, %v6160_v30 }
 0x340   : > { %18542 = vmatprep.mubr.msk.f32.mxu0 %vm294_vm0, %v23723_v28  ;;  %v6445_v28 = vld [vmem:[%s26144_s5 + $0x30] sm:$0xff] }
 0x343   : > { %18543 = vmatmul.mubr.msk.f32.gmra.mrb[28].mxu0 %vm294_vm0, %v23728_v58  ;;  %v6446_v58 = vld [vmem:[%s26144_s5 + $0x38] sm:$0xff] }
 0x344   : > { %18545 = vmatprep.mubr.msk.f32.mxu0 %vm294_vm0, %v6163_v29  ;;  %v20432_v9 = vpack.c.bf16 %v6446_v58, %v6445_v28 }
 0x346   : > { %20433 = vmatprep.subr.bf16.mxu1 %v20432_v9  ;;  %20577 = vmatprep.subr.bf16.mxu0 %v20432_v9 }
 0x347   : > { %18546 = vmatmul.mubr.msk.f32.gmra.mrb[30].mxu0 %vm294_vm0, %v6164_v38  ;;  %20435 = vmatpush3.bf16.msra.mxu1 %v20432_v9 }
 0x348   : > { %20579 = vmatpush3.bf16.msra.mxu0 %v20432_v9  ;;  %20437 = vmatprep.subr.bf16.mxu1 %v23905_v2 }
 0x349   : > { %20581 = vmatprep.subr.bf16.mxu0 %v23905_v2 }
 0x34a   : > { %18565 = vmatmul.mubr.msk.f32.vlgmr.msra.gmra.mrb[32].mxu1 %vm294_vm0, %v6424_v18 }
 0x34b   : > { %20439 = vmatpush3.bf16.msra.mxu1 %v23905_v2 }
 0x34c   : > { %20441 = vmatprep.subr.bf16.mxu1 %v23926_v62 }
 0x34f   : > { %20443 = vmatpush3.bf16.msra.mxu1 %v23926_v62 }
 0x350   : > { %20445 = vmatprep.subr.bf16.mxu1 %v23939_v33 }
 0x353   : > { %20447 = vmatpush3.bf16.msra.mxu1 %v23939_v33 }
 0x354   : > { %20449 = vmatprep.subr.bf16.mxu1 %v23953_v53 }
 0x357   : > { %20451 = vmatpush3.bf16.msra.mxu1 %v23953_v53 }
 0x3ea   : > { %v18166_v27 = vpop.f32.mrb[16].mxu1 }
 0x3eb   : > { %v4286_v7 = vpop.f32.mrb[17].mxu1 }
 0x3ec   : > { %v21020_v26 = vadd.f32 %v23890_v8, %v4286_v7 }
 0x3ee   : > { %v4365_v36 = vmax.f32 %v21020_v26, 0.0  ;;  %v18169_v56 = vpop.f32.mrb[18].mxu1 }
 0x3ef   : > { %v4295_v35 = vpop.f32.mrb[19].mxu1 }
 0x3f0   : > { %4373 = vst.msk [vmem:[#allocation4 + $0x18] sm:$0xff] %vm294_vm0, %v4365_v36  ;;  %v21021_v59 = vadd.f32 %v23890_v8, %v4295_v35  ;;  %4375 = vrot.lane.b32.xlu1 %v4365_v36, %s22144_s27 }
 0x3f2   : > { %v4366_v37 = vmax.f32 %v21021_v59, 0.0  ;;  %v18172_v54 = vpop.f32.mrb[20].mxu1  ;;  %v15097_v59 = vld [vmem:[%s26144_s5 + $0x80] sm:$0xff] }
 0x3f3   : > { %v4304_v47 = vpop.f32.mrb[21].mxu1 }
 0x3f4   : > { %4379 = vst.msk [vmem:[#allocation4 + $0x38] sm:$0xff] %vm294_vm0, %v4366_v37  ;;  %v21022_v23 = vadd.f32 %v23890_v8, %v4304_v47  ;;  %4381 = vrot.lane.b32.xlu1 %v4366_v37, %s22144_s27  ;;  %v15098_v37 = vld [vmem:[%s26144_s5 + $0x88] sm:$0xff] }
 0x3f5   : > { %v23986_v54 = vpack.c.bf16 %v15098_v37, %v15097_v59 }
 0x3f6   : > { %v4367_v60 = vmax.f32 %v21022_v23, 0.0  ;;  %v18175_v44 = vpop.f32.mrb[22].mxu1 }
 0x3f7   : > { %v4313_v45 = vpop.f32.mrb[23].mxu1  ;;  %v23907_v51 = vld [vmem:[#allocation4 + $0x17] sm:$0xff]  ;;  %v23909_v63 = vld [vmem:[#allocation4 + $0x1f] sm:$0xff]  ;;  %20453 = vmatprep.subr.bf16.mxu1 %v23986_v54 }
 0x3f8   : > { %4385 = vst.msk [vmem:[#allocation4 + $0x58] sm:$0xff] %vm294_vm0, %v4367_v60  ;;  %v21023_v16 = vadd.f32 %v23890_v8, %v4313_v45  ;;  %18567 = vmatprep.mubr.msk.f32.mxu1 %vm294_vm0, %v23907_v51  ;;  %4387 = vrot.lane.b32.xlu1 %v4367_v60, %s22144_s27 }
 0x3f9   : > { %18568 = vmatmul.mubr.msk.f32.gmra.mrb[34].mxu1 %vm294_vm0, %v23909_v63 }
 0x3fa   : > { %v4368_v4 = vmax.f32 %v21023_v16, 0.0  ;;  %v18178_v15 = vpop.f32.mrb[24].mxu1 }
 0x3fb   : > { %v4322_v20 = vpop.f32.mrb[25].mxu1  ;;  %v24014_v32 = vld [vmem:[#allocation4 + $0x3f] sm:$0xff] }
 0x3fc   : > { %4391 = vst.msk [vmem:[#allocation4 + $0x78] sm:$0xff] %vm294_vm0, %v4368_v4  ;;  %v21024_v22 = vadd.f32 %v23890_v8, %v4322_v20  ;;  %4393 = vrot.lane.b32.xlu0 %v4368_v4, %s22144_s27 }
 0x3fe   : > { %v4369_v40 = vmax.f32 %v21024_v22, 0.0  ;;  %v18181_v41 = vpop.f32.mrb[26].mxu1  ;;  %v18526_v48 = vpop.f32.mrb[16].mxu0 }
 0x3ff   : > { %v4331_v49 = vpop.f32.mrb[27].mxu1  ;;  %v6287_v52 = vpop.f32.mrb[17].mxu0  ;;  %v24038_v5 = vld [vmem:[#allocation4 + $0x5f] sm:$0xff] }
 0x400   : > { %4397 = vst.msk [vmem:[#allocation4 + $0x98] sm:$0xff] %vm294_vm0, %v4369_v40  ;;  %v21025_v61 = vadd.f32 %v23890_v8, %v4331_v49  ;;  %v21028_v0 = vadd.f32 %v23890_v8, %v6287_v52  ;;  %4399 = vrot.lane.b32.xlu0 %v4369_v40, %s22144_s27  ;;  %v24027_v49 = vld [vmem:[#allocation4 + $0x57] sm:$0xff] }
 0x402   : > { %v4370_v43 = vmax.f32 %v21025_v61, 0.0  ;;  %v6366_v6 = vmax.f32 %v21028_v0, 0.0  ;;  %v18184_v46 = vpop.f32.mrb[28].mxu1  ;;  %v18529_v12 = vpop.f32.mrb[18].mxu0 }
 0x403   : > { %v4340_v34 = vpop.f32.mrb[29].mxu1  ;;  %v6296_v21 = vpop.f32.mrb[19].mxu0 }
 0x404   : > { %4403 = vst.msk [vmem:[#allocation4 + $0xb8] sm:$0xff] %vm294_vm0, %v4370_v43  ;;  %6374 = vst.msk [vmem:[#allocation4 + $0x118] sm:$0xff] %vm294_vm0, %v6366_v6  ;;  %v21026_v39 = vadd.f32 %v23890_v8, %v4340_v34  ;;  %v21029_v24 = vadd.f32 %v23890_v8, %v6296_v21  ;;  %4405 = vrot.lane.b32.xlu0 %v4370_v43, %s22144_s27  ;;  %v24063_v34 = vld [vmem:[#allocation4 + $0x77] sm:$0xff] }
 0x406   : > { %v4371_v10 = vmax.f32 %v21026_v39, 0.0  ;;  %v6367_v31 = vmax.f32 %v21029_v24, 0.0  ;;  %v18187_v1 = vpop.f32.mrb[30].mxu1  ;;  %v18532_v14 = vpop.f32.mrb[20].mxu0  ;;  %v6638_v24 = vld [vmem:[#allocation4 + $0x8] sm:$0xff] }
 0x407   : > { %v4349_v30 = vpop.f32.mrb[31].mxu1  ;;  %v6305_v29 = vpop.f32.mrb[21].mxu0  ;;  %v24046_v43 = vld [vmem:[#allocation4 + $0x97] sm:$0xff]  ;;  %v24056_v12 = vld [vmem:[#allocation4 + $0x9f] sm:$0xff] }
 0x408   : > { %4409 = vst.msk [vmem:[#allocation4 + $0xd8] sm:$0xff] %vm294_vm0, %v4371_v10  ;;  %6380 = vst.msk [vmem:[#allocation4 + $0x138] sm:$0xff] %vm294_vm0, %v6367_v31  ;;  %v21027_v38 = vadd.f32 %v23890_v8, %v4349_v30  ;;  %v21030_v42 = vadd.f32 %v23890_v8, %v6305_v29  ;;  %4411 = vrot.lane.b32.xlu0 %v4371_v10, %s22144_s27  ;;  %v24074_v10 = vld [vmem:[#allocation4 + $0x7f] sm:$0xff]  ;;  %v6639_v30 = vld [vmem:[#allocation4 + $0x10] sm:$0xff] }
 0x409   : > { %v15100_v14 = vld [vmem:[%s26144_s5 + $0x98] sm:$0xff] }
 0x40a   : > { %v4372_v13 = vmax.f32 %v21027_v38, 0.0  ;;  %v6368_v19 = vmax.f32 %v21030_v42, 0.0  ;;  %v18535_v28 = vpop.f32.mrb[22].mxu0  ;;  %v24098_v42 = vld [vmem:[#allocation4 + $0x18] sm:$0xff] }
 0x40b   : > { %v6314_v58 = vpop.f32.mrb[23].mxu0  ;;  %v24083_v1 = vld [vmem:[#allocation4 + $0xb7] sm:$0xff]  ;;  %v24096_v38 = vld [vmem:[#allocation4 + $0xbf] sm:$0xff]  ;;  %v15102_v28 = vld [vmem:[%s26144_s5 + $0xa8] sm:$0xff] }
 0x40c   : > { %4415 = vst.msk [vmem:[#allocation4 + $0xf8] sm:$0xff] %vm294_vm0, %v4372_v13  ;;  %6386 = vst.msk [vmem:[#allocation4 + $0x158] sm:$0xff] %vm294_vm0, %v6368_v19  ;;  %v21031_v9 = vadd.f32 %v23890_v8, %v6314_v58  ;;  %4417 = vrot.lane.b32.xlu1 %v4372_v13, %s22144_s27  ;;  %6376 = vrot.lane.b32.xlu0 %v6366_v6, %s22144_s27  ;;  %v24118_v58 = vld [vmem:[#allocation4 + $0x20] sm:$0xff] }
 0x40e   : > { %v6369_v17 = vmax.f32 %v21031_v9, 0.0  ;;  %v18538_v18 = vpop.f32.mrb[24].mxu0 }
 0x40f   : > { %v6323_v27 = vpop.f32.mrb[25].mxu0  ;;  %v24153_v37 = vld [vmem:[#allocation4 + $0xdf] sm:$0xff] }
 0x410   : > { %6392 = vst.msk [vmem:[#allocation4 + $0x178] sm:$0xff] %vm294_vm0, %v6369_v17  ;;  %v21032_v7 = vadd.f32 %v23890_v8, %v6323_v27  ;;  %6394 = vrot.lane.b32.xlu1 %v6369_v17, %s22144_s27  ;;  %v24126_v27 = vld [vmem:[#allocation4 + $0xd7] sm:$0xff] }
 0x412   : > { %v6370_v26 = vmax.f32 %v21032_v7, 0.0  ;;  %v18541_v36 = vpop.f32.mrb[26].mxu0 }
 0x413   : > { %v6332_v56 = vpop.f32.mrb[27].mxu0  ;;  %v15104_v36 = vld [vmem:[%s26144_s5 + $0xb8] sm:$0xff] }
 0x414   : > { %6398 = vst.msk [vmem:[#allocation4 + $0x198] sm:$0xff] %vm294_vm0, %v6370_v26  ;;  %v21033_v35 = vadd.f32 %v23890_v8, %v6332_v56  ;;  %6382 = vrot.lane.b32.xlu1 %v6367_v31, %s22144_s27  ;;  %6400 = vrot.lane.b32.xlu0 %v6370_v26, %s22144_s27  ;;  %v15103_v26 = vld [vmem:[%s26144_s5 + $0xb0] sm:$0xff] }
 0x415   : > { %v24148_v56 = vld [vmem:[#allocation4 + $0x30] sm:$0xff] }
 0x416   : > { %v6371_v47 = vmax.f32 %v21033_v35, 0.0  ;;  %v18544_v23 = vpop.f32.mrb[28].mxu0 }
 0x417   : > { %v6341_v50 = vpop.f32.mrb[29].mxu0  ;;  %v24158_v23 = vpack.c.bf16 %v15104_v36, %v15103_v26  ;;  %v15123_v26 = vld [vmem:[%s26144_s5 + $0xd0] sm:$0xff]  ;;  %v15124_v36 = vld [vmem:[%s26144_s5 + $0xd8] sm:$0xff] }
 0x418   : > { %6404 = vst.msk [vmem:[#allocation4 + $0x1b8] sm:$0xff] %vm294_vm0, %v6371_v47  ;;  %v21034_v57 = vadd.f32 %v23890_v8, %v6341_v50  ;;  %6388 = vrot.lane.b32.xlu1 %v6368_v19, %s22144_s27  ;;  %6406 = vrot.lane.b32.xlu0 %v6371_v47, %s22144_s27  ;;  %v24155_v47 = vld [vmem:[#allocation4 + $0x38] sm:$0xff] }
 0x41a   : > { %v6372_v60 = vmax.f32 %v21034_v57, 0.0  ;;  %v18547_v44 = vpop.f32.mrb[30].mxu0  ;;  %v15121_v57 = vld [vmem:[%s26144_s5 + $0xc0] sm:$0xff] }
 0x41b   : > { %v6350_v45 = vpop.f32.mrb[31].mxu0  ;;  %v24176_v44 = vld [vmem:[#allocation4 + $0x40] sm:$0xff] }
 0x41c   : > { %6410 = vst.msk [vmem:[#allocation4 + $0x1d8] sm:$0xff] %vm294_vm0, %v6372_v60  ;;  %v21035_v16 = vadd.f32 %v23890_v8, %v6350_v45  ;;  %6412 = vrot.lane.b32.xlu0 %v6372_v60, %s22144_s27  ;;  %v24009_v8 = vld [vmem:[#allocation4 + $0x37] sm:$0xff]  ;;  %v15122_v60 = vld [vmem:[%s26144_s5 + $0xc8] sm:$0xff] }
 0x41e   : > { %v6373_v3 = vmax.f32 %v21035_v16, 0.0 }
 0x420   : > { %6416 = vst.msk [vmem:[#allocation4 + $0x1f8] sm:$0xff] %vm294_vm0, %v6373_v3  ;;  %6418 = vrot.lane.b32.xlu1 %v6373_v3, %s22144_s27  ;;  %v24183_v3 = vpack.c.bf16 %v15122_v60, %v15121_v57  ;;  %v24277_v57 = vpack.c.bf16 %v15124_v36, %v15123_v26  ;;  %v24300_v26 = vld [vmem:[#allocation4 + $0xd8] sm:$0xff] }
 0x421   : > { %26291 = vst [vmem:[#allocation11_spill] sm:$0xff] %v24300_v26 }
 0x462   : > { %v4376_v55 = vpop.permute.xlu1 %4375 }
 0x463   : > { %4378 = vst.msk [vmem:[#allocation4 + $0x28] sm:$0xff] %vm294_vm0, %v4376_v55 }
 0x466   : > { %v4382_v4 = vpop.permute.xlu1 %4381 }
 0x467   : > { %4384 = vst.msk [vmem:[#allocation4 + $0x48] sm:$0xff] %vm294_vm0, %v4382_v4  ;;  %v24191_v4 = vld [vmem:[#allocation4 + $0xf7] sm:$0xff] }
 0x46a   : > { %v4388_v15 = vpop.permute.xlu1 %4387  ;;  %v24000_v20 = vld [vmem:[#allocation4 + $0x27] sm:$0xff]  ;;  %v24002_v22 = vld [vmem:[#allocation4 + $0x2f] sm:$0xff] }
 0x46b   : > { %4390 = vst.msk [vmem:[#allocation4 + $0x68] sm:$0xff] %vm294_vm0, %v4388_v15  ;;  %18570 = vmatprep.mubr.msk.f32.mxu1 %vm294_vm0, %v24000_v20  ;;  %v24197_v15 = vld [vmem:[#allocation4 + $0x50] sm:$0xff] }
 0x46c   : > { %18571 = vmatmul.mubr.msk.f32.gmra.mrb[36].mxu1 %vm294_vm0, %v24002_v22 }
 0x46d   : > { %18573 = vmatprep.mubr.msk.f32.mxu1 %vm294_vm0, %v24009_v8 }
 0x46e   : > { %v4394_v25 = vpop.permute.xlu0 %4393  ;;  %v24018_v40 = vld [vmem:[#allocation4 + $0x47] sm:$0xff]  ;;  %v24023_v48 = vld [vmem:[#allocation4 + $0x4f] sm:$0xff] }
 0x46f   : > { %4396 = vst.msk [vmem:[#allocation4 + $0x88] sm:$0xff] %vm294_vm0, %v4394_v25  ;;  %v24189_v55 = vld [vmem:[#allocation4 + $0x48] sm:$0xff] }
 0x470   : > { %18574 = vmatmul.mubr.msk.f32.gmra.mrb[38].mxu1 %vm294_vm0, %v24014_v32 }
 0x471   : > { %18576 = vmatprep.mubr.msk.f32.mxu1 %vm294_vm0, %v24018_v40 }
 0x472   : > { %v4400_v41 = vpop.permute.xlu0 %4399  ;;  %v24044_v11 = vld [vmem:[#allocation4 + $0x67] sm:$0xff]  ;;  %v24054_v46 = vld [vmem:[#allocation4 + $0x6f] sm:$0xff] }
 0x473   : > { %4402 = vst.msk [vmem:[#allocation4 + $0xa8] sm:$0xff] %vm294_vm0, %v4400_v41  ;;  %v24201_v41 = vld [vmem:[#allocation4 + $0xff] sm:$0xff] }
 0x474   : > { %18577 = vmatmul.mubr.msk.f32.gmra.mrb[40].mxu1 %vm294_vm0, %v24023_v48 }
 0x475   : > { %18579 = vmatprep.mubr.msk.f32.mxu1 %vm294_vm0, %v24027_v49 }
 0x476   : > { %v4406_v52 = vpop.permute.xlu0 %4405  ;;  %v24031_v61 = vld [vmem:[#allocation4 + $0x87] sm:$0xff]  ;;  %v24033_v0 = vld [vmem:[#allocation4 + $0x8f] sm:$0xff] }
 0x477   : > { %4408 = vst.msk [vmem:[#allocation4 + $0xc8] sm:$0xff] %vm294_vm0, %v4406_v52  ;;  %18924 = vmatprep.mubr.msk.f32.mxu0 %vm294_vm0, %v24031_v61  ;;  %v24208_v52 = vld [vmem:[#allocation4 + $0x58] sm:$0xff] }
 0x478   : > { %18580 = vmatmul.mubr.msk.f32.gmra.mrb[42].mxu1 %vm294_vm0, %v24038_v5  ;;  %18925 = vmatmul.mubr.msk.f32.vlgmr.msra.gmra.mrb[32].mxu0 %vm294_vm0, %v24033_v0 }
 0x479   : > { %18582 = vmatprep.mubr.msk.f32.mxu1 %vm294_vm0, %v24044_v11  ;;  %18927 = vmatprep.mubr.msk.f32.mxu0 %vm294_vm0, %v24046_v43 }
 0x47a   : > { %20583 = vmatpush3.bf16.msra.mxu0 %v23905_v2  ;;  %v4412_v6 = vpop.permute.xlu0 %4411  ;;  %v24065_v21 = vld [vmem:[#allocation4 + $0xa7] sm:$0xff]  ;;  %v24076_v31 = vld [vmem:[#allocation4 + $0xaf] sm:$0xff] }
 0x47b   : > { %4414 = vst.msk [vmem:[#allocation4 + $0xe8] sm:$0xff] %vm294_vm0, %v4412_v6  ;;  %20585 = vmatprep.subr.bf16.mxu0 %v23926_v62  ;;  %v24210_v6 = vld [vmem:[#allocation4 + $0x88] sm:$0xff] }
 0x47c   : > { %18583 = vmatmul.mubr.msk.f32.gmra.mrb[44].mxu1 %vm294_vm0, %v24054_v46  ;;  %18928 = vmatmul.mubr.msk.f32.gmra.mrb[34].mxu0 %vm294_vm0, %v24056_v12 }
 0x47d   : > { %18585 = vmatprep.mubr.msk.f32.mxu1 %vm294_vm0, %v24063_v34  ;;  %18930 = vmatprep.mubr.msk.f32.mxu0 %vm294_vm0, %v24065_v21 }
 0x47e   : > { %v4418_v2 = vpop.permute.xlu1 %4417  ;;  %v6377_v39 = vpop.permute.xlu0 %6376  ;;  %20587 = vmatpush3.bf16.msra.mxu0 %v23926_v62  ;;  %v15099_v62 = vld [vmem:[%s26144_s5 + $0x90] sm:$0xff]  ;;  %v24106_v19 = vld [vmem:[#allocation4 + $0xc7] sm:$0xff] }
 0x47f   : > { %4420 = vst.msk [vmem:[#allocation4 + $0x108] sm:$0xff] %vm294_vm0, %v4418_v2  ;;  %6379 = vst.msk [vmem:[#allocation4 + $0x128] sm:$0xff] %vm294_vm0, %v6377_v39  ;;  %20589 = vmatprep.subr.bf16.mxu0 %v23939_v33  ;;  %v24101_v13 = vpack.c.bf16 %v15100_v14, %v15099_v62  ;;  %v24124_v18 = vld [vmem:[#allocation4 + $0xcf] sm:$0xff]  ;;  %v24216_v2 = vld [vmem:[#allocation4 + $0x60] sm:$0xff] }
 0x480   : > { %18586 = vmatmul.mubr.msk.f32.gmra.mrb[46].mxu1 %vm294_vm0, %v24074_v10  ;;  %18931 = vmatmul.mubr.msk.f32.gmra.mrb[36].mxu0 %vm294_vm0, %v24076_v31  ;;  %v24218_v39 = vld [vmem:[#allocation4 + $0x90] sm:$0xff]  ;;  %v24226_v62 = vld [vmem:[#allocation4 + $0x98] sm:$0xff]  ;;  %v24282_v60 = vld [vmem:[#allocation4 + $0xc8] sm:$0xff] }
 0x481   : > { %18933 = vmatprep.mubr.msk.f32.mxu0 %vm294_vm0, %v24083_v1  ;;  %18604 = vmatprep.mubr.msk.f32.mxu1 %vm294_vm0, %v6638_v24  ;;  %v24224_v24 = vld [vmem:[#allocation4 + $0x68] sm:$0xff]  ;;  %v24232_v14 = vld [vmem:[#allocation4 + $0x70] sm:$0xff]  ;;  %26288 = vst [vmem:[#allocation9_spill] sm:$0xff] %v24282_v60 }
 0x482   : > { %v6395_v29 = vpop.permute.xlu1 %6394  ;;  %20591 = vmatpush3.bf16.msra.mxu0 %v23939_v33  ;;  %v15101_v33 = vld [vmem:[%s26144_s5 + $0xa0] sm:$0xff]  ;;  %v24180_v16 = vld [vmem:[#allocation4 + $0xef] sm:$0xff] }
 0x483   : > { %6397 = vst.msk [vmem:[#allocation4 + $0x188] sm:$0xff] %vm294_vm0, %v6395_v29  ;;  %20593 = vmatprep.subr.bf16.mxu0 %v23953_v53  ;;  %v24130_v7 = vpack.c.bf16 %v15102_v28, %v15101_v33  ;;  %v24164_v50 = vld [vmem:[#allocation4 + $0xe7] sm:$0xff]  ;;  %v24242_v29 = vld [vmem:[#allocation4 + $0x78] sm:$0xff] }
 0x484   : > { %18605 = vmatmul.mubr.msk.f32.vlgmr.msra.gmra.mrb[32].mxu1 %vm294_vm0, %v6639_v30  ;;  %18934 = vmatmul.mubr.msk.f32.gmra.mrb[38].mxu0 %vm294_vm0, %v24096_v38  ;;  %v24234_v30 = vld [vmem:[#allocation4 + $0xa0] sm:$0xff]  ;;  %v24244_v33 = vld [vmem:[#allocation4 + $0xa8] sm:$0xff] }
 0x485   : > { %18607 = vmatprep.mubr.msk.f32.mxu1 %vm294_vm0, %v24098_v42  ;;  %18936 = vmatprep.mubr.msk.f32.mxu0 %vm294_vm0, %v24106_v19  ;;  %v24250_v28 = vld [vmem:[#allocation4 + $0x80] sm:$0xff] }
 0x486   : > { %v6383_v9 = vpop.permute.xlu1 %6382  ;;  %v6401_v17 = vpop.permute.xlu0 %6400  ;;  %20595 = vmatpush3.bf16.msra.mxu0 %v23953_v53  ;;  %20455 = vmatpush3.bf16.msra.mxu1 %v23986_v54  ;;  %v24136_v53 = vld [vmem:[#allocation4 + $0x28] sm:$0xff] }
 0x487   : > { %6385 = vst.msk [vmem:[#allocation4 + $0x148] sm:$0xff] %vm294_vm0, %v6383_v9  ;;  %6403 = vst.msk [vmem:[#allocation4 + $0x1a8] sm:$0xff] %vm294_vm0, %v6401_v17  ;;  %20457 = vmatprep.subr.bf16.mxu1 %v24101_v13  ;;  %20597 = vmatprep.subr.bf16.mxu0 %v23986_v54  ;;  %v6856_v9 = vld [vmem:[#allocation4 + $0x9] sm:$0xff]  ;;  %v24260_v17 = vld [vmem:[#allocation4 + $0xb8] sm:$0xff] }
 0x488   : > { %18608 = vmatmul.mubr.msk.f32.gmra.mrb[34].mxu1 %vm294_vm0, %v24118_v58  ;;  %18937 = vmatmul.mubr.msk.f32.gmra.mrb[40].mxu0 %vm294_vm0, %v24124_v18 }
 0x489   : > { %18610 = vmatprep.mubr.msk.f32.mxu1 %vm294_vm0, %v24136_v53  ;;  %18939 = vmatprep.mubr.msk.f32.mxu0 %vm294_vm0, %v24126_v27 }
 0x48a   : > { %v6389_v35 = vpop.permute.xlu1 %6388  ;;  %v6407_v59 = vpop.permute.xlu0 %6406  ;;  %20459 = vmatpush3.bf16.msra.mxu1 %v24101_v13 }
 0x48b   : > { %6391 = vst.msk [vmem:[#allocation4 + $0x168] sm:$0xff] %vm294_vm0, %v6389_v35  ;;  %6409 = vst.msk [vmem:[#allocation4 + $0x1c8] sm:$0xff] %vm294_vm0, %v6407_v59  ;;  %20461 = vmatprep.subr.bf16.mxu1 %v24130_v7  ;;  %v6857_v35 = vld [vmem:[#allocation4 + $0x11] sm:$0xff]  ;;  %v24274_v59 = vld [vmem:[#allocation4 + $0x19] sm:$0xff] }
 0x48c   : > { %18611 = vmatmul.mubr.msk.f32.gmra.mrb[36].mxu1 %vm294_vm0, %v24148_v56  ;;  %18940 = vmatmul.mubr.msk.f32.gmra.mrb[42].mxu0 %vm294_vm0, %v24153_v37  ;;  %26287 = vst [vmem:[#allocation8_spill] sm:$0xff] %v24274_v59 }
 0x48d   : > { %18613 = vmatprep.mubr.msk.f32.mxu1 %vm294_vm0, %v24155_v47  ;;  %18942 = vmatprep.mubr.msk.f32.mxu0 %vm294_vm0, %v24164_v50 }
 0x48e   : > { %v6413_v45 = vpop.permute.xlu0 %6412  ;;  %20463 = vmatpush3.bf16.msra.mxu1 %v24130_v7 }
 0x48f   : > { %6415 = vst.msk [vmem:[#allocation4 + $0x1e8] sm:$0xff] %vm294_vm0, %v6413_v45  ;;  %20465 = vmatprep.subr.bf16.mxu1 %v24158_v23  ;;  %v15125_v45 = vld [vmem:[%s26144_s5 + $0xe0] sm:$0xff] }
 0x490   : > { %18614 = vmatmul.mubr.msk.f32.gmra.mrb[38].mxu1 %vm294_vm0, %v24176_v44  ;;  %18943 = vmatmul.mubr.msk.f32.gmra.mrb[44].mxu0 %vm294_vm0, %v24180_v16 }
 0x491   : > { %18616 = vmatprep.mubr.msk.f32.mxu1 %vm294_vm0, %v24189_v55  ;;  %18945 = vmatprep.mubr.msk.f32.mxu0 %vm294_vm0, %v24191_v4 }
 0x492   : > { %v6419_v25 = vpop.permute.xlu1 %6418  ;;  %20467 = vmatpush3.bf16.msra.mxu1 %v24158_v23 }
 0x493   : > { %6421 = vst.msk [vmem:[#allocation4 + $0x208] sm:$0xff] %vm294_vm0, %v6419_v25  ;;  %20469 = vmatprep.subr.bf16.mxu1 %v24183_v3  ;;  %v24294_v25 = vld [vmem:[#allocation4 + $0xd0] sm:$0xff] }
 0x494   : > { %18617 = vmatmul.mubr.msk.f32.gmra.mrb[40].mxu1 %vm294_vm0, %v24197_v15  ;;  %18946 = vmatmul.mubr.msk.f32.gmra.mrb[46].mxu0 %vm294_vm0, %v24201_v41  ;;  %26289 = vst [vmem:[#allocation10_spill] sm:$0xff] %v24294_v25 }
 0x495   : > { %18619 = vmatprep.mubr.msk.f32.mxu1 %vm294_vm0, %v24208_v52  ;;  %18964 = vmatprep.mubr.msk.f32.mxu0 %vm294_vm0, %v24210_v6 }
 0x498   : > { %18620 = vmatmul.mubr.msk.f32.gmra.mrb[42].mxu1 %vm294_vm0, %v24216_v2  ;;  %18965 = vmatmul.mubr.msk.f32.vlgmr.msra.gmra.mrb[32].mxu0 %vm294_vm0, %v24218_v39 }
 0x499   : > { %18622 = vmatprep.mubr.msk.f32.mxu1 %vm294_vm0, %v24224_v24  ;;  %18967 = vmatprep.mubr.msk.f32.mxu0 %vm294_vm0, %v24226_v62 }
 0x49a   : > { %20599 = vmatpush3.bf16.msra.mxu0 %v23986_v54  ;;  %v24252_v54 = vld [vmem:[#allocation4 + $0xb0] sm:$0xff] }
 0x49b   : > { %20601 = vmatprep.subr.bf16.mxu0 %v24101_v13 }
 0x49c   : > { %18623 = vmatmul.mubr.msk.f32.gmra.mrb[44].mxu1 %vm294_vm0, %v24232_v14  ;;  %18968 = vmatmul.mubr.msk.f32.gmra.mrb[34].mxu0 %vm294_vm0, %v24234_v30 }
 0x49d   : > { %18625 = vmatprep.mubr.msk.f32.mxu1 %vm294_vm0, %v24242_v29  ;;  %18970 = vmatprep.mubr.msk.f32.mxu0 %vm294_vm0, %v24244_v33 }
 0x49e   : > { %20603 = vmatpush3.bf16.msra.mxu0 %v24101_v13  ;;  %v24271_v13 = vld [vmem:[#allocation4 + $0xc0] sm:$0xff] }
 0x49f   : > { %20605 = vmatprep.subr.bf16.mxu0 %v24130_v7 }
 0x4a0   : > { %18626 = vmatmul.mubr.msk.f32.gmra.mrb[46].mxu1 %vm294_vm0, %v24250_v28  ;;  %18971 = vmatmul.mubr.msk.f32.gmra.mrb[36].mxu0 %vm294_vm0, %v24252_v54 }
 0x4a1   : > { %18973 = vmatprep.mubr.msk.f32.mxu0 %vm294_vm0, %v24260_v17  ;;  %18644 = vmatprep.mubr.msk.f32.mxu1 %vm294_vm0, %v6856_v9  ;;  %v24298_v9 = vld [vmem:[#allocation4 + $0x21] sm:$0xff] }
 0x4a2   : > { %20607 = vmatpush3.bf16.msra.mxu0 %v24130_v7  ;;  %v15126_v7 = vld [vmem:[%s26144_s5 + $0xe8] sm:$0xff]  ;;  %26290 = vst [vmem:[#allocation12_spill] sm:$0xff] %v24298_v9 }
 0x4a3   : > { %20609 = vmatprep.subr.bf16.mxu0 %v24158_v23  ;;  %v24304_v36 = vpack.c.bf16 %v15126_v7, %v15125_v45  ;;  %v24322_v45 = vld [vmem:[#allocation4 + $0xe0] sm:$0xff]  ;;  %v24325_v7 = vld [vmem:[#allocation4 + $0x31] sm:$0xff] }
 0x4a4   : > { %18645 = vmatmul.mubr.msk.f32.vlgmr.msra.gmra.mrb[32].mxu1 %vm294_vm0, %v6857_v35  ;;  %18974 = vmatmul.mubr.msk.f32.gmra.mrb[38].mxu0 %vm294_vm0, %v24271_v13  ;;  %v24310_v35 = vld [vmem:[#allocation4 + $0x29] sm:$0xff]  ;;  %26293 = vst [vmem:[#allocation13_spill] sm:$0xff] %v24322_v45  ;;  %26294 = vst [vmem:[#allocation15_spill] sm:$0xff] %v24325_v7 }
 0x4a5   : > { %18647 = vmatprep.mubr.msk.f32.mxu1 %vm294_vm0, %v24274_v59  ;;  %18976 = vmatprep.mubr.msk.f32.mxu0 %vm294_vm0, %v24282_v60  ;;  %26292 = vst [vmem:[#allocation14_spill] sm:$0xff] %v24310_v35  ;;  %v15128_v60 = vld [vmem:[%s26144_s5 + $0xf8] sm:$0xff]  ;;  %v15146_v59 = vld [vmem:[%s26144_s5 + $0x108] sm:$0xff] }
 0x4a6   : > { %20611 = vmatpush3.bf16.msra.mxu0 %v24158_v23  ;;  %20471 = vmatpush3.bf16.msra.mxu1 %v24183_v3  ;;  %v15127_v23 = vld [vmem:[%s26144_s5 + $0xf0] sm:$0xff] }
 0x4a7   : > { %20473 = vmatprep.subr.bf16.mxu1 %v24277_v57  ;;  %20613 = vmatprep.subr.bf16.mxu0 %v24183_v3 }
 0x4a8   : > { %18648 = vmatmul.mubr.msk.f32.gmra.mrb[34].mxu1 %vm294_vm0, %v24298_v9  ;;  %18977 = vmatmul.mubr.msk.f32.gmra.mrb[40].mxu0 %vm294_vm0, %v24294_v25  ;;  %v24327_v25 = vld [vmem:[#allocation4 + $0x39] sm:$0xff]  ;;  %v24330_v9 = vpack.c.bf16 %v15128_v60, %v15127_v23  ;;  %v24348_v60 = vld [vmem:[#allocation4 + $0xf0] sm:$0xff]  ;;  %v24351_v23 = vld [vmem:[#allocation4 + $0x41] sm:$0xff] }
 0x4a9   : > { %18650 = vmatprep.mubr.msk.f32.mxu1 %vm294_vm0, %v24310_v35  ;;  %18979 = vmatprep.mubr.msk.f32.mxu0 %vm294_vm0, %v24300_v26  ;;  %26295 = vst [vmem:[#allocation16_spill] sm:$0xff] %v24327_v25  ;;  %v24336_v35 = vld [vmem:[#allocation4 + $0xe8] sm:$0xff]  ;;  %v15145_v26 = vld [vmem:[%s26144_s5 + $0x100] sm:$0xff]  ;;  %26297 = vst [vmem:[#allocation18_spill] sm:$0xff] %v24348_v60 }
 0x4aa   : > { %20475 = vmatpush3.bf16.msra.mxu1 %v24277_v57  ;;  %26296 = vst [vmem:[#allocation17_spill] sm:$0xff] %v24336_v35 }
 0x4ab   : > { %20477 = vmatprep.subr.bf16.mxu1 %v24304_v36 }
 0x4ac   : > { %18651 = vmatmul.mubr.msk.f32.gmra.mrb[36].mxu1 %vm294_vm0, %v24325_v7  ;;  %18980 = vmatmul.mubr.msk.f32.gmra.mrb[42].mxu0 %vm294_vm0, %v24322_v45  ;;  %v24354_v45 = vpack.c.bf16 %v15146_v59, %v15145_v26  ;;  %v24362_v7 = vld [vmem:[#allocation4 + $0xf8] sm:$0xff] }
 0x4ad   : > { %18653 = vmatprep.mubr.msk.f32.mxu1 %vm294_vm0, %v24327_v25  ;;  %18982 = vmatprep.mubr.msk.f32.mxu0 %vm294_vm0, %v24336_v35  ;;  %v24360_v25 = vld [vmem:[#allocation4 + $0x49] sm:$0xff]  ;;  %26299 = vst [vmem:[#allocation20_spill] sm:$0xff] %v24362_v7  ;;  %v24368_v35 = vld [vmem:[#allocation4 + $0x100] sm:$0xff]  ;;  %v24371_v59 = vld [vmem:[#allocation4 + $0x51] sm:$0xff] }
 0x4ae   : > { %20479 = vmatpush3.bf16.msra.mxu1 %v24304_v36  ;;  %26298 = vst [vmem:[#allocation19_spill] sm:$0xff] %v24360_v25  ;;  %26300 = vst [vmem:[#allocation22_spill] sm:$0xff] %v24368_v35  ;;  %v24378_v26 = vld [vmem:[#allocation4 + $0x59] sm:$0xff] }
 0x4af   : > { %20481 = vmatprep.subr.bf16.mxu1 %v24330_v9  ;;  %26301 = vst [vmem:[#allocation21_spill] sm:$0xff] %v24371_v59  ;;  %26302 = vst [vmem:[#allocation23_spill] sm:$0xff] %v24378_v26 }
 0x4b0   : > { %18654 = vmatmul.mubr.msk.f32.gmra.mrb[38].mxu1 %vm294_vm0, %v24351_v23  ;;  %18983 = vmatmul.mubr.msk.f32.gmra.mrb[44].mxu0 %vm294_vm0, %v24348_v60  ;;  %v24388_v60 = vld [vmem:[#allocation4 + $0x91] sm:$0xff] }
 0x4b1   : > { %18656 = vmatprep.mubr.msk.f32.mxu1 %vm294_vm0, %v24360_v25  ;;  %18985 = vmatprep.mubr.msk.f32.mxu0 %vm294_vm0, %v24362_v7  ;;  %v24380_v25 = vld [vmem:[#allocation4 + $0x89] sm:$0xff]  ;;  %v24386_v7 = vld [vmem:[#allocation4 + $0x61] sm:$0xff]  ;;  %26304 = vst [vmem:[#allocation27_spill] sm:$0xff] %v24388_v60 }
 0x4b2   : > { %20483 = vmatpush3.bf16.msra.mxu1 %v24330_v9  ;;  %26303 = vst [vmem:[#allocation25_spill] sm:$0xff] %v24380_v25 }
 0x4b3   : > { %20485 = vmatprep.subr.bf16.mxu1 %v24354_v45 }
 0x4b4   : > { %18657 = vmatmul.mubr.msk.f32.gmra.mrb[40].mxu1 %vm294_vm0, %v24371_v59  ;;  %18986 = vmatmul.mubr.msk.f32.gmra.mrb[46].mxu0 %vm294_vm0, %v24368_v35  ;;  %v24394_v35 = vld [vmem:[#allocation4 + $0x69] sm:$0xff]  ;;  %v24396_v59 = vld [vmem:[#allocation4 + $0x99] sm:$0xff] }
 0x4b5   : > { %18659 = vmatprep.mubr.msk.f32.mxu1 %vm294_vm0, %v24378_v26  ;;  %19004 = vmatprep.mubr.msk.f32.mxu0 %vm294_vm0, %v24380_v25  ;;  %26305 = vst [vmem:[#allocation28_spill] sm:$0xff] %v24394_v35  ;;  %26306 = vst [vmem:[#allocation29_spill] sm:$0xff] %v24396_v59  ;;  %v24403_v25 = vld [vmem:[#allocation4 + $0x71] sm:$0xff]  ;;  %v24405_v26 = vld [vmem:[#allocation4 + $0xa1] sm:$0xff] }
 0x4b6   : > { %26307 = vst [vmem:[#allocation30_spill] sm:$0xff] %v24405_v26 }
 0x4b8   : > { %18660 = vmatmul.mubr.msk.f32.gmra.mrb[42].mxu1 %vm294_vm0, %v24386_v7  ;;  %19005 = vmatmul.mubr.msk.f32.vlgmr.msra.gmra.mrb[32].mxu0 %vm294_vm0, %v24388_v60  ;;  %v24412_v60 = vld [vmem:[#allocation4 + $0x79] sm:$0xff] }
 0x4b9   : > { %18662 = vmatprep.mubr.msk.f32.mxu1 %vm294_vm0, %v24394_v35  ;;  %19007 = vmatprep.mubr.msk.f32.mxu0 %vm294_vm0, %v24396_v59  ;;  %26308 = vst [vmem:[#allocation31_spill] sm:$0xff] %v24412_v60  ;;  %v24414_v35 = vld [vmem:[#allocation4 + $0xa9] sm:$0xff]  ;;  %v24423_v59 = vld [vmem:[#allocation4 + $0xb1] sm:$0xff] }
 0x4ba   : > { %20615 = vmatpush3.bf16.msra.mxu0 %v24183_v3  ;;  %26309 = vst [vmem:[#allocation33_spill] sm:$0xff] %v24414_v35  ;;  %v24421_v3 = vld [vmem:[#allocation4 + $0x81] sm:$0xff]  ;;  %26311 = vst [vmem:[#allocation24_spill] sm:$0xff] %v24423_v59 }
 0x4bb   : > { %20617 = vmatprep.subr.bf16.mxu0 %v24277_v57  ;;  %26310 = vst [vmem:[#allocation32_spill] sm:$0xff] %v24421_v3 }
 0x4bc   : > { %18663 = vmatmul.mubr.msk.f32.gmra.mrb[44].mxu1 %vm294_vm0, %v24403_v25  ;;  %19008 = vmatmul.mubr.msk.f32.gmra.mrb[34].mxu0 %vm294_vm0, %v24405_v26  ;;  %v24430_v26 = vld [vmem:[#allocation4 + $0xb9] sm:$0xff] }
 0x4bd   : > { %18665 = vmatprep.mubr.msk.f32.mxu1 %vm294_vm0, %v24412_v60  ;;  %19010 = vmatprep.mubr.msk.f32.mxu0 %vm294_vm0, %v24414_v35  ;;  %v15147_v35 = vld [vmem:[%s26144_s5 + $0x110] sm:$0xff] }
 0x4be   : > { %20619 = vmatpush3.bf16.msra.mxu0 %v24277_v57  ;;  %v15148_v57 = vld [vmem:[%s26144_s5 + $0x118] sm:$0xff]  ;;  %v24450_v60 = vld [vmem:[#allocation4 + $0xc9] sm:$0xff] }
 0x4bf   : > { %20621 = vmatprep.subr.bf16.mxu0 %v24304_v36 }
 0x4c0   : > { %18666 = vmatmul.mubr.msk.f32.gmra.mrb[46].mxu1 %vm294_vm0, %v24421_v3  ;;  %19011 = vmatmul.mubr.msk.f32.gmra.mrb[36].mxu0 %vm294_vm0, %v24423_v59  ;;  %v24443_v3 = vld [vmem:[#allocation4 + $0xc1] sm:$0xff]  ;;  %v20488_v59 = vpack.c.bf16 %v15148_v57, %v15147_v35  ;;  %v15152_v57 = vld [vmem:[%s26144_s5 + $0x138] sm:$0xff] }
 0x4c1   : > { %18684 = vmatprep.mubr.msk.f32.mxu1 %vm294_vm0, %v23907_v51  ;;  %19013 = vmatprep.mubr.msk.f32.mxu0 %vm294_vm0, %v24430_v26  ;;  %v15149_v51 = vld [vmem:[%s26144_s5 + $0x120] sm:$0xff] }
 0x4c2   : > { %20623 = vmatpush3.bf16.msra.mxu0 %v24304_v36  ;;  %v15150_v36 = vld [vmem:[%s26144_s5 + $0x128] sm:$0xff] }
 0x4c3   : > { %20625 = vmatprep.subr.bf16.mxu0 %v24330_v9  ;;  %v20492_v35 = vpack.c.bf16 %v15150_v36, %v15149_v51  ;;  %v24489_v36 = vld [vmem:[#allocation4 + $0xe9] sm:$0xff] }
 0x4c4   : > { %18685 = vmatmul.mubr.msk.f32.vlgmr.msra.gmra.mrb[32].mxu1 %vm294_vm0, %v23909_v63  ;;  %19014 = vmatmul.mubr.msk.f32.gmra.mrb[38].mxu0 %vm294_vm0, %v24443_v3  ;;  %v24464_v63 = vld [vmem:[#allocation4 + $0xd1] sm:$0xff] }
 0x4c5   : > { %18687 = vmatprep.mubr.msk.f32.mxu1 %vm294_vm0, %v24000_v20  ;;  %19016 = vmatprep.mubr.msk.f32.mxu0 %vm294_vm0, %v24450_v60  ;;  %v24471_v20 = vld [vmem:[#allocation4 + $0xd9] sm:$0xff] }
 0x4c6   : > { %20627 = vmatpush3.bf16.msra.mxu0 %v24330_v9  ;;  %20487 = vmatpush3.bf16.msra.mxu1 %v24354_v45  ;;  %26312 = vst [vmem:[#allocation26_spill] sm:$0xff] %v24471_v20  ;;  %v15151_v9 = vld [vmem:[%s26144_s5 + $0x130] sm:$0xff] }
 0x4c7   : > { %20489 = vmatprep.subr.bf16.mxu1 %v20488_v59  ;;  %20629 = vmatprep.subr.bf16.mxu0 %v24354_v45  ;;  %v20496_v51 = vpack.c.bf16 %v15152_v57, %v15151_v9  ;;  %v24509_v57 = vld [vmem:[#allocation4 + $0xf9] sm:$0xff] }
 0x4c8   : > { %18688 = vmatmul.mubr.msk.f32.gmra.mrb[34].mxu1 %vm294_vm0, %v24002_v22  ;;  %19017 = vmatmul.mubr.msk.f32.gmra.mrb[40].mxu0 %vm294_vm0, %v24464_v63  ;;  %v24483_v22 = vld [vmem:[#allocation4 + $0xe1] sm:$0xff] }
 0x4c9   : > { %18690 = vmatprep.mubr.msk.f32.mxu1 %vm294_vm0, %v24009_v8  ;;  %19019 = vmatprep.mubr.msk.f32.mxu0 %vm294_vm0, %v24471_v20  ;;  %v15169_v8 = vld [vmem:[%s26144_s5 + $0x140] sm:$0xff]  ;;  %v15170_v20 = vld [vmem:[%s26144_s5 + $0x148] sm:$0xff] }
 0x4ca   : > { %20491 = vmatpush3.bf16.msra.mxu1 %v20488_v59  ;;  %v24503_v9 = vpack.c.bf16 %v15170_v20, %v15169_v8  ;;  %v26335_v20 = vld [vmem:[#allocation24_spill] sm:$0xff]  ;;  %v7728_v8 = vld [vmem:[#allocation4 + $0x27] sm:$0xff] }
 0x4cb   : > { %20493 = vmatprep.subr.bf16.mxu1 %v20492_v35 }
 0x4cc   : > { %18691 = vmatmul.mubr.msk.f32.gmra.mrb[36].mxu1 %vm294_vm0, %v24014_v32  ;;  %19020 = vmatmul.mubr.msk.f32.gmra.mrb[42].mxu0 %vm294_vm0, %v24483_v22  ;;  %v24501_v32 = vld [vmem:[#allocation4 + $0xf1] sm:$0xff] }
 0x4cd   : > { %18693 = vmatprep.mubr.msk.f32.mxu1 %vm294_vm0, %v24018_v40  ;;  %19022 = vmatprep.mubr.msk.f32.mxu0 %vm294_vm0, %v24489_v36  ;;  %v24515_v40 = vld [vmem:[#allocation4 + $0x101] sm:$0xff] }
 0x4ce   : > { %20495 = vmatpush3.bf16.msra.mxu1 %v20492_v35 }
 0x4cf   : > { %20497 = vmatprep.subr.bf16.mxu1 %v20496_v51 }
 0x4d0   : > { %18694 = vmatmul.mubr.msk.f32.gmra.mrb[38].mxu1 %vm294_vm0, %v24023_v48  ;;  %19023 = vmatmul.mubr.msk.f32.gmra.mrb[44].mxu0 %vm294_vm0, %v24501_v32  ;;  %v15171_v48 = vld [vmem:[%s26144_s5 + $0x150] sm:$0xff] }
 0x4d1   : > { %18696 = vmatprep.mubr.msk.f32.mxu1 %vm294_vm0, %v24027_v49  ;;  %19025 = vmatprep.mubr.msk.f32.mxu0 %vm294_vm0, %v24509_v57  ;;  %v15172_v49 = vld [vmem:[%s26144_s5 + $0x158] sm:$0xff] }
 0x4d2   : > { %20499 = vmatpush3.bf16.msra.mxu1 %v20496_v51 }
 0x4d3   : > { %20501 = vmatprep.subr.bf16.mxu1 %v24503_v9 }
 0x4d4   : > { %18697 = vmatmul.mubr.msk.f32.gmra.mrb[40].mxu1 %vm294_vm0, %v24038_v5  ;;  %19026 = vmatmul.mubr.msk.f32.gmra.mrb[46].mxu0 %vm294_vm0, %v24515_v40  ;;  %v15174_v5 = vld [vmem:[%s26144_s5 + $0x168] sm:$0xff] }
 0x4d5   : > { %18699 = vmatprep.mubr.msk.f32.mxu1 %vm294_vm0, %v24044_v11  ;;  %19044 = vmatprep.mubr.msk.f32.mxu0 %vm294_vm0, %v24046_v43  ;;  %v15175_v43 = vld [vmem:[%s26144_s5 + $0x170] sm:$0xff] }
 0x4d8   : > { %18700 = vmatmul.mubr.msk.f32.gmra.mrb[42].mxu1 %vm294_vm0, %v24054_v46  ;;  %19045 = vmatmul.mubr.msk.f32.vlgmr.msra.gmra.mrb[32].mxu0 %vm294_vm0, %v24056_v12  ;;  %v15176_v46 = vld [vmem:[%s26144_s5 + $0x178] sm:$0xff] }
 0x4d9   : > { %18702 = vmatprep.mubr.msk.f32.mxu1 %vm294_vm0, %v24063_v34  ;;  %19047 = vmatprep.mubr.msk.f32.mxu0 %vm294_vm0, %v24065_v21  ;;  %v20512_v12 = vpack.c.bf16 %v15176_v46, %v15175_v43  ;;  %v15193_v34 = vld [vmem:[%s26144_s5 + $0x180] sm:$0xff]  ;;  %v15194_v21 = vld [vmem:[%s26144_s5 + $0x188] sm:$0xff]  ;;  %v15223_v43 = vld [vmem:[%s26144_s5 + $0x1f0] sm:$0xff] }
 0x4da   : > { %20631 = vmatpush3.bf16.msra.mxu0 %v24354_v45  ;;  %v26330_v45 = vld [vmem:[#allocation29_spill] sm:$0xff] }
 0x4db   : > { %20633 = vmatprep.subr.bf16.mxu0 %v20488_v59  ;;  %v15224_v46 = vld [vmem:[%s26144_s5 + $0x1f8] sm:$0xff] }
 0x4dc   : > { %18703 = vmatmul.mubr.msk.f32.gmra.mrb[44].mxu1 %vm294_vm0, %v24074_v10  ;;  %19048 = vmatmul.mubr.msk.f32.gmra.mrb[34].mxu0 %vm294_vm0, %v24076_v31  ;;  %v24601_v10 = vpack.c.bf16 %v15194_v21, %v15193_v34  ;;  %v24607_v31 = vld [vmem:[#allocation4 + $0x107] sm:$0xff]  ;;  %v7734_v34 = vld [vmem:[#allocation4 + $0x57] sm:$0xff] }
 0x4dd   : > { %18705 = vmatprep.mubr.msk.f32.mxu1 %vm294_vm0, %v24031_v61  ;;  %19050 = vmatprep.mubr.msk.f32.mxu0 %vm294_vm0, %v24083_v1  ;;  %v20504_v61 = vpack.c.bf16 %v15172_v49, %v15171_v48  ;;  %v24613_v1 = vld [vmem:[#allocation4 + $0x10f] sm:$0xff]  ;;  %v15220_v48 = vld [vmem:[%s26144_s5 + $0x1d8] sm:$0xff]  ;;  %v15241_v21 = vld [vmem:[%s26144_s5 + $0x200] sm:$0xff] }
 0x4de   : > { %20635 = vmatpush3.bf16.msra.mxu0 %v20488_v59  ;;  %v26332_v59 = vld [vmem:[#allocation31_spill] sm:$0xff] }
 0x4df   : > { %20637 = vmatprep.subr.bf16.mxu0 %v20492_v35 }
 0x4e0   : > { %18706 = vmatmul.mubr.msk.f32.gmra.mrb[46].mxu1 %vm294_vm0, %v24033_v0  ;;  %19051 = vmatmul.mubr.msk.f32.gmra.mrb[36].mxu0 %vm294_vm0, %v24096_v38  ;;  %v15173_v0 = vld [vmem:[%s26144_s5 + $0x160] sm:$0xff]  ;;  %v15195_v38 = vld [vmem:[%s26144_s5 + $0x190] sm:$0xff] }
 0x4e1   : > { %18724 = vmatprep.mubr.msk.f32.mxu1 %vm294_vm0, %v24098_v42  ;;  %19053 = vmatprep.mubr.msk.f32.mxu0 %vm294_vm0, %v24106_v19  ;;  %v20508_v11 = vpack.c.bf16 %v15174_v5, %v15173_v0  ;;  %v15196_v42 = vld [vmem:[%s26144_s5 + $0x198] sm:$0xff]  ;;  %v26313_v19 = vld [vmem:[#allocation8_spill] sm:$0xff]  ;;  %v15222_v0 = vld [vmem:[%s26144_s5 + $0x1e8] sm:$0xff] }
 0x4e2   : > { %20639 = vmatpush3.bf16.msra.mxu0 %v20492_v35  ;;  %v26333_v35 = vld [vmem:[#allocation33_spill] sm:$0xff] }
 0x4e3   : > { %20641 = vmatprep.subr.bf16.mxu0 %v20496_v51  ;;  %v7731_v5 = vld [vmem:[#allocation4 + $0x3f] sm:$0xff] }
 0x4e4   : > { %18725 = vmatmul.mubr.msk.f32.vlgmr.msra.gmra.mrb[32].mxu1 %vm294_vm0, %v24118_v58  ;;  %19054 = vmatmul.mubr.msk.f32.gmra.mrb[38].mxu0 %vm294_vm0, %v24124_v18  ;;  %v26314_v58 = vld [vmem:[#allocation9_spill] sm:$0xff]  ;;  %v20520_v18 = vpack.c.bf16 %v15196_v42, %v15195_v38  ;;  %v7736_v38 = vld [vmem:[#allocation4 + $0x67] sm:$0xff] }
 0x4e5   : > { %18727 = vmatprep.mubr.msk.f32.mxu1 %vm294_vm0, %v24136_v53  ;;  %19056 = vmatprep.mubr.msk.f32.mxu0 %vm294_vm0, %v24126_v27  ;;  %v26315_v27 = vld [vmem:[#allocation12_spill] sm:$0xff]  ;;  %v26316_v53 = vld [vmem:[#allocation10_spill] sm:$0xff] }
 0x4e6   : > { %20643 = vmatpush3.bf16.msra.mxu0 %v20496_v51  ;;  %20503 = vmatpush3.bf16.msra.mxu1 %v24503_v9  ;;  %v26336_v51 = vld [vmem:[#allocation25_spill] sm:$0xff]  ;;  %v24806_v42 = vld [vmem:[#allocation4 + $0x109] sm:$0xff] }
 0x4e7   : > { %20505 = vmatprep.subr.bf16.mxu1 %v20504_v61  ;;  %20645 = vmatprep.subr.bf16.mxu0 %v24503_v9 }
 0x4e8   : > { %18728 = vmatmul.mubr.msk.f32.gmra.mrb[34].mxu1 %vm294_vm0, %v24148_v56  ;;  %19057 = vmatmul.mubr.msk.f32.gmra.mrb[40].mxu0 %vm294_vm0, %v24153_v37  ;;  %v15197_v56 = vld [vmem:[%s26144_s5 + $0x1a0] sm:$0xff]  ;;  %v15198_v37 = vld [vmem:[%s26144_s5 + $0x1a8] sm:$0xff] }
 0x4e9   : > { %18730 = vmatprep.mubr.msk.f32.mxu1 %vm294_vm0, %v24155_v47  ;;  %19059 = vmatprep.mubr.msk.f32.mxu0 %vm294_vm0, %v24164_v50  ;;  %v26317_v47 = vld [vmem:[#allocation14_spill] sm:$0xff]  ;;  %v26318_v50 = vld [vmem:[#allocation11_spill] sm:$0xff] }
 0x4ea   : > { %20507 = vmatpush3.bf16.msra.mxu1 %v20504_v61 }
 0x4eb   : > { %20509 = vmatprep.subr.bf16.mxu1 %v20508_v11 }
 0x4ec   : > { %18731 = vmatmul.mubr.msk.f32.gmra.mrb[36].mxu1 %vm294_vm0, %v24176_v44  ;;  %19060 = vmatmul.mubr.msk.f32.gmra.mrb[42].mxu0 %vm294_vm0, %v24180_v16  ;;  %v20524_v44 = vpack.c.bf16 %v15198_v37, %v15197_v56  ;;  %v26319_v16 = vld [vmem:[#allocation15_spill] sm:$0xff]  ;;  %v9742_v56 = vld [vmem:[#allocation4 + $0xb7] sm:$0xff] }
 0x4ed   : > { %18733 = vmatprep.mubr.msk.f32.mxu1 %vm294_vm0, %v24189_v55  ;;  %19062 = vmatprep.mubr.msk.f32.mxu0 %vm294_vm0, %v24191_v4  ;;  %v26320_v55 = vld [vmem:[#allocation13_spill] sm:$0xff]  ;;  %v15199_v4 = vld [vmem:[%s26144_s5 + $0x1b0] sm:$0xff] }
 0x4ee   : > { %20511 = vmatpush3.bf16.msra.mxu1 %v20508_v11  ;;  %v7741_v37 = vld [vmem:[#allocation4 + $0x8f] sm:$0xff] }
 0x4ef   : > { %20513 = vmatprep.subr.bf16.mxu1 %v20512_v12 }
 0x4f0   : > { %18734 = vmatmul.mubr.msk.f32.gmra.mrb[38].mxu1 %vm294_vm0, %v24197_v15  ;;  %19063 = vmatmul.mubr.msk.f32.gmra.mrb[44].mxu0 %vm294_vm0, %v24201_v41  ;;  %v15200_v15 = vld [vmem:[%s26144_s5 + $0x1b8] sm:$0xff]  ;;  %v26321_v41 = vld [vmem:[#allocation16_spill] sm:$0xff] }
 0x4f1   : > { %18736 = vmatprep.mubr.msk.f32.mxu1 %vm294_vm0, %v24208_v52  ;;  %19065 = vmatprep.mubr.msk.f32.mxu0 %vm294_vm0, %v24607_v31  ;;  %v26322_v52 = vld [vmem:[#allocation17_spill] sm:$0xff] }
 0x4f2   : > { %20515 = vmatpush3.bf16.msra.mxu1 %v20512_v12 }
 0x4f3   : > { %20517 = vmatprep.subr.bf16.mxu1 %v24601_v10 }
 0x4f4   : > { %18737 = vmatmul.mubr.msk.f32.gmra.mrb[40].mxu1 %vm294_vm0, %v24216_v2  ;;  %19066 = vmatmul.mubr.msk.f32.gmra.mrb[46].mxu0 %vm294_vm0, %v24613_v1  ;;  %v26323_v2 = vld [vmem:[#allocation18_spill] sm:$0xff] }
 0x4f5   : > { %18739 = vmatprep.mubr.msk.f32.mxu1 %vm294_vm0, %v24224_v24  ;;  %19084 = vmatprep.mubr.msk.f32.mxu0 %vm294_vm0, %v24226_v62  ;;  %v15218_v24 = vld [vmem:[%s26144_s5 + $0x1c8] sm:$0xff] }
 0x4f6   : > { %v26324_v62 = vld [vmem:[#allocation19_spill] sm:$0xff] }
 0x4f8   : > { %18740 = vmatmul.mubr.msk.f32.gmra.mrb[42].mxu1 %vm294_vm0, %v24232_v14  ;;  %19085 = vmatmul.mubr.msk.f32.vlgmr.msra.gmra.mrb[32].mxu0 %vm294_vm0, %v24234_v30  ;;  %v26325_v14 = vld [vmem:[#allocation20_spill] sm:$0xff] }
 0x4f9   : > { %18742 = vmatprep.mubr.msk.f32.mxu1 %vm294_vm0, %v24242_v29  ;;  %19087 = vmatprep.mubr.msk.f32.mxu0 %vm294_vm0, %v24244_v33  ;;  %v26326_v29 = vld [vmem:[#allocation21_spill] sm:$0xff]  ;;  %v26327_v33 = vld [vmem:[#allocation22_spill] sm:$0xff] }
 0x4fa   : > { %20647 = vmatpush3.bf16.msra.mxu0 %v24503_v9  ;;  %v15219_v9 = vld [vmem:[%s26144_s5 + $0x1d0] sm:$0xff] }
 0x4fb   : > { %20649 = vmatprep.subr.bf16.mxu0 %v20504_v61  ;;  %v24752_v49 = vpack.c.bf16 %v15220_v48, %v15219_v9  ;;  %v7953_v9 = vld [vmem:[#allocation4 + $0x60] sm:$0xff] }
 0x4fc   : > { %18743 = vmatmul.mubr.msk.f32.gmra.mrb[44].mxu1 %vm294_vm0, %v24250_v28  ;;  %19088 = vmatmul.mubr.msk.f32.gmra.mrb[34].mxu0 %vm294_vm0, %v24252_v54  ;;  %v24705_v28 = vld [vmem:[#allocation4 + $0x108] sm:$0xff] }
 0x4fd   : > { %18745 = vmatprep.mubr.msk.f32.mxu1 %vm294_vm0, %v24210_v6  ;;  %19090 = vmatprep.mubr.msk.f32.mxu0 %vm294_vm0, %v24260_v17  ;;  %v20528_v6 = vpack.c.bf16 %v15200_v15, %v15199_v4  ;;  %v26328_v54 = vld [vmem:[#allocation23_spill] sm:$0xff]  ;;  %v24711_v17 = vld [vmem:[#allocation4 + $0x110] sm:$0xff] }
 0x4fe   : > { %20651 = vmatpush3.bf16.msra.mxu0 %v20504_v61  ;;  %v15221_v61 = vld [vmem:[%s26144_s5 + $0x1e0] sm:$0xff]  ;;  %v9746_v4 = vld [vmem:[#allocation4 + $0xd7] sm:$0xff]  ;;  %v7946_v15 = vld [vmem:[#allocation4 + $0x28] sm:$0xff] }
 0x4ff   : > { %20653 = vmatprep.subr.bf16.mxu0 %v20508_v11 }
 0x500   : > { %18746 = vmatmul.mubr.msk.f32.gmra.mrb[46].mxu1 %vm294_vm0, %v24218_v39  ;;  %19091 = vmatmul.mubr.msk.f32.gmra.mrb[36].mxu0 %vm294_vm0, %v24271_v13  ;;  %v15217_v39 = vld [vmem:[%s26144_s5 + $0x1c0] sm:$0xff]  ;;  %v26329_v13 = vld [vmem:[#allocation28_spill] sm:$0xff] }
 0x501   : > { %18764 = vmatprep.mubr.msk.f32.mxu1 %vm294_vm0, %v26313_v19  ;;  %19093 = vmatprep.mubr.msk.f32.mxu0 %vm294_vm0, %v26314_v58  ;;  %v24699_v30 = vpack.c.bf16 %v15218_v24, %v15217_v39  ;;  %v24812_v19 = vld [vmem:[#allocation4 + $0x111] sm:$0xff]  ;;  %v9740_v58 = vld [vmem:[#allocation4 + $0xa7] sm:$0xff] }
 0x502   : > { %20655 = vmatpush3.bf16.msra.mxu0 %v20508_v11  ;;  %v7732_v11 = vld [vmem:[#allocation4 + $0x47] sm:$0xff]  ;;  %v7948_v39 = vld [vmem:[#allocation4 + $0x38] sm:$0xff] }
 0x503   : > { %20657 = vmatprep.subr.bf16.mxu0 %v20512_v12 }
 0x504   : > { %18765 = vmatmul.mubr.msk.f32.vlgmr.msra.gmra.mrb[32].mxu1 %vm294_vm0, %v26315_v27  ;;  %19094 = vmatmul.mubr.msk.f32.gmra.mrb[38].mxu0 %vm294_vm0, %v26316_v53  ;;  %v9741_v27 = vld [vmem:[#allocation4 + $0xaf] sm:$0xff]  ;;  %v7740_v53 = vld [vmem:[#allocation4 + $0x87] sm:$0xff] }
 0x505   : > { %18767 = vmatprep.mubr.msk.f32.mxu1 %vm294_vm0, %v26317_v47  ;;  %19096 = vmatprep.mubr.msk.f32.mxu0 %vm294_vm0, %v26318_v50  ;;  %v9743_v47 = vld [vmem:[#allocation4 + $0xbf] sm:$0xff]  ;;  %v7742_v50 = vld [vmem:[#allocation4 + $0x97] sm:$0xff] }
 0x506   : > { %20659 = vmatpush3.bf16.msra.mxu0 %v20512_v12  ;;  %20519 = vmatpush3.bf16.msra.mxu1 %v24601_v10  ;;  %v7733_v12 = vld [vmem:[#allocation4 + $0x4f] sm:$0xff] }
 0x507   : > { %20521 = vmatprep.subr.bf16.mxu1 %v20520_v18  ;;  %20661 = vmatprep.subr.bf16.mxu0 %v24601_v10 }
 0x508   : > { %18768 = vmatmul.mubr.msk.f32.gmra.mrb[34].mxu1 %vm294_vm0, %v26319_v16  ;;  %19097 = vmatmul.mubr.msk.f32.gmra.mrb[40].mxu0 %vm294_vm0, %v26320_v55  ;;  %v7743_v16 = vld [vmem:[#allocation4 + $0x9f] sm:$0xff]  ;;  %v9745_v55 = vld [vmem:[#allocation4 + $0xcf] sm:$0xff] }
 0x509   : > { %18770 = vmatprep.mubr.msk.f32.mxu1 %vm294_vm0, %v26321_v41  ;;  %19099 = vmatprep.mubr.msk.f32.mxu0 %vm294_vm0, %v26322_v52  ;;  %v15243_v41 = vld [vmem:[%s26144_s5 + $0x210] sm:$0xff]  ;;  %v15244_v52 = vld [vmem:[%s26144_s5 + $0x218] sm:$0xff] }
 0x50a   : > { %20523 = vmatpush3.bf16.msra.mxu1 %v20520_v18  ;;  %v24844_v24 = vpack.c.bf16 %v15244_v52, %v15243_v41  ;;  %v9968_v41 = vld [vmem:[#allocation4 + $0x100] sm:$0xff]  ;;  %v8169_v52 = vld [vmem:[#allocation4 + $0x51] sm:$0xff] }
 0x50b   : > { %20525 = vmatprep.subr.bf16.mxu1 %v20524_v44 }
 0x50c   : > { %18771 = vmatmul.mubr.msk.f32.gmra.mrb[36].mxu1 %vm294_vm0, %v24351_v23  ;;  %19100 = vmatmul.mubr.msk.f32.gmra.mrb[42].mxu0 %vm294_vm0, %v26323_v2  ;;  %v26331_v23 = vld [vmem:[#allocation30_spill] sm:$0xff] }
 0x50d   : > { %18773 = vmatprep.mubr.msk.f32.mxu1 %vm294_vm0, %v26324_v62  ;;  %19102 = vmatprep.mubr.msk.f32.mxu0 %vm294_vm0, %v26325_v14  ;;  %v9747_v2 = vld [vmem:[#allocation4 + $0xdf] sm:$0xff]  ;;  %v9748_v62 = vld [vmem:[#allocation4 + $0xe7] sm:$0xff] }
 0x50e   : > { %20527 = vmatpush3.bf16.msra.mxu1 %v20524_v44  ;;  %v15245_v14 = vld [vmem:[%s26144_s5 + $0x220] sm:$0xff] }
 0x50f   : > { %20529 = vmatprep.subr.bf16.mxu1 %v20528_v6 }
 0x510   : > { %18774 = vmatmul.mubr.msk.f32.gmra.mrb[38].mxu1 %vm294_vm0, %v26326_v29  ;;  %19103 = vmatmul.mubr.msk.f32.gmra.mrb[44].mxu0 %vm294_vm0, %v26327_v33  ;;  %v7949_v29 = vld [vmem:[#allocation4 + $0x40] sm:$0xff]  ;;  %v9749_v33 = vld [vmem:[#allocation4 + $0xef] sm:$0xff] }
 0x511   : > { %18776 = vmatprep.mubr.msk.f32.mxu1 %vm294_vm0, %v26328_v54  ;;  %19105 = vmatprep.mubr.msk.f32.mxu0 %vm294_vm0, %v24705_v28  ;;  %v9750_v54 = vld [vmem:[#allocation4 + $0xf7] sm:$0xff] }
 0x512   : > { %20531 = vmatpush3.bf16.msra.mxu1 %v20528_v6 }
 0x513   : > { %20533 = vmatprep.subr.bf16.mxu1 %v24699_v30 }
 0x514   : > { %18777 = vmatmul.mubr.msk.f32.gmra.mrb[40].mxu1 %vm294_vm0, %v24386_v7  ;;  %19106 = vmatmul.mubr.msk.f32.gmra.mrb[46].mxu0 %vm294_vm0, %v24711_v17  ;;  %v26334_v7 = vld [vmem:[#allocation32_spill] sm:$0xff] }
 0x515   : > { %18779 = vmatprep.mubr.msk.f32.mxu1 %vm294_vm0, %v26329_v13  ;;  %19124 = vmatprep.mubr.msk.f32.mxu0 %vm294_vm0, %v26330_v45  ;;  %v7950_v45 = vld [vmem:[#allocation4 + $0x48] sm:$0xff] }
 0x518   : > { %18780 = vmatmul.mubr.msk.f32.gmra.mrb[42].mxu1 %vm294_vm0, %v24403_v25  ;;  %19125 = vmatmul.mubr.msk.f32.vlgmr.msra.gmra.mrb[32].mxu0 %vm294_vm0, %v26331_v23  ;;  %v26337_v25 = vld [vmem:[#allocation27_spill] sm:$0xff]  ;;  %v15247_v23 = vld [vmem:[%s26144_s5 + $0x230] sm:$0xff] }
 0x519   : > { %18782 = vmatprep.mubr.msk.f32.mxu1 %vm294_vm0, %v26332_v59  ;;  %19127 = vmatprep.mubr.msk.f32.mxu0 %vm294_vm0, %v26333_v35  ;;  %v15248_v59 = vld [vmem:[%s26144_s5 + $0x238] sm:$0xff]  ;;  %v7951_v35 = vld [vmem:[#allocation4 + $0x50] sm:$0xff] }
 0x51a   : > { %20663 = vmatpush3.bf16.msra.mxu0 %v24601_v10  ;;  %v7735_v10 = vld [vmem:[#allocation4 + $0x5f] sm:$0xff] }
 0x51b   : > { %20665 = vmatprep.subr.bf16.mxu0 %v20520_v18 }
 0x51c   : > { %18783 = vmatmul.mubr.msk.f32.gmra.mrb[44].mxu1 %vm294_vm0, %v26334_v7  ;;  %19128 = vmatmul.mubr.msk.f32.gmra.mrb[34].mxu0 %vm294_vm0, %v26335_v20  ;;  %v9751_v7 = vld [vmem:[#allocation4 + $0xff] sm:$0xff]  ;;  %v24874_v20 = vpack.c.bf16 %v15248_v59, %v15247_v23  ;;  %v10175_v59 = vld [vmem:[#allocation4 + $0xb1] sm:$0xff] }
 0x51d   : > { %18785 = vmatprep.mubr.msk.f32.mxu1 %vm294_vm0, %v26336_v51  ;;  %19130 = vmatprep.mubr.msk.f32.mxu0 %vm294_vm0, %v24430_v26  ;;  %v7729_v26 = vld [vmem:[#allocation4 + $0x2f] sm:$0xff]  ;;  %v7952_v51 = vld [vmem:[#allocation4 + $0x58] sm:$0xff]  ;;  %v8175_v23 = vld [vmem:[#allocation4 + $0x81] sm:$0xff] }
 0x51e   : > { %20667 = vmatpush3.bf16.msra.mxu0 %v20520_v18  ;;  %v7739_v18 = vld [vmem:[#allocation4 + $0x7f] sm:$0xff] }
 0x51f   : > { %20669 = vmatprep.subr.bf16.mxu0 %v20524_v44 }
 0x520   : > { %18786 = vmatmul.mubr.msk.f32.gmra.mrb[46].mxu1 %vm294_vm0, %v26337_v25  ;;  %19131 = vmatmul.mubr.msk.f32.gmra.mrb[36].mxu0 %vm294_vm0, %v24443_v3  ;;  %v7730_v3 = vld [vmem:[#allocation4 + $0x37] sm:$0xff]  ;;  %v10471_v25 = vld [vmem:[%s26144_s5] sm:$0xff] }
 0x521   : > { %18804 = vmatprep.mubr.msk.f32.mxu1 %vm294_vm0, %v7728_v8  ;;  %19133 = vmatprep.mubr.msk.f32.mxu0 %vm294_vm0, %v24450_v60  ;;  %v26338_v60 = vld [vmem:[#allocation26_spill] sm:$0xff]  ;;  %v10472_v8 = vld [vmem:[%s26144_s5 + $0x8] sm:$0xff] }
 0x522   : > { %20671 = vmatpush3.bf16.msra.mxu0 %v20524_v44  ;;  %v9744_v44 = vld [vmem:[#allocation4 + $0xc7] sm:$0xff]  ;;  %v24889_v48 = vpack.c.bf16 %v10472_v8, %v10471_v25  ;;  %v8178_v25 = vld [vmem:[#allocation4 + $0x99] sm:$0xff] }
 0x523   : > { %20673 = vmatprep.subr.bf16.mxu0 %v20528_v6  ;;  %v10178_v8 = vld [vmem:[#allocation4 + $0xc9] sm:$0xff] }
 0x524   : > { %18805 = vmatmul.mubr.msk.f32.vlgmr.msra.gmra.mrb[32].mxu1 %vm294_vm0, %v7729_v26  ;;  %19134 = vmatmul.mubr.msk.f32.gmra.mrb[38].mxu0 %vm294_vm0, %v24464_v63  ;;  %v24769_v63 = vpack.c.bf16 %v15222_v0, %v15221_v61  ;;  %v7954_v26 = vld [vmem:[#allocation4 + $0x68] sm:$0xff]  ;;  %v24900_v61 = vld [vmem:[#allocation4 + $0x11f] sm:$0xff] }
 0x525   : > { %18807 = vmatprep.mubr.msk.f32.mxu1 %vm294_vm0, %v7730_v3  ;;  %19136 = vmatprep.mubr.msk.f32.mxu0 %vm294_vm0, %v26338_v60  ;;  %v7955_v3 = vld [vmem:[#allocation4 + $0x70] sm:$0xff]  ;;  %v7956_v0 = vld [vmem:[#allocation4 + $0x78] sm:$0xff]  ;;  %v9957_v60 = vld [vmem:[#allocation4 + $0xa8] sm:$0xff] }
 0x526   : > { %20675 = vmatpush3.bf16.msra.mxu0 %v20528_v6  ;;  %20535 = vmatpush3.bf16.msra.mxu1 %v24699_v30  ;;  %v7947_v6 = vld [vmem:[#allocation4 + $0x30] sm:$0xff] }
 0x527   : > { %20537 = vmatprep.subr.bf16.mxu1 %v24752_v49  ;;  %20677 = vmatprep.subr.bf16.mxu0 %v24699_v30 }
 0x528   : > { %18808 = vmatmul.mubr.msk.f32.gmra.mrb[34].mxu1 %vm294_vm0, %v7731_v5  ;;  %19137 = vmatmul.mubr.msk.f32.gmra.mrb[40].mxu0 %vm294_vm0, %v24483_v22  ;;  %v24785_v22 = vpack.c.bf16 %v15224_v46, %v15223_v43  ;;  %v7957_v5 = vld [vmem:[#allocation4 + $0x80] sm:$0xff]  ;;  %v9959_v43 = vld [vmem:[#allocation4 + $0xb8] sm:$0xff]  ;;  %v7959_v46 = vld [vmem:[#allocation4 + $0x90] sm:$0xff] }
 0x529   : > { %18810 = vmatprep.mubr.msk.f32.mxu1 %vm294_vm0, %v7732_v11  ;;  %19139 = vmatprep.mubr.msk.f32.mxu0 %vm294_vm0, %v24489_v36  ;;  %v15242_v36 = vld [vmem:[%s26144_s5 + $0x208] sm:$0xff] }
 0x52a   : > { %20539 = vmatpush3.bf16.msra.mxu1 %v24752_v49  ;;  %v7958_v11 = vld [vmem:[#allocation4 + $0x88] sm:$0xff] }
 0x52b   : > { %20541 = vmatprep.subr.bf16.mxu1 %v24769_v63 }
 0x52c   : > { %18811 = vmatmul.mubr.msk.f32.gmra.mrb[36].mxu1 %vm294_vm0, %v7733_v12  ;;  %19140 = vmatmul.mubr.msk.f32.gmra.mrb[42].mxu0 %vm294_vm0, %v24501_v32  ;;  %v24801_v32 = vpack.c.bf16 %v15242_v36, %v15241_v21  ;;  %v9960_v12 = vld [vmem:[#allocation4 + $0xc0] sm:$0xff]  ;;  %v9962_v36 = vld [vmem:[#allocation4 + $0xd0] sm:$0xff] }
 0x52d   : > { %18813 = vmatprep.mubr.msk.f32.mxu1 %vm294_vm0, %v7734_v34  ;;  %19142 = vmatprep.mubr.msk.f32.mxu0 %vm294_vm0, %v24509_v57  ;;  %v7737_v57 = vld [vmem:[#allocation4 + $0x6f] sm:$0xff]  ;;  %v7961_v21 = vld [vmem:[#allocation4 + $0xa0] sm:$0xff] }
 0x52e   : > { %20543 = vmatpush3.bf16.msra.mxu1 %v24769_v63  ;;  %v9961_v34 = vld [vmem:[#allocation4 + $0xc8] sm:$0xff] }
 0x52f   : > { %20545 = vmatprep.subr.bf16.mxu1 %v24785_v22 }
 0x530   : > { %18814 = vmatmul.mubr.msk.f32.gmra.mrb[38].mxu1 %vm294_vm0, %v7735_v10  ;;  %19143 = vmatmul.mubr.msk.f32.gmra.mrb[44].mxu0 %vm294_vm0, %v24515_v40  ;;  %v7738_v40 = vld [vmem:[#allocation4 + $0x77] sm:$0xff] }
 0x531   : > { %18816 = vmatprep.mubr.msk.f32.mxu1 %vm294_vm0, %v7736_v38  ;;  %19145 = vmatprep.mubr.msk.f32.mxu0 %vm294_vm0, %v24806_v42  ;;  %v9963_v10 = vld [vmem:[#allocation4 + $0xd8] sm:$0xff]  ;;  %v10473_v38 = vld [vmem:[%s26144_s5 + $0x10] sm:$0xff] }
 0x532   : > { %20547 = vmatpush3.bf16.msra.mxu1 %v24785_v22 }
 0x533   : > { %20549 = vmatprep.subr.bf16.mxu1 %v24801_v32 }
 0x534   : > { %18817 = vmatmul.mubr.msk.f32.gmra.mrb[40].mxu1 %vm294_vm0, %v7737_v57  ;;  %19146 = vmatmul.mubr.msk.f32.gmra.mrb[46].mxu0 %vm294_vm0, %v24812_v19  ;;  %v10474_v57 = vld [vmem:[%s26144_s5 + $0x18] sm:$0xff] }
 0x535   : > { %18819 = vmatprep.mubr.msk.f32.mxu1 %vm294_vm0, %v7738_v40  ;;  %19164 = vmatprep.mubr.msk.f32.mxu0 %vm294_vm0, %v9740_v58  ;;  %v9964_v40 = vld [vmem:[#allocation4 + $0xe0] sm:$0xff]  ;;  %v8165_v58 = vld [vmem:[#allocation4 + $0x31] sm:$0xff] }
 0x538   : > { %18820 = vmatmul.mubr.msk.f32.gmra.mrb[42].mxu1 %vm294_vm0, %v7739_v18  ;;  %19165 = vmatmul.mubr.msk.f32.vlgmr.msra.gmra.mrb[32].mxu0 %vm294_vm0, %v9741_v27  ;;  %v8166_v18 = vld [vmem:[#allocation4 + $0x39] sm:$0xff]  ;;  %v24932_v27 = vpack.c.bf16 %v10474_v57, %v10473_v38  ;;  %v15545_v57 = vld [vmem:[%s26144_s5 + $0x88] sm:$0xff] }
 0x539   : > { %18822 = vmatprep.mubr.msk.f32.mxu1 %vm294_vm0, %v7740_v53  ;;  %19167 = vmatprep.mubr.msk.f32.mxu0 %vm294_vm0, %v9742_v56  ;;  %v9965_v53 = vld [vmem:[#allocation4 + $0xe8] sm:$0xff]  ;;  %v10475_v56 = vld [vmem:[%s26144_s5 + $0x20] sm:$0xff] }
 0x53a   : > { %20679 = vmatpush3.bf16.msra.mxu0 %v24699_v30  ;;  %v15246_v30 = vld [vmem:[%s26144_s5 + $0x228] sm:$0xff]  ;;  %v15544_v38 = vld [vmem:[%s26144_s5 + $0x80] sm:$0xff] }
 0x53b   : > { %20681 = vmatprep.subr.bf16.mxu0 %v24752_v49  ;;  %v24860_v13 = vpack.c.bf16 %v15246_v30, %v15245_v14  ;;  %v8172_v30 = vld [vmem:[#allocation4 + $0x69] sm:$0xff] }
 0x53c   : > { %18823 = vmatmul.mubr.msk.f32.gmra.mrb[44].mxu1 %vm294_vm0, %v7741_v37  ;;  %19168 = vmatmul.mubr.msk.f32.gmra.mrb[34].mxu0 %vm294_vm0, %v9743_v47  ;;  %v10476_v37 = vld [vmem:[%s26144_s5 + $0x28] sm:$0xff]  ;;  %v9966_v47 = vld [vmem:[#allocation4 + $0xf0] sm:$0xff] }
 0x53d   : > { %18825 = vmatprep.mubr.msk.f32.mxu1 %vm294_vm0, %v7742_v50  ;;  %19170 = vmatprep.mubr.msk.f32.mxu0 %vm294_vm0, %v9744_v44  ;;  %v8167_v50 = vld [vmem:[#allocation4 + $0x41] sm:$0xff]  ;;  %v9967_v44 = vld [vmem:[#allocation4 + $0xf8] sm:$0xff] }
 0x53e   : > { %20683 = vmatpush3.bf16.msra.mxu0 %v24752_v49  ;;  %v24894_v49 = vld [vmem:[#allocation4 + $0x117] sm:$0xff] }
 0x53f   : > { %20685 = vmatprep.subr.bf16.mxu0 %v24769_v63 }
 0x540   : > { %18826 = vmatmul.mubr.msk.f32.gmra.mrb[46].mxu1 %vm294_vm0, %v7743_v16  ;;  %19171 = vmatmul.mubr.msk.f32.gmra.mrb[36].mxu0 %vm294_vm0, %v9745_v55  ;;  %v24948_v16 = vpack.c.bf16 %v10476_v37, %v10475_v56  ;;  %v8168_v55 = vld [vmem:[#allocation4 + $0x49] sm:$0xff]  ;;  %v25104_v37 = vld [vmem:[#allocation4 + $0x157] sm:$0xff] }
 0x541   : > { %18844 = vmatprep.mubr.msk.f32.mxu1 %vm294_vm0, %v7946_v15  ;;  %19173 = vmatprep.mubr.msk.f32.mxu0 %vm294_vm0, %v9746_v4  ;;  %v10477_v4 = vld [vmem:[%s26144_s5 + $0x30] sm:$0xff]  ;;  %v10478_v15 = vld [vmem:[%s26144_s5 + $0x38] sm:$0xff] }
 0x542   : > { %20687 = vmatpush3.bf16.msra.mxu0 %v24769_v63  ;;  %v9958_v63 = vld [vmem:[#allocation4 + $0xb0] sm:$0xff] }
 0x543   : > { %20689 = vmatprep.subr.bf16.mxu0 %v24785_v22  ;;  %v25097_v56 = vld [vmem:[#allocation4 + $0x14f] sm:$0xff] }
 0x544   : > { %18845 = vmatmul.mubr.msk.f32.vlgmr.msra.gmra.mrb[32].mxu1 %vm294_vm0, %v7947_v6  ;;  %19174 = vmatmul.mubr.msk.f32.gmra.mrb[38].mxu0 %vm294_vm0, %v9747_v2  ;;  %v24962_v6 = vpack.c.bf16 %v10478_v15, %v10477_v4  ;;  %v8170_v2 = vld [vmem:[#allocation4 + $0x59] sm:$0xff]  ;;  %v25129_v4 = vld [vmem:[#allocation4 + $0x16f] sm:$0xff] }
 0x545   : > { %18847 = vmatprep.mubr.msk.f32.mxu1 %vm294_vm0, %v7948_v39  ;;  %19176 = vmatprep.mubr.msk.f32.mxu0 %vm294_vm0, %v9748_v62  ;;  %v15520_v39 = vld [vmem:[%s26144_s5 + $0x40] sm:$0xff] }
 0x546   : > { %20691 = vmatpush3.bf16.msra.mxu0 %v24785_v22  ;;  %20551 = vmatpush3.bf16.msra.mxu1 %v24801_v32  ;;  %v7960_v22 = vld [vmem:[#allocation4 + $0x98] sm:$0xff]  ;;  %v8171_v62 = vld [vmem:[#allocation4 + $0x61] sm:$0xff] }
 0x547   : > { %20553 = vmatprep.subr.bf16.mxu1 %v24844_v24  ;;  %20693 = vmatprep.subr.bf16.mxu0 %v24801_v32  ;;  %v25131_v15 = vld [vmem:[#allocation4 + $0x19f] sm:$0xff] }
 0x548   : > { %18848 = vmatmul.mubr.msk.f32.gmra.mrb[34].mxu1 %vm294_vm0, %v7949_v29  ;;  %19177 = vmatmul.mubr.msk.f32.gmra.mrb[40].mxu0 %vm294_vm0, %v9749_v33  ;;  %v24982_v29 = vld [vmem:[#allocation4 + $0x118] sm:$0xff]  ;;  %v24987_v33 = vld [vmem:[#allocation4 + $0x120] sm:$0xff] }
 0x549   : > { %18850 = vmatprep.mubr.msk.f32.mxu1 %vm294_vm0, %v7950_v45  ;;  %19179 = vmatprep.mubr.msk.f32.mxu0 %vm294_vm0, %v9750_v54  ;;  %v8173_v54 = vld [vmem:[#allocation4 + $0x71] sm:$0xff]  ;;  %v10174_v45 = vld [vmem:[#allocation4 + $0xa9] sm:$0xff] }
 0x54a   : > { %20555 = vmatpush3.bf16.msra.mxu1 %v24844_v24 }
 0x54b   : > { %20557 = vmatprep.subr.bf16.mxu1 %v24860_v13 }
 0x54c   : > { %18851 = vmatmul.mubr.msk.f32.gmra.mrb[36].mxu1 %vm294_vm0, %v7951_v35  ;;  %19180 = vmatmul.mubr.msk.f32.gmra.mrb[42].mxu0 %vm294_vm0, %v9751_v7  ;;  %v8176_v35 = vld [vmem:[#allocation4 + $0x89] sm:$0xff]  ;;  %v10176_v7 = vld [vmem:[#allocation4 + $0xb9] sm:$0xff] }
 0x54d   : > { %18853 = vmatprep.mubr.msk.f32.mxu1 %vm294_vm0, %v7952_v51  ;;  %19182 = vmatprep.mubr.msk.f32.mxu0 %vm294_vm0, %v24607_v31  ;;  %v10177_v51 = vld [vmem:[#allocation4 + $0xc1] sm:$0xff] }
 0x54e   : > { %20559 = vmatpush3.bf16.msra.mxu1 %v24860_v13 }
 0x54f   : > { %20561 = vmatprep.subr.bf16.mxu1 %v24874_v20 }
 0x550   : > { %18854 = vmatmul.mubr.msk.f32.gmra.mrb[38].mxu1 %vm294_vm0, %v7953_v9  ;;  %19183 = vmatmul.mubr.msk.f32.gmra.mrb[44].mxu0 %vm294_vm0, %v24613_v1  ;;  %v8179_v9 = vld [vmem:[#allocation4 + $0xa1] sm:$0xff] }
 0x551   : > { %18856 = vmatprep.mubr.msk.f32.mxu1 %vm294_vm0, %v7954_v26  ;;  %19185 = vmatprep.mubr.msk.f32.mxu0 %vm294_vm0, %v24894_v49  ;;  %v10179_v26 = vld [vmem:[#allocation4 + $0xd1] sm:$0xff] }
 0x552   : > { %20563 = vmatpush3.bf16.msra.mxu1 %v24874_v20 }
 0x553   : > { %20709 = vmatprep.subr.bf16.mxu1 %v24889_v48 }
 0x554   : > { %18857 = vmatmul.mubr.msk.f32.gmra.mrb[40].mxu1 %vm294_vm0, %v7955_v3  ;;  %19186 = vmatmul.mubr.msk.f32.gmra.mrb[46].mxu0 %vm294_vm0, %v24900_v61  ;;  %v15522_v3 = vld [vmem:[%s26144_s5 + $0x50] sm:$0xff] }
 0x555   : > { %18859 = vmatprep.mubr.msk.f32.mxu1 %vm294_vm0, %v7956_v0  ;;  %19204 = vmatprep.mubr.msk.f32.mxu0 %vm294_vm0, %v9957_v60  ;;  %v15523_v0 = vld [vmem:[%s26144_s5 + $0x58] sm:$0xff]  ;;  %v10181_v60 = vld [vmem:[#allocation4 + $0xe1] sm:$0xff] }
 0x558   : > { %18860 = vmatmul.mubr.msk.f32.gmra.mrb[42].mxu1 %vm294_vm0, %v7957_v5  ;;  %19205 = vmatmul.mubr.msk.f32.vlgmr.msra.gmra.mrb[32].mxu0 %vm294_vm0, %v9958_v63  ;;  %v25021_v5 = vpack.c.bf16 %v15523_v0, %v15522_v3  ;;  %v10182_v63 = vld [vmem:[#allocation4 + $0xe9] sm:$0xff]  ;;  %v25242_v3 = vld [vmem:[#allocation4 + $0x140] sm:$0xff] }
 0x559   : > { %18862 = vmatprep.mubr.msk.f32.mxu1 %vm294_vm0, %v7958_v11  ;;  %19207 = vmatprep.mubr.msk.f32.mxu0 %vm294_vm0, %v9959_v43  ;;  %v15524_v11 = vld [vmem:[%s26144_s5 + $0x60] sm:$0xff]  ;;  %v10183_v43 = vld [vmem:[#allocation4 + $0xf1] sm:$0xff] }
 0x55a   : > { %20695 = vmatpush3.bf16.msra.mxu0 %v24801_v32  ;;  %v8164_v32 = vld [vmem:[#allocation4 + $0x29] sm:$0xff] }
 0x55b   : > { %20697 = vmatprep.subr.bf16.mxu0 %v24844_v24  ;;  %v25245_v0 = vld [vmem:[#allocation4 + $0x1ef] sm:$0xff] }
 0x55c   : > { %18863 = vmatmul.mubr.msk.f32.gmra.mrb[44].mxu1 %vm294_vm0, %v7959_v46  ;;  %19208 = vmatmul.mubr.msk.f32.gmra.mrb[34].mxu0 %vm294_vm0, %v9960_v12  ;;  %v25044_v12 = vld [vmem:[#allocation4 + $0x127] sm:$0xff] }
 0x55d   : > { %18865 = vmatprep.mubr.msk.f32.mxu1 %vm294_vm0, %v7960_v22  ;;  %19210 = vmatprep.mubr.msk.f32.mxu0 %vm294_vm0, %v9961_v34  ;;  %v15526_v22 = vld [vmem:[%s26144_s5 + $0x70] sm:$0xff]  ;;  %v15527_v34 = vld [vmem:[%s26144_s5 + $0x78] sm:$0xff] }
 0x55e   : > { %20699 = vmatpush3.bf16.msra.mxu0 %v24844_v24  ;;  %v15521_v24 = vld [vmem:[%s26144_s5 + $0x48] sm:$0xff] }
 0x55f   : > { %20701 = vmatprep.subr.bf16.mxu0 %v24860_v13  ;;  %v24977_v14 = vpack.c.bf16 %v15521_v24, %v15520_v39  ;;  %v25156_v39 = vld [vmem:[#allocation4 + $0x1b7] sm:$0xff] }
 0x560   : > { %18866 = vmatmul.mubr.msk.f32.gmra.mrb[46].mxu1 %vm294_vm0, %v7961_v21  ;;  %19211 = vmatmul.mubr.msk.f32.gmra.mrb[36].mxu0 %vm294_vm0, %v9962_v36  ;;  %v10185_v21 = vld [vmem:[#allocation4 + $0x101] sm:$0xff]  ;;  %v25056_v36 = vld [vmem:[#allocation4 + $0x12f] sm:$0xff] }
 0x561   : > { %18884 = vmatprep.mubr.msk.f32.mxu1 %vm294_vm0, %v8164_v32  ;;  %19213 = vmatprep.mubr.msk.f32.mxu0 %vm294_vm0, %v9963_v10  ;;  %v25059_v10 = vpack.c.bf16 %v15527_v34, %v15526_v22  ;;  %v25064_v32 = vld [vmem:[#allocation4 + $0x137] sm:$0xff]  ;;  %v25288_v34 = vld [vmem:[#allocation4 + $0x168] sm:$0xff] }
 0x562   : > { %20703 = vmatpush3.bf16.msra.mxu0 %v24860_v13  ;;  %v8174_v13 = vld [vmem:[#allocation4 + $0x79] sm:$0xff]  ;;  %v15546_v24 = vld [vmem:[%s26144_s5 + $0x90] sm:$0xff] }
 0x563   : > { %20705 = vmatprep.subr.bf16.mxu0 %v24874_v20  ;;  %v25282_v22 = vld [vmem:[#allocation4 + $0x190] sm:$0xff] }
 0x564   : > { %18885 = vmatmul.mubr.msk.f32.vlgmr.msra.gmra.mrb[32].mxu1 %vm294_vm0, %v8165_v58  ;;  %19214 = vmatmul.mubr.msk.f32.gmra.mrb[38].mxu0 %vm294_vm0, %v9964_v40  ;;  %v25077_v40 = vld [vmem:[#allocation4 + $0x13f] sm:$0xff]  ;;  %v25080_v58 = vpack.c.bf16 %v15545_v57, %v15544_v38 }
 0x565   : > { %18887 = vmatprep.mubr.msk.f32.mxu1 %vm294_vm0, %v8166_v18  ;;  %19216 = vmatprep.mubr.msk.f32.mxu0 %vm294_vm0, %v9965_v53  ;;  %v25086_v18 = vld [vmem:[#allocation4 + $0x119] sm:$0xff]  ;;  %v25095_v53 = vld [vmem:[#allocation4 + $0x121] sm:$0xff] }
 0x566   : > { %20707 = vmatpush3.bf16.msra.mxu0 %v24874_v20  ;;  %20711 = vmatpush3.bf16.msra.mxu1 %v24889_v48  ;;  %v8177_v20 = vld [vmem:[#allocation4 + $0x91] sm:$0xff]  ;;  %26339 = vst [vmem:[#allocation34_spill] sm:$0xff] %v25086_v18  ;;  %26340 = vst [vmem:[#allocation8_spill] sm:$0xff] %v25095_v53  ;;  %v25298_v38 = vld [vmem:[#allocation4 + $0x1a0] sm:$0xff] }
 0x567   : > { %20713 = vmatprep.subr.bf16.mxu1 %v24932_v27  ;;  %20853 = vmatprep.subr.bf16.mxu0 %v24889_v48  ;;  %v25306_v57 = vld [vmem:[#allocation4 + $0x178] sm:$0xff] }
 0x568   : > { %18888 = vmatmul.mubr.msk.f32.gmra.mrb[34].mxu1 %vm294_vm0, %v8167_v50  ;;  %19217 = vmatmul.mubr.msk.f32.gmra.mrb[40].mxu0 %vm294_vm0, %v9966_v47  ;;  %v25106_v47 = vld [vmem:[#allocation4 + $0x187] sm:$0xff]  ;;  %v25112_v50 = vld [vmem:[#allocation4 + $0x15f] sm:$0xff] }
 0x569   : > { %18890 = vmatprep.mubr.msk.f32.mxu1 %vm294_vm0, %v8168_v55  ;;  %19219 = vmatprep.mubr.msk.f32.mxu0 %vm294_vm0, %v9967_v44  ;;  %v25114_v44 = vld [vmem:[#allocation4 + $0x18f] sm:$0xff]  ;;  %v25122_v55 = vld [vmem:[#allocation4 + $0x197] sm:$0xff] }
 0x56a   : > { %20715 = vmatpush3.bf16.msra.mxu1 %v24932_v27 }
 0x56b   : > { %20717 = vmatprep.subr.bf16.mxu1 %v24948_v16 }
 0x56c   : > { %18891 = vmatmul.mubr.msk.f32.gmra.mrb[36].mxu1 %vm294_vm0, %v8169_v52  ;;  %19220 = vmatmul.mubr.msk.f32.gmra.mrb[42].mxu0 %vm294_vm0, %v9968_v41  ;;  %v25138_v41 = vld [vmem:[#allocation4 + $0x177] sm:$0xff]  ;;  %v25140_v52 = vld [vmem:[#allocation4 + $0x1a7] sm:$0xff] }
 0x56d   : > { %18893 = vmatprep.mubr.msk.f32.mxu1 %vm294_vm0, %v8170_v2  ;;  %19222 = vmatprep.mubr.msk.f32.mxu0 %vm294_vm0, %v24705_v28  ;;  %v25149_v2 = vld [vmem:[#allocation4 + $0x1af] sm:$0xff] }
 0x56e   : > { %20719 = vmatpush3.bf16.msra.mxu1 %v24948_v16 }
 0x56f   : > { %20721 = vmatprep.subr.bf16.mxu1 %v24962_v6 }
 0x570   : > { %18894 = vmatmul.mubr.msk.f32.gmra.mrb[38].mxu1 %vm294_vm0, %v8171_v62  ;;  %19223 = vmatmul.mubr.msk.f32.gmra.mrb[44].mxu0 %vm294_vm0, %v24711_v17  ;;  %v15547_v62 = vld [vmem:[%s26144_s5 + $0x98] sm:$0xff] }
 0x571   : > { %18896 = vmatprep.mubr.msk.f32.mxu1 %vm294_vm0, %v8172_v30  ;;  %19225 = vmatprep.mubr.msk.f32.mxu0 %vm294_vm0, %v24982_v29  ;;  %v25172_v30 = vpack.c.bf16 %v15547_v62, %v15546_v24  ;;  %v25308_v24 = vld [vmem:[#allocation4 + $0x1a8] sm:$0xff]  ;;  %v25314_v62 = vld [vmem:[#allocation4 + $0x180] sm:$0xff] }
 0x572   : > { %20723 = vmatpush3.bf16.msra.mxu1 %v24962_v6 }
 0x573   : > { %20725 = vmatprep.subr.bf16.mxu1 %v24977_v14 }
 0x574   : > { %18897 = vmatmul.mubr.msk.f32.gmra.mrb[40].mxu1 %vm294_vm0, %v8173_v54  ;;  %19226 = vmatmul.mubr.msk.f32.gmra.mrb[46].mxu0 %vm294_vm0, %v24987_v33  ;;  %v25178_v54 = vld [vmem:[#allocation4 + $0x1c7] sm:$0xff] }
 0x575   : > { %18899 = vmatprep.mubr.msk.f32.mxu1 %vm294_vm0, %v8174_v13  ;;  %19244 = vmatprep.mubr.msk.f32.mxu0 %vm294_vm0, %v10174_v45  ;;  %v15549_v13 = vld [vmem:[%s26144_s5 + $0xa8] sm:$0xff]  ;;  %v25194_v45 = vld [vmem:[#allocation4 + $0x1d7] sm:$0xff] }
 0x578   : > { %18900 = vmatmul.mubr.msk.f32.gmra.mrb[42].mxu1 %vm294_vm0, %v8175_v23  ;;  %19245 = vmatmul.mubr.msk.f32.vlgmr.msra.gmra.mrb[32].mxu0 %vm294_vm0, %v10175_v59  ;;  %v25204_v59 = vld [vmem:[#allocation4 + $0x128] sm:$0xff] }
 0x579   : > { %18902 = vmatprep.mubr.msk.f32.mxu1 %vm294_vm0, %v8176_v35  ;;  %19247 = vmatprep.mubr.msk.f32.mxu0 %vm294_vm0, %v10176_v7  ;;  %v15550_v35 = vld [vmem:[%s26144_s5 + $0xb0] sm:$0xff]  ;;  %v15551_v7 = vld [vmem:[%s26144_s5 + $0xb8] sm:$0xff] }
 0x57a   : > { %20855 = vmatpush3.bf16.msra.mxu0 %v24889_v48  ;;  %v10180_v48 = vld [vmem:[#allocation4 + $0xd9] sm:$0xff] }
 0x57b   : > { %20857 = vmatprep.subr.bf16.mxu0 %v24932_v27 }
 0x57c   : > { %18903 = vmatmul.mubr.msk.f32.gmra.mrb[44].mxu1 %vm294_vm0, %v8177_v20  ;;  %19248 = vmatmul.mubr.msk.f32.gmra.mrb[34].mxu0 %vm294_vm0, %v10177_v51  ;;  %v25216_v20 = vld [vmem:[#allocation4 + $0x130] sm:$0xff]  ;;  %v25219_v51 = vld [vmem:[#allocation4 + $0x1df] sm:$0xff] }
 0x57d   : > { %18905 = vmatprep.mubr.msk.f32.mxu1 %vm294_vm0, %v8178_v25  ;;  %19250 = vmatprep.mubr.msk.f32.mxu0 %vm294_vm0, %v10178_v8  ;;  %v25221_v25 = vld [vmem:[#allocation4 + $0x138] sm:$0xff]  ;;  %v25224_v8 = vpack.c.bf16 %v15551_v7, %v15550_v35 }
 0x57e   : > { %20859 = vmatpush3.bf16.msra.mxu0 %v24932_v27  ;;  %v25088_v27 = vld [vmem:[#allocation4 + $0x147] sm:$0xff]  ;;  %v15571_v35 = vld [vmem:[%s26144_s5 + $0xd8] sm:$0xff] }
 0x57f   : > { %20861 = vmatprep.subr.bf16.mxu0 %v24948_v16 }
 0x580   : > { %18906 = vmatmul.mubr.msk.f32.gmra.mrb[46].mxu1 %vm294_vm0, %v8179_v9  ;;  %19251 = vmatmul.mubr.msk.f32.gmra.mrb[36].mxu0 %vm294_vm0, %v10179_v26  ;;  %v25230_v9 = vld [vmem:[#allocation4 + $0x1e7] sm:$0xff] }
 0x581   : > { %19253 = vmatprep.mubr.msk.f32.mxu0 %vm294_vm0, %v10180_v48  ;;  %19284 = vmatprep.mubr.msk.f32.mxu1 %vm294_vm0, %v24607_v31  ;;  %v15525_v31 = vld [vmem:[%s26144_s5 + $0x68] sm:$0xff]  ;;  %v15568_v26 = vld [vmem:[%s26144_s5 + $0xc0] sm:$0xff] }
 0x582   : > { %20863 = vmatpush3.bf16.msra.mxu0 %v24948_v16  ;;  %v25039_v46 = vpack.c.bf16 %v15525_v31, %v15524_v11  ;;  %v25120_v16 = vld [vmem:[#allocation4 + $0x167] sm:$0xff]  ;;  %v25262_v11 = vld [vmem:[#allocation4 + $0x150] sm:$0xff]  ;;  %v25265_v31 = vld [vmem:[#allocation4 + $0x1ff] sm:$0xff] }
 0x583   : > { %20865 = vmatprep.subr.bf16.mxu0 %v24962_v6  ;;  %v15569_v48 = vld [vmem:[%s26144_s5 + $0xc8] sm:$0xff] }
 0x584   : > { %19254 = vmatmul.mubr.msk.f32.gmra.mrb[38].mxu0 %vm294_vm0, %v10181_v60  ;;  %19285 = vmatmul.mubr.msk.f32.vlgmr.msra.gmra.mrb[48].mxu1 %vm294_vm0, %v24613_v1  ;;  %v10184_v1 = vld [vmem:[#allocation4 + $0xf9] sm:$0xff]  ;;  %v25248_v60 = vpack.c.bf16 %v15569_v48, %v15568_v26  ;;  %v25346_v26 = vld [vmem:[#allocation4 + $0x1c8] sm:$0xff] }
 0x585   : > { %19256 = vmatprep.mubr.msk.f32.mxu0 %vm294_vm0, %v10182_v63  ;;  %19287 = vmatprep.mubr.msk.f32.mxu1 %vm294_vm0, %v24894_v49  ;;  %v25256_v63 = vld [vmem:[#allocation4 + $0x1f7] sm:$0xff]  ;;  %26341 = vst [vmem:[#allocation9_spill] sm:$0xff] %v25346_v26 }
 0x586   : > { %20867 = vmatpush3.bf16.msra.mxu0 %v24962_v6  ;;  %20727 = vmatpush3.bf16.msra.mxu1 %v24977_v14  ;;  %v25147_v6 = vld [vmem:[#allocation4 + $0x17f] sm:$0xff] }
 0x587   : > { %20729 = vmatprep.subr.bf16.mxu1 %v25021_v5  ;;  %20869 = vmatprep.subr.bf16.mxu0 %v24977_v14  ;;  %v25362_v48 = vld [vmem:[#allocation4 + $0x1d8] sm:$0xff] }
 0x588   : > { %19257 = vmatmul.mubr.msk.f32.gmra.mrb[40].mxu0 %vm294_vm0, %v10183_v43  ;;  %19288 = vmatmul.mubr.msk.f32.gmra.mrb[50].mxu1 %vm294_vm0, %v24900_v61  ;;  %v25272_v43 = vld [vmem:[#allocation4 + $0x158] sm:$0xff]  ;;  %26343 = vst [vmem:[#allocation10_spill] sm:$0xff] %v25362_v48 }
 0x589   : > { %19259 = vmatprep.mubr.msk.f32.mxu0 %vm294_vm0, %v10184_v1  ;;  %19290 = vmatprep.mubr.msk.f32.mxu1 %vm294_vm0, %v25044_v12  ;;  %v25274_v1 = vld [vmem:[#allocation4 + $0x188] sm:$0xff] }
 0x58a   : > { %20731 = vmatpush3.bf16.msra.mxu1 %v25021_v5 }
 0x58b   : > { %20733 = vmatprep.subr.bf16.mxu1 %v25039_v46 }
 0x58c   : > { %19260 = vmatmul.mubr.msk.f32.gmra.mrb[42].mxu0 %vm294_vm0, %v10185_v21  ;;  %19291 = vmatmul.mubr.msk.f32.gmra.mrb[52].mxu1 %vm294_vm0, %v25056_v36  ;;  %v25290_v21 = vld [vmem:[#allocation4 + $0x198] sm:$0xff] }
 0x58d   : > { %19262 = vmatprep.mubr.msk.f32.mxu0 %vm294_vm0, %v24806_v42  ;;  %19293 = vmatprep.mubr.msk.f32.mxu1 %vm294_vm0, %v25064_v32 }
 0x58e   : > { %20735 = vmatpush3.bf16.msra.mxu1 %v25039_v46 }
 0x58f   : > { %20737 = vmatprep.subr.bf16.mxu1 %v25059_v10 }
 0x590   : > { %19263 = vmatmul.mubr.msk.f32.gmra.mrb[44].mxu0 %vm294_vm0, %v24812_v19  ;;  %19294 = vmatmul.mubr.msk.f32.gmra.mrb[54].mxu1 %vm294_vm0, %v25077_v40 }
 0x591   : > { %19265 = vmatprep.mubr.msk.f32.mxu0 %vm294_vm0, %v25086_v18  ;;  %19296 = vmatprep.mubr.msk.f32.mxu1 %vm294_vm0, %v25088_v27 }
 0x592   : > { %20739 = vmatpush3.bf16.msra.mxu1 %v25059_v10 }
 0x593   : > { %20741 = vmatprep.subr.bf16.mxu1 %v25080_v58 }
 0x594   : > { %19266 = vmatmul.mubr.msk.f32.gmra.mrb[46].mxu0 %vm294_vm0, %v25095_v53  ;;  %19297 = vmatmul.mubr.msk.f32.gmra.mrb[56].mxu1 %vm294_vm0, %v25097_v56 }
 0x595   : > { %19299 = vmatprep.mubr.msk.f32.mxu1 %vm294_vm0, %v25104_v37  ;;  %19644 = vmatprep.mubr.msk.f32.mxu0 %vm294_vm0, %v25106_v47 }
 0x598   : > { %19300 = vmatmul.mubr.msk.f32.gmra.mrb[58].mxu1 %vm294_vm0, %v25112_v50  ;;  %19645 = vmatmul.mubr.msk.f32.vlgmr.msra.gmra.mrb[48].mxu0 %vm294_vm0, %v25114_v44 }
 0x599   : > { %19302 = vmatprep.mubr.msk.f32.mxu1 %vm294_vm0, %v25120_v16  ;;  %19647 = vmatprep.mubr.msk.f32.mxu0 %vm294_vm0, %v25122_v55 }
 0x59a   : > { %20871 = vmatpush3.bf16.msra.mxu0 %v24977_v14  ;;  %v25169_v14 = vld [vmem:[#allocation4 + $0x1bf] sm:$0xff] }
 0x59b   : > { %20873 = vmatprep.subr.bf16.mxu0 %v25021_v5 }
 0x59c   : > { %19303 = vmatmul.mubr.msk.f32.gmra.mrb[60].mxu1 %vm294_vm0, %v25129_v4  ;;  %19648 = vmatmul.mubr.msk.f32.gmra.mrb[50].mxu0 %vm294_vm0, %v25131_v15 }
 0x59d   : > { %19305 = vmatprep.mubr.msk.f32.mxu1 %vm294_vm0, %v25138_v41  ;;  %19650 = vmatprep.mubr.msk.f32.mxu0 %vm294_vm0, %v25140_v52 }
 0x59e   : > { %20875 = vmatpush3.bf16.msra.mxu0 %v25021_v5  ;;  %v25254_v5 = vld [vmem:[#allocation4 + $0x148] sm:$0xff] }
 0x59f   : > { %20877 = vmatprep.subr.bf16.mxu0 %v25039_v46 }
 0x5a0   : > { %19306 = vmatmul.mubr.msk.f32.gmra.mrb[62].mxu1 %vm294_vm0, %v25147_v6  ;;  %19651 = vmatmul.mubr.msk.f32.gmra.mrb[52].mxu0 %vm294_vm0, %v25149_v2 }
 0x5a1   : > { %19324 = vmatprep.mubr.msk.f32.mxu1 %vm294_vm0, %v24705_v28  ;;  %19653 = vmatprep.mubr.msk.f32.mxu0 %vm294_vm0, %v25156_v39  ;;  %v15548_v28 = vld [vmem:[%s26144_s5 + $0xa0] sm:$0xff] }
 0x5a2   : > { %20879 = vmatpush3.bf16.msra.mxu0 %v25039_v46  ;;  %v25198_v23 = vpack.c.bf16 %v15549_v13, %v15548_v28  ;;  %v25280_v46 = vld [vmem:[#allocation4 + $0x160] sm:$0xff]  ;;  %v25324_v28 = vld [vmem:[#allocation4 + $0x1b8] sm:$0xff]  ;;  %v15570_v13 = vld [vmem:[%s26144_s5 + $0xd0] sm:$0xff] }
 0x5a3   : > { %20881 = vmatprep.subr.bf16.mxu0 %v25059_v10  ;;  %v25340_v7 = vpack.c.bf16 %v15571_v35, %v15570_v13  ;;  %v25372_v35 = vld [vmem:[#allocation4 + $0x129] sm:$0xff] }
 0x5a4   : > { %19325 = vmatmul.mubr.msk.f32.vlgmr.msra.gmra.mrb[48].mxu1 %vm294_vm0, %v24711_v17  ;;  %19654 = vmatmul.mubr.msk.f32.gmra.mrb[54].mxu0 %vm294_vm0, %v25169_v14  ;;  %v25192_v17 = vld [vmem:[#allocation4 + $0x1cf] sm:$0xff]  ;;  %26344 = vst [vmem:[#allocation14_spill] sm:$0xff] %v25372_v35 }
 0x5a5   : > { %19327 = vmatprep.mubr.msk.f32.mxu1 %vm294_vm0, %v24982_v29  ;;  %19656 = vmatprep.mubr.msk.f32.mxu0 %vm294_vm0, %v25178_v54 }
 0x5a6   : > { %20883 = vmatpush3.bf16.msra.mxu0 %v25059_v10  ;;  %20743 = vmatpush3.bf16.msra.mxu1 %v25080_v58  ;;  %v25296_v10 = vld [vmem:[#allocation4 + $0x170] sm:$0xff] }
 0x5a7   : > { %20745 = vmatprep.subr.bf16.mxu1 %v25172_v30  ;;  %20885 = vmatprep.subr.bf16.mxu0 %v25080_v58 }
 0x5a8   : > { %19328 = vmatmul.mubr.msk.f32.gmra.mrb[50].mxu1 %vm294_vm0, %v24987_v33  ;;  %19657 = vmatmul.mubr.msk.f32.gmra.mrb[56].mxu0 %vm294_vm0, %v25192_v17 }
 0x5a9   : > { %19330 = vmatprep.mubr.msk.f32.mxu1 %vm294_vm0, %v25204_v59  ;;  %19659 = vmatprep.mubr.msk.f32.mxu0 %vm294_vm0, %v25194_v45 }
 0x5aa   : > { %20747 = vmatpush3.bf16.msra.mxu1 %v25172_v30 }
 0x5ab   : > { %20749 = vmatprep.subr.bf16.mxu1 %v25198_v23 }
 0x5ac   : > { %19331 = vmatmul.mubr.msk.f32.gmra.mrb[52].mxu1 %vm294_vm0, %v25216_v20  ;;  %19660 = vmatmul.mubr.msk.f32.gmra.mrb[58].mxu0 %vm294_vm0, %v25219_v51 }
 0x5ad   : > { %19333 = vmatprep.mubr.msk.f32.mxu1 %vm294_vm0, %v25221_v25  ;;  %19662 = vmatprep.mubr.msk.f32.mxu0 %vm294_vm0, %v25230_v9 }
 0x5ae   : > { %20751 = vmatpush3.bf16.msra.mxu1 %v25198_v23 }
 0x5af   : > { %20753 = vmatprep.subr.bf16.mxu1 %v25224_v8 }
 0x5b0   : > { %19334 = vmatmul.mubr.msk.f32.gmra.mrb[54].mxu1 %vm294_vm0, %v25242_v3  ;;  %19663 = vmatmul.mubr.msk.f32.gmra.mrb[60].mxu0 %vm294_vm0, %v25245_v0 }
 0x5b1   : > { %19336 = vmatprep.mubr.msk.f32.mxu1 %vm294_vm0, %v25254_v5  ;;  %19665 = vmatprep.mubr.msk.f32.mxu0 %vm294_vm0, %v25256_v63 }
 0x5b2   : > { %20755 = vmatpush3.bf16.msra.mxu1 %v25224_v8 }
 0x5b3   : > { %20757 = vmatprep.subr.bf16.mxu1 %v25248_v60 }
 0x5b4   : > { %19337 = vmatmul.mubr.msk.f32.gmra.mrb[56].mxu1 %vm294_vm0, %v25262_v11  ;;  %19666 = vmatmul.mubr.msk.f32.gmra.mrb[62].mxu0 %vm294_vm0, %v25265_v31 }
 0x5b5   : > { %19339 = vmatprep.mubr.msk.f32.mxu1 %vm294_vm0, %v25272_v43  ;;  %19684 = vmatprep.mubr.msk.f32.mxu0 %vm294_vm0, %v25274_v1 }
 0x5b8   : > { %19340 = vmatmul.mubr.msk.f32.gmra.mrb[58].mxu1 %vm294_vm0, %v25280_v46  ;;  %19685 = vmatmul.mubr.msk.f32.vlgmr.msra.gmra.mrb[48].mxu0 %vm294_vm0, %v25282_v22 }
 0x5b9   : > { %19342 = vmatprep.mubr.msk.f32.mxu1 %vm294_vm0, %v25288_v34  ;;  %19687 = vmatprep.mubr.msk.f32.mxu0 %vm294_vm0, %v25290_v21 }
 0x5ba   : > { %20887 = vmatpush3.bf16.msra.mxu0 %v25080_v58  ;;  %v25316_v58 = vld [vmem:[#allocation4 + $0x1b0] sm:$0xff] }
 0x5bb   : > { %20889 = vmatprep.subr.bf16.mxu0 %v25172_v30 }
 0x5bc   : > { %19343 = vmatmul.mubr.msk.f32.gmra.mrb[60].mxu1 %vm294_vm0, %v25296_v10  ;;  %19688 = vmatmul.mubr.msk.f32.gmra.mrb[50].mxu0 %vm294_vm0, %v25298_v38 }
 0x5bd   : > { %19345 = vmatprep.mubr.msk.f32.mxu1 %vm294_vm0, %v25306_v57  ;;  %19690 = vmatprep.mubr.msk.f32.mxu0 %vm294_vm0, %v25308_v24 }
 0x5be   : > { %20891 = vmatpush3.bf16.msra.mxu0 %v25172_v30  ;;  %v25336_v30 = vld [vmem:[#allocation4 + $0x1c0] sm:$0xff] }
 0x5bf   : > { %20893 = vmatprep.subr.bf16.mxu0 %v25198_v23 }
 0x5c0   : > { %19346 = vmatmul.mubr.msk.f32.gmra.mrb[62].mxu1 %vm294_vm0, %v25314_v62  ;;  %19691 = vmatmul.mubr.msk.f32.gmra.mrb[52].mxu0 %vm294_vm0, %v25316_v58 }
 0x5c1   : > { %19364 = vmatprep.mubr.msk.f32.mxu1 %vm294_vm0, %v24806_v42  ;;  %19693 = vmatprep.mubr.msk.f32.mxu0 %vm294_vm0, %v25324_v28  ;;  %v15572_v42 = vld [vmem:[%s26144_s5 + $0xe0] sm:$0xff] }
 0x5c2   : > { %20895 = vmatpush3.bf16.msra.mxu0 %v25198_v23  ;;  %v15573_v23 = vld [vmem:[%s26144_s5 + $0xe8] sm:$0xff] }
 0x5c3   : > { %20897 = vmatprep.subr.bf16.mxu0 %v25224_v8  ;;  %v25366_v13 = vpack.c.bf16 %v15573_v23, %v15572_v42  ;;  %v25384_v42 = vld [vmem:[#allocation4 + $0x1e0] sm:$0xff]  ;;  %v25387_v23 = vld [vmem:[#allocation4 + $0x131] sm:$0xff] }
 0x5c4   : > { %19365 = vmatmul.mubr.msk.f32.vlgmr.msra.gmra.mrb[48].mxu1 %vm294_vm0, %v24812_v19  ;;  %19694 = vmatmul.mubr.msk.f32.gmra.mrb[54].mxu0 %vm294_vm0, %v25336_v30  ;;  %v25358_v19 = vld [vmem:[#allocation4 + $0x1d0] sm:$0xff]  ;;  %26345 = vst [vmem:[#allocation11_spill] sm:$0xff] %v25384_v42  ;;  %26346 = vst [vmem:[#allocation15_spill] sm:$0xff] %v25387_v23 }
 0x5c5   : > { %19367 = vmatprep.mubr.msk.f32.mxu1 %vm294_vm0, %v25086_v18  ;;  %19696 = vmatprep.mubr.msk.f32.mxu0 %vm294_vm0, %v25346_v26  ;;  %26342 = vst [vmem:[#allocation12_spill] sm:$0xff] %v25358_v19  ;;  %v15575_v26 = vld [vmem:[%s26144_s5 + $0xf8] sm:$0xff]  ;;  %v15593_v18 = vld [vmem:[%s26144_s5 + $0x108] sm:$0xff] }
 0x5c6   : > { %20899 = vmatpush3.bf16.msra.mxu0 %v25224_v8  ;;  %20759 = vmatpush3.bf16.msra.mxu1 %v25248_v60  ;;  %v15574_v8 = vld [vmem:[%s26144_s5 + $0xf0] sm:$0xff] }
 0x5c7   : > { %20761 = vmatprep.subr.bf16.mxu1 %v25340_v7  ;;  %20901 = vmatprep.subr.bf16.mxu0 %v25248_v60 }
 0x5c8   : > { %19368 = vmatmul.mubr.msk.f32.gmra.mrb[50].mxu1 %vm294_vm0, %v25095_v53  ;;  %19697 = vmatmul.mubr.msk.f32.gmra.mrb[56].mxu0 %vm294_vm0, %v25358_v19  ;;  %v25389_v19 = vld [vmem:[#allocation4 + $0x139] sm:$0xff]  ;;  %v25392_v53 = vpack.c.bf16 %v15575_v26, %v15574_v8  ;;  %v25410_v26 = vld [vmem:[#allocation4 + $0x1f0] sm:$0xff]  ;;  %v25413_v8 = vld [vmem:[#allocation4 + $0x141] sm:$0xff] }
 0x5c9   : > { %19370 = vmatprep.mubr.msk.f32.mxu1 %vm294_vm0, %v25372_v35  ;;  %19699 = vmatprep.mubr.msk.f32.mxu0 %vm294_vm0, %v25362_v48  ;;  %26347 = vst [vmem:[#allocation13_spill] sm:$0xff] %v25389_v19  ;;  %v25398_v35 = vld [vmem:[#allocation4 + $0x1e8] sm:$0xff]  ;;  %v15592_v48 = vld [vmem:[%s26144_s5 + $0x100] sm:$0xff]  ;;  %26349 = vst [vmem:[#allocation17_spill] sm:$0xff] %v25410_v26 }
 0x5ca   : > { %20763 = vmatpush3.bf16.msra.mxu1 %v25340_v7  ;;  %26348 = vst [vmem:[#allocation16_spill] sm:$0xff] %v25398_v35 }
 0x5cb   : > { %20765 = vmatprep.subr.bf16.mxu1 %v25366_v13 }
 0x5cc   : > { %19371 = vmatmul.mubr.msk.f32.gmra.mrb[52].mxu1 %vm294_vm0, %v25387_v23  ;;  %19700 = vmatmul.mubr.msk.f32.gmra.mrb[58].mxu0 %vm294_vm0, %v25384_v42  ;;  %v25416_v42 = vpack.c.bf16 %v15593_v18, %v15592_v48  ;;  %v25424_v23 = vld [vmem:[#allocation4 + $0x1f8] sm:$0xff] }
 0x5cd   : > { %19373 = vmatprep.mubr.msk.f32.mxu1 %vm294_vm0, %v25389_v19  ;;  %19702 = vmatprep.mubr.msk.f32.mxu0 %vm294_vm0, %v25398_v35  ;;  %v25422_v19 = vld [vmem:[#allocation4 + $0x149] sm:$0xff]  ;;  %26351 = vst [vmem:[#allocation19_spill] sm:$0xff] %v25424_v23  ;;  %v25430_v35 = vld [vmem:[#allocation4 + $0x200] sm:$0xff]  ;;  %v25433_v18 = vld [vmem:[#allocation4 + $0x151] sm:$0xff] }
 0x5ce   : > { %20767 = vmatpush3.bf16.msra.mxu1 %v25366_v13  ;;  %26350 = vst [vmem:[#allocation18_spill] sm:$0xff] %v25422_v19  ;;  %26352 = vst [vmem:[#allocation20_spill] sm:$0xff] %v25430_v35  ;;  %v25440_v48 = vld [vmem:[#allocation4 + $0x159] sm:$0xff] }
 0x5cf   : > { %20769 = vmatprep.subr.bf16.mxu1 %v25392_v53  ;;  %26353 = vst [vmem:[#allocation21_spill] sm:$0xff] %v25433_v18  ;;  %26354 = vst [vmem:[#allocation22_spill] sm:$0xff] %v25440_v48 }
 0x5d0   : > { %19374 = vmatmul.mubr.msk.f32.gmra.mrb[54].mxu1 %vm294_vm0, %v25413_v8  ;;  %19703 = vmatmul.mubr.msk.f32.gmra.mrb[60].mxu0 %vm294_vm0, %v25410_v26  ;;  %v25450_v26 = vld [vmem:[#allocation4 + $0x191] sm:$0xff] }
 0x5d1   : > { %19376 = vmatprep.mubr.msk.f32.mxu1 %vm294_vm0, %v25422_v19  ;;  %19705 = vmatprep.mubr.msk.f32.mxu0 %vm294_vm0, %v25424_v23  ;;  %v25442_v19 = vld [vmem:[#allocation4 + $0x189] sm:$0xff]  ;;  %v25448_v23 = vld [vmem:[#allocation4 + $0x161] sm:$0xff]  ;;  %26356 = vst [vmem:[#allocation28_spill] sm:$0xff] %v25450_v26 }
 0x5d2   : > { %20771 = vmatpush3.bf16.msra.mxu1 %v25392_v53  ;;  %26355 = vst [vmem:[#allocation23_spill] sm:$0xff] %v25442_v19 }
 0x5d3   : > { %20773 = vmatprep.subr.bf16.mxu1 %v25416_v42 }
 0x5d4   : > { %19377 = vmatmul.mubr.msk.f32.gmra.mrb[56].mxu1 %vm294_vm0, %v25433_v18  ;;  %19706 = vmatmul.mubr.msk.f32.gmra.mrb[62].mxu0 %vm294_vm0, %v25430_v35  ;;  %v25456_v35 = vld [vmem:[#allocation4 + $0x169] sm:$0xff]  ;;  %v25458_v18 = vld [vmem:[#allocation4 + $0x199] sm:$0xff] }
 0x5d5   : > { %19379 = vmatprep.mubr.msk.f32.mxu1 %vm294_vm0, %v25440_v48  ;;  %19724 = vmatprep.mubr.msk.f32.mxu0 %vm294_vm0, %v25442_v19  ;;  %26357 = vst [vmem:[#allocation29_spill] sm:$0xff] %v25456_v35  ;;  %26358 = vst [vmem:[#allocation30_spill] sm:$0xff] %v25458_v18  ;;  %v25465_v19 = vld [vmem:[#allocation4 + $0x171] sm:$0xff]  ;;  %v25467_v48 = vld [vmem:[#allocation4 + $0x1a1] sm:$0xff] }
 0x5d6   : > { %26359 = vst [vmem:[#allocation31_spill] sm:$0xff] %v25467_v48 }
 0x5d8   : > { %19380 = vmatmul.mubr.msk.f32.gmra.mrb[58].mxu1 %vm294_vm0, %v25448_v23  ;;  %19725 = vmatmul.mubr.msk.f32.vlgmr.msra.gmra.mrb[48].mxu0 %vm294_vm0, %v25450_v26  ;;  %v25474_v26 = vld [vmem:[#allocation4 + $0x179] sm:$0xff] }
 0x5d9   : > { %19382 = vmatprep.mubr.msk.f32.mxu1 %vm294_vm0, %v25456_v35  ;;  %19727 = vmatprep.mubr.msk.f32.mxu0 %vm294_vm0, %v25458_v18  ;;  %26360 = vst [vmem:[#allocation33_spill] sm:$0xff] %v25474_v26  ;;  %v25476_v35 = vld [vmem:[#allocation4 + $0x1a9] sm:$0xff]  ;;  %v25485_v18 = vld [vmem:[#allocation4 + $0x1b1] sm:$0xff] }
 0x5da   : > { %20903 = vmatpush3.bf16.msra.mxu0 %v25248_v60  ;;  %26361 = vst [vmem:[#allocation32_spill] sm:$0xff] %v25476_v35  ;;  %v25483_v60 = vld [vmem:[#allocation4 + $0x181] sm:$0xff]  ;;  %26363 = vst [vmem:[#allocation25_spill] sm:$0xff] %v25485_v18 }
 0x5db   : > { %20905 = vmatprep.subr.bf16.mxu0 %v25340_v7  ;;  %26362 = vst [vmem:[#allocation24_spill] sm:$0xff] %v25483_v60 }
 0x5dc   : > { %19383 = vmatmul.mubr.msk.f32.gmra.mrb[60].mxu1 %vm294_vm0, %v25465_v19  ;;  %19728 = vmatmul.mubr.msk.f32.gmra.mrb[50].mxu0 %vm294_vm0, %v25467_v48  ;;  %v25492_v48 = vld [vmem:[#allocation4 + $0x1b9] sm:$0xff] }
 0x5dd   : > { %19385 = vmatprep.mubr.msk.f32.mxu1 %vm294_vm0, %v25474_v26  ;;  %19730 = vmatprep.mubr.msk.f32.mxu0 %vm294_vm0, %v25476_v35  ;;  %v15594_v35 = vld [vmem:[%s26144_s5 + $0x110] sm:$0xff] }
 0x5de   : > { %20907 = vmatpush3.bf16.msra.mxu0 %v25340_v7  ;;  %v15595_v7 = vld [vmem:[%s26144_s5 + $0x118] sm:$0xff]  ;;  %v25512_v26 = vld [vmem:[#allocation4 + $0x1c9] sm:$0xff] }
 0x5df   : > { %20909 = vmatprep.subr.bf16.mxu0 %v25366_v13 }
 0x5e0   : > { %19386 = vmatmul.mubr.msk.f32.gmra.mrb[62].mxu1 %vm294_vm0, %v25483_v60  ;;  %19731 = vmatmul.mubr.msk.f32.gmra.mrb[52].mxu0 %vm294_vm0, %v25485_v18  ;;  %v25505_v60 = vld [vmem:[#allocation4 + $0x1c1] sm:$0xff]  ;;  %v20776_v18 = vpack.c.bf16 %v15595_v7, %v15594_v35  ;;  %v15599_v7 = vld [vmem:[%s26144_s5 + $0x138] sm:$0xff] }
 0x5e1   : > { %19404 = vmatprep.mubr.msk.f32.mxu1 %vm294_vm0, %v24894_v49  ;;  %19733 = vmatprep.mubr.msk.f32.mxu0 %vm294_vm0, %v25492_v48  ;;  %v15596_v49 = vld [vmem:[%s26144_s5 + $0x120] sm:$0xff] }
 0x5e2   : > { %20911 = vmatpush3.bf16.msra.mxu0 %v25366_v13  ;;  %v15597_v13 = vld [vmem:[%s26144_s5 + $0x128] sm:$0xff] }
 0x5e3   : > { %20913 = vmatprep.subr.bf16.mxu0 %v25392_v53  ;;  %v20780_v35 = vpack.c.bf16 %v15597_v13, %v15596_v49  ;;  %v25551_v13 = vld [vmem:[#allocation4 + $0x1e9] sm:$0xff] }
 0x5e4   : > { %19405 = vmatmul.mubr.msk.f32.vlgmr.msra.gmra.mrb[48].mxu1 %vm294_vm0, %v24900_v61  ;;  %19734 = vmatmul.mubr.msk.f32.gmra.mrb[54].mxu0 %vm294_vm0, %v25505_v60  ;;  %v25526_v61 = vld [vmem:[#allocation4 + $0x1d1] sm:$0xff] }
 0x5e5   : > { %19407 = vmatprep.mubr.msk.f32.mxu1 %vm294_vm0, %v25044_v12  ;;  %19736 = vmatprep.mubr.msk.f32.mxu0 %vm294_vm0, %v25512_v26  ;;  %v25533_v12 = vld [vmem:[#allocation4 + $0x1d9] sm:$0xff] }
 0x5e6   : > { %20915 = vmatpush3.bf16.msra.mxu0 %v25392_v53  ;;  %20775 = vmatpush3.bf16.msra.mxu1 %v25416_v42  ;;  %26364 = vst [vmem:[#allocation27_spill] sm:$0xff] %v25533_v12  ;;  %v15598_v53 = vld [vmem:[%s26144_s5 + $0x130] sm:$0xff] }
 0x5e7   : > { %20777 = vmatprep.subr.bf16.mxu1 %v20776_v18  ;;  %20917 = vmatprep.subr.bf16.mxu0 %v25416_v42  ;;  %v20784_v49 = vpack.c.bf16 %v15599_v7, %v15598_v53  ;;  %v25571_v7 = vld [vmem:[#allocation4 + $0x1f9] sm:$0xff] }
 0x5e8   : > { %19408 = vmatmul.mubr.msk.f32.gmra.mrb[50].mxu1 %vm294_vm0, %v25056_v36  ;;  %19737 = vmatmul.mubr.msk.f32.gmra.mrb[56].mxu0 %vm294_vm0, %v25526_v61  ;;  %v25545_v36 = vld [vmem:[#allocation4 + $0x1e1] sm:$0xff] }
 0x5e9   : > { %19410 = vmatprep.mubr.msk.f32.mxu1 %vm294_vm0, %v25064_v32  ;;  %19739 = vmatprep.mubr.msk.f32.mxu0 %vm294_vm0, %v25533_v12  ;;  %v15616_v32 = vld [vmem:[%s26144_s5 + $0x140] sm:$0xff]  ;;  %v15617_v12 = vld [vmem:[%s26144_s5 + $0x148] sm:$0xff] }
 0x5ea   : > { %20779 = vmatpush3.bf16.msra.mxu1 %v20776_v18  ;;  %v25565_v53 = vpack.c.bf16 %v15617_v12, %v15616_v32  ;;  %v26385_v32 = vld [vmem:[#allocation32_spill] sm:$0xff] }
 0x5eb   : > { %20781 = vmatprep.subr.bf16.mxu1 %v20780_v35 }
 0x5ec   : > { %19411 = vmatmul.mubr.msk.f32.gmra.mrb[52].mxu1 %vm294_vm0, %v25077_v40  ;;  %19740 = vmatmul.mubr.msk.f32.gmra.mrb[58].mxu0 %vm294_vm0, %v25545_v36  ;;  %v25563_v40 = vld [vmem:[#allocation4 + $0x1f1] sm:$0xff] }
 0x5ed   : > { %19413 = vmatprep.mubr.msk.f32.mxu1 %vm294_vm0, %v25088_v27  ;;  %19742 = vmatprep.mubr.msk.f32.mxu0 %vm294_vm0, %v25551_v13  ;;  %v25577_v27 = vld [vmem:[#allocation4 + $0x201] sm:$0xff] }
 0x5ee   : > { %20783 = vmatpush3.bf16.msra.mxu1 %v20780_v35 }
 0x5ef   : > { %20785 = vmatprep.subr.bf16.mxu1 %v20784_v49 }
 0x5f0   : > { %19414 = vmatmul.mubr.msk.f32.gmra.mrb[54].mxu1 %vm294_vm0, %v25097_v56  ;;  %19743 = vmatmul.mubr.msk.f32.gmra.mrb[60].mxu0 %vm294_vm0, %v25563_v40  ;;  %v15618_v56 = vld [vmem:[%s26144_s5 + $0x150] sm:$0xff] }
 0x5f1   : > { %19416 = vmatprep.mubr.msk.f32.mxu1 %vm294_vm0, %v25104_v37  ;;  %19745 = vmatprep.mubr.msk.f32.mxu0 %vm294_vm0, %v25571_v7  ;;  %v15619_v37 = vld [vmem:[%s26144_s5 + $0x158] sm:$0xff] }
 0x5f2   : > { %20787 = vmatpush3.bf16.msra.mxu1 %v20784_v49 }
 0x5f3   : > { %20789 = vmatprep.subr.bf16.mxu1 %v25565_v53 }
 0x5f4   : > { %19417 = vmatmul.mubr.msk.f32.gmra.mrb[56].mxu1 %vm294_vm0, %v25112_v50  ;;  %19746 = vmatmul.mubr.msk.f32.gmra.mrb[62].mxu0 %vm294_vm0, %v25577_v27  ;;  %v15620_v50 = vld [vmem:[%s26144_s5 + $0x160] sm:$0xff] }
 0x5f5   : > { %19419 = vmatprep.mubr.msk.f32.mxu1 %vm294_vm0, %v25120_v16  ;;  %19764 = vmatprep.mubr.msk.f32.mxu0 %vm294_vm0, %v25122_v55  ;;  %v15623_v16 = vld [vmem:[%s26144_s5 + $0x178] sm:$0xff] }
 0x5f8   : > { %19420 = vmatmul.mubr.msk.f32.gmra.mrb[58].mxu1 %vm294_vm0, %v25129_v4  ;;  %19765 = vmatmul.mubr.msk.f32.vlgmr.msra.gmra.mrb[48].mxu0 %vm294_vm0, %v25131_v15  ;;  %v15640_v4 = vld [vmem:[%s26144_s5 + $0x180] sm:$0xff]  ;;  %v15641_v15 = vld [vmem:[%s26144_s5 + $0x188] sm:$0xff] }
 0x5f9   : > { %19422 = vmatprep.mubr.msk.f32.mxu1 %vm294_vm0, %v25138_v41  ;;  %19767 = vmatprep.mubr.msk.f32.mxu0 %vm294_vm0, %v25140_v52  ;;  %v25663_v41 = vpack.c.bf16 %v15641_v15, %v15640_v4  ;;  %v25669_v52 = vld [vmem:[#allocation4 + $0x207] sm:$0xff]  ;;  %v15666_v15 = vld [vmem:[%s26144_s5 + $0x1d0] sm:$0xff] }
 0x5fa   : > { %20919 = vmatpush3.bf16.msra.mxu0 %v25416_v42  ;;  %v26382_v42 = vld [vmem:[#allocation30_spill] sm:$0xff] }
 0x5fb   : > { %20921 = vmatprep.subr.bf16.mxu0 %v20776_v18  ;;  %v11749_v4 = vld [vmem:[#allocation4 + $0x127] sm:$0xff] }
 0x5fc   : > { %19423 = vmatmul.mubr.msk.f32.gmra.mrb[60].mxu1 %vm294_vm0, %v25147_v6  ;;  %19768 = vmatmul.mubr.msk.f32.gmra.mrb[50].mxu0 %vm294_vm0, %v25149_v2  ;;  %v25675_v6 = vld [vmem:[#allocation4 + $0x20f] sm:$0xff] }
 0x5fd   : > { %19425 = vmatprep.mubr.msk.f32.mxu1 %vm294_vm0, %v25106_v47  ;;  %19770 = vmatprep.mubr.msk.f32.mxu0 %vm294_vm0, %v25156_v39  ;;  %v20792_v47 = vpack.c.bf16 %v15619_v37, %v15618_v56  ;;  %v15642_v2 = vld [vmem:[%s26144_s5 + $0x190] sm:$0xff]  ;;  %v15643_v39 = vld [vmem:[%s26144_s5 + $0x198] sm:$0xff] }
 0x5fe   : > { %20923 = vmatpush3.bf16.msra.mxu0 %v20776_v18 }
 0x5ff   : > { %20925 = vmatprep.subr.bf16.mxu0 %v20780_v35 }
 0x600   : > { %19426 = vmatmul.mubr.msk.f32.gmra.mrb[62].mxu1 %vm294_vm0, %v25114_v44  ;;  %19771 = vmatmul.mubr.msk.f32.gmra.mrb[52].mxu0 %vm294_vm0, %v25169_v14  ;;  %v15622_v44 = vld [vmem:[%s26144_s5 + $0x170] sm:$0xff]  ;;  %v26365_v14 = vld [vmem:[#allocation34_spill] sm:$0xff] }
 0x601   : > { %19444 = vmatprep.mubr.msk.f32.mxu1 %vm294_vm0, %v24982_v29  ;;  %19773 = vmatprep.mubr.msk.f32.mxu0 %vm294_vm0, %v25178_v54  ;;  %v15621_v29 = vld [vmem:[%s26144_s5 + $0x168] sm:$0xff]  ;;  %v20800_v55 = vpack.c.bf16 %v15623_v16, %v15622_v44  ;;  %v26366_v54 = vld [vmem:[#allocation9_spill] sm:$0xff] }
 0x602   : > { %20927 = vmatpush3.bf16.msra.mxu0 %v20780_v35 }
 0x603   : > { %20929 = vmatprep.subr.bf16.mxu0 %v20784_v49 }
 0x604   : > { %19445 = vmatmul.mubr.msk.f32.vlgmr.msra.gmra.mrb[48].mxu1 %vm294_vm0, %v24987_v33  ;;  %19774 = vmatmul.mubr.msk.f32.gmra.mrb[54].mxu0 %vm294_vm0, %v25192_v17  ;;  %v20796_v33 = vpack.c.bf16 %v15621_v29, %v15620_v50  ;;  %v20808_v17 = vpack.c.bf16 %v15643_v39, %v15642_v2  ;;  %v26388_v29 = vld [vmem:[#allocation23_spill] sm:$0xff] }
 0x605   : > { %19447 = vmatprep.mubr.msk.f32.mxu1 %vm294_vm0, %v25204_v59  ;;  %19776 = vmatprep.mubr.msk.f32.mxu0 %vm294_vm0, %v25194_v45  ;;  %v26367_v45 = vld [vmem:[#allocation8_spill] sm:$0xff] }
 0x606   : > { %20931 = vmatpush3.bf16.msra.mxu0 %v20784_v49  ;;  %20791 = vmatpush3.bf16.msra.mxu1 %v25565_v53  ;;  %v26368_v59 = vld [vmem:[#allocation12_spill] sm:$0xff]  ;;  %v26384_v49 = vld [vmem:[#allocation33_spill] sm:$0xff] }
 0x607   : > { %20793 = vmatprep.subr.bf16.mxu1 %v20792_v47  ;;  %20933 = vmatprep.subr.bf16.mxu0 %v25565_v53  ;;  %v11750_v39 = vld [vmem:[#allocation4 + $0x12f] sm:$0xff] }
 0x608   : > { %19448 = vmatmul.mubr.msk.f32.gmra.mrb[50].mxu1 %vm294_vm0, %v25216_v20  ;;  %19777 = vmatmul.mubr.msk.f32.gmra.mrb[56].mxu0 %vm294_vm0, %v25219_v51  ;;  %v15644_v20 = vld [vmem:[%s26144_s5 + $0x1a0] sm:$0xff]  ;;  %v15645_v51 = vld [vmem:[%s26144_s5 + $0x1a8] sm:$0xff] }
 0x609   : > { %19450 = vmatprep.mubr.msk.f32.mxu1 %vm294_vm0, %v25221_v25  ;;  %19779 = vmatprep.mubr.msk.f32.mxu0 %vm294_vm0, %v25230_v9  ;;  %v26369_v25 = vld [vmem:[#allocation14_spill] sm:$0xff] }
 0x60a   : > { %20795 = vmatpush3.bf16.msra.mxu1 %v20792_v47  ;;  %v26370_v9 = vld [vmem:[#allocation10_spill] sm:$0xff] }
 0x60b   : > { %20797 = vmatprep.subr.bf16.mxu1 %v20796_v33 }
 0x60c   : > { %19451 = vmatmul.mubr.msk.f32.gmra.mrb[52].mxu1 %vm294_vm0, %v25242_v3  ;;  %19780 = vmatmul.mubr.msk.f32.gmra.mrb[58].mxu0 %vm294_vm0, %v25245_v0  ;;  %v25733_v3 = vpack.c.bf16 %v15645_v51, %v15644_v20  ;;  %v26371_v0 = vld [vmem:[#allocation15_spill] sm:$0xff] }
 0x60d   : > { %19453 = vmatprep.mubr.msk.f32.mxu1 %vm294_vm0, %v25254_v5  ;;  %19782 = vmatprep.mubr.msk.f32.mxu0 %vm294_vm0, %v25256_v63  ;;  %v26372_v5 = vld [vmem:[#allocation11_spill] sm:$0xff]  ;;  %v15646_v63 = vld [vmem:[%s26144_s5 + $0x1b0] sm:$0xff] }
 0x60e   : > { %20799 = vmatpush3.bf16.msra.mxu1 %v20796_v33  ;;  %v26390_v20 = vld [vmem:[#allocation27_spill] sm:$0xff] }
 0x60f   : > { %20801 = vmatprep.subr.bf16.mxu1 %v20800_v55 }
 0x610   : > { %19454 = vmatmul.mubr.msk.f32.gmra.mrb[54].mxu1 %vm294_vm0, %v25262_v11  ;;  %19783 = vmatmul.mubr.msk.f32.gmra.mrb[60].mxu0 %vm294_vm0, %v25265_v31  ;;  %v15647_v11 = vld [vmem:[%s26144_s5 + $0x1b8] sm:$0xff] }
 0x611   : > { %19456 = vmatprep.mubr.msk.f32.mxu1 %vm294_vm0, %v25272_v43  ;;  %19785 = vmatprep.mubr.msk.f32.mxu0 %vm294_vm0, %v25669_v52  ;;  %v26373_v31 = vld [vmem:[#allocation13_spill] sm:$0xff]  ;;  %v26374_v43 = vld [vmem:[#allocation16_spill] sm:$0xff] }
 0x612   : > { %20803 = vmatpush3.bf16.msra.mxu1 %v20800_v55 }
 0x613   : > { %20805 = vmatprep.subr.bf16.mxu1 %v25663_v41 }
 0x614   : > { %19457 = vmatmul.mubr.msk.f32.gmra.mrb[56].mxu1 %vm294_vm0, %v25280_v46  ;;  %19786 = vmatmul.mubr.msk.f32.gmra.mrb[62].mxu0 %vm294_vm0, %v25675_v6  ;;  %v26375_v46 = vld [vmem:[#allocation17_spill] sm:$0xff] }
 0x615   : > { %19459 = vmatprep.mubr.msk.f32.mxu1 %vm294_vm0, %v25288_v34  ;;  %19804 = vmatprep.mubr.msk.f32.mxu0 %vm294_vm0, %v25290_v21  ;;  %v15665_v34 = vld [vmem:[%s26144_s5 + $0x1c8] sm:$0xff]  ;;  %v26376_v21 = vld [vmem:[#allocation18_spill] sm:$0xff] }
 0x618   : > { %19460 = vmatmul.mubr.msk.f32.gmra.mrb[58].mxu1 %vm294_vm0, %v25296_v10  ;;  %19805 = vmatmul.mubr.msk.f32.vlgmr.msra.gmra.mrb[48].mxu0 %vm294_vm0, %v25298_v38  ;;  %v26377_v10 = vld [vmem:[#allocation19_spill] sm:$0xff] }
 0x619   : > { %19462 = vmatprep.mubr.msk.f32.mxu1 %vm294_vm0, %v25306_v57  ;;  %19807 = vmatprep.mubr.msk.f32.mxu0 %vm294_vm0, %v25308_v24  ;;  %v26378_v57 = vld [vmem:[#allocation21_spill] sm:$0xff]  ;;  %v26379_v24 = vld [vmem:[#allocation20_spill] sm:$0xff] }
 0x61a   : > { %20935 = vmatpush3.bf16.msra.mxu0 %v25565_v53 }
 0x61b   : > { %20937 = vmatprep.subr.bf16.mxu0 %v20792_v47 }
 0x61c   : > { %19463 = vmatmul.mubr.msk.f32.gmra.mrb[60].mxu1 %vm294_vm0, %v25314_v62  ;;  %19808 = vmatmul.mubr.msk.f32.gmra.mrb[50].mxu0 %vm294_vm0, %v25316_v58  ;;  %v25774_v62 = vld [vmem:[#allocation4 + $0x208] sm:$0xff]  ;;  %v26380_v58 = vld [vmem:[#allocation22_spill] sm:$0xff] }
 0x61d   : > { %19465 = vmatprep.mubr.msk.f32.mxu1 %vm294_vm0, %v25274_v1  ;;  %19810 = vmatprep.mubr.msk.f32.mxu0 %vm294_vm0, %v25324_v28  ;;  %v25750_v1 = vpack.c.bf16 %v15647_v11, %v15646_v63  ;;  %v25780_v28 = vld [vmem:[#allocation4 + $0x210] sm:$0xff]  ;;  %v11753_v63 = vld [vmem:[#allocation4 + $0x147] sm:$0xff] }
 0x61e   : > { %20939 = vmatpush3.bf16.msra.mxu0 %v20792_v47  ;;  %v26386_v47 = vld [vmem:[#allocation24_spill] sm:$0xff] }
 0x61f   : > { %20941 = vmatprep.subr.bf16.mxu0 %v20796_v33  ;;  %v15670_v11 = vld [vmem:[%s26144_s5 + $0x1f0] sm:$0xff] }
 0x620   : > { %19466 = vmatmul.mubr.msk.f32.gmra.mrb[62].mxu1 %vm294_vm0, %v25282_v22  ;;  %19811 = vmatmul.mubr.msk.f32.gmra.mrb[52].mxu0 %vm294_vm0, %v25336_v30  ;;  %v15664_v22 = vld [vmem:[%s26144_s5 + $0x1c0] sm:$0xff]  ;;  %v26381_v30 = vld [vmem:[#allocation29_spill] sm:$0xff] }
 0x621   : > { %19484 = vmatprep.mubr.msk.f32.mxu1 %vm294_vm0, %v26365_v14  ;;  %19813 = vmatprep.mubr.msk.f32.mxu0 %vm294_vm0, %v26366_v54  ;;  %v25768_v38 = vpack.c.bf16 %v15665_v34, %v15664_v22  ;;  %v11754_v34 = vld [vmem:[#allocation4 + $0x14f] sm:$0xff] }
 0x622   : > { %20943 = vmatpush3.bf16.msra.mxu0 %v20796_v33 }
 0x623   : > { %20945 = vmatprep.subr.bf16.mxu0 %v20800_v55 }
 0x624   : > { %19485 = vmatmul.mubr.msk.f32.vlgmr.msra.gmra.mrb[48].mxu1 %vm294_vm0, %v26367_v45  ;;  %19814 = vmatmul.mubr.msk.f32.gmra.mrb[54].mxu0 %vm294_vm0, %v26368_v59  ;;  %v15669_v45 = vld [vmem:[%s26144_s5 + $0x1e8] sm:$0xff] }
 0x625   : > { %19487 = vmatprep.mubr.msk.f32.mxu1 %vm294_vm0, %v26369_v25  ;;  %19816 = vmatprep.mubr.msk.f32.mxu0 %vm294_vm0, %v26370_v9  ;;  %v11752_v9 = vld [vmem:[#allocation4 + $0x13f] sm:$0xff] }
 0x626   : > { %20947 = vmatpush3.bf16.msra.mxu0 %v20800_v55  ;;  %20807 = vmatpush3.bf16.msra.mxu1 %v25663_v41  ;;  %v26389_v55 = vld [vmem:[#allocation28_spill] sm:$0xff] }
 0x627   : > { %20809 = vmatprep.subr.bf16.mxu1 %v20808_v17  ;;  %20949 = vmatprep.subr.bf16.mxu0 %v25663_v41 }
 0x628   : > { %19488 = vmatmul.mubr.msk.f32.gmra.mrb[50].mxu1 %vm294_vm0, %v26371_v0  ;;  %19817 = vmatmul.mubr.msk.f32.gmra.mrb[56].mxu0 %vm294_vm0, %v26372_v5 }
 0x629   : > { %19490 = vmatprep.mubr.msk.f32.mxu1 %vm294_vm0, %v26373_v31  ;;  %19819 = vmatprep.mubr.msk.f32.mxu0 %vm294_vm0, %v26374_v43  ;;  %v15671_v31 = vld [vmem:[%s26144_s5 + $0x1f8] sm:$0xff] }
 0x62a   : > { %20811 = vmatpush3.bf16.msra.mxu1 %v20808_v17 }
 0x62b   : > { %20813 = vmatprep.subr.bf16.mxu1 %v25733_v3 }
 0x62c   : > { %19491 = vmatmul.mubr.msk.f32.gmra.mrb[52].mxu1 %vm294_vm0, %v25413_v8  ;;  %19820 = vmatmul.mubr.msk.f32.gmra.mrb[58].mxu0 %vm294_vm0, %v26375_v46  ;;  %v25795_v8 = vld [vmem:[%s26145_s6] ss:$0 sm:$0xff] }
 0x62d   : > { %19493 = vmatprep.mubr.msk.f32.mxu1 %vm294_vm0, %v26376_v21  ;;  %19822 = vmatprep.mubr.msk.f32.mxu0 %vm294_vm0, %v26377_v10  ;;  %v25869_v21 = vpack.c.bf16 %v15671_v31, %v15670_v11  ;;  %v13760_v11 = vld [vmem:[#allocation4 + $0x1b7] sm:$0xff] }
 0x62e   : > { %20815 = vmatpush3.bf16.msra.mxu1 %v25733_v3 }
 0x62f   : > { %20817 = vmatprep.subr.bf16.mxu1 %v25750_v1 }
 0x630   : > { %19494 = vmatmul.mubr.msk.f32.gmra.mrb[54].mxu1 %vm294_vm0, %v26378_v57  ;;  %19823 = vmatmul.mubr.msk.f32.gmra.mrb[60].mxu0 %vm294_vm0, %v26379_v24 }
 0x631   : > { %19496 = vmatprep.mubr.msk.f32.mxu1 %vm294_vm0, %v26380_v58  ;;  %19825 = vmatprep.mubr.msk.f32.mxu0 %vm294_vm0, %v25774_v62  ;;  %v15688_v58 = vld [vmem:[%s26144_s5 + $0x200] sm:$0xff] }
 0x632   : > { %20819 = vmatpush3.bf16.msra.mxu1 %v25750_v1 }
 0x633   : > { %20821 = vmatprep.subr.bf16.mxu1 %v25768_v38 }
 0x634   : > { %19497 = vmatmul.mubr.msk.f32.gmra.mrb[56].mxu1 %vm294_vm0, %v25448_v23  ;;  %19826 = vmatmul.mubr.msk.f32.gmra.mrb[62].mxu0 %vm294_vm0, %v25780_v28  ;;  %v26383_v23 = vld [vmem:[#allocation31_spill] sm:$0xff] }
 0x635   : > { %19499 = vmatprep.mubr.msk.f32.mxu1 %vm294_vm0, %v26381_v30  ;;  %19844 = vmatprep.mubr.msk.f32.mxu0 %vm294_vm0, %v26382_v42  ;;  %v15689_v30 = vld [vmem:[%s26144_s5 + $0x208] sm:$0xff] }
 0x637   : > { %v18886_v18 = vpop.f32.mrb[32].mxu1 }
 0x638   : > { %v8303_v35 = vpop.f32.mrb[33].mxu1  ;;  %19500 = vmatmul.mubr.msk.f32.gmra.mrb[58].mxu1 %vm294_vm0, %v25465_v19  ;;  %19845 = vmatmul.mubr.msk.f32.vlgmr.msra.gmra.mrb[48].mxu0 %vm294_vm0, %v26383_v23  ;;  %v26387_v19 = vld [vmem:[#allocation25_spill] sm:$0xff] }
 0x639   : > { %v21036_v12 = vadd.f32 %v25795_v8, %v8303_v35  ;;  %19502 = vmatprep.mubr.msk.f32.mxu1 %vm294_vm0, %v26384_v49  ;;  %19847 = vmatprep.mubr.msk.f32.mxu0 %vm294_vm0, %v26385_v32 }
 0x63a   : > { %20951 = vmatpush3.bf16.msra.mxu0 %v25663_v41 }
 0x63b   : > { %v15265_v53 = vmul.f32 -1.442695, %v21036_v12  ;;  %v18889_v56 = vpop.f32.mrb[34].mxu1  ;;  %20953 = vmatprep.subr.bf16.mxu0 %v20808_v17 }
 0x63c   : > { %v8312_v37 = vpop.f32.mrb[35].mxu1  ;;  %19503 = vmatmul.mubr.msk.f32.gmra.mrb[60].mxu1 %vm294_vm0, %v26386_v47  ;;  %19848 = vmatmul.mubr.msk.f32.gmra.mrb[50].mxu0 %vm294_vm0, %v26387_v19  ;;  %v25893_v19 = vld [vmem:[#allocation4 + $0x209] sm:$0xff] }
 0x63d   : > { %21971 = vpow2.f32 %v15265_v53  ;;  %v21037_v50 = vadd.f32 %v25795_v8, %v8312_v37  ;;  %19505 = vmatprep.mubr.msk.f32.mxu1 %vm294_vm0, %v26388_v29  ;;  %19850 = vmatprep.mubr.msk.f32.mxu0 %vm294_vm0, %v25492_v48  ;;  %v15667_v48 = vld [vmem:[%s26144_s5 + $0x1d8] sm:$0xff]  ;;  %v25888_v53 = vpack.c.bf16 %v15689_v30, %v15688_v58 }
 0x63e   : > { %20955 = vmatpush3.bf16.msra.mxu0 %v20808_v17  ;;  %v25833_v14 = vpack.c.bf16 %v15667_v48, %v15666_v15  ;;  %v11751_v17 = vld [vmem:[#allocation4 + $0x137] sm:$0xff] }
 0x63f   : > { %v15266_v33 = vmul.f32 -1.442695, %v21037_v50  ;;  %v18892_v44 = vpop.f32.mrb[36].mxu1  ;;  %20957 = vmatprep.subr.bf16.mxu0 %v25733_v3 }
 0x640   : > { %v8321_v16 = vpop.f32.mrb[37].mxu1  ;;  %19506 = vmatmul.mubr.msk.f32.gmra.mrb[62].mxu1 %vm294_vm0, %v26389_v55  ;;  %19851 = vmatmul.mubr.msk.f32.gmra.mrb[52].mxu0 %vm294_vm0, %v25505_v60 }
 0x641   : > { %21973 = vpow2.f32 %v15266_v33  ;;  %v21038_v41 = vadd.f32 %v25795_v8, %v8321_v16  ;;  %19524 = vmatprep.mubr.msk.f32.mxu1 %vm294_vm0, %v11749_v4  ;;  %19853 = vmatprep.mubr.msk.f32.mxu0 %vm294_vm0, %v25512_v26  ;;  %v15668_v26 = vld [vmem:[%s26144_s5 + $0x1e0] sm:$0xff]  ;;  %v25900_v33 = vld [vmem:[#allocation4 + $0x211] sm:$0xff] }
 0x642   : > { %20959 = vmatpush3.bf16.msra.mxu0 %v25733_v3  ;;  %v25852_v3 = vpack.c.bf16 %v15669_v45, %v15668_v26  ;;  %v11760_v45 = vld [vmem:[#allocation4 + $0x17f] sm:$0xff] }
 0x643   : > { %v15267_v60 = vmul.f32 -1.442695, %v21038_v41  ;;  %v18895_v2 = vpop.f32.mrb[38].mxu1  ;;  %20961 = vmatprep.subr.bf16.mxu0 %v25750_v1 }
 0x644   : > { %v8330_v54 = vpop.f32.mrb[39].mxu1  ;;  %19525 = vmatmul.mubr.msk.f32.vlgmr.msra.gmra.mrb[48].mxu1 %vm294_vm0, %v11750_v39  ;;  %19854 = vmatmul.mubr.msk.f32.gmra.mrb[54].mxu0 %vm294_vm0, %v25526_v61  ;;  %v11759_v39 = vld [vmem:[#allocation4 + $0x177] sm:$0xff] }
 0x645   : > { %21975 = vpow2.f32 %v15267_v60  ;;  %v21039_v59 = vadd.f32 %v25795_v8, %v8330_v54  ;;  %19527 = vmatprep.mubr.msk.f32.mxu1 %vm294_vm0, %v11751_v17  ;;  %19856 = vmatprep.mubr.msk.f32.mxu0 %vm294_vm0, %v26390_v20  ;;  %v13758_v54 = vld [vmem:[#allocation4 + $0x1a7] sm:$0xff] }
 0x646   : > { %20963 = vmatpush3.bf16.msra.mxu0 %v25750_v1  ;;  %20823 = vmatpush3.bf16.msra.mxu1 %v25768_v38 }
 0x647   : > { %v21972_v61 = vpop.eup %21971  ;;  %v15268_v51 = vmul.f32 -1.442695, %v21039_v59  ;;  %v18898_v25 = vpop.f32.mrb[40].mxu1  ;;  %20825 = vmatprep.subr.bf16.mxu1 %v25833_v14  ;;  %20965 = vmatprep.subr.bf16.mxu0 %v25768_v38 }
 0x648   : > { %v8406_v0 = vadd.f32 1.0, %v21972_v61  ;;  %v8339_v5 = vpop.f32.mrb[41].mxu1  ;;  %19528 = vmatmul.mubr.msk.f32.gmra.mrb[50].mxu1 %vm294_vm0, %v11752_v9  ;;  %19857 = vmatmul.mubr.msk.f32.gmra.mrb[56].mxu0 %vm294_vm0, %v25545_v36  ;;  %v13759_v25 = vld [vmem:[#allocation4 + $0x1af] sm:$0xff] }
 0x649   : > { %21977 = vpow2.f32 %v15268_v51  ;;  %v21040_v43 = vadd.f32 %v25795_v8, %v8339_v5  ;;  %19530 = vmatprep.mubr.msk.f32.mxu1 %vm294_vm0, %v11753_v63  ;;  %19859 = vmatprep.mubr.msk.f32.mxu0 %vm294_vm0, %v25551_v13  ;;  %v11755_v13 = vld [vmem:[#allocation4 + $0x157] sm:$0xff]  ;;  %v11761_v63 = vld [vmem:[#allocation4 + $0x187] sm:$0xff] }
 0x64a   : > { %21979 = vrcp.f32 %v8406_v0  ;;  %20827 = vmatpush3.bf16.msra.mxu1 %v25833_v14 }
 0x64b   : > { %v21974_v36 = vpop.eup %21973  ;;  %v15269_v1 = vmul.f32 -1.442695, %v21040_v43  ;;  %v18901_v46 = vpop.f32.mrb[42].mxu1  ;;  %20829 = vmatprep.subr.bf16.mxu1 %v25852_v3 }
 0x64c   : > { %v19246_v22 = vpop.f32.mrb[32].mxu0  ;;  %v8407_v10 = vadd.f32 1.0, %v21974_v36  ;;  %v8348_v57 = vpop.f32.mrb[43].mxu1  ;;  %19531 = vmatmul.mubr.msk.f32.gmra.mrb[52].mxu1 %vm294_vm0, %v11754_v34  ;;  %19860 = vmatmul.mubr.msk.f32.gmra.mrb[58].mxu0 %vm294_vm0, %v25563_v40  ;;  %v11756_v40 = vld [vmem:[#allocation4 + $0x15f] sm:$0xff]  ;;  %v11762_v46 = vld [vmem:[#allocation4 + $0x18f] sm:$0xff] }
 0x64d   : > { %v10312_v24 = vpop.f32.mrb[33].mxu0  ;;  %21981 = vpow2.f32 %v15269_v1  ;;  %v21041_v42 = vadd.f32 %v25795_v8, %v8348_v57  ;;  %19533 = vmatprep.mubr.msk.f32.mxu1 %vm294_vm0, %v11755_v13  ;;  %19862 = vmatprep.mubr.msk.f32.mxu0 %vm294_vm0, %v25571_v7  ;;  %v11757_v7 = vld [vmem:[#allocation4 + $0x167] sm:$0xff]  ;;  %v13761_v22 = vld [vmem:[#allocation4 + $0x1bf] sm:$0xff] }
 0x64e   : > { %v21044_v18 = vadd.f32 %v25795_v8, %v10312_v24  ;;  %21983 = vrcp.f32 %v8407_v10  ;;  %20831 = vmatpush3.bf16.msra.mxu1 %v25852_v3  ;;  %v11763_v24 = vld [vmem:[#allocation4 + $0x197] sm:$0xff]  ;;  %v13762_v13 = vld [vmem:[#allocation4 + $0x1c7] sm:$0xff] }
 0x64f   : > { %v21976_v35 = vpop.eup %21975  ;;  %v15270_v23 = vmul.f32 -1.442695, %v21041_v42  ;;  %v18904_v49 = vpop.f32.mrb[44].mxu1  ;;  %20833 = vmatprep.subr.bf16.mxu1 %v25869_v21 }
 0x650   : > { %v15488_v12 = vmul.f32 -1.442695, %v21044_v18  ;;  %v19249_v32 = vpop.f32.mrb[34].mxu0  ;;  %v8408_v56 = vadd.f32 1.0, %v21976_v35  ;;  %v8357_v37 = vpop.f32.mrb[45].mxu1  ;;  %19534 = vmatmul.mubr.msk.f32.gmra.mrb[54].mxu1 %vm294_vm0, %v11756_v40  ;;  %19863 = vmatmul.mubr.msk.f32.gmra.mrb[60].mxu0 %vm294_vm0, %v25577_v27  ;;  %v11758_v27 = vld [vmem:[#allocation4 + $0x16f] sm:$0xff] }
 0x651   : > { %v10321_v47 = vpop.f32.mrb[35].mxu0  ;;  %21985 = vpow2.f32 %v15270_v23  ;;  %v21042_v50 = vadd.f32 %v25795_v8, %v8357_v37  ;;  %19536 = vmatprep.mubr.msk.f32.mxu1 %vm294_vm0, %v11757_v7  ;;  %19865 = vmatprep.mubr.msk.f32.mxu0 %vm294_vm0, %v25893_v19  ;;  %v11764_v35 = vld [vmem:[#allocation4 + $0x19f] sm:$0xff]  ;;  %v13763_v23 = vld [vmem:[#allocation4 + $0x1cf] sm:$0xff] }
 0x652   : > { %v21045_v29 = vadd.f32 %v25795_v8, %v10321_v47  ;;  %21987 = vrcp.f32 %v8408_v56  ;;  %20835 = vmatpush3.bf16.msra.mxu1 %v25869_v21  ;;  %v11966_v37 = vld [vmem:[#allocation4 + $0x128] sm:$0xff]  ;;  %v15691_v47 = vld [vmem:[%s26144_s5 + $0x218] sm:$0xff] }
 0x653   : > { %v21978_v44 = vpop.eup %21977  ;;  %21989 = vpow2.f32 %v15488_v12  ;;  %v15271_v16 = vmul.f32 -1.442695, %v21042_v50  ;;  %v18907_v4 = vpop.f32.mrb[46].mxu1  ;;  %20837 = vmatprep.subr.bf16.mxu1 %v25888_v53  ;;  %v13764_v12 = vld [vmem:[#allocation4 + $0x1d7] sm:$0xff] }
 0x654   : > { %v15489_v55 = vmul.f32 -1.442695, %v21045_v29  ;;  %v19252_v15 = vpop.f32.mrb[36].mxu0  ;;  %v21980_v48 = vpop.eup %21979  ;;  %v8409_v41 = vadd.f32 1.0, %v21978_v44  ;;  %19537 = vmatmul.mubr.msk.f32.gmra.mrb[56].mxu1 %vm294_vm0, %v11758_v27  ;;  %19866 = vmatmul.mubr.msk.f32.gmra.mrb[62].mxu0 %vm294_vm0, %v25900_v33  ;;  %v11967_v29 = vld [vmem:[#allocation4 + $0x130] sm:$0xff]  ;;  %v13765_v4 = vld [vmem:[#allocation4 + $0x1df] sm:$0xff] }
 0x655   : > { %v8366_v60 = vpop.f32.mrb[47].mxu1  ;;  %v10330_v2 = vpop.f32.mrb[37].mxu0  ;;  %8431 = vst.msk [vmem:[%s25905_s13] sm:$0xff] %vm8430_vm1, %v21980_v48  ;;  %21991 = vpow2.f32 %v15271_v16  ;;  %19539 = vmatprep.mubr.msk.f32.mxu1 %vm294_vm0, %v11759_v39  ;;  %19884 = vmatprep.mubr.msk.f32.mxu0 %vm294_vm0, %v13758_v54  ;;  %v11968_v15 = vld [vmem:[#allocation4 + $0x138] sm:$0xff]  ;;  %v13766_v39 = vld [vmem:[#allocation4 + $0x1e7] sm:$0xff] }
 0x656   : > { %v21043_v17 = vadd.f32 %v25795_v8, %v8366_v60  ;;  %v21046_v26 = vadd.f32 %v25795_v8, %v10330_v2  ;;  %21993 = vrcp.f32 %v8409_v41  ;;  %v15693_v54 = vld [vmem:[%s26144_s5 + $0x228] sm:$0xff] }
 0x657   : > { %v21982_v59 = vpop.eup %21981  ;;  %21995 = vpow2.f32 %v15489_v55  ;;  %v19255_v51 = vpop.f32.mrb[38].mxu0 }
 0x658   : > { %v15272_v20 = vmul.f32 -1.442695, %v21043_v17  ;;  %v15490_v61 = vmul.f32 -1.442695, %v21046_v26  ;;  %v21984_v9 = vpop.eup %21983  ;;  %v8410_v0 = vadd.f32 1.0, %v21982_v59  ;;  %v10339_v5 = vpop.f32.mrb[39].mxu0  ;;  %19540 = vmatmul.mubr.msk.f32.gmra.mrb[58].mxu1 %vm294_vm0, %v11760_v45  ;;  %19885 = vmatmul.mubr.msk.f32.vlgmr.msra.gmra.mrb[48].mxu0 %vm294_vm0, %v13759_v25 }
 0x659   : > { %15273 = vst.msk [vmem:[%s25905_s13 + $0x8] sm:$0xff] %vm8430_vm1, %v21984_v9  ;;  %v21047_v31 = vadd.f32 %v25795_v8, %v10339_v5  ;;  %19542 = vmatprep.mubr.msk.f32.mxu1 %vm294_vm0, %v11761_v63  ;;  %19887 = vmatprep.mubr.msk.f32.mxu0 %vm294_vm0, %v13760_v11  ;;  %v11969_v45 = vld [vmem:[#allocation4 + $0x140] sm:$0xff]  ;;  %v13767_v25 = vld [vmem:[#allocation4 + $0x1ef] sm:$0xff]  ;;  %v13768_v9 = vld [vmem:[#allocation4 + $0x1f7] sm:$0xff] }
 0x65a   : > { %21997 = vpow2.f32 %v15272_v20  ;;  %20967 = vmatpush3.bf16.msra.mxu0 %v25768_v38 }
 0x65b   : > { %21999 = vrcp.f32 %v8410_v0  ;;  %v21986_v43 = vpop.eup %21985  ;;  %v15491_v36 = vmul.f32 -1.442695, %v21047_v31  ;;  %v19258_v1 = vpop.f32.mrb[40].mxu0  ;;  %20969 = vmatprep.subr.bf16.mxu0 %v25833_v14  ;;  %v15694_v31 = vld [vmem:[%s26144_s5 + $0x230] sm:$0xff] }
 0x65c   : > { %22001 = vpow2.f32 %v15490_v61  ;;  %v21988_v34 = vpop.eup %21987  ;;  %v8411_v10 = vadd.f32 1.0, %v21986_v43  ;;  %v10348_v57 = vpop.f32.mrb[41].mxu0  ;;  %19543 = vmatmul.mubr.msk.f32.gmra.mrb[60].mxu1 %vm294_vm0, %v11762_v46  ;;  %19888 = vmatmul.mubr.msk.f32.gmra.mrb[50].mxu0 %vm294_vm0, %v13761_v22  ;;  %v15695_v43 = vld [vmem:[%s26144_s5 + $0x238] sm:$0xff]  ;;  %v11971_v1 = vld [vmem:[#allocation4 + $0x150] sm:$0xff] }
 0x65d   : > { %v21990_v58 = vpop.eup %21989  ;;  %15274 = vst.msk [vmem:[%s25905_s13 + $0x10] sm:$0xff] %vm8430_vm1, %v21988_v34  ;;  %22003 = vpow2.f32 %v15491_v36  ;;  %v21048_v38 = vadd.f32 %v25795_v8, %v10348_v57  ;;  %19545 = vmatprep.mubr.msk.f32.mxu1 %vm294_vm0, %v11763_v24  ;;  %19890 = vmatprep.mubr.msk.f32.mxu0 %vm294_vm0, %v13762_v13  ;;  %v25989_v57 = vpack.c.bf16 %v15695_v43, %v15694_v31  ;;  %v13990_v31 = vld [vmem:[#allocation4 + $0x220] sm:$0xff]  ;;  %v12192_v43 = vld [vmem:[#allocation4 + $0x171] sm:$0xff] }
 0x65e   : > { %22005 = vrcp.f32 %v8411_v10  ;;  %v10415_v30 = vadd.f32 1.0, %v21990_v58  ;;  %20971 = vmatpush3.bf16.msra.mxu0 %v25833_v14  ;;  %v15690_v14 = vld [vmem:[%s26144_s5 + $0x210] sm:$0xff]  ;;  %v13769_v10 = vld [vmem:[#allocation4 + $0x1ff] sm:$0xff] }
 0x65f   : > { %v21992_v42 = vpop.eup %21991  ;;  %v15492_v18 = vmul.f32 -1.442695, %v21048_v38  ;;  %v19261_v40 = vpop.f32.mrb[42].mxu0  ;;  %20973 = vmatprep.subr.bf16.mxu0 %v25852_v3  ;;  %v25951_v48 = vpack.c.bf16 %v15691_v47, %v15690_v14  ;;  %v11972_v58 = vld [vmem:[#allocation4 + $0x158] sm:$0xff]  ;;  %v11973_v38 = vld [vmem:[#allocation4 + $0x160] sm:$0xff]  ;;  %v13975_v14 = vld [vmem:[#allocation4 + $0x1a8] sm:$0xff] }
 0x660   : > { %v21994_v49 = vpop.eup %21993  ;;  %22007 = vrcp.f32 %v10415_v30  ;;  %v8412_v32 = vadd.f32 1.0, %v21992_v42  ;;  %v10357_v56 = vpop.f32.mrb[43].mxu0  ;;  %19546 = vmatmul.mubr.msk.f32.gmra.mrb[62].mxu1 %vm294_vm0, %v11764_v35  ;;  %19891 = vmatmul.mubr.msk.f32.gmra.mrb[52].mxu0 %vm294_vm0, %v13763_v23  ;;  %v13772_v42 = vld [vmem:[#allocation4 + $0x217] sm:$0xff]  ;;  %v11977_v47 = vld [vmem:[#allocation4 + $0x180] sm:$0xff] }
 0x661   : > { %v21996_v7 = vpop.eup %21995  ;;  %15275 = vst.msk [vmem:[%s25905_s13 + $0x18] sm:$0xff] %vm8430_vm1, %v21994_v49  ;;  %22009 = vpow2.f32 %v15492_v18  ;;  %v21049_v50 = vadd.f32 %v25795_v8, %v10357_v56  ;;  %19564 = vmatprep.mubr.msk.f32.mxu1 %vm294_vm0, %v11966_v37  ;;  %19893 = vmatprep.mubr.msk.f32.mxu0 %vm294_vm0, %v13764_v12  ;;  %v11975_v23 = vld [vmem:[#allocation4 + $0x170] sm:$0xff]  ;;  %v13773_v12 = vld [vmem:[#allocation4 + $0x21f] sm:$0xff] }
 0x662   : > { %22011 = vrcp.f32 %v8412_v32  ;;  %v10416_v27 = vadd.f32 1.0, %v21996_v7  ;;  %20975 = vmatpush3.bf16.msra.mxu0 %v25852_v3  ;;  %v15692_v3 = vld [vmem:[%s26144_s5 + $0x220] sm:$0xff]  ;;  %v13976_v7 = vld [vmem:[#allocation4 + $0x1b0] sm:$0xff] }
 0x663   : > { %v15493_v16 = vmul.f32 -1.442695, %v21049_v50  ;;  %v19264_v55 = vpop.f32.mrb[44].mxu0  ;;  %20977 = vmatprep.subr.bf16.mxu0 %v25869_v21  ;;  %v25970_v0 = vpack.c.bf16 %v15693_v54, %v15692_v3  ;;  %v12183_v3 = vld [vmem:[#allocation4 + $0x129] sm:$0xff]  ;;  %v13981_v54 = vld [vmem:[#allocation4 + $0x1d8] sm:$0xff] }
 0x664   : > { %v21998_v44 = vpop.eup %21997  ;;  %22013 = vrcp.f32 %v10416_v27  ;;  %v10366_v2 = vpop.f32.mrb[45].mxu0  ;;  %19565 = vmatmul.mubr.msk.f32.vlgmr.msra.gmra.mrb[48].mxu1 %vm294_vm0, %v11967_v29  ;;  %19894 = vmatmul.mubr.msk.f32.gmra.mrb[54].mxu0 %vm294_vm0, %v13765_v4  ;;  %v11979_v55 = vld [vmem:[#allocation4 + $0x190] sm:$0xff]  ;;  %v13978_v4 = vld [vmem:[#allocation4 + $0x1c0] sm:$0xff] }
 0x665   : > { %v22000_v41 = vpop.eup %21999  ;;  %v8413_v60 = vadd.f32 1.0, %v21998_v44  ;;  %22015 = vpow2.f32 %v15493_v16  ;;  %v21050_v26 = vadd.f32 %v25795_v8, %v10366_v2  ;;  %19567 = vmatprep.mubr.msk.f32.mxu1 %vm294_vm0, %v11968_v15  ;;  %19896 = vmatprep.mubr.msk.f32.mxu0 %vm294_vm0, %v13766_v39  ;;  %v11978_v44 = vld [vmem:[#allocation4 + $0x188] sm:$0xff]  ;;  %v13977_v16 = vld [vmem:[#allocation4 + $0x1b8] sm:$0xff]  ;;  %v11981_v2 = vld [vmem:[#allocation4 + $0x1a0] sm:$0xff] }
 0x666   : > { %v22002_v17 = vpop.eup %22001  ;;  %15276 = vst.msk [vmem:[%s25905_s13 + $0x20] sm:$0xff] %vm8430_vm1, %v22000_v41  ;;  %20979 = vmatpush3.bf16.msra.mxu0 %v25869_v21  ;;  %20839 = vmatpush3.bf16.msra.mxu1 %v25888_v53  ;;  %v11970_v21 = vld [vmem:[#allocation4 + $0x148] sm:$0xff]  ;;  %v11980_v41 = vld [vmem:[#allocation4 + $0x198] sm:$0xff]  ;;  %v13980_v39 = vld [vmem:[#allocation4 + $0x1d0] sm:$0xff] }
 0x667   : > { %22017 = vrcp.f32 %v8413_v60  ;;  %v10417_v59 = vadd.f32 1.0, %v22002_v17  ;;  %v22004_v20 = vpop.eup %22003  ;;  %v15494_v61 = vmul.f32 -1.442695, %v21050_v26  ;;  %v19267_v51 = vpop.f32.mrb[46].mxu0  ;;  %20841 = vmatprep.subr.bf16.mxu1 %v25951_v48  ;;  %20981 = vmatprep.subr.bf16.mxu0 %v25888_v53  ;;  %v13979_v60 = vld [vmem:[#allocation4 + $0x1c8] sm:$0xff]  ;;  %v13982_v17 = vld [vmem:[#allocation4 + $0x1e0] sm:$0xff] }
 0x668   : > { %v22006_v5 = vpop.eup %22005  ;;  %v10418_v63 = vadd.f32 1.0, %v22004_v20  ;;  %v10375_v11 = vpop.f32.mrb[47].mxu0  ;;  %19568 = vmatmul.mubr.msk.f32.gmra.mrb[50].mxu1 %vm294_vm0, %v11969_v45  ;;  %19897 = vmatmul.mubr.msk.f32.gmra.mrb[56].mxu0 %vm294_vm0, %v13767_v25  ;;  %v12185_v45 = vld [vmem:[#allocation4 + $0x139] sm:$0xff]  ;;  %v13984_v20 = vld [vmem:[#allocation4 + $0x1f0] sm:$0xff] }
 0x669   : > { %22019 = vrcp.f32 %v10417_v59  ;;  %15277 = vst.msk [vmem:[%s25905_s13 + $0x28] sm:$0xff] %vm8430_vm1, %v22006_v5  ;;  %v21051_v36 = vadd.f32 %v25795_v8, %v10375_v11  ;;  %19570 = vmatprep.mubr.msk.f32.mxu1 %vm294_vm0, %v11970_v21  ;;  %19899 = vmatprep.mubr.msk.f32.mxu0 %vm294_vm0, %v13768_v9  ;;  %v13983_v59 = vld [vmem:[#allocation4 + $0x1e8] sm:$0xff]  ;;  %v13985_v25 = vld [vmem:[#allocation4 + $0x1f8] sm:$0xff]  ;;  %v13986_v9 = vld [vmem:[#allocation4 + $0x200] sm:$0xff] }
 0x66a   : > { %22021 = vpow2.f32 %v15494_v61  ;;  %v22008_v46 = vpop.eup %22007  ;;  %20843 = vmatpush3.bf16.msra.mxu1 %v25951_v48  ;;  %v12186_v61 = vld [vmem:[#allocation4 + $0x141] sm:$0xff]  ;;  %v12187_v51 = vld [vmem:[#allocation4 + $0x149] sm:$0xff]  ;;  %v12189_v5 = vld [vmem:[#allocation4 + $0x159] sm:$0xff] }
 0x66b   : > { %22023 = vrcp.f32 %v10418_v63  ;;  %v22010_v22 = vpop.eup %22009  ;;  %15496 = vst.msk [vmem:[%s25905_s13 + $0x40] sm:$0xff] %vm8430_vm1, %v22008_v46  ;;  %v15495_v34 = vmul.f32 -1.442695, %v21051_v36  ;;  %20845 = vmatprep.subr.bf16.mxu1 %v25970_v0  ;;  %v13989_v63 = vld [vmem:[#allocation4 + $0x218] sm:$0xff]  ;;  %v12190_v11 = vld [vmem:[#allocation4 + $0x161] sm:$0xff]  ;;  %v12191_v21 = vld [vmem:[#allocation4 + $0x169] sm:$0xff] }
 0x66c   : > { %v22012_v24 = vpop.eup %22011  ;;  %v10419_v13 = vadd.f32 1.0, %v22010_v22  ;;  %19571 = vmatmul.mubr.msk.f32.gmra.mrb[52].mxu1 %vm294_vm0, %v11971_v1  ;;  %19900 = vmatmul.mubr.msk.f32.gmra.mrb[58].mxu0 %vm294_vm0, %v13769_v10  ;;  %v12193_v36 = vld [vmem:[#allocation4 + $0x179] sm:$0xff]  ;;  %v12194_v1 = vld [vmem:[#allocation4 + $0x181] sm:$0xff]  ;;  %v14193_v46 = vld [vmem:[#allocation4 + $0x1b1] sm:$0xff] }
 0x66d   : > { %15278 = vst.msk [vmem:[%s25905_s13 + $0x30] sm:$0xff] %vm8430_vm1, %v22012_v24  ;;  %22025 = vpow2.f32 %v15495_v34  ;;  %19573 = vmatprep.mubr.msk.f32.mxu1 %vm294_vm0, %v11972_v58  ;;  %19902 = vmatprep.mubr.msk.f32.mxu0 %vm294_vm0, %v25669_v52  ;;  %v11974_v52 = vld [vmem:[#allocation4 + $0x168] sm:$0xff]  ;;  %v14194_v22 = vld [vmem:[#allocation4 + $0x1b9] sm:$0xff]  ;;  %v12196_v34 = vld [vmem:[#allocation4 + $0x191] sm:$0xff] }
 0x66e   : > { %v22014_v30 = vpop.eup %22013  ;;  %22027 = vrcp.f32 %v10419_v13  ;;  %20847 = vmatpush3.bf16.msra.mxu1 %v25970_v0  ;;  %v14195_v10 = vld [vmem:[#allocation4 + $0x1c1] sm:$0xff]  ;;  %v14196_v24 = vld [vmem:[#allocation4 + $0x1c9] sm:$0xff]  ;;  %v14197_v58 = vld [vmem:[#allocation4 + $0x1d1] sm:$0xff] }
 0x66f   : > { %v22016_v18 = vpop.eup %22015  ;;  %15497 = vst.msk [vmem:[%s25905_s13 + $0x48] sm:$0xff] %vm8430_vm1, %v22014_v30  ;;  %20849 = vmatprep.subr.bf16.mxu1 %v25989_v57  ;;  %v12198_v13 = vld [vmem:[#allocation4 + $0x1a1] sm:$0xff] }
 0x670   : > { %v10420_v35 = vadd.f32 1.0, %v22016_v18  ;;  %19574 = vmatmul.mubr.msk.f32.gmra.mrb[54].mxu1 %vm294_vm0, %v11973_v38  ;;  %19903 = vmatmul.mubr.msk.f32.gmra.mrb[60].mxu0 %vm294_vm0, %v25675_v6  ;;  %v11976_v6 = vld [vmem:[#allocation4 + $0x178] sm:$0xff]  ;;  %v14199_v30 = vld [vmem:[#allocation4 + $0x1e1] sm:$0xff] }
 0x671   : > { %v22018_v40 = vpop.eup %22017  ;;  %19576 = vmatprep.mubr.msk.f32.mxu1 %vm294_vm0, %v11974_v52  ;;  %19905 = vmatprep.mubr.msk.f32.mxu0 %vm294_vm0, %v13772_v42  ;;  %v14198_v38 = vld [vmem:[#allocation4 + $0x1d9] sm:$0xff]  ;;  %v14200_v42 = vld [vmem:[#allocation4 + $0x1e9] sm:$0xff]  ;;  %v14201_v18 = vld [vmem:[#allocation4 + $0x1f1] sm:$0xff] }
 0x672   : > { %15279 = vst.msk [vmem:[%s25905_s13 + $0x38] sm:$0xff] %vm8430_vm1, %v22018_v40  ;;  %22029 = vrcp.f32 %v10420_v35  ;;  %20851 = vmatpush3.bf16.msra.mxu1 %v25989_v57  ;;  %v14202_v40 = vld [vmem:[#allocation4 + $0x1f9] sm:$0xff]  ;;  %v14203_v35 = vld [vmem:[#allocation4 + $0x201] sm:$0xff] }
 0x673   : > { %v22020_v49 = vpop.eup %22019  ;;  %v14206_v52 = vld [vmem:[#allocation4 + $0x219] sm:$0xff] }
 0x674   : > { %v22022_v32 = vpop.eup %22021  ;;  %15498 = vst.msk [vmem:[%s25905_s13 + $0x50] sm:$0xff] %vm8430_vm1, %v22020_v49  ;;  %19577 = vmatmul.mubr.msk.f32.gmra.mrb[56].mxu1 %vm294_vm0, %v11975_v23  ;;  %19906 = vmatmul.mubr.msk.f32.gmra.mrb[62].mxu0 %vm294_vm0, %v13773_v12  ;;  %v14207_v23 = vld [vmem:[#allocation4 + $0x221] sm:$0xff] }
 0x675   : > { %v22024_v56 = vpop.eup %22023  ;;  %v10421_v37 = vadd.f32 1.0, %v22022_v32  ;;  %19579 = vmatprep.mubr.msk.f32.mxu1 %vm294_vm0, %v11976_v6  ;;  %19924 = vmatprep.mubr.msk.f32.mxu0 %vm294_vm0, %v13975_v14 }
 0x676   : > { %15499 = vst.msk [vmem:[%s25905_s13 + $0x58] sm:$0xff] %vm8430_vm1, %v22024_v56 }
 0x677   : > { %22031 = vrcp.f32 %v10421_v37  ;;  %v22026_v50 = vpop.eup %22025 }
 0x678   : > { %v22028_v29 = vpop.eup %22027  ;;  %v10422_v27 = vadd.f32 1.0, %v22026_v50  ;;  %19580 = vmatmul.mubr.msk.f32.gmra.mrb[58].mxu1 %vm294_vm0, %v11977_v47  ;;  %19925 = vmatmul.mubr.msk.f32.vlgmr.msra.gmra.mrb[48].mxu0 %vm294_vm0, %v13976_v7 }
 0x679   : > { %15500 = vst.msk [vmem:[%s25905_s13 + $0x60] sm:$0xff] %vm8430_vm1, %v22028_v29  ;;  %19582 = vmatprep.mubr.msk.f32.mxu1 %vm294_vm0, %v11978_v44  ;;  %19927 = vmatprep.mubr.msk.f32.mxu0 %vm294_vm0, %v13977_v16 }
 0x67a   : > { %22033 = vrcp.f32 %v10422_v27  ;;  %20983 = vmatpush3.bf16.msra.mxu0 %v25888_v53 }
 0x67b   : > { %20985 = vmatprep.subr.bf16.mxu0 %v25951_v48 }
 0x67c   : > { %v22030_v15 = vpop.eup %22029  ;;  %19583 = vmatmul.mubr.msk.f32.gmra.mrb[60].mxu1 %vm294_vm0, %v11979_v55  ;;  %19928 = vmatmul.mubr.msk.f32.gmra.mrb[50].mxu0 %vm294_vm0, %v13978_v4 }
 0x67d   : > { %15501 = vst.msk [vmem:[%s25905_s13 + $0x68] sm:$0xff] %vm8430_vm1, %v22030_v15  ;;  %19585 = vmatprep.mubr.msk.f32.mxu1 %vm294_vm0, %v11980_v41  ;;  %19930 = vmatprep.mubr.msk.f32.mxu0 %vm294_vm0, %v13979_v60 }
 0x67e   : > { %20987 = vmatpush3.bf16.msra.mxu0 %v25951_v48  ;;  %v12184_v48 = vld [vmem:[#allocation4 + $0x131] sm:$0xff] }
 0x67f   : > { %20989 = vmatprep.subr.bf16.mxu0 %v25970_v0 }
 0x680   : > { %19586 = vmatmul.mubr.msk.f32.gmra.mrb[62].mxu1 %vm294_vm0, %v11981_v2  ;;  %19931 = vmatmul.mubr.msk.f32.gmra.mrb[52].mxu0 %vm294_vm0, %v13980_v39 }
 0x681   : > { %v22032_v53 = vpop.eup %22031  ;;  %19604 = vmatprep.mubr.msk.f32.mxu1 %vm294_vm0, %v12183_v3  ;;  %19933 = vmatprep.mubr.msk.f32.mxu0 %vm294_vm0, %v13981_v54 }
 0x682   : > { %15502 = vst.msk [vmem:[%s25905_s13 + $0x70] sm:$0xff] %vm8430_vm1, %v22032_v53  ;;  %20991 = vmatpush3.bf16.msra.mxu0 %v25970_v0  ;;  %v12188_v0 = vld [vmem:[#allocation4 + $0x151] sm:$0xff] }
 0x683   : > { %20993 = vmatprep.subr.bf16.mxu0 %v25989_v57 }
 0x684   : > { %v22034_v26 = vpop.eup %22033  ;;  %19605 = vmatmul.mubr.msk.f32.vlgmr.msra.gmra.mrb[48].mxu1 %vm294_vm0, %v12184_v48  ;;  %19934 = vmatmul.mubr.msk.f32.gmra.mrb[54].mxu0 %vm294_vm0, %v13982_v17 }
 0x685   : > { %15503 = vst.msk [vmem:[%s25905_s13 + $0x78] sm:$0xff] %vm8430_vm1, %v22034_v26  ;;  %19607 = vmatprep.mubr.msk.f32.mxu1 %vm294_vm0, %v12185_v45  ;;  %19936 = vmatprep.mubr.msk.f32.mxu0 %vm294_vm0, %v13983_v59 }
 0x686   : > { %20995 = vmatpush3.bf16.msra.mxu0 %v25989_v57  ;;  %v12197_v57 = vld [vmem:[#allocation4 + $0x199] sm:$0xff] }
 0x688   : > { %19608 = vmatmul.mubr.msk.f32.gmra.mrb[50].mxu1 %vm294_vm0, %v12186_v61  ;;  %19937 = vmatmul.mubr.msk.f32.gmra.mrb[56].mxu0 %vm294_vm0, %v13984_v20 }
 0x689   : > { %19610 = vmatprep.mubr.msk.f32.mxu1 %vm294_vm0, %v12187_v51  ;;  %19939 = vmatprep.mubr.msk.f32.mxu0 %vm294_vm0, %v13985_v25 }
 0x68c   : > { %19611 = vmatmul.mubr.msk.f32.gmra.mrb[52].mxu1 %vm294_vm0, %v12188_v0  ;;  %19940 = vmatmul.mubr.msk.f32.gmra.mrb[58].mxu0 %vm294_vm0, %v13986_v9 }
 0x68d   : > { %19613 = vmatprep.mubr.msk.f32.mxu1 %vm294_vm0, %v12189_v5  ;;  %19942 = vmatprep.mubr.msk.f32.mxu0 %vm294_vm0, %v25774_v62  ;;  %v14192_v62 = vld [vmem:[#allocation4 + $0x1a9] sm:$0xff] }
 0x690   : > { %19614 = vmatmul.mubr.msk.f32.gmra.mrb[54].mxu1 %vm294_vm0, %v12190_v11  ;;  %19943 = vmatmul.mubr.msk.f32.gmra.mrb[60].mxu0 %vm294_vm0, %v25780_v28  ;;  %v12195_v28 = vld [vmem:[#allocation4 + $0x189] sm:$0xff] }
 0x691   : > { %19616 = vmatprep.mubr.msk.f32.mxu1 %vm294_vm0, %v12191_v21  ;;  %19945 = vmatprep.mubr.msk.f32.mxu0 %vm294_vm0, %v13989_v63 }
 0x694   : > { %19617 = vmatmul.mubr.msk.f32.gmra.mrb[56].mxu1 %vm294_vm0, %v12192_v43  ;;  %19946 = vmatmul.mubr.msk.f32.gmra.mrb[62].mxu0 %vm294_vm0, %v13990_v31 }
 0x695   : > { %19619 = vmatprep.mubr.msk.f32.mxu1 %vm294_vm0, %v12193_v36  ;;  %19964 = vmatprep.mubr.msk.f32.mxu0 %vm294_vm0, %v14192_v62 }
 0x698   : > { %19620 = vmatmul.mubr.msk.f32.gmra.mrb[58].mxu1 %vm294_vm0, %v12194_v1  ;;  %19965 = vmatmul.mubr.msk.f32.vlgmr.msra.gmra.mrb[48].mxu0 %vm294_vm0, %v14193_v46 }
 0x699   : > { %19622 = vmatprep.mubr.msk.f32.mxu1 %vm294_vm0, %v12195_v28  ;;  %19967 = vmatprep.mubr.msk.f32.mxu0 %vm294_vm0, %v14194_v22 }
 0x69c   : > { %19623 = vmatmul.mubr.msk.f32.gmra.mrb[60].mxu1 %vm294_vm0, %v12196_v34  ;;  %19968 = vmatmul.mubr.msk.f32.gmra.mrb[50].mxu0 %vm294_vm0, %v14195_v10 }
 0x69d   : > { %19625 = vmatprep.mubr.msk.f32.mxu1 %vm294_vm0, %v12197_v57  ;;  %19970 = vmatprep.mubr.msk.f32.mxu0 %vm294_vm0, %v14196_v24 }
 0x6a0   : > { %19626 = vmatmul.mubr.msk.f32.gmra.mrb[62].mxu1 %vm294_vm0, %v12198_v13  ;;  %19971 = vmatmul.mubr.msk.f32.gmra.mrb[52].mxu0 %vm294_vm0, %v14197_v58 }
 0x6a1   : > { %19973 = vmatprep.mubr.msk.f32.mxu0 %vm294_vm0, %v14198_v38 }
 0x6a4   : > { %19974 = vmatmul.mubr.msk.f32.gmra.mrb[54].mxu0 %vm294_vm0, %v14199_v30 }
 0x6a5   : > { %19976 = vmatprep.mubr.msk.f32.mxu0 %vm294_vm0, %v14200_v42 }
 0x6a8   : > { %19977 = vmatmul.mubr.msk.f32.gmra.mrb[56].mxu0 %vm294_vm0, %v14201_v18 }
 0x6a9   : > { %19979 = vmatprep.mubr.msk.f32.mxu0 %vm294_vm0, %v14202_v40 }
 0x6ac   : > { %19980 = vmatmul.mubr.msk.f32.gmra.mrb[58].mxu0 %vm294_vm0, %v14203_v35 }
 0x6ad   : > { %19982 = vmatprep.mubr.msk.f32.mxu0 %vm294_vm0, %v25893_v19 }
 0x6b0   : > { %19983 = vmatmul.mubr.msk.f32.gmra.mrb[60].mxu0 %vm294_vm0, %v25900_v33 }
 0x6b1   : > { %19985 = vmatprep.mubr.msk.f32.mxu0 %vm294_vm0, %v14206_v52 }
 0x6b4   : > { %19986 = vmatmul.mubr.msk.f32.gmra.mrb[62].mxu0 %vm294_vm0, %v14207_v23 }
 0x757   : > { %v19606_v12 = vpop.f32.mrb[48].mxu1 }
 0x758   : > { %v12321_v49 = vpop.f32.mrb[49].mxu1 }
 0x759   : > { %v21052_v32 = vadd.f32 %v25795_v8, %v12321_v49 }
 0x75b   : > { %v15712_v56 = vmul.f32 -1.442695, %v21052_v32  ;;  %v19609_v37 = vpop.f32.mrb[50].mxu1 }
 0x75c   : > { %v12330_v6 = vpop.f32.mrb[51].mxu1 }
 0x75d   : > { %22035 = vpow2.f32 %v15712_v56  ;;  %v21053_v14 = vadd.f32 %v25795_v8, %v12330_v6  ;;  %v22099_v56 = vld [vmem:[%s26145_s6] ss:$0 sm:$0xff] }
 0x75f   : > { %v15713_v19 = vmul.f32 -1.442695, %v21053_v14  ;;  %v19612_v47 = vpop.f32.mrb[52].mxu1 }
 0x760   : > { %v12339_v7 = vpop.f32.mrb[53].mxu1 }
 0x761   : > { %22037 = vpow2.f32 %v15713_v19  ;;  %v21054_v33 = vadd.f32 %v25795_v8, %v12339_v7 }
 0x763   : > { %v15714_v50 = vmul.f32 -1.442695, %v21054_v33  ;;  %v19615_v29 = vpop.f32.mrb[54].mxu1 }
 0x764   : > { %v12348_v27 = vpop.f32.mrb[55].mxu1 }
 0x765   : > { %22039 = vpow2.f32 %v15714_v50  ;;  %v21055_v44 = vadd.f32 %v25795_v8, %v12348_v27 }
 0x767   : > { %v22036_v16 = vpop.eup %22035  ;;  %v15715_v55 = vmul.f32 -1.442695, %v21055_v44  ;;  %v19618_v4 = vpop.f32.mrb[56].mxu1 }
 0x768   : > { %v12424_v15 = vadd.f32 1.0, %v22036_v16  ;;  %v12357_v41 = vpop.f32.mrb[57].mxu1 }
 0x769   : > { %22041 = vpow2.f32 %v15715_v55  ;;  %v21056_v60 = vadd.f32 %v25795_v8, %v12357_v41 }
 0x76a   : > { %22043 = vrcp.f32 %v12424_v15 }
 0x76b   : > { %v22038_v2 = vpop.eup %22037  ;;  %v15716_v39 = vmul.f32 -1.442695, %v21056_v60  ;;  %v19621_v53 = vpop.f32.mrb[58].mxu1 }
 0x76c   : > { %v19966_v3 = vpop.f32.mrb[48].mxu0  ;;  %v12425_v54 = vadd.f32 1.0, %v22038_v2  ;;  %v12366_v17 = vpop.f32.mrb[59].mxu1 }
 0x76d   : > { %v14330_v48 = vpop.f32.mrb[49].mxu0  ;;  %22045 = vpow2.f32 %v15716_v39  ;;  %v21057_v26 = vadd.f32 %v25795_v8, %v12366_v17 }
 0x76e   : > { %v21060_v45 = vadd.f32 %v25795_v8, %v14330_v48  ;;  %22047 = vrcp.f32 %v12425_v54 }
 0x76f   : > { %v22040_v59 = vpop.eup %22039  ;;  %v15717_v20 = vmul.f32 -1.442695, %v21057_v26  ;;  %v19624_v51 = vpop.f32.mrb[60].mxu1 }
 0x770   : > { %v15936_v61 = vmul.f32 -1.442695, %v21060_v45  ;;  %v19969_v25 = vpop.f32.mrb[50].mxu0  ;;  %v12426_v9 = vadd.f32 1.0, %v22040_v59  ;;  %v12375_v0 = vpop.f32.mrb[61].mxu1 }
 0x771   : > { %v14339_v5 = vpop.f32.mrb[51].mxu0  ;;  %22049 = vpow2.f32 %v15717_v20  ;;  %v21058_v63 = vadd.f32 %v25795_v8, %v12375_v0 }
 0x772   : > { %v21061_v11 = vadd.f32 %v25795_v8, %v14339_v5  ;;  %22051 = vrcp.f32 %v12426_v9 }
 0x773   : > { %v22042_v21 = vpop.eup %22041  ;;  %22053 = vpow2.f32 %v15936_v61  ;;  %v15718_v31 = vmul.f32 -1.442695, %v21058_v63  ;;  %v19627_v36 = vpop.f32.mrb[62].mxu1 }
 0x774   : > { %v15937_v43 = vmul.f32 -1.442695, %v21061_v11  ;;  %v19972_v62 = vpop.f32.mrb[52].mxu0  ;;  %v22044_v1 = vpop.eup %22043  ;;  %v12427_v46 = vadd.f32 1.0, %v22042_v21 }
 0x775   : > { %v12384_v28 = vpop.f32.mrb[63].mxu1  ;;  %v14348_v22 = vpop.f32.mrb[53].mxu0  ;;  %15720 = vst.msk [vmem:[%s25905_s13 + $0x80] sm:$0xff] %vm8430_vm1, %v22044_v1  ;;  %22055 = vpow2.f32 %v15718_v31 }
 0x776   : > { %v21059_v34 = vadd.f32 %v25795_v8, %v12384_v28  ;;  %v21062_v10 = vadd.f32 %v25795_v8, %v14348_v22  ;;  %22057 = vrcp.f32 %v12427_v46 }
 0x777   : > { %v22046_v57 = vpop.eup %22045  ;;  %22059 = vpow2.f32 %v15937_v43  ;;  %v19975_v58 = vpop.f32.mrb[54].mxu0 }
 0x778   : > { %v15719_v24 = vmul.f32 -1.442695, %v21059_v34  ;;  %v15938_v13 = vmul.f32 -1.442695, %v21062_v10  ;;  %v22048_v38 = vpop.eup %22047  ;;  %v12428_v30 = vadd.f32 1.0, %v22046_v57  ;;  %v14357_v42 = vpop.f32.mrb[55].mxu0 }
 0x779   : > { %15721 = vst.msk [vmem:[%s25905_s13 + $0x88] sm:$0xff] %vm8430_vm1, %v22048_v38  ;;  %v21063_v18 = vadd.f32 %v25795_v8, %v14357_v42 }
 0x77a   : > { %22061 = vpow2.f32 %v15719_v24 }
 0x77b   : > { %22063 = vrcp.f32 %v12428_v30  ;;  %v22050_v40 = vpop.eup %22049  ;;  %v15939_v35 = vmul.f32 -1.442695, %v21063_v18  ;;  %v19978_v52 = vpop.f32.mrb[56].mxu0 }
 0x77c   : > { %22065 = vpow2.f32 %v15938_v13  ;;  %v22052_v23 = vpop.eup %22051  ;;  %v12429_v12 = vadd.f32 1.0, %v22050_v40  ;;  %v14366_v49 = vpop.f32.mrb[57].mxu0 }
 0x77d   : > { %v22054_v32 = vpop.eup %22053  ;;  %15722 = vst.msk [vmem:[%s25905_s13 + $0x90] sm:$0xff] %vm8430_vm1, %v22052_v23  ;;  %22067 = vpow2.f32 %v15939_v35  ;;  %v21064_v37 = vadd.f32 %v22099_v56, %v14366_v49 }
 0x77e   : > { %22069 = vrcp.f32 %v12429_v12  ;;  %v14433_v8 = vadd.f32 1.0, %v22054_v32 }
 0x77f   : > { %v22056_v6 = vpop.eup %22055  ;;  %v15940_v14 = vmul.f32 -1.442695, %v21064_v37  ;;  %v19981_v19 = vpop.f32.mrb[58].mxu0 }
 0x780   : > { %v22058_v47 = vpop.eup %22057  ;;  %22071 = vrcp.f32 %v14433_v8  ;;  %v12430_v7 = vadd.f32 1.0, %v22056_v6  ;;  %v14375_v33 = vpop.f32.mrb[59].mxu0 }
 0x781   : > { %v22060_v50 = vpop.eup %22059  ;;  %15723 = vst.msk [vmem:[%s25905_s13 + $0x98] sm:$0xff] %vm8430_vm1, %v22058_v47  ;;  %22073 = vpow2.f32 %v15940_v14  ;;  %v21065_v29 = vadd.f32 %v22099_v56, %v14375_v33 }
 0x782   : > { %22075 = vrcp.f32 %v12430_v7  ;;  %v14434_v27 = vadd.f32 1.0, %v22060_v50 }
 0x783   : > { %v15941_v16 = vmul.f32 -1.442695, %v21065_v29  ;;  %v19984_v55 = vpop.f32.mrb[60].mxu0 }
 0x784   : > { %v22062_v44 = vpop.eup %22061  ;;  %22077 = vrcp.f32 %v14434_v27  ;;  %v14384_v41 = vpop.f32.mrb[61].mxu0 }
 0x785   : > { %v22064_v4 = vpop.eup %22063  ;;  %v12431_v15 = vadd.f32 1.0, %v22062_v44  ;;  %22079 = vpow2.f32 %v15941_v16  ;;  %v21066_v2 = vadd.f32 %v22099_v56, %v14384_v41 }
 0x786   : > { %v22066_v60 = vpop.eup %22065  ;;  %15724 = vst.msk [vmem:[%s25905_s13 + $0xa0] sm:$0xff] %vm8430_vm1, %v22064_v4 }
 0x787   : > { %22081 = vrcp.f32 %v12431_v15  ;;  %v14435_v39 = vadd.f32 1.0, %v22066_v60  ;;  %v22068_v53 = vpop.eup %22067  ;;  %v15942_v3 = vmul.f32 -1.442695, %v21066_v2  ;;  %v19987_v54 = vpop.f32.mrb[62].mxu0 }
 0x788   : > { %v22070_v17 = vpop.eup %22069  ;;  %v14436_v48 = vadd.f32 1.0, %v22068_v53  ;;  %v14393_v26 = vpop.f32.mrb[63].mxu0 }
 0x789   : > { %22083 = vrcp.f32 %v14435_v39  ;;  %15725 = vst.msk [vmem:[%s25905_s13 + $0xa8] sm:$0xff] %vm8430_vm1, %v22070_v17  ;;  %v21067_v45 = vadd.f32 %v22099_v56, %v14393_v26 }
 0x78a   : > { %22085 = vpow2.f32 %v15942_v3  ;;  %v22072_v59 = vpop.eup %22071 }
 0x78b   : > { %22087 = vrcp.f32 %v14436_v48  ;;  %v22074_v20 = vpop.eup %22073  ;;  %15944 = vst.msk [vmem:[%s25905_s13 + $0xc0] sm:$0xff] %vm8430_vm1, %v22072_v59  ;;  %v15943_v61 = vmul.f32 -1.442695, %v21067_v45 }
 0x78c   : > { %v22076_v51 = vpop.eup %22075  ;;  %v14437_v25 = vadd.f32 1.0, %v22074_v20 }
 0x78d   : > { %15726 = vst.msk [vmem:[%s25905_s13 + $0xb0] sm:$0xff] %vm8430_vm1, %v22076_v51  ;;  %22089 = vpow2.f32 %v15943_v61 }
 0x78e   : > { %v22078_v9 = vpop.eup %22077  ;;  %22091 = vrcp.f32 %v14437_v25 }
 0x78f   : > { %v22080_v0 = vpop.eup %22079  ;;  %15945 = vst.msk [vmem:[%s25905_s13 + $0xc8] sm:$0xff] %vm8430_vm1, %v22078_v9 }
 0x790   : > { %v14438_v63 = vadd.f32 1.0, %v22080_v0 }
 0x791   : > { %v22082_v5 = vpop.eup %22081 }
 0x792   : > { %15727 = vst.msk [vmem:[%s25905_s13 + $0xb8] sm:$0xff] %vm8430_vm1, %v22082_v5  ;;  %22093 = vrcp.f32 %v14438_v63 }
 0x793   : > { %v22084_v11 = vpop.eup %22083 }
 0x794   : > { %v22086_v21 = vpop.eup %22085  ;;  %15946 = vst.msk [vmem:[%s25905_s13 + $0xd0] sm:$0xff] %vm8430_vm1, %v22084_v11 }
 0x795   : > { %v22088_v31 = vpop.eup %22087  ;;  %v14439_v43 = vadd.f32 1.0, %v22086_v21 }
 0x796   : > { %15947 = vst.msk [vmem:[%s25905_s13 + $0xd8] sm:$0xff] %vm8430_vm1, %v22088_v31 }
 0x797   : > { %22095 = vrcp.f32 %v14439_v43  ;;  %v22090_v36 = vpop.eup %22089 }
 0x798   : > { %v22092_v62 = vpop.eup %22091  ;;  %v14440_v1 = vadd.f32 1.0, %v22090_v36 }
 0x799   : > { %15948 = vst.msk [vmem:[%s25905_s13 + $0xe0] sm:$0xff] %vm8430_vm1, %v22092_v62 }
 0x79a   : > { %22097 = vrcp.f32 %v14440_v1 }
 0x79c   : > { %v22094_v46 = vpop.eup %22093 }
 0x79d   : > { %15949 = vst.msk [vmem:[%s25905_s13 + $0xe8] sm:$0xff] %vm8430_vm1, %v22094_v46 }
 0x7a1   : > { %v22096_v28 = vpop.eup %22095 }
 0x7a2   : > { %15950 = vst.msk [vmem:[%s25905_s13 + $0xf0] sm:$0xff] %vm8430_vm1, %v22096_v28 }
 0x7a4   : > { %v22098_v22 = vpop.eup %22097 }
 0x7a5   : > { %15951 = vst.msk [vmem:[%s25905_s13 + $0xf8] sm:$0xff] %vm8430_vm1, %v22098_v22 }
 0x7a6 PF: > { %s18_s24 = sadd.s32 1, %s22138_s24  }
 0x7a7   : > { %p15_p3 = scmp.ge.s32.totalorder %s18_s24, 4  }
 0x7a9   :  { %17 = sbr.rel (!%p15_p3) target bundleno = 1 (0x1), region = 145 }
 0x7b0   :  { %14494 = vsyncpa [#allocation6], 1 }
 0x7b1   :  { %14496 = vsyncpa [#allocation6 + $0x1], 1 }

</bundles_post_ra>
